<compile_context>
chip_gen: v6e
topology: v6e:2x2x1
jax: 0.10.0
libtpu: 0.0.40
codegen_flags: <defaults>
</compile_context>

<pallas_src>
import functools

import jax
import jax.numpy as jnp
from jax.experimental import pallas as pl
from jax.experimental.pallas import tpu as pltpu


def _res_layer_kernel(x_ref, w_ref, aff_ref, o_ref, xs_ref, acc_ref, h_ref, *,
                      H, W, C):
    """Fused ResLayer forward for one image (NHWC, channels on lanes).

    xs_ref  : (H+2, W, 3C) bf16 — for row hp and dx in {0,1,2}:
              xs[hp, w, dx*C:(dx+1)*C] == zero_padded_act[hp, w+dx, :]
    acc_ref : (H*W, C) f32 VMEM accumulator.
    h_ref   : (H, W, C) bf16 intermediate (conv1 output after bn1+relu).
    """
    f32 = jnp.float32
    bf16 = jnp.bfloat16

    # Zero once per invocation; only halo rows / pad columns stay zero, the
    # interior is overwritten by the fills below (same regions for both convs).
    xs_ref[...] = jnp.zeros_like(xs_ref)

    def fill_taps(src):
        # src(lo, hi) -> bf16 (H, hi-lo, C) slice of the *unpadded* activation.
        xs_ref[1:H + 1, 1:W, 0:C] = src(0, W - 1)            # dx = 0
        xs_ref[1:H + 1, :, C:2 * C] = src(0, W)               # dx = 1
        xs_ref[1:H + 1, 0:W - 1, 2 * C:3 * C] = src(1, W)     # dx = 2

    def conv3x3(widx):
        # out[h*W+w, co] = sum_dy (xs[h+dy] as (H*W, 3C)) @ w[widx, dy]
        for dy in range(3):                                   # static unroll
            band = xs_ref[dy:dy + H].reshape(H * W, 3 * C)    # free aligned view
            update = jnp.dot(band, w_ref[widx, dy],
                             preferred_element_type=f32)
            if dy == 0:
                acc_ref[...] = update
            else:
                acc_ref[...] += update

    # ---- conv1 + bn1 + relu -------------------------------------------------
    fill_taps(lambda lo, hi: x_ref[0, :, lo:hi, :].astype(bf16))
    conv3x3(0)
    h1 = acc_ref[...] * aff_ref[0:1, :] + aff_ref[1:2, :]     # folded BN1
    h_ref[...] = jnp.maximum(h1, 0.0).reshape(H, W, C).astype(bf16)

    # ---- conv2 + bn2 + residual + relu --------------------------------------
    fill_taps(lambda lo, hi: h_ref[:, lo:hi, :])
    conv3x3(1)
    res = x_ref[0].astype(f32).reshape(H * W, C)               # resident residual
    out = acc_ref[...] * aff_ref[2:3, :] + aff_ref[3:4, :] + res
    out = jnp.maximum(out, 0.0)
    o_ref[...] = out.reshape(1, H, W, C).astype(o_ref.dtype)   # lane-dense store


def res_layer_forward(x_nchw, w1, g1, b1, m1, v1, w2, g2, b2, m2, v2, eps=1e-5):
    """Pallas equivalent of ResLayer.forward (inference-mode BN).

    x_nchw: (B, 256, H, W) PyTorch layout; weights (Cout, Cin, 3, 3)."""
    B, C, H, W = x_nchw.shape
    x = jnp.transpose(x_nchw, (0, 2, 3, 1))                    # NHWC, C on lanes

    def pack(w):
        # (Cout, Cin, kh, kw) -> (3, 3*Cin, Cout), entry [dy, dx*C+ci, co]
        return jnp.transpose(w, (2, 3, 1, 0)).reshape(3, 3 * C, C)

    wboth = jnp.stack([pack(w1), pack(w2)]).astype(jnp.bfloat16)   # (2,3,3C,C)
    s1 = g1 * jax.lax.rsqrt(v1 + eps)
    s2 = g2 * jax.lax.rsqrt(v2 + eps)
    aff = jnp.stack([s1, b1 - m1 * s1, s2, b2 - m2 * s2]).astype(jnp.float32)

    y = pl.pallas_call(
        functools.partial(_res_layer_kernel, H=H, W=W, C=C),
        out_shape=jax.ShapeDtypeStruct((B, H, W, C), x.dtype),
        grid_spec=pltpu.PrefetchScalarGridSpec(
            num_scalar_prefetch=0,
            grid=(B,),                          # batch-parallel (megacore on v7x)
            in_specs=[
                pl.BlockSpec((1, H, W, C), lambda b: (b, 0, 0, 0)),      # image
                pl.BlockSpec((2, 3, 3 * C, C), lambda b: (0, 0, 0, 0)),  # weights (bf16, resident)
                pl.BlockSpec((4, C), lambda b: (0, 0)),                  # BN scale/shift x2
            ],
            out_specs=pl.BlockSpec((1, H, W, C), lambda b: (b, 0, 0, 0)),
            scratch_shapes=[
                pltpu.VMEM((H + 2, W, 3 * C), jnp.bfloat16),   # shifted-tap buffer
                pltpu.VMEM((H * W, C), jnp.float32),           # accumulator
                pltpu.VMEM((H, W, C), jnp.bfloat16),           # conv1 activation
            ],
        ),
        compiler_params=pltpu.CompilerParams(
            dimension_semantics=("parallel",),
            vmem_limit_bytes=40 * 1024 * 1024,   # ample on v5e/v6e, headroom on v7x
        ),
    )(x, wboth, aff)
    return jnp.transpose(y, (0, 3, 1, 2))                      # back to NCHW


def res_layer_ref(x, w1, g1, b1, m1, v1, w2, g2, b2, m2, v2, eps=1e-5):
    """Pure-JAX f32 reference (inference-mode BN), NCHW like PyTorch."""
    dn = ("NCHW", "OIHW", "NCHW")

    def bn(t, g, b, m, v):
        s = g * jax.lax.rsqrt(v + eps)
        return t * s[None, :, None, None] + (b - m * s)[None, :, None, None]

    out = jax.lax.conv_general_dilated(x, w1, (1, 1), ((1, 1), (1, 1)),
                                       dimension_numbers=dn)
    out = jnp.maximum(bn(out, g1, b1, m1, v1), 0.0)
    out = jax.lax.conv_general_dilated(out, w2, (1, 1), ((1, 1), (1, 1)),
                                       dimension_numbers=dn)
    out = bn(out, g2, b2, m2, v2) + x
    return jnp.maximum(out, 0.0)


if __name__ == "__main__":
    key = jax.random.PRNGKey(0)
    B, C, H, W = 2, 256, 16, 16          # channels fixed at 256 by the module
    ks = jax.random.split(key, 11)
    x = jax.random.normal(ks[0], (B, C, H, W), dtype=jnp.float32)
    w1 = jax.random.normal(ks[1], (C, C, 3, 3), jnp.float32) * 0.02
    w2 = jax.random.normal(ks[2], (C, C, 3, 3), jnp.float32) * 0.02
    g1 = 1.0 + 0.1 * jax.random.normal(ks[3], (C,), jnp.float32)
    b1 = 0.1 * jax.random.normal(ks[4], (C,), jnp.float32)
    m1 = 0.1 * jax.random.normal(ks[5], (C,), jnp.float32)
    v1 = jax.random.uniform(ks[6], (C,), jnp.float32, 0.5, 1.5)
    g2 = 1.0 + 0.1 * jax.random.normal(ks[7], (C,), jnp.float32)
    b2 = 0.1 * jax.random.normal(ks[8], (C,), jnp.float32)
    m2 = 0.1 * jax.random.normal(ks[9], (C,), jnp.float32)
    v2 = jax.random.uniform(ks[10], (C,), jnp.float32, 0.5, 1.5)

    fwd = jax.jit(res_layer_forward)
    out = fwd(x, w1, g1, b1, m1, v1, w2, g2, b2, m2, v2)
    jax.block_until_ready(out)

    ref = res_layer_ref(x, w1, g1, b1, m1, v1, w2, g2, b2, m2, v2)
    assert out.shape == x.shape and out.dtype == x.dtype
    assert bool(jnp.all(out >= 0.0))
    assert jnp.allclose(out, ref, atol=5e-2, rtol=5e-2), \
        float(jnp.max(jnp.abs(out - ref)))

    print("KERNEL_OK")
</pallas_src>

<mosaic_0001>
module attributes {stable_mosaic.version = 11 : i64} {
  func.func @_res_layer_kernel(%arg0: i32, %arg1: memref<1x16x16x256xf32, #tpu.memory_space<vmem>>, %arg2: memref<2x3x768x256xbf16, #tpu.memory_space<vmem>>, %arg3: memref<4x256xf32, #tpu.memory_space<vmem>>, %arg4: memref<1x16x16x256xf32, #tpu.memory_space<vmem>>, %arg5: memref<18x16x768xbf16, #tpu.memory_space<vmem>>, %arg6: memref<256x256xf32, #tpu.memory_space<vmem>>, %arg7: memref<16x16x256xbf16, #tpu.memory_space<vmem>>) attributes {dimension_semantics = [#tpu.dimension_semantics<parallel>], iteration_bounds = array<i64: 2>, scalar_prefetch = 0 : i64, scratch_operands = 3 : i64, tpu.core_type = #tpu.core_type<tc>, window_params = [{transform_indices = @transform_0, window_bounds = array<i64: 1, 16, 16, 256>}, {pipeline_mode = #tpu.pipeline_mode<synchronous>, transform_indices = @transform_1, window_bounds = array<i64: 2, 3, 768, 256>}, {pipeline_mode = #tpu.pipeline_mode<synchronous>, transform_indices = @transform_2, window_bounds = array<i64: 4, 256>}, {transform_indices = @transform_3, window_bounds = array<i64: 1, 16, 16, 256>}]} {
    %cst = arith.constant 0.000000e+00 : bf16
    %0 = vector.broadcast %cst : bf16 to vector<18x16x768xbf16>
    %c0 = arith.constant 0 : index
    %c0_0 = arith.constant 0 : index
    %c0_1 = arith.constant 0 : index
    %1 = vector.load %arg5[%c0, %c0_0, %c0_1] : memref<18x16x768xbf16, #tpu.memory_space<vmem>>, vector<18x16x768xbf16>
    tpu.vector_store %arg5[%c0, %c0_0, %c0_1], %0 {strides = array<i32>} : memref<18x16x768xbf16, #tpu.memory_space<vmem>>, vector<18x16x768xbf16>,
    %c0_2 = arith.constant 0 : index
    %c0_3 = arith.constant 0 : index
    %c0_4 = arith.constant 0 : index
    %c0_5 = arith.constant 0 : index
    %2 = vector.load %arg1[%c0_2, %c0_3, %c0_4, %c0_5] : memref<1x16x16x256xf32, #tpu.memory_space<vmem>>, vector<1x16x15x256xf32>
    %3 = vector.shape_cast %2 : vector<1x16x15x256xf32> to vector<16x15x256xf32>
    %4 = arith.truncf %3 : vector<16x15x256xf32> to vector<16x15x256xbf16>
    %c1 = arith.constant 1 : index
    %c1_6 = arith.constant 1 : index
    %c0_7 = arith.constant 0 : index
    %5 = vector.load %arg5[%c1, %c1_6, %c0_7] : memref<18x16x768xbf16, #tpu.memory_space<vmem>>, vector<16x15x256xbf16>
    tpu.vector_store %arg5[%c1, %c1_6, %c0_7], %4 {strides = array<i32>} : memref<18x16x768xbf16, #tpu.memory_space<vmem>>, vector<16x15x256xbf16>,
    %c0_8 = arith.constant 0 : index
    %c0_9 = arith.constant 0 : index
    %c0_10 = arith.constant 0 : index
    %c0_11 = arith.constant 0 : index
    %6 = vector.load %arg1[%c0_8, %c0_9, %c0_10, %c0_11] : memref<1x16x16x256xf32, #tpu.memory_space<vmem>>, vector<1x16x16x256xf32>
    %7 = vector.shape_cast %6 : vector<1x16x16x256xf32> to vector<16x16x256xf32>
    %8 = arith.truncf %7 : vector<16x16x256xf32> to vector<16x16x256xbf16>
    %c1_12 = arith.constant 1 : index
    %c0_13 = arith.constant 0 : index
    %c256 = arith.constant 256 : index
    %9 = vector.load %arg5[%c1_12, %c0_13, %c256] : memref<18x16x768xbf16, #tpu.memory_space<vmem>>, vector<16x16x256xbf16>
    tpu.vector_store %arg5[%c1_12, %c0_13, %c256], %8 {strides = array<i32>} : memref<18x16x768xbf16, #tpu.memory_space<vmem>>, vector<16x16x256xbf16>,
    %c0_14 = arith.constant 0 : index
    %c0_15 = arith.constant 0 : index
    %c1_16 = arith.constant 1 : index
    %c0_17 = arith.constant 0 : index
    %10 = vector.load %arg1[%c0_14, %c0_15, %c1_16, %c0_17] : memref<1x16x16x256xf32, #tpu.memory_space<vmem>>, vector<1x16x15x256xf32>
    %11 = vector.shape_cast %10 : vector<1x16x15x256xf32> to vector<16x15x256xf32>
    %12 = arith.truncf %11 : vector<16x15x256xf32> to vector<16x15x256xbf16>
    %c1_18 = arith.constant 1 : index
    %c0_19 = arith.constant 0 : index
    %c512 = arith.constant 512 : index
    %13 = vector.load %arg5[%c1_18, %c0_19, %c512] : memref<18x16x768xbf16, #tpu.memory_space<vmem>>, vector<16x15x256xbf16>
    tpu.vector_store %arg5[%c1_18, %c0_19, %c512], %12 {strides = array<i32>} : memref<18x16x768xbf16, #tpu.memory_space<vmem>>, vector<16x15x256xbf16>,
    %c0_20 = arith.constant 0 : index
    %c0_21 = arith.constant 0 : index
    %c0_22 = arith.constant 0 : index
    %14 = vector.load %arg5[%c0_20, %c0_21, %c0_22] : memref<18x16x768xbf16, #tpu.memory_space<vmem>>, vector<16x16x768xbf16>
    %15 = vector.shape_cast %14 : vector<16x16x768xbf16> to vector<256x768xbf16>
    %c0_23 = arith.constant 0 : index
    %c0_24 = arith.constant 0 : index
    %c0_25 = arith.constant 0 : index
    %c0_26 = arith.constant 0 : index
    %16 = vector.load %arg2[%c0_23, %c0_24, %c0_25, %c0_26] : memref<2x3x768x256xbf16, #tpu.memory_space<vmem>>, vector<1x1x768x256xbf16>
    %17 = vector.shape_cast %16 : vector<1x1x768x256xbf16> to vector<768x256xbf16>
    %cst_27 = arith.constant dense<0.000000e+00> : vector<256x256xf32>
    %18 = tpu.matmul %15, %17, %cst_27 {dimension_numbers = #tpu.dot_dimension_numbers<[1], [0], [0], [1], [0, 0, 1, 1], [], []>} : vector<256x768xbf16>, vector<768x256xbf16>, vector<256x256xf32> -> vector<256x256xf32>
    %c0_28 = arith.constant 0 : index
    %c0_29 = arith.constant 0 : index
    %19 = vector.load %arg6[%c0_28, %c0_29] : memref<256x256xf32, #tpu.memory_space<vmem>>, vector<256x256xf32>
    tpu.vector_store %arg6[%c0_28, %c0_29], %18 {strides = array<i32>} : memref<256x256xf32, #tpu.memory_space<vmem>>, vector<256x256xf32>,
    %c1_30 = arith.constant 1 : index
    %c0_31 = arith.constant 0 : index
    %c0_32 = arith.constant 0 : index
    %20 = vector.load %arg5[%c1_30, %c0_31, %c0_32] : memref<18x16x768xbf16, #tpu.memory_space<vmem>>, vector<16x16x768xbf16>
    %21 = vector.shape_cast %20 : vector<16x16x768xbf16> to vector<256x768xbf16>
    %c0_33 = arith.constant 0 : index
    %c1_34 = arith.constant 1 : index
    %c0_35 = arith.constant 0 : index
    %c0_36 = arith.constant 0 : index
    %22 = vector.load %arg2[%c0_33, %c1_34, %c0_35, %c0_36] : memref<2x3x768x256xbf16, #tpu.memory_space<vmem>>, vector<1x1x768x256xbf16>
    %23 = vector.shape_cast %22 : vector<1x1x768x256xbf16> to vector<768x256xbf16>
    %cst_37 = arith.constant dense<0.000000e+00> : vector<256x256xf32>
    %24 = tpu.matmul %21, %23, %cst_37 {dimension_numbers = #tpu.dot_dimension_numbers<[1], [0], [0], [1], [0, 0, 1, 1], [], []>} : vector<256x768xbf16>, vector<768x256xbf16>, vector<256x256xf32> -> vector<256x256xf32>
    %c0_38 = arith.constant 0 : index
    %c0_39 = arith.constant 0 : index
    %25 = vector.load %arg6[%c0_38, %c0_39] : memref<256x256xf32, #tpu.memory_space<vmem>>, vector<256x256xf32>
    %26 = arith.addf %25, %24 : vector<256x256xf32>
    %c0_40 = arith.constant 0 : index
    %c0_41 = arith.constant 0 : index
    %27 = vector.load %arg6[%c0_40, %c0_41] : memref<256x256xf32, #tpu.memory_space<vmem>>, vector<256x256xf32>
    tpu.vector_store %arg6[%c0_40, %c0_41], %26 {strides = array<i32>} : memref<256x256xf32, #tpu.memory_space<vmem>>, vector<256x256xf32>,
    %c2 = arith.constant 2 : index
    %c0_42 = arith.constant 0 : index
    %c0_43 = arith.constant 0 : index
    %28 = vector.load %arg5[%c2, %c0_42, %c0_43] : memref<18x16x768xbf16, #tpu.memory_space<vmem>>, vector<16x16x768xbf16>
    %29 = vector.shape_cast %28 : vector<16x16x768xbf16> to vector<256x768xbf16>
    %c0_44 = arith.constant 0 : index
    %c2_45 = arith.constant 2 : index
    %c0_46 = arith.constant 0 : index
    %c0_47 = arith.constant 0 : index
    %30 = vector.load %arg2[%c0_44, %c2_45, %c0_46, %c0_47] : memref<2x3x768x256xbf16, #tpu.memory_space<vmem>>, vector<1x1x768x256xbf16>
    %31 = vector.shape_cast %30 : vector<1x1x768x256xbf16> to vector<768x256xbf16>
    %cst_48 = arith.constant dense<0.000000e+00> : vector<256x256xf32>
    %32 = tpu.matmul %29, %31, %cst_48 {dimension_numbers = #tpu.dot_dimension_numbers<[1], [0], [0], [1], [0, 0, 1, 1], [], []>} : vector<256x768xbf16>, vector<768x256xbf16>, vector<256x256xf32> -> vector<256x256xf32>
    %c0_49 = arith.constant 0 : index
    %c0_50 = arith.constant 0 : index
    %33 = vector.load %arg6[%c0_49, %c0_50] : memref<256x256xf32, #tpu.memory_space<vmem>>, vector<256x256xf32>
    %34 = arith.addf %33, %32 : vector<256x256xf32>
    %c0_51 = arith.constant 0 : index
    %c0_52 = arith.constant 0 : index
    %35 = vector.load %arg6[%c0_51, %c0_52] : memref<256x256xf32, #tpu.memory_space<vmem>>, vector<256x256xf32>
    tpu.vector_store %arg6[%c0_51, %c0_52], %34 {strides = array<i32>} : memref<256x256xf32, #tpu.memory_space<vmem>>, vector<256x256xf32>,
    %c0_53 = arith.constant 0 : index
    %c0_54 = arith.constant 0 : index
    %36 = vector.load %arg6[%c0_53, %c0_54] : memref<256x256xf32, #tpu.memory_space<vmem>>, vector<256x256xf32>
    %c0_55 = arith.constant 0 : index
    %c0_56 = arith.constant 0 : index
    %37 = vector.load %arg3[%c0_55, %c0_56] : memref<4x256xf32, #tpu.memory_space<vmem>>, vector<1x256xf32>
    %38 = vector.broadcast %37 : vector<1x256xf32> to vector<256x256xf32>
    %39 = arith.mulf %36, %38 : vector<256x256xf32>
    %c1_57 = arith.constant 1 : index
    %c0_58 = arith.constant 0 : index
    %40 = vector.load %arg3[%c1_57, %c0_58] : memref<4x256xf32, #tpu.memory_space<vmem>>, vector<1x256xf32>
    %41 = vector.broadcast %40 : vector<1x256xf32> to vector<256x256xf32>
    %42 = arith.addf %39, %41 : vector<256x256xf32>
    %cst_59 = arith.constant 0.000000e+00 : f32
    %43 = vector.broadcast %cst_59 : f32 to vector<256x256xf32>
    %44 = arith.maximumf %42, %43 : vector<256x256xf32>
    %45 = vector.shape_cast %44 : vector<256x256xf32> to vector<16x16x256xf32>
    %46 = arith.truncf %45 : vector<16x16x256xf32> to vector<16x16x256xbf16>
    %c0_60 = arith.constant 0 : index
    %c0_61 = arith.constant 0 : index
    %c0_62 = arith.constant 0 : index
    %47 = vector.load %arg7[%c0_60, %c0_61, %c0_62] : memref<16x16x256xbf16, #tpu.memory_space<vmem>>, vector<16x16x256xbf16>
    tpu.vector_store %arg7[%c0_60, %c0_61, %c0_62], %46 {strides = array<i32>} : memref<16x16x256xbf16, #tpu.memory_space<vmem>>, vector<16x16x256xbf16>,
    %c0_63 = arith.constant 0 : index
    %c0_64 = arith.constant 0 : index
    %c0_65 = arith.constant 0 : index
    %48 = vector.load %arg7[%c0_63, %c0_64, %c0_65] : memref<16x16x256xbf16, #tpu.memory_space<vmem>>, vector<16x15x256xbf16>
    %c1_66 = arith.constant 1 : index
    %c1_67 = arith.constant 1 : index
    %c0_68 = arith.constant 0 : index
    %49 = vector.load %arg5[%c1_66, %c1_67, %c0_68] : memref<18x16x768xbf16, #tpu.memory_space<vmem>>, vector<16x15x256xbf16>
    tpu.vector_store %arg5[%c1_66, %c1_67, %c0_68], %48 {strides = array<i32>} : memref<18x16x768xbf16, #tpu.memory_space<vmem>>, vector<16x15x256xbf16>,
    %c0_69 = arith.constant 0 : index
    %c0_70 = arith.constant 0 : index
    %c0_71 = arith.constant 0 : index
    %50 = vector.load %arg7[%c0_69, %c0_70, %c0_71] : memref<16x16x256xbf16, #tpu.memory_space<vmem>>, vector<16x16x256xbf16>
    %c1_72 = arith.constant 1 : index
    %c0_73 = arith.constant 0 : index
    %c256_74 = arith.constant 256 : index
    %51 = vector.load %arg5[%c1_72, %c0_73, %c256_74] : memref<18x16x768xbf16, #tpu.memory_space<vmem>>, vector<16x16x256xbf16>
    tpu.vector_store %arg5[%c1_72, %c0_73, %c256_74], %50 {strides = array<i32>} : memref<18x16x768xbf16, #tpu.memory_space<vmem>>, vector<16x16x256xbf16>,
    %c0_75 = arith.constant 0 : index
    %c1_76 = arith.constant 1 : index
    %c0_77 = arith.constant 0 : index
    %52 = vector.load %arg7[%c0_75, %c1_76, %c0_77] : memref<16x16x256xbf16, #tpu.memory_space<vmem>>, vector<16x15x256xbf16>
    %c1_78 = arith.constant 1 : index
    %c0_79 = arith.constant 0 : index
    %c512_80 = arith.constant 512 : index
    %53 = vector.load %arg5[%c1_78, %c0_79, %c512_80] : memref<18x16x768xbf16, #tpu.memory_space<vmem>>, vector<16x15x256xbf16>
    tpu.vector_store %arg5[%c1_78, %c0_79, %c512_80], %52 {strides = array<i32>} : memref<18x16x768xbf16, #tpu.memory_space<vmem>>, vector<16x15x256xbf16>,
    %c0_81 = arith.constant 0 : index
    %c0_82 = arith.constant 0 : index
    %c0_83 = arith.constant 0 : index
    %54 = vector.load %arg5[%c0_81, %c0_82, %c0_83] : memref<18x16x768xbf16, #tpu.memory_space<vmem>>, vector<16x16x768xbf16>
    %55 = vector.shape_cast %54 : vector<16x16x768xbf16> to vector<256x768xbf16>
    %c1_84 = arith.constant 1 : index
    %c0_85 = arith.constant 0 : index
    %c0_86 = arith.constant 0 : index
    %c0_87 = arith.constant 0 : index
    %56 = vector.load %arg2[%c1_84, %c0_85, %c0_86, %c0_87] : memref<2x3x768x256xbf16, #tpu.memory_space<vmem>>, vector<1x1x768x256xbf16>
    %57 = vector.shape_cast %56 : vector<1x1x768x256xbf16> to vector<768x256xbf16>
    %cst_88 = arith.constant dense<0.000000e+00> : vector<256x256xf32>
    %58 = tpu.matmul %55, %57, %cst_88 {dimension_numbers = #tpu.dot_dimension_numbers<[1], [0], [0], [1], [0, 0, 1, 1], [], []>} : vector<256x768xbf16>, vector<768x256xbf16>, vector<256x256xf32> -> vector<256x256xf32>
    %c0_89 = arith.constant 0 : index
    %c0_90 = arith.constant 0 : index
    %59 = vector.load %arg6[%c0_89, %c0_90] : memref<256x256xf32, #tpu.memory_space<vmem>>, vector<256x256xf32>
    tpu.vector_store %arg6[%c0_89, %c0_90], %58 {strides = array<i32>} : memref<256x256xf32, #tpu.memory_space<vmem>>, vector<256x256xf32>,
    %c1_91 = arith.constant 1 : index
    %c0_92 = arith.constant 0 : index
    %c0_93 = arith.constant 0 : index
    %60 = vector.load %arg5[%c1_91, %c0_92, %c0_93] : memref<18x16x768xbf16, #tpu.memory_space<vmem>>, vector<16x16x768xbf16>
    %61 = vector.shape_cast %60 : vector<16x16x768xbf16> to vector<256x768xbf16>
    %c1_94 = arith.constant 1 : index
    %c1_95 = arith.constant 1 : index
    %c0_96 = arith.constant 0 : index
    %c0_97 = arith.constant 0 : index
    %62 = vector.load %arg2[%c1_94, %c1_95, %c0_96, %c0_97] : memref<2x3x768x256xbf16, #tpu.memory_space<vmem>>, vector<1x1x768x256xbf16>
    %63 = vector.shape_cast %62 : vector<1x1x768x256xbf16> to vector<768x256xbf16>
    %cst_98 = arith.constant dense<0.000000e+00> : vector<256x256xf32>
    %64 = tpu.matmul %61, %63, %cst_98 {dimension_numbers = #tpu.dot_dimension_numbers<[1], [0], [0], [1], [0, 0, 1, 1], [], []>} : vector<256x768xbf16>, vector<768x256xbf16>, vector<256x256xf32> -> vector<256x256xf32>
    %c0_99 = arith.constant 0 : index
    %c0_100 = arith.constant 0 : index
    %65 = vector.load %arg6[%c0_99, %c0_100] : memref<256x256xf32, #tpu.memory_space<vmem>>, vector<256x256xf32>
    %66 = arith.addf %65, %64 : vector<256x256xf32>
    %c0_101 = arith.constant 0 : index
    %c0_102 = arith.constant 0 : index
    %67 = vector.load %arg6[%c0_101, %c0_102] : memref<256x256xf32, #tpu.memory_space<vmem>>, vector<256x256xf32>
    tpu.vector_store %arg6[%c0_101, %c0_102], %66 {strides = array<i32>} : memref<256x256xf32, #tpu.memory_space<vmem>>, vector<256x256xf32>,
    %c2_103 = arith.constant 2 : index
    %c0_104 = arith.constant 0 : index
    %c0_105 = arith.constant 0 : index
    %68 = vector.load %arg5[%c2_103, %c0_104, %c0_105] : memref<18x16x768xbf16, #tpu.memory_space<vmem>>, vector<16x16x768xbf16>
    %69 = vector.shape_cast %68 : vector<16x16x768xbf16> to vector<256x768xbf16>
    %c1_106 = arith.constant 1 : index
    %c2_107 = arith.constant 2 : index
    %c0_108 = arith.constant 0 : index
    %c0_109 = arith.constant 0 : index
    %70 = vector.load %arg2[%c1_106, %c2_107, %c0_108, %c0_109] : memref<2x3x768x256xbf16, #tpu.memory_space<vmem>>, vector<1x1x768x256xbf16>
    %71 = vector.shape_cast %70 : vector<1x1x768x256xbf16> to vector<768x256xbf16>
    %cst_110 = arith.constant dense<0.000000e+00> : vector<256x256xf32>
    %72 = tpu.matmul %69, %71, %cst_110 {dimension_numbers = #tpu.dot_dimension_numbers<[1], [0], [0], [1], [0, 0, 1, 1], [], []>} : vector<256x768xbf16>, vector<768x256xbf16>, vector<256x256xf32> -> vector<256x256xf32>
    %c0_111 = arith.constant 0 : index
    %c0_112 = arith.constant 0 : index
    %73 = vector.load %arg6[%c0_111, %c0_112] : memref<256x256xf32, #tpu.memory_space<vmem>>, vector<256x256xf32>
    %74 = arith.addf %73, %72 : vector<256x256xf32>
    %c0_113 = arith.constant 0 : index
    %c0_114 = arith.constant 0 : index
    %75 = vector.load %arg6[%c0_113, %c0_114] : memref<256x256xf32, #tpu.memory_space<vmem>>, vector<256x256xf32>
    tpu.vector_store %arg6[%c0_113, %c0_114], %74 {strides = array<i32>} : memref<256x256xf32, #tpu.memory_space<vmem>>, vector<256x256xf32>,
    %c0_115 = arith.constant 0 : index
    %c0_116 = arith.constant 0 : index
    %c0_117 = arith.constant 0 : index
    %c0_118 = arith.constant 0 : index
    %76 = vector.load %arg1[%c0_115, %c0_116, %c0_117, %c0_118] : memref<1x16x16x256xf32, #tpu.memory_space<vmem>>, vector<1x16x16x256xf32>
    %77 = vector.shape_cast %76 : vector<1x16x16x256xf32> to vector<16x16x256xf32>
    %78 = vector.shape_cast %77 : vector<16x16x256xf32> to vector<256x256xf32>
    %c0_119 = arith.constant 0 : index
    %c0_120 = arith.constant 0 : index
    %79 = vector.load %arg6[%c0_119, %c0_120] : memref<256x256xf32, #tpu.memory_space<vmem>>, vector<256x256xf32>
    %c2_121 = arith.constant 2 : index
    %c0_122 = arith.constant 0 : index
    %80 = vector.load %arg3[%c2_121, %c0_122] : memref<4x256xf32, #tpu.memory_space<vmem>>, vector<1x256xf32>
    %81 = vector.broadcast %80 : vector<1x256xf32> to vector<256x256xf32>
    %82 = arith.mulf %79, %81 : vector<256x256xf32>
    %c3 = arith.constant 3 : index
    %c0_123 = arith.constant 0 : index
    %83 = vector.load %arg3[%c3, %c0_123] : memref<4x256xf32, #tpu.memory_space<vmem>>, vector<1x256xf32>
    %84 = vector.broadcast %83 : vector<1x256xf32> to vector<256x256xf32>
    %85 = arith.addf %82, %84 : vector<256x256xf32>
    %86 = arith.addf %85, %78 : vector<256x256xf32>
    %cst_124 = arith.constant 0.000000e+00 : f32
    %87 = vector.broadcast %cst_124 : f32 to vector<256x256xf32>
    %88 = arith.maximumf %86, %87 : vector<256x256xf32>
    %89 = vector.shape_cast %88 : vector<256x256xf32> to vector<1x16x16x256xf32>
    %c0_125 = arith.constant 0 : index
    %c0_126 = arith.constant 0 : index
    %c0_127 = arith.constant 0 : index
    %c0_128 = arith.constant 0 : index
    %90 = vector.load %arg4[%c0_125, %c0_126, %c0_127, %c0_128] : memref<1x16x16x256xf32, #tpu.memory_space<vmem>>, vector<1x16x16x256xf32>
    tpu.vector_store %arg4[%c0_125, %c0_126, %c0_127, %c0_128], %89 {strides = array<i32>} : memref<1x16x16x256xf32, #tpu.memory_space<vmem>>, vector<1x16x16x256xf32>,
    return
  }
  func.func @transform_0(%arg0: i32) -> (i32, i32, i32, i32) {
    %c0_i32 = arith.constant 0 : i32
    %c0_i32_0 = arith.constant 0 : i32
    %c0_i32_1 = arith.constant 0 : i32
    %c0_i32_2 = arith.constant 0 : i32
    return %arg0, %c0_i32, %c0_i32_0, %c0_i32_1 : i32, i32, i32, i32
  }
  func.func @transform_1(%arg0: i32) -> (i32, i32, i32, i32) {
    %c0_i32 = arith.constant 0 : i32
    %c0_i32_0 = arith.constant 0 : i32
    %c0_i32_1 = arith.constant 0 : i32
    %c0_i32_2 = arith.constant 0 : i32
    %c0_i32_3 = arith.constant 0 : i32
    return %c0_i32, %c0_i32_0, %c0_i32_1, %c0_i32_2 : i32, i32, i32, i32
  }
  func.func @transform_2(%arg0: i32) -> (i32, i32) {
    %c0_i32 = arith.constant 0 : i32
    %c0_i32_0 = arith.constant 0 : i32
    %c0_i32_1 = arith.constant 0 : i32
    return %c0_i32, %c0_i32_0 : i32, i32
  }
  func.func @transform_3(%arg0: i32) -> (i32, i32, i32, i32) {
    %c0_i32 = arith.constant 0 : i32
    %c0_i32_0 = arith.constant 0 : i32
    %c0_i32_1 = arith.constant 0 : i32
    %c0_i32_2 = arith.constant 0 : i32
    return %arg0, %c0_i32, %c0_i32_0, %c0_i32_1 : i32, i32, i32, i32
  }
}

</mosaic_0001>

<bundles_post_ra>
// kernel: res_layer_forward.1
= control target key start
LH: loop header
LB: loop body
LE: loop exit
PB: predicated region body
PF: predicated region fallthrough
CT: control target
= control target key end

     0   :  { %8 = vsyncpa [#allocation6], 0  ;;  %s25091_s0 = inlined_call_operand.vmem [shape: f32[2,16,16,256], index: 0, kind: input, shape index: {}]   ;;  %s25092_s1 = inlined_call_operand.vmem [shape: bf16[2,3,768,256], index: 1, kind: input, shape index: {}]   ;;  %s25093_s2 = inlined_call_operand.vmem [shape: f32[4,256], index: 2, kind: input, shape index: {}]   ;;  %s25094_s3 = inlined_call_operand.hbm [shape: f32[2,16,16,256], index: 3, kind: output, shape index: {}]  }
   0x1   :  { %10 = vsyncpa [#allocation6 + $0x1], 0  ;;  %s17970_s12 = smov 0   ;;  %s17972_s13 = smov 0  }
   0x2   :  { %s17974_s14 = smov 0   ;;  %s17976_s15 = smov 0  }
   0x3 LB: > { %s17991_s16 = sadd.s32 4294967295, %s17944_s15   ;;  %s15007_s17 = sadd.s32 4294967294, %s17944_s15   ;;  %s17944_s15 = sphi %s17976_s15, %s27178_s15   ;;  %s17940_s14 = sphi %s17974_s14, %s27177_s14   ;;  %s17936_s13 = sphi %s17972_s13, %s27176_s13   ;;  %s17932_s12 = sphi %s17970_s12, %s27175_s12  }
   0x4   : > { %s17995_s18 = sadd.s32 1, %s17944_s15   ;;  %s91_s19 = sadd.s32 1, %s17940_s14 }
   0x5   : > { %s88_s20 = ssub.s32 %s17944_s15, %s17995_s18  ;;  %p101_p0 = scmp.ne.s32.totalorder %s17940_s14, %s17936_s13 }
   0x6   : > { %p89_p1 = scmp.eq.s32.totalorder %s88_s20, 0  ;;  %p102_p2 = scmp.eq.s32.totalorder %s17991_s16, 1 }
   0x7   : > { %p107_p3 = scmp.ne.s32.totalorder %s17936_s13, %s17932_s12  ;;  %p108_p4 = scmp.eq.s32.totalorder %s15007_s17, 1 }
   0x8   : > { %s18006_s21 = scalar_select %p89_p1, %s17940_s14, %s91_s19  }
   0x9   : > { %p18008_p5 = por %p102_p2, %p101_p0  ;;  %p18012_p6 = por %p108_p4, %p107_p3 }
   0xa   : > { %p15010_p7 = scmp.ge.s32.totalorder %s17944_s15, 1  ;;  %p140_p8 = scmp.lt.s32.totalorder %s17944_s15, 3 }
   0xc   : > { %p141_p9 = pnand %p15010_p7, %p140_p8 }
   0xe   : > { %144 = sbr.rel (%p141_p9) target bundleno = 1705 (0x6a9), region = 32 }
  0x13   : > { %v17018_v0 = vld [vmem:[%s25092_s1 + $0x74] ss:$8 sps:$4 sm:$0xff]   ;;  %v17946_v2 = vmov 0   ;;  %v17022_v4 = vld [vmem:[%s25092_s1 + $0x70] ss:$8 sps:$4 sm:$0xff]   ;;  %p164_p10 = scmp.lt.s32.totalorder %s17991_s16, 1 }
  0x14   : > { %v17020_v1 = vld [vmem:[%s25092_s1 + $0x174] ss:$8 sps:$4 sm:$0xff]   ;;  %v18026_v3 = vcombine.high %v17946_v2, %v17946_v2  ;;  %2936 = vmatprep.subr.bf16.mxu0 %v17018_v0  ;;  %v17023_v5 = vld [vmem:[%s25092_s1 + $0x170] ss:$8 sps:$4 sm:$0xff]   ;;  %v17024_v6 = vld [vmem:[%s25092_s1 + $0x64] ss:$8 sps:$4 sm:$0xff]  }
  0x15   : > { %3129 = vmatprep.subr.bf16.mxu1 %v17020_v1  ;;  %2937 = vmatpush1.bf16.msra.mxu0 %v17022_v4  ;;  %v17026_v7 = vld [vmem:[%s25092_s1 + $0x164] ss:$8 sps:$4 sm:$0xff]   ;;  %v17028_v8 = vld [vmem:[%s25092_s1 + $0x60] ss:$8 sps:$4 sm:$0xff]   ;;  %v17030_v10 = vld [vmem:[%s25092_s1 + $0x54] ss:$8 sps:$4 sm:$0xff]  }
  0x16   : > { %25455 = vst [vmem:[#allocation8_spill] sm:$0xff] %v18026_v3  ;;  %2968 = vmatprep.mubr.bf16.mxu0 %v18026_v3  ;;  %3130 = vmatpush1.bf16.msra.mxu1 %v17023_v5  ;;  %v17029_v9 = vld [vmem:[%s25092_s1 + $0x160] ss:$8 sps:$4 sm:$0xff]   ;;  %v17032_v11 = vld [vmem:[%s25092_s1 + $0x154] ss:$8 sps:$4 sm:$0xff]   ;;  %s165_s28 = scalar_select %p164_p10, %s17991_s16, 1 }
  0x17   : > { %2938 = vmatprep.subr.bf16.mxu0 %v17024_v6  ;;  %3161 = vmatprep.mubr.bf16.mxu1 %v18026_v3  ;;  %v17034_v12 = vld [vmem:[%s25092_s1 + $0x50] ss:$8 sps:$4 sm:$0xff]   ;;  %v17036_v14 = vld [vmem:[%s25092_s1 + $0x44] ss:$8 sps:$4 sm:$0xff]   ;;  %v17040_v16 = vld [vmem:[%s25092_s1 + $0x40] ss:$8 sps:$4 sm:$0xff]  }
  0x18   : > { %3131 = vmatprep.subr.bf16.mxu1 %v17026_v7  ;;  %v17035_v13 = vld [vmem:[%s25092_s1 + $0x150] ss:$8 sps:$4 sm:$0xff]   ;;  %v17038_v15 = vld [vmem:[%s25092_s1 + $0x144] ss:$8 sps:$4 sm:$0xff]   ;;  %v17041_v17 = vld [vmem:[%s25092_s1 + $0x140] ss:$8 sps:$4 sm:$0xff]  }
  0x19   : > { %2939 = vmatpush1.bf16.msra.mxu0 %v17028_v8  ;;  %v17042_v18 = vld [vmem:[%s25092_s1 + $0x34] ss:$8 sps:$4 sm:$0xff]   ;;  %v17046_v20 = vld [vmem:[%s25092_s1 + $0x30] ss:$8 sps:$4 sm:$0xff]   ;;  %v17048_v22 = vld [vmem:[%s25092_s1 + $0x24] ss:$8 sps:$4 sm:$0xff]  }
  0x1a   : > { %3132 = vmatpush1.bf16.msra.mxu1 %v17029_v9  ;;  %2940 = vmatprep.subr.bf16.mxu0 %v17030_v10  ;;  %v17044_v19 = vld [vmem:[%s25092_s1 + $0x134] ss:$8 sps:$4 sm:$0xff]   ;;  %v17047_v21 = vld [vmem:[%s25092_s1 + $0x130] ss:$8 sps:$4 sm:$0xff]   ;;  %v17050_v23 = vld [vmem:[%s25092_s1 + $0x124] ss:$8 sps:$4 sm:$0xff]  }
  0x1b   : > { %3133 = vmatprep.subr.bf16.mxu1 %v17032_v11  ;;  %v17052_v24 = vld [vmem:[%s25092_s1 + $0x20] ss:$8 sps:$4 sm:$0xff]   ;;  %v17054_v26 = vld [vmem:[%s25092_s1 + $0x14] ss:$8 sps:$4 sm:$0xff]   ;;  %v17058_v28 = vld [vmem:[%s25092_s1 + $0x10] ss:$8 sps:$4 sm:$0xff]  }
  0x1c   : > { %v17053_v25 = vld [vmem:[%s25092_s1 + $0x120] ss:$8 sps:$4 sm:$0xff]   ;;  %v17056_v27 = vld [vmem:[%s25092_s1 + $0x114] ss:$8 sps:$4 sm:$0xff]   ;;  %v17059_v29 = vld [vmem:[%s25092_s1 + $0x110] ss:$8 sps:$4 sm:$0xff]  }
  0x1d   : > { %2941 = vmatpush1.bf16.msra.mxu0 %v17034_v12  ;;  %v17060_v30 = vld [vmem:[%s25092_s1 + $0x4] ss:$8 sps:$4 sm:$0xff]   ;;  %v17064_v32 = vld [vmem:[%s25092_s1] ss:$8 sps:$4 sm:$0xff]   ;;  %v17066_v34 = vld [vmem:[%s25092_s1 + $0xf4] ss:$8 sps:$4 sm:$0xff]  }
  0x1e   : > { %3134 = vmatpush1.bf16.msra.mxu1 %v17035_v13  ;;  %2942 = vmatprep.subr.bf16.mxu0 %v17036_v14  ;;  %v17062_v31 = vld [vmem:[%s25092_s1 + $0x104] ss:$8 sps:$4 sm:$0xff]   ;;  %v17065_v33 = vld [vmem:[%s25092_s1 + $0x100] ss:$8 sps:$4 sm:$0xff]   ;;  %v17068_v35 = vld [vmem:[%s25092_s1 + $0x1f4] ss:$8 sps:$4 sm:$0xff]  }
  0x1f   : > { %3135 = vmatprep.subr.bf16.mxu1 %v17038_v15  ;;  %v17070_v36 = vld [vmem:[%s25092_s1 + $0xf0] ss:$8 sps:$4 sm:$0xff]   ;;  %v17072_v38 = vld [vmem:[%s25092_s1 + $0xe4] ss:$8 sps:$4 sm:$0xff]   ;;  %v17076_v40 = vld [vmem:[%s25092_s1 + $0xe0] ss:$8 sps:$4 sm:$0xff]  }
  0x20   : > { %v17071_v37 = vld [vmem:[%s25092_s1 + $0x1f0] ss:$8 sps:$4 sm:$0xff]   ;;  %v17074_v39 = vld [vmem:[%s25092_s1 + $0x1e4] ss:$8 sps:$4 sm:$0xff]   ;;  %v17077_v41 = vld [vmem:[%s25092_s1 + $0x1e0] ss:$8 sps:$4 sm:$0xff]  }
  0x21   : > { %2943 = vmatpush1.bf16.msra.mxu0 %v17040_v16  ;;  %v17078_v42 = vld [vmem:[%s25092_s1 + $0xd4] ss:$8 sps:$4 sm:$0xff]   ;;  %s16782_s10 = sshll.u32 %s165_s28, 9  ;;  %v17082_v44 = vld [vmem:[%s25092_s1 + $0xd0] ss:$8 sps:$4 sm:$0xff]   ;;  %vm794_vm2 = vcmask 1043456  }
  0x22   : > { %3136 = vmatpush1.bf16.msra.mxu1 %v17041_v17  ;;  %2944 = vmatprep.subr.bf16.mxu0 %v17042_v18  ;;  %v17080_v43 = vld [vmem:[%s25092_s1 + $0x1d4] ss:$8 sps:$4 sm:$0xff]   ;;  %v17083_v45 = vld [vmem:[%s25092_s1 + $0x1d0] ss:$8 sps:$4 sm:$0xff]   ;;  %v17084_v46 = vld [vmem:[%s25092_s1 + $0xc4] ss:$8 sps:$4 sm:$0xff]   ;;  %s18167_s30 = scalar_lea.vmem %s25091_s0, %s16782_s10 }
  0x23   : > { %3137 = vmatprep.subr.bf16.mxu1 %v17044_v19  ;;  %v17086_v47 = vld [vmem:[%s25092_s1 + $0x1c4] ss:$8 sps:$4 sm:$0xff]   ;;  %v17088_v48 = vld [vmem:[%s25092_s1 + $0xc0] ss:$8 sps:$4 sm:$0xff]   ;;  %v280_v52 = vld [vmem:[%s18167_s30 + $0x10] sm:$0x7f] }
  0x24   : > { %v17089_v49 = vld [vmem:[%s25092_s1 + $0x1c0] ss:$8 sps:$4 sm:$0xff]   ;;  %v17090_v53 = vld [vmem:[%s25092_s1 + $0xb4] ss:$8 sps:$4 sm:$0xff]   ;;  %vm795_vm0 = vsmask.f32 7938 }
  0x25   : > { %2945 = vmatpush1.bf16.msra.mxu0 %v17046_v20  ;;  %v18176_v50 = vld [vmem:[%s18167_s30] sm:$0xff]  ;;  %v18179_v51 = vld [vmem:[%s18167_s30 + $0x8] sm:$0xff]  ;;  %v17092_v54 = vld [vmem:[%s25092_s1 + $0x1b4] ss:$8 sps:$4 sm:$0xff]   ;;  %vm798_vm1 = vsmask.f32 7954 }
  0x26   : > { %3138 = vmatpush1.bf16.msra.mxu1 %v17047_v21  ;;  %2946 = vmatprep.subr.bf16.mxu0 %v17048_v22  ;;  %v281_v55 = vld [vmem:[%s18167_s30 + $0x18] sm:$0x7f]  ;;  %v16783_v56 = vpack.c.bf16 %v18179_v51, %v18176_v50  ;;  %v17096_v60 = vld [vmem:[%s25092_s1 + $0xa4] ss:$8 sps:$4 sm:$0xff]   ;;  %vm797_vm3 = vcmask 1047556   ;;  %vm18219_vm6 = vmand %vm794_vm2, %vm795_vm0  ;;  %v25458_v19 = vmov 0 }
  0x27   : > { %3139 = vmatprep.subr.bf16.mxu1 %v17050_v23  ;;  %v16784_v57 = vpack.c.bf16 %v281_v55, %v280_v52  ;;  %v17094_v58 = vld [vmem:[%s25092_s1 + $0xb0] ss:$8 sps:$4 sm:$0xff]   ;;  %v17098_v62 = vld [vmem:[%s25092_s1 + $0x1a4] ss:$8 sps:$4 sm:$0xff]   ;;  %vm502_vm4 = vsmask.f32 256  ;;  %vm799_vm7 = vmand %vm797_vm3, %vm798_vm1 }
  0x28   : > { %v17095_v59 = vld [vmem:[%s25092_s1 + $0x1b0] ss:$8 sps:$4 sm:$0xff]   ;;  %v506_v61 = vshrl.u32 %v16783_v56, 16  ;;  %v18204_v0 = vld [vmem:[%s18167_s30 + $0x20] sm:$0xff]  ;;  %v18207_v1 = vld [vmem:[%s18167_s30 + $0x28] sm:$0xff]  ;;  %v509_v9 = vshll.u32 %v16783_v56, 16 }
  0x29   : > { %2947 = vmatpush1.bf16.msra.mxu0 %v17052_v24  ;;  %v514_v63 = vshrl.u32 %v16784_v57, 16  ;;  %v284_v4 = vld [vmem:[%s18167_s30 + $0x30] sm:$0x7f]  ;;  %v285_v5 = vld [vmem:[%s18167_s30 + $0x38] sm:$0x7f]  ;;  %v517_v14 = vshll.u32 %v16784_v57, 16  ;;  %v16785_v15 = vpack.c.bf16 %v18207_v1, %v18204_v0  ;;  %vm18253_vm9 = vmor %vm799_vm7, %vm18219_vm6 }
  0x2a   : > { %3140 = vmatpush1.bf16.msra.mxu1 %v17053_v25  ;;  %2948 = vmatprep.subr.bf16.mxu0 %v17054_v26  ;;  %vm503_vm5 = vsmask.f32 4368  ;;  %v17100_v6 = vld [vmem:[%s25092_s1 + $0xa0] ss:$8 sps:$4 sm:$0xff]   ;;  %v508_v8 = vrot.slane %v506_v61, 7  ;;  %v16786_v16 = vpack.c.bf16 %v285_v5, %v284_v4  ;;  %v25461_v24 = vmov 0 }
  0x2b   : > { %3141 = vmatprep.subr.bf16.mxu1 %v17056_v27  ;;  %v17101_v7 = vld [vmem:[%s25092_s1 + $0x1a0] ss:$8 sps:$4 sm:$0xff]   ;;  %v17102_v11 = vld [vmem:[%s25092_s1 + $0x94] ss:$8 sps:$4 sm:$0xff]   ;;  %v516_v13 = vrot.slane %v514_v63, 7  ;;  %vm18241_vm8 = vmor %vm502_vm4, %vm503_vm5  ;;  %v25462_v24 = vsel %vm18253_vm9, 4294967295, %v25461_v24 }
  0x2c   : > { %v17104_v12 = vld [vmem:[%s25092_s1 + $0x194] ss:$8 sps:$4 sm:$0xff]   ;;  %v17106_v17 = vld [vmem:[%s25092_s1 + $0x90] ss:$8 sps:$4 sm:$0xff]   ;;  %v25459_v19 = vsel %vm18241_vm8, 4294967295, %v25458_v19  ;;  %v511_v22 = vor.u32 %v509_v9, %v508_v8  ;;  %v512_v23 = vrot.slane %v508_v8, 4 }
  0x2d   : > { %2949 = vmatpush1.bf16.msra.mxu0 %v17058_v28  ;;  %v17107_v18 = vld [vmem:[%s25092_s1 + $0x190] ss:$8 sps:$4 sm:$0xff]   ;;  %25460 = vst [vmem:[#allocation9_spill] sm:$0xff] %v25459_v19  ;;  %v17108_v20 = vld [vmem:[%s25092_s1 + $0x84] ss:$8 sps:$4 sm:$0xff]   ;;  %25463 = vst [vmem:[#allocation10_spill] sm:$0xff] %v25462_v24  ;;  %v519_v25 = vor.u32 %v517_v14, %v516_v13 }
  0x2e   : > { %3142 = vmatpush1.bf16.msra.mxu1 %v17059_v29  ;;  %2950 = vmatprep.subr.bf16.mxu0 %v17060_v30  ;;  %v17110_v21 = vld [vmem:[%s25092_s1 + $0x184] ss:$8 sps:$4 sm:$0xff]   ;;  %v522_v26 = vshrl.u32 %v16785_v15, 16  ;;  %v530_v27 = vshrl.u32 %v16786_v16, 16  ;;  %v288_v30 = vld [vmem:[%s18167_s30 + $0x50] sm:$0x7f] }
  0x2f   : > { %3143 = vmatprep.subr.bf16.mxu1 %v17062_v31  ;;  %v18258_v28 = vld [vmem:[%s18167_s30 + $0x40] sm:$0xff]  ;;  %v18261_v29 = vld [vmem:[%s18167_s30 + $0x48] sm:$0xff]  ;;  %v289_v31 = vld [vmem:[%s18167_s30 + $0x58] sm:$0x7f]  ;;  %vm1377_vm10 = vsmask.f32 3328 }
  0x30   : > { %v18303_v56 = vld [vmem:[%s18167_s30 + $0x68] sm:$0xff]  ;;  %v292_v57 = vld [vmem:[%s18167_s30 + $0x70] sm:$0x7f]  ;;  %v18340_v14 = vld [vmem:[%s18167_s30 + $0x80] sm:$0xff]  ;;  %vm1718_vm11 = vsmask.f32 7424 }
  0x31   : > { %2951 = vmatpush1.bf16.msra.mxu0 %v17064_v32  ;;  %v17112_v32 = vld [vmem:[%s25092_s1 + $0x80] ss:$8 sps:$4 sm:$0xff]   ;;  %v17120_v13 = vld [vmem:[%s25092_s1 + $0x250] ss:$8 sps:$4 sm:$0xff]   ;;  %vm18571_vm12 = vmand %vm794_vm2, %vm1377_vm10  ;;  %vm1378_vm15 = vsmask.f32 7440 }
  0x32   : > { %3144 = vmatpush1.bf16.msra.mxu1 %v17065_v33  ;;  %2952 = vmatprep.subr.bf16.mxu0 %v17066_v34  ;;  %v17113_v33 = vld [vmem:[%s25092_s1 + $0x180] ss:$8 sps:$4 sm:$0xff]   ;;  %v18273_v34 = vsel %vm18253_vm9, %v511_v22, 0  ;;  %v296_v22 = vld [vmem:[%s18167_s30 + $0x90] sm:$0x7f]  ;;  %vm18583_vm13 = vmand %vm797_vm3, %vm1718_vm11  ;;  %s161_s27 = sand.u32 1, %s17936_s13  }
  0x33   : > { %3145 = vmatprep.subr.bf16.mxu1 %v17068_v35  ;;  %25464 = vst [vmem:[#allocation11_spill] sm:$0xff] %v18273_v34  ;;  %v525_v35 = vshll.u32 %v16785_v15, 16  ;;  %vm18622_vm14 = vmor %vm18583_vm13, %vm18571_vm12  ;;  %s15011_s28 = sshll.u32 %s161_s27, 9  ;;  %s16911_s4 = sshll.u32 %s17991_s16, 13 }
  0x34   : > { %vm19024_vm0 = vmor %vm1377_vm10, %vm1378_vm15  ;;  %s24581_s29 = scalar_lea.vmem [#allocation5], %s15011_s28  ;;  %s25043_s8 = scalar_lea.hbm %s25094_s3, %s16911_s4 }
  0x35   : > { %2953 = vmatpush2.bf16.msra.mxu0 %v17070_v36  ;;  %v533_v36 = vshll.u32 %v16786_v16, 16  ;;  %s14945_s5 = sshll.u32 %s24581_s29, 4  ;;  %s17947_s9 = smov [#allocation5]   ;;  %s25045_s5 = int_to_ptr.vmem [resolvable:$true] %s14945_s5 }
  0x36   : > { %3146 = vmatpush2.bf16.msra.mxu1 %v17071_v37  ;;  %2954 = vmatprep.subr.bf16.mxu0 %v17072_v38  ;;  %v16787_v37 = vpack.c.bf16 %v18261_v29, %v18258_v28  ;;  %v17116_v38 = vld [vmem:[%s25092_s1 + $0x274] ss:$8 sps:$4 sm:$0xff]   ;;  %s17884_s16 = scalar_lea.vmem %s25045_s5, 8192  ;;  %s17888_s10 = sshll.u32 %s17947_s9, 4  ;;  %s17889_s10 = int_to_ptr.vmem [resolvable:$false] %s17888_s10 }
  0x37   : > { %3147 = vmatprep.subr.bf16.mxu1 %v17074_v39  ;;  %v520_v39 = vsel %vm18241_vm8, %v512_v23, %v519_v25  ;;  %v297_v23 = vld [vmem:[%s18167_s30 + $0x98] sm:$0x7f]  ;;  %p17885_p11 = scmp.ne.s32.totalorder %s25045_s5, %s17884_s16  ;;  %s17890_s11 = scalar_lea.vmem %s17889_s10, 16384 }
  0x38   : > { %v18328_v10 = vcombine.low %v18273_v34, %v520_v39  ;;  %v17141_v25 = vld [vmem:[%s25092_s1 + $0x370] ss:$8 sps:$4 sm:$0xff]   ;;  %p17891_p0 = scmp.lt.s32.totalorder %s25045_s5, %s17889_s10  ;;  %p17892_p1 = scmp.lt.s32.totalorder %s17890_s11, %s17884_s16 }
  0x39   : > { %2955 = vmatpush2.bf16.msra.mxu0 %v17076_v40  ;;  %v868_v40 = vld [vmem:[%s18167_s30 + $0x18] sm:$0xff]  ;;  %p17886_p12 = pnand %p17885_p11, %p18008_p5 }
  0x3a   : > { %3148 = vmatpush2.bf16.msra.mxu1 %v17077_v41  ;;  %2956 = vmatprep.subr.bf16.mxu0 %v17078_v42  ;;  %v524_v41 = vrot.slane %v522_v26, 7  ;;  %v532_v42 = vrot.slane %v530_v27, 7  ;;  %v17143_v26 = vld [vmem:[%s25092_s1 + $0x374] ss:$8 sps:$4 sm:$0xff]   ;;  %p17893_p2 = por %p17892_p1, %p17891_p0 }
  0x3b   : > { %3149 = vmatprep.subr.bf16.mxu1 %v17080_v43  ;;  %v16788_v43 = vpack.c.bf16 %v289_v31, %v288_v30  ;;  %v871_v27 = vld [vmem:[%s18167_s30 + $0x30] sm:$0xff]  ;;  %p17887_p13 = pneg %p17886_p12 }
  0x3c   : > { %v527_v52 = vor.u32 %v525_v35, %v524_v41  ;;  %v17146_v35 = vld [vmem:[%s25092_s1 + $0x364] ss:$8 sps:$4 sm:$0xff]  }
  0x3d   : > { %2957 = vmatpush2.bf16.msra.mxu0 %v17082_v44  ;;  %v18285_v44 = vcombine.low %v17946_v2, %v17946_v2  ;;  %v538_v2 = vshrl.u32 %v16787_v37, 16  ;;  %v546_v55 = vshrl.u32 %v16788_v43, 16  ;;  %v549_v63 = vshll.u32 %v16788_v43, 16  ;;  %v17144_v43 = vld [vmem:[%s25092_s1 + $0x360] ss:$8 sps:$4 sm:$0xff]   ;;  %p17894_p3 = pnand %p17893_p2, %p17887_p13 }
  0x3e   : > { %3150 = vmatpush2.bf16.msra.mxu1 %v17083_v45  ;;  %2958 = vmatprep.subr.bf16.mxu0 %v17084_v46  ;;  %v17114_v45 = vld [vmem:[%s25092_s1 + $0x270] ss:$8 sps:$4 sm:$0xff]   ;;  %v18291_v46 = vcombine.high %v18273_v34, %v520_v39 }
  0x3f   : > { %3151 = vmatprep.subr.bf16.mxu1 %v17086_v47  ;;  %25465 = vst [vmem:[#allocation12_spill] sm:$0xff] %v18285_v44  ;;  %v18294_v47 = vpack.c.bf16 %v868_v40, %v18179_v51  ;;  %v17117_v51 = vld [vmem:[%s25092_s1 + $0x260] ss:$8 sps:$4 sm:$0xff]   ;;  %v540_v61 = vrot.slane %v538_v2, 7  ;;  %v548_v8 = vrot.slane %v546_v55, 7 }
  0x40   : > { %v17126_v2 = vld [vmem:[%s25092_s1 + $0x230] ss:$8 sps:$4 sm:$0xff]  }
  0x41   : > { %2959 = vmatpush2.bf16.msra.mxu0 %v17088_v48  ;;  %v17119_v48 = vld [vmem:[%s25092_s1 + $0x264] ss:$8 sps:$4 sm:$0xff]  }
  0x42   : > { %3152 = vmatpush2.bf16.msra.mxu1 %v17089_v49  ;;  %2960 = vmatprep.subr.bf16.mxu0 %v17090_v53  ;;  %v18300_v49 = vld [vmem:[%s18167_s30 + $0x60] sm:$0xff]  ;;  %v528_v53 = vrot.slane %v524_v41, 4  ;;  %v16792_v41 = vpack.c.bf16 %v297_v23, %v296_v22  ;;  %v17134_v22 = vld [vmem:[%s25092_s1 + $0x214] ss:$8 sps:$4 sm:$0xff]  }
  0x43   : > { %3153 = vmatprep.subr.bf16.mxu1 %v17092_v54  ;;  %v535_v54 = vor.u32 %v533_v36, %v532_v42  ;;  %v16789_v4 = vpack.c.bf16 %v18303_v56, %v18300_v49  ;;  %v17128_v42 = vld [vmem:[%s25092_s1 + $0x234] ss:$8 sps:$4 sm:$0xff]   ;;  %v17153_v23 = vld [vmem:[%s25092_s1 + $0x340] ss:$8 sps:$4 sm:$0xff]  }
  0x45   : > { %2961 = vmatpush2.bf16.msra.mxu0 %v17094_v58  ;;  %v293_v58 = vld [vmem:[%s18167_s30 + $0x78] sm:$0x7f]  ;;  %v536_v5 = vsel %vm18241_vm8, %v528_v53, %v535_v54  ;;  %v557_v31 = vshll.u32 %v16789_v4, 16 }
  0x46   : > { %3154 = vmatpush2.bf16.msra.mxu1 %v17095_v59  ;;  %2962 = vmatprep.subr.bf16.mxu0 %v17096_v60  ;;  %v867_v59 = vld [vmem:[%s18167_s30 + $0x10] sm:$0xff]  ;;  %v872_v60 = vld [vmem:[%s18167_s30 + $0x38] sm:$0xff]  ;;  %v16790_v9 = vpack.c.bf16 %v293_v58, %v292_v57  ;;  %v18410_v57 = vld [vmem:[%s18167_s30 + $0xa8] sm:$0xff] }
  0x47   : > { %3155 = vmatprep.subr.bf16.mxu1 %v17098_v62  ;;  %v541_v62 = vshll.u32 %v16787_v37, 16  ;;  %v876_v37 = vld [vmem:[%s18167_s30 + $0x58] sm:$0xff] }
  0x48   : > { %v18403_v54 = vpack.c.bf16 %v876_v37, %v18261_v29  ;;  %v17152_v29 = vld [vmem:[%s25092_s1 + $0x354] ss:$8 sps:$4 sm:$0xff]   ;;  %v18466_v37 = vld [vmem:[%s18167_s30 + $0xc8] sm:$0xff] }
  0x49   : > { %2963 = vmatpush2.bf16.msra.mxu0 %v17100_v6  ;;  %v18322_v6 = vsel %vm18253_vm9, %v527_v52, 0  ;;  %v543_v16 = vor.u32 %v541_v62, %v540_v61  ;;  %v18397_v52 = vld [vmem:[%s18167_s30 + $0xa0] sm:$0xff]  ;;  %v301_v62 = vld [vmem:[%s18167_s30 + $0xb8] sm:$0x7f] }
  0x4a   : > { %3156 = vmatpush2.bf16.msra.mxu1 %v17101_v7  ;;  %2964 = vmatprep.subr.bf16.mxu0 %v17102_v11  ;;  %25466 = vst [vmem:[#allocation13_spill] sm:$0xff] %v18322_v6  ;;  %v17122_v7 = vld [vmem:[%s25092_s1 + $0x254] ss:$8 sps:$4 sm:$0xff]   ;;  %v18331_v11 = vpack.c.bf16 %v867_v59, %v18176_v50  ;;  %v18343_v15 = vcombine.high %v18322_v6, %v536_v5  ;;  %v17125_v50 = vld [vmem:[%s25092_s1 + $0x244] ss:$8 sps:$4 sm:$0xff]   ;;  %25473 = vst [vmem:[#allocation20_spill] sm:$0xff] %v18403_v54 }
  0x4b   : > { %3157 = vmatprep.subr.bf16.mxu1 %v17104_v12  ;;  %v18334_v12 = vpack.c.bf16 %v872_v60, %v18207_v1  ;;  %v18349_v1 = vld [vmem:[%s18167_s30 + $0x88] sm:$0xff]  ;;  %v18366_v30 = vsel %vm18253_vm9, %v543_v16, 0  ;;  %v578_v60 = vshrl.u32 %v16792_v41, 16 }
  0x4c   : > { %25468 = vst [vmem:[#allocation15_spill] sm:$0xff] %v18343_v15  ;;  %25469 = vst [vmem:[#allocation16_spill] sm:$0xff] %v18366_v30  ;;  %v17129_v16 = vld [vmem:[%s25092_s1 + $0x220] ss:$8 sps:$4 sm:$0xff]  }
  0x4d   : > { %2965 = vmatpush2.bf16.msra.mxu0 %v17106_v17  ;;  %25467 = vst [vmem:[#allocation14_spill] sm:$0xff] %v18334_v12  ;;  %v544_v17 = vrot.slane %v540_v61, 4  ;;  %v300_v61 = vld [vmem:[%s18167_s30 + $0xb0] sm:$0x7f] }
  0x4e   : > { %3158 = vmatpush2.bf16.msra.mxu1 %v17107_v18  ;;  %2966 = vmatprep.subr.bf16.mxu0 %v17108_v20  ;;  %v554_v18 = vshrl.u32 %v16789_v4, 16  ;;  %v551_v20 = vor.u32 %v549_v63, %v548_v8  ;;  %v17150_v63 = vld [vmem:[%s25092_s1 + $0x350] ss:$8 sps:$4 sm:$0xff]  }
  0x4f   : > { %3159 = vmatprep.subr.bf16.mxu1 %v17110_v21  ;;  %v562_v21 = vshrl.u32 %v16790_v9, 16  ;;  %v875_v4 = vld [vmem:[%s18167_s30 + $0x50] sm:$0xff] }
  0x50   : > { %v552_v36 = vsel %vm18241_vm8, %v544_v17, %v551_v20  ;;  %v556_v39 = vrot.slane %v554_v18, 7  ;;  %v16793_v17 = vpack.c.bf16 %v18410_v57, %v18397_v52  ;;  %v580_v20 = vrot.slane %v578_v60, 7 }
  0x51   : > { %2967 = vmatpush2.bf16.msra.mxu0 %v17112_v32  ;;  %v565_v32 = vshll.u32 %v16790_v9, 16  ;;  %v564_v40 = vrot.slane %v562_v21, 7  ;;  %v18400_v53 = vcombine.high %v18366_v30, %v552_v36  ;;  %v16794_v21 = vpack.c.bf16 %v301_v62, %v300_v61 }
  0x52   : > { %3160 = vmatpush2.bf16.msra.mxu1 %v17113_v33  ;;  %3322 = vmatprep.subr.bf16.mxu0 %v17116_v38  ;;  %v18370_v33 = vpack.c.bf16 %v18349_v1, %v18340_v14  ;;  %v17123_v38 = vld [vmem:[%s25092_s1 + $0x240] ss:$8 sps:$4 sm:$0xff]   ;;  %v559_v58 = vor.u32 %v557_v31, %v556_v39 }
  0x53   : > { %4732 = vmatprep.subr.bf16.mxu1 %v17143_v26  ;;  %25472 = vst [vmem:[#allocation19_spill] sm:$0xff] %v18400_v53  ;;  %v567_v59 = vor.u32 %v565_v32, %v564_v40  ;;  %v18451_v26 = vpack.c.bf16 %v875_v4, %v18258_v28  ;;  %v304_v40 = vld [vmem:[%s18167_s30 + $0xd0] sm:$0x7f]  ;;  %v597_v60 = vshll.u32 %v16794_v21, 16  ;;  %v17135_v4 = vld [vmem:[%s25092_s1 + $0x200] ss:$8 sps:$4 sm:$0xff]  }
  0x54   : > { %2969 = vmatmul.mubr.bf16.vlgmr.msra.gmra.mxu0 %v18285_v44  ;;  %v570_v55 = vshrl.u32 %v18370_v33, 16  ;;  %v573_v9 = vshll.u32 %v18370_v33, 16  ;;  %v18439_v18 = vsel %vm18253_vm9, %v559_v58, 0  ;;  %v586_v33 = vshrl.u32 %v16793_v17, 16  ;;  %v884_v58 = vld [vmem:[%s18167_s30 + $0x98] sm:$0xff] }
  0x55   : > { %3162 = vmatmul.mubr.bf16.vlgmr.msra.gmra.mxu1 %v18285_v44  ;;  %3323 = vmatpush1.bf16.msra.mxu0 %v17114_v45  ;;  %v18388_v45 = vcombine.low %v18322_v6, %v536_v5  ;;  %v17155_v5 = vld [vmem:[%s25092_s1 + $0x344] ss:$8 sps:$4 sm:$0xff]   ;;  %25474 = vst [vmem:[#allocation21_spill] sm:$0xff] %v18439_v18  ;;  %25476 = vst [vmem:[#allocation23_spill] sm:$0xff] %v18451_v26 }
  0x56   : > { %2978 = vmatprep.mubr.bf16.mxu0 %v18291_v46  ;;  %3171 = vmatprep.mubr.bf16.mxu1 %v18294_v47  ;;  %v572_v8 = vrot.slane %v570_v55, 7  ;;  %v17164_v55 = vld [vmem:[%s25092_s1 + $0x324] ss:$8 sps:$4 sm:$0xff]  }
  0x57   : > { %3324 = vmatprep.subr.bf16.mxu0 %v17119_v48  ;;  %4733 = vmatpush1.bf16.msra.mxu1 %v17141_v25  ;;  %25470 = vst [vmem:[#allocation17_spill] sm:$0xff] %v18388_v45  ;;  %v18391_v48 = vpack.c.bf16 %v871_v27, %v18204_v0  ;;  %v17131_v0 = vld [vmem:[%s25092_s1 + $0x224] ss:$8 sps:$4 sm:$0xff]   ;;  %v18448_v25 = vcombine.low %v18366_v30, %v552_v36 }
  0x58   : > { %4734 = vmatprep.subr.bf16.mxu1 %v17146_v35  ;;  %v575_v32 = vor.u32 %v573_v9, %v572_v8  ;;  %v17132_v35 = vld [vmem:[%s25092_s1 + $0x210] ss:$8 sps:$4 sm:$0xff]   ;;  %v18463_v36 = vld [vmem:[%s18167_s30 + $0xc0] sm:$0xff]  ;;  %v576_v28 = vrot.slane %v572_v8, 4 }
  0x59   : > { %3325 = vmatpush1.bf16.msra.mxu0 %v17117_v51  ;;  %25471 = vst [vmem:[#allocation18_spill] sm:$0xff] %v18391_v48  ;;  %v560_v51 = vrot.slane %v556_v39, 4  ;;  %25475 = vst [vmem:[#allocation22_spill] sm:$0xff] %v18448_v25  ;;  %v594_v39 = vshrl.u32 %v16794_v21, 16  ;;  %v18496_v62 = vpack.c.bf16 %v18466_v37, %v18463_v36 }
  0x5a   : > { %3326 = vmatprep.subr.bf16.mxu0 %v17122_v7  ;;  %v880_v7 = vld [vmem:[%s18167_s30 + $0x78] sm:$0xff] }
  0x5b   : > { %4735 = vmatpush1.bf16.msra.mxu1 %v17144_v43  ;;  %v18457_v31 = vpack.c.bf16 %v880_v7, %v18303_v56  ;;  %v17161_v56 = vld [vmem:[%s25092_s1 + $0x334] ss:$8 sps:$4 sm:$0xff]   ;;  %v17137_v43 = vld [vmem:[%s25092_s1 + $0x204] ss:$8 sps:$4 sm:$0xff]   ;;  %v596_v61 = vrot.slane %v594_v39, 7 }
  0x5c   : > { %2979 = vmatmul.mubr.bf16.gmra.mxu0 %v18328_v10  ;;  %4736 = vmatprep.subr.bf16.mxu1 %v17152_v29  ;;  %v17162_v7 = vld [vmem:[%s25092_s1 + $0x320] ss:$8 sps:$4 sm:$0xff]   ;;  %v883_v39 = vld [vmem:[%s18167_s30 + $0x90] sm:$0xff] }
  0x5d   : > { %3172 = vmatmul.mubr.bf16.gmra.mxu1 %v18331_v11  ;;  %2988 = vmatprep.mubr.bf16.mxu0 %v18343_v15  ;;  %25478 = vst [vmem:[#allocation25_spill] sm:$0xff] %v18457_v31 }
  0x5e   : > { %3181 = vmatprep.mubr.bf16.mxu1 %v18334_v12  ;;  %3327 = vmatpush1.bf16.msra.mxu0 %v17120_v13  ;;  %v581_v13 = vshll.u32 %v16792_v41, 16  ;;  %v879_v41 = vld [vmem:[%s18167_s30 + $0x70] sm:$0xff] }
  0x5f   : > { %3328 = vmatprep.subr.bf16.mxu0 %v17125_v50  ;;  %v568_v50 = vsel %vm18241_vm8, %v560_v51, %v567_v59  ;;  %4737 = vmatpush1.bf16.msra.mxu1 %v17150_v63  ;;  %v588_v51 = vrot.slane %v586_v33, 7  ;;  %v589_v59 = vshll.u32 %v16793_v17, 16  ;;  %v18513_v9 = vpack.c.bf16 %v879_v41, %v18300_v49  ;;  %v17138_v49 = vld [vmem:[%s25092_s1 + $0x2f0] ss:$8 sps:$4 sm:$0xff]  }
  0x60   : > { %4738 = vmatprep.subr.bf16.mxu1 %v17155_v5  ;;  %v18454_v27 = vcombine.high %v18439_v18, %v568_v50  ;;  %v17140_v5 = vld [vmem:[%s25092_s1 + $0x2f4] ss:$8 sps:$4 sm:$0xff]   ;;  %v18510_v8 = vcombine.low %v18439_v18, %v568_v50  ;;  %v18522_v17 = vpack.c.bf16 %v884_v58, %v18349_v1  ;;  %v602_v33 = vshrl.u32 %v18496_v62, 16  ;;  %v17149_v1 = vld [vmem:[%s25092_s1 + $0x2e4] ss:$8 sps:$4 sm:$0xff]  }
  0x61   : > { %25481 = vst [vmem:[#allocation28_spill] sm:$0xff] %v18513_v9  ;;  %v592_v21 = vrot.slane %v588_v51, 4  ;;  %v309_v50 = vld [vmem:[%s18167_s30 + $0xf8] sm:$0x7f] }
  0x62   : > { %3329 = vmatpush1.bf16.msra.mxu0 %v17123_v38  ;;  %25477 = vst [vmem:[#allocation24_spill] sm:$0xff] %v18454_v27  ;;  %v583_v38 = vor.u32 %v581_v13, %v580_v20  ;;  %25480 = vst [vmem:[#allocation27_spill] sm:$0xff] %v18510_v8  ;;  %v18516_v13 = vld [vmem:[%s18167_s30 + $0xe0] sm:$0xff]  ;;  %v591_v20 = vor.u32 %v589_v59, %v588_v51  ;;  %v888_v41 = vld [vmem:[%s18167_s30 + $0xb8] sm:$0xff]  ;;  %v604_v58 = vrot.slane %v602_v33, 7 }
  0x63   : > { %3330 = vmatprep.subr.bf16.mxu0 %v17128_v42  ;;  %v305_v42 = vld [vmem:[%s18167_s30 + $0xd8] sm:$0x7f]  ;;  %4739 = vmatpush1.bf16.msra.mxu1 %v17153_v23  ;;  %25483 = vst [vmem:[#allocation30_spill] sm:$0xff] %v18522_v17  ;;  %v308_v23 = vld [vmem:[%s18167_s30 + $0xf0] sm:$0x7f] }
  0x64   : > { %2989 = vmatmul.mubr.bf16.gmra.mxu0 %v18388_v45  ;;  %v584_v29 = vsel %vm18241_vm8, %v576_v28, %v583_v38  ;;  %v18498_v63 = vpack.c.bf16 %v305_v42, %v304_v40  ;;  %4740 = vmatprep.subr.bf16.mxu1 %v17161_v56  ;;  %v17170_v28 = vld [vmem:[%s25092_s1 + $0x314] ss:$8 sps:$4 sm:$0xff]   ;;  %v17168_v38 = vld [vmem:[%s25092_s1 + $0x310] ss:$8 sps:$4 sm:$0xff]   ;;  %v17173_v40 = vld [vmem:[%s25092_s1 + $0x304] ss:$8 sps:$4 sm:$0xff]   ;;  %v18564_v59 = vpack.c.bf16 %v309_v50, %v308_v23 }
  0x65   : > { %3182 = vmatmul.mubr.bf16.gmra.mxu1 %v18391_v48  ;;  %2998 = vmatprep.mubr.bf16.mxu0 %v18400_v53  ;;  %v18553_v56 = vsel %vm18253_vm9, %v591_v20, 0  ;;  %v605_v42 = vshll.u32 %v18496_v62, 16  ;;  %v17158_v62 = vld [vmem:[%s25092_s1 + $0x2d4] ss:$8 sps:$4 sm:$0xff]   ;;  %v18594_v20 = vld [vmem:[%s18167_s30 + $0x100] sm:$0xff] }
  0x66   : > { %3191 = vmatprep.mubr.bf16.mxu1 %v18403_v54  ;;  %3331 = vmatpush1.bf16.msra.mxu0 %v17126_v2  ;;  %v17159_v2 = vld [vmem:[%s25092_s1 + $0x330] ss:$8 sps:$4 sm:$0xff]   ;;  %25484 = vst [vmem:[#allocation31_spill] sm:$0xff] %v18553_v56  ;;  %v17167_v33 = vld [vmem:[%s25092_s1 + $0x2c4] ss:$8 sps:$4 sm:$0xff]  }
  0x67   : > { %3332 = vmatprep.subr.bf16.mxu0 %v17131_v0  ;;  %v18489_v0 = vsel %vm18253_vm9, %v575_v32, 0  ;;  %4741 = vmatpush1.bf16.msra.mxu1 %v17159_v2  ;;  %v599_v32 = vor.u32 %v597_v60, %v596_v61  ;;  %v17147_v60 = vld [vmem:[%s25092_s1 + $0x2e0] ss:$8 sps:$4 sm:$0xff]   ;;  %v17156_v23 = vld [vmem:[%s25092_s1 + $0x2d0] ss:$8 sps:$4 sm:$0xff]  }
  0x68   : > { %25479 = vst [vmem:[#allocation26_spill] sm:$0xff] %v18489_v0  ;;  %4742 = vmatprep.subr.bf16.mxu1 %v17164_v55 }
  0x69   : > { %v600_v55 = vsel %vm18241_vm8, %v592_v21, %v599_v32  ;;  %v18597_v21 = vld [vmem:[%s18167_s30 + $0x108] sm:$0xff]  ;;  %v312_v32 = vld [vmem:[%s18167_s30 + $0x110] sm:$0x7f] }
  0x6a   : > { %3333 = vmatpush1.bf16.msra.mxu0 %v17129_v16  ;;  %v18519_v16 = vcombine.high %v18489_v0, %v584_v29  ;;  %v18603_v50 = vcombine.high %v18553_v56, %v600_v55  ;;  %v18642_v61 = vpack.c.bf16 %v18597_v21, %v18594_v20 }
  0x6b   : > { %3334 = vmatprep.subr.bf16.mxu0 %v17134_v22  ;;  %v18525_v22 = vld [vmem:[%s18167_s30 + $0xe8] sm:$0xff]  ;;  %4743 = vmatpush1.bf16.msra.mxu1 %v17162_v7  ;;  %v18591_v7 = vpack.c.bf16 %v883_v39, %v18340_v14  ;;  %v313_v14 = vld [vmem:[%s18167_s30 + $0x118] sm:$0x7f]  ;;  %v25493_v39 = vmov 0 }
  0x6c   : > { %2999 = vmatmul.mubr.bf16.gmra.mxu0 %v18448_v25  ;;  %25482 = vst [vmem:[#allocation29_spill] sm:$0xff] %v18519_v16  ;;  %v18560_v2 = vpack.c.bf16 %v18525_v22, %v18516_v13  ;;  %4744 = vmatprep.subr.bf16.mxu1 %v17170_v28  ;;  %25491 = vst [vmem:[#allocation34_spill] sm:$0xff] %v18603_v50  ;;  %v25494_v39 = vsel %vm18622_vm14, 4294967295, %v25493_v39 }
  0x6d   : > { %3192 = vmatmul.mubr.bf16.gmra.mxu1 %v18451_v26  ;;  %3008 = vmatprep.mubr.bf16.mxu0 %v18454_v27  ;;  %25490 = vst [vmem:[#allocation33_spill] sm:$0xff] %v18591_v7  ;;  %25495 = vst [vmem:[#allocation36_spill] sm:$0xff] %v25494_v39  ;;  %v919_v26 = vld [vmem:[%s18167_s30 + $0x1b0] sm:$0xff] }
  0x6e   : > { %3201 = vmatprep.mubr.bf16.mxu1 %v18457_v31  ;;  %3335 = vmatpush1.bf16.msra.mxu0 %v17132_v35  ;;  %v610_v35 = vshrl.u32 %v18498_v63, 16 }
  0x6f   : > { %3336 = vmatprep.subr.bf16.mxu0 %v17137_v43  ;;  %v613_v43 = vshll.u32 %v18498_v63, 16  ;;  %4745 = vmatpush1.bf16.msra.mxu1 %v17168_v38  ;;  %v17171_v63 = vld [vmem:[%s25092_s1 + $0x300] ss:$8 sps:$4 sm:$0xff]   ;;  %v626_v38 = vshrl.u32 %v18564_v59, 16 }
  0x70   : > { %v612_v51 = vrot.slane %v610_v35, 7  ;;  %4746 = vmatprep.subr.bf16.mxu1 %v17173_v40  ;;  %v607_v35 = vor.u32 %v605_v42, %v604_v58  ;;  %v17177_v40 = vld [vmem:[%s25092_s1 + $0x3f0] ss:$8 sps:$4 sm:$0xff]  }
  0x71   : > { %v887_v42 = vld [vmem:[%s18167_s30 + $0xb0] sm:$0xff] }
  0x72   : > { %3337 = vmatpush1.bf16.msra.mxu0 %v17135_v4  ;;  %v615_v28 = vor.u32 %v613_v43, %v612_v51  ;;  %v892_v43 = vld [vmem:[%s18167_s30 + $0xd8] sm:$0xff]  ;;  %v621_v51 = vshll.u32 %v18560_v2, 16  ;;  %v628_v4 = vrot.slane %v626_v38, 7 }
  0x73   : > { %3338 = vmatprep.subr.bf16.mxu0 %v17140_v5  ;;  %v18588_v5 = vcombine.low %v18489_v0, %v584_v29  ;;  %v618_v29 = vshrl.u32 %v18560_v2, 16  ;;  %4747 = vmatpush1.bf16.msra.mxu1 %v17171_v63  ;;  %v18648_v63 = vsel %vm18253_vm9, %v607_v35, 0  ;;  %v18650_v0 = vpack.c.bf16 %v313_v14, %v312_v32  ;;  %v17165_v2 = vld [vmem:[%s25092_s1 + $0x2c0] ss:$8 sps:$4 sm:$0xff]  }
  0x74   : > { %3009 = vmatmul.mubr.bf16.gmra.mxu0 %v18510_v8  ;;  %25496 = vst [vmem:[#allocation37_spill] sm:$0xff] %v18648_v63  ;;  %v18662_v32 = vcombine.low %v18553_v56, %v600_v55  ;;  %v18668_v14 = vpack.c.bf16 %v892_v43, %v18466_v37  ;;  %v18674_v35 = vld [vmem:[%s18167_s30 + $0x128] sm:$0xff]  ;;  %v634_v55 = vshrl.u32 %v18642_v61, 16  ;;  %v17174_v37 = vld [vmem:[%s25092_s1 + $0x2b0] ss:$8 sps:$4 sm:$0xff]  }
  0x75   : > { %3202 = vmatmul.mubr.bf16.gmra.mxu1 %v18513_v9  ;;  %3018 = vmatprep.mubr.bf16.mxu0 %v18519_v16  ;;  %25489 = vst [vmem:[#allocation32_spill] sm:$0xff] %v18588_v5  ;;  %v17185_v43 = vld [vmem:[%s25092_s1 + $0x2a4] ss:$8 sps:$4 sm:$0xff]   ;;  %v645_v6 = vshll.u32 %v18650_v0, 16 }
  0x76   : > { %3211 = vmatprep.mubr.bf16.mxu1 %v18522_v17  ;;  %3339 = vmatpush2.bf16.msra.mxu0 %v17138_v49  ;;  %v18606_v49 = vpack.c.bf16 %v888_v41, %v18410_v57  ;;  %v17179_v57 = vld [vmem:[%s25092_s1 + $0x3f4] ss:$8 sps:$4 sm:$0xff]   ;;  %v17182_v41 = vld [vmem:[%s25092_s1 + $0x3e4] ss:$8 sps:$4 sm:$0xff]   ;;  %25497 = vst [vmem:[#allocation38_spill] sm:$0xff] %v18662_v32  ;;  %25499 = vst [vmem:[#allocation40_spill] sm:$0xff] %v18668_v14 }
  0x77   : > { %3340 = vmatprep.subr.bf16.mxu0 %v17149_v1  ;;  %v608_v1 = vrot.slane %v604_v58, 4  ;;  %v620_v58 = vrot.slane %v618_v29, 7  ;;  %4748 = vmatprep.subr.bf16.mxu1 %v17179_v57  ;;  %v17180_v29 = vld [vmem:[%s25092_s1 + $0x3e0] ss:$8 sps:$4 sm:$0xff]   ;;  %v316_v57 = vld [vmem:[%s18167_s30 + $0x130] sm:$0x7f] }
  0x78   : > { %25492 = vst [vmem:[#allocation35_spill] sm:$0xff] %v18606_v49  ;;  %4749 = vmatpush2.bf16.msra.mxu1 %v17177_v40  ;;  %v18916_v17 = vld [vmem:[%s18167_s30 + $0x1c0] sm:$0xff] }
  0x79   : > { %4750 = vmatprep.subr.bf16.mxu1 %v17182_v41  ;;  %v624_v38 = vrot.slane %v620_v58, 4  ;;  %v17188_v41 = vld [vmem:[%s25092_s1 + $0x3d4] ss:$8 sps:$4 sm:$0xff]  }
  0x7a   : > { %3341 = vmatpush2.bf16.msra.mxu0 %v17147_v60  ;;  %v629_v60 = vshll.u32 %v18564_v59, 16  ;;  %v17176_v59 = vld [vmem:[%s25092_s1 + $0x2b4] ss:$8 sps:$4 sm:$0xff]  }
  0x7b   : > { %3342 = vmatprep.subr.bf16.mxu0 %v17158_v62  ;;  %v616_v62 = vsel %vm18241_vm8, %v608_v1, %v615_v28  ;;  %v623_v28 = vor.u32 %v621_v51, %v620_v58  ;;  %v17186_v58 = vld [vmem:[%s25092_s1 + $0x3d0] ss:$8 sps:$4 sm:$0xff]   ;;  %v17191_v51 = vld [vmem:[%s25092_s1 + $0x3c4] ss:$8 sps:$4 sm:$0xff]  }
  0x7c   : > { %3019 = vmatmul.mubr.bf16.gmra.mxu0 %v18588_v5  ;;  %v18677_v1 = vcombine.high %v18648_v63, %v616_v62  ;;  %v631_v40 = vor.u32 %v629_v60, %v628_v4  ;;  %4751 = vmatpush2.bf16.msra.mxu1 %v17180_v29  ;;  %v891_v60 = vld [vmem:[%s18167_s30 + $0xd0] sm:$0xff]  ;;  %v637_v29 = vshll.u32 %v18642_v61, 16  ;;  %v17183_v61 = vld [vmem:[%s25092_s1 + $0x2a0] ss:$8 sps:$4 sm:$0xff]  }
  0x7d   : > { %3212 = vmatmul.mubr.bf16.gmra.mxu1 %v18591_v7  ;;  %3028 = vmatprep.mubr.bf16.mxu0 %v18603_v50  ;;  %v18705_v4 = vsel %vm18253_vm9, %v623_v28, 0  ;;  %v17189_v28 = vld [vmem:[%s25092_s1 + $0x3c0] ss:$8 sps:$4 sm:$0xff]  }
  0x7e   : > { %3221 = vmatprep.mubr.bf16.mxu1 %v18606_v49  ;;  %3343 = vmatpush2.bf16.msra.mxu0 %v17156_v23  ;;  %v18665_v23 = vpack.c.bf16 %v887_v42, %v18397_v52  ;;  %25500 = vst [vmem:[#allocation41_spill] sm:$0xff] %v18677_v1  ;;  %v642_v52 = vshrl.u32 %v18650_v0, 16  ;;  %v317_v42 = vld [vmem:[%s18167_s30 + $0x138] sm:$0x7f]  ;;  %25501 = vst [vmem:[#allocation42_spill] sm:$0xff] %v18705_v4  ;;  %v632_v18 = vsel %vm18241_vm8, %v624_v38, %v631_v40  ;;  %v18737_v40 = vld [vmem:[%s18167_s30 + $0x148] sm:$0xff] }
  0x7f   : > { %3344 = vmatprep.subr.bf16.mxu0 %v17167_v33  ;;  %v18671_v33 = vld [vmem:[%s18167_s30 + $0x120] sm:$0xff]  ;;  %v18716_v34 = vpack.c.bf16 %v317_v42, %v316_v57  ;;  %4752 = vmatprep.subr.bf16.mxu1 %v17188_v41  ;;  %v17194_v38 = vld [vmem:[%s25092_s1 + $0x294] ss:$8 sps:$4 sm:$0xff]   ;;  %v18728_v0 = vcombine.low %v18648_v63, %v616_v62 }
  0x80   : > { %25498 = vst [vmem:[#allocation39_spill] sm:$0xff] %v18665_v23  ;;  %v18711_v56 = vpack.c.bf16 %v18674_v35, %v18671_v33  ;;  %v644_v30 = vrot.slane %v642_v52, 7  ;;  %4753 = vmatpush2.bf16.msra.mxu1 %v17186_v58  ;;  %v18734_v57 = vld [vmem:[%s18167_s30 + $0x140] sm:$0xff]  ;;  %v320_v52 = vld [vmem:[%s18167_s30 + $0x150] sm:$0x7f] }
  0x81   : > { %25502 = vst [vmem:[#allocation43_spill] sm:$0xff] %v18728_v0  ;;  %4754 = vmatprep.subr.bf16.mxu1 %v17191_v51  ;;  %v321_v62 = vld [vmem:[%s18167_s30 + $0x158] sm:$0x7f]  ;;  %v658_v51 = vshrl.u32 %v18716_v34, 16  ;;  %v661_v49 = vshll.u32 %v18716_v34, 16 }
  0x82   : > { %3345 = vmatpush2.bf16.msra.mxu0 %v17165_v2  ;;  %v896_v2 = vld [vmem:[%s18167_s30 + $0xf8] sm:$0xff]  ;;  %v650_v42 = vshrl.u32 %v18711_v56, 16  ;;  %v16804_v63 = vpack.c.bf16 %v321_v62, %v320_v52  ;;  %v17198_v52 = vld [vmem:[%s25092_s1 + $0x3a0] ss:$8 sps:$4 sm:$0xff]  }
  0x83   : > { %3346 = vmatprep.subr.bf16.mxu0 %v17176_v59  ;;  %v636_v59 = vrot.slane %v634_v55, 7  ;;  %v18731_v55 = vpack.c.bf16 %v891_v60, %v18463_v36  ;;  %v18744_v41 = vpack.c.bf16 %v896_v2, %v18525_v22  ;;  %v17192_v36 = vld [vmem:[%s25092_s1 + $0x290] ss:$8 sps:$4 sm:$0xff]   ;;  %v647_v60 = vor.u32 %v645_v6, %v644_v30  ;;  %v17197_v22 = vld [vmem:[%s25092_s1 + $0x3b4] ss:$8 sps:$4 sm:$0xff]  }
  0x84   : > { %3029 = vmatmul.mubr.bf16.gmra.mxu0 %v18662_v32  ;;  %4755 = vmatpush2.bf16.msra.mxu1 %v17189_v28  ;;  %v17195_v2 = vld [vmem:[%s25092_s1 + $0x3b0] ss:$8 sps:$4 sm:$0xff]   ;;  %v17200_v30 = vld [vmem:[%s25092_s1 + $0x3a4] ss:$8 sps:$4 sm:$0xff]   ;;  %v653_v28 = vshll.u32 %v18711_v56, 16 }
  0x85   : > { %3222 = vmatmul.mubr.bf16.gmra.mxu1 %v18665_v23  ;;  %3038 = vmatprep.mubr.bf16.mxu0 %v18677_v1  ;;  %25503 = vst [vmem:[#allocation44_spill] sm:$0xff] %v18731_v55  ;;  %25505 = vst [vmem:[#allocation46_spill] sm:$0xff] %v18744_v41  ;;  %v640_v58 = vrot.slane %v636_v59, 4  ;;  %v895_v6 = vld [vmem:[%s18167_s30 + $0xf0] sm:$0xff]  ;;  %v660_v23 = vrot.slane %v658_v51, 7  ;;  %v674_v51 = vshrl.u32 %v16804_v63, 16 }
  0x86   : > { %3231 = vmatprep.mubr.bf16.mxu1 %v18668_v14  ;;  %3347 = vmatpush2.bf16.msra.mxu0 %v17174_v37  ;;  %v18741_v37 = vcombine.high %v18705_v4, %v632_v18  ;;  %v17201_v56 = vld [vmem:[%s25092_s1 + $0x280] ss:$8 sps:$4 sm:$0xff]   ;;  %v17212_v34 = vld [vmem:[%s25092_s1 + $0x474] ss:$8 sps:$4 sm:$0xff]   ;;  %v18793_v62 = vpack.c.bf16 %v895_v6, %v18516_v13 }
  0x87   : > { %3348 = vmatprep.subr.bf16.mxu0 %v17185_v43  ;;  %v639_v43 = vor.u32 %v637_v29, %v636_v59  ;;  %v17203_v29 = vld [vmem:[%s25092_s1 + $0x284] ss:$8 sps:$4 sm:$0xff]   ;;  %v900_v59 = vld [vmem:[%s18167_s30 + $0x118] sm:$0xff]  ;;  %4756 = vmatprep.subr.bf16.mxu1 %v17197_v22  ;;  %v324_v13 = vld [vmem:[%s18167_s30 + $0x170] sm:$0x7f] }
  0x88   : > { %25504 = vst [vmem:[#allocation45_spill] sm:$0xff] %v18741_v37  ;;  %4757 = vmatpush2.bf16.msra.mxu1 %v17195_v2  ;;  %25508 = vst [vmem:[#allocation49_spill] sm:$0xff] %v18793_v62  ;;  %v18802_v22 = vld [vmem:[%s18167_s30 + $0x160] sm:$0xff]  ;;  %v18805_v2 = vld [vmem:[%s18167_s30 + $0x168] sm:$0xff] }
  0x89   : > { %v18777_v14 = vsel %vm18253_vm9, %v639_v43, 0  ;;  %4758 = vmatprep.subr.bf16.mxu1 %v17200_v30  ;;  %v325_v6 = vld [vmem:[%s18167_s30 + $0x178] sm:$0x7f] }
  0x8a   : > { %3349 = vmatpush2.bf16.msra.mxu0 %v17183_v61  ;;  %v652_v61 = vrot.slane %v650_v42, 7  ;;  %25506 = vst [vmem:[#allocation47_spill] sm:$0xff] %v18777_v14  ;;  %v18790_v42 = vcombine.low %v18705_v4, %v632_v18  ;;  %v17204_v30 = vld [vmem:[%s25092_s1 + $0x390] ss:$8 sps:$4 sm:$0xff]  }
  0x8b   : > { %3350 = vmatprep.subr.bf16.mxu0 %v17194_v38  ;;  %v16803_v38 = vpack.c.bf16 %v18737_v40, %v18734_v57 }
  0x8c   : > { %3039 = vmatmul.mubr.bf16.gmra.mxu0 %v18728_v0  ;;  %25507 = vst [vmem:[#allocation48_spill] sm:$0xff] %v18790_v42  ;;  %v655_v18 = vor.u32 %v653_v28, %v652_v61  ;;  %4759 = vmatpush2.bf16.msra.mxu1 %v17198_v52  ;;  %v676_v28 = vrot.slane %v674_v51, 7  ;;  %v16805_v52 = vpack.c.bf16 %v18805_v2, %v18802_v22 }
  0x8d   : > { %3232 = vmatmul.mubr.bf16.gmra.mxu1 %v18731_v55  ;;  %3048 = vmatprep.mubr.bf16.mxu0 %v18741_v37  ;;  %v648_v55 = vsel %vm18241_vm8, %v640_v58, %v647_v60  ;;  %v656_v58 = vrot.slane %v652_v61, 4  ;;  %v666_v60 = vshrl.u32 %v16803_v38, 16 }
  0x8e   : > { %3241 = vmatprep.mubr.bf16.mxu1 %v18744_v41  ;;  %3351 = vmatpush2.bf16.msra.mxu0 %v17192_v36  ;;  %v18796_v36 = vpack.c.bf16 %v900_v59, %v18597_v21  ;;  %v18799_v43 = vcombine.high %v18777_v14, %v648_v55  ;;  %v17206_v21 = vld [vmem:[%s25092_s1 + $0x394] ss:$8 sps:$4 sm:$0xff]   ;;  %v18830_v4 = vsel %vm18253_vm9, %v655_v18, 0  ;;  %v16806_v41 = vpack.c.bf16 %v325_v6, %v324_v13 }
  0x8f   : > { %3352 = vmatprep.subr.bf16.mxu0 %v17203_v29  ;;  %v663_v29 = vor.u32 %v661_v49, %v660_v23  ;;  %v17209_v49 = vld [vmem:[%s25092_s1 + $0x384] ss:$8 sps:$4 sm:$0xff]   ;;  %v899_v23 = vld [vmem:[%s18167_s30 + $0x110] sm:$0xff]  ;;  %v904_v59 = vld [vmem:[%s18167_s30 + $0x138] sm:$0xff]  ;;  %v668_v61 = vrot.slane %v666_v60, 7  ;;  %25511 = vst [vmem:[#allocation52_spill] sm:$0xff] %v18830_v4  ;;  %4760 = vmatprep.subr.bf16.mxu1 %v17206_v21  ;;  %v18836_v60 = vcombine.low %v18777_v14, %v648_v55 }
  0x90   : > { %25509 = vst [vmem:[#allocation50_spill] sm:$0xff] %v18796_v36  ;;  %25510 = vst [vmem:[#allocation51_spill] sm:$0xff] %v18799_v43  ;;  %4761 = vmatpush2.bf16.msra.mxu1 %v17204_v30  ;;  %v18842_v51 = vpack.c.bf16 %v904_v59, %v18674_v35  ;;  %v682_v13 = vshrl.u32 %v16805_v52, 16  ;;  %v690_v21 = vshrl.u32 %v16806_v41, 16  ;;  %v18848_v30 = vld [vmem:[%s18167_s30 + $0x180] sm:$0xff]  ;;  %v18851_v55 = vld [vmem:[%s18167_s30 + $0x188] sm:$0xff] }
  0x91   : > { %25512 = vst [vmem:[#allocation53_spill] sm:$0xff] %v18836_v60  ;;  %4762 = vmatprep.subr.bf16.mxu1 %v17209_v49  ;;  %v672_v18 = vrot.slane %v668_v61, 4  ;;  %v903_v35 = vld [vmem:[%s18167_s30 + $0x130] sm:$0xff]  ;;  %v685_v59 = vshll.u32 %v16805_v52, 16  ;;  %v693_v14 = vshll.u32 %v16806_v41, 16 }
  0x92   : > { %3353 = vmatpush2.bf16.msra.mxu0 %v17201_v56  ;;  %v677_v56 = vshll.u32 %v16804_v63, 16  ;;  %v17207_v63 = vld [vmem:[%s25092_s1 + $0x380] ss:$8 sps:$4 sm:$0xff]   ;;  %25514 = vst [vmem:[#allocation55_spill] sm:$0xff] %v18842_v51  ;;  %v684_v49 = vrot.slane %v682_v13, 7 }
  0x93   : > { %4925 = vmatprep.subr.bf16.mxu0 %v17212_v34  ;;  %v664_v34 = vsel %vm18241_vm8, %v656_v58, %v663_v29  ;;  %v18839_v58 = vpack.c.bf16 %v899_v23, %v18594_v20  ;;  %v328_v20 = vld [vmem:[%s18167_s30 + $0x190] sm:$0x7f]  ;;  %v329_v23 = vld [vmem:[%s18167_s30 + $0x198] sm:$0x7f] }
  0x94   : > { %3049 = vmatmul.mubr.bf16.gmra.mxu0 %v18790_v42  ;;  %v679_v29 = vor.u32 %v677_v56, %v676_v28  ;;  %4763 = vmatpush2.bf16.msra.mxu1 %v17207_v63  ;;  %v908_v56 = vld [vmem:[%s18167_s30 + $0x158] sm:$0xff]  ;;  %v692_v63 = vrot.slane %v690_v21, 7  ;;  %v687_v13 = vor.u32 %v685_v59, %v684_v49  ;;  %v688_v21 = vrot.slane %v684_v49, 4 }
  0x95   : > { %3242 = vmatmul.mubr.bf16.gmra.mxu1 %v18793_v62  ;;  %3058 = vmatprep.mubr.bf16.mxu0 %v18799_v43  ;;  %v669_v62 = vshll.u32 %v16803_v38, 16  ;;  %25513 = vst [vmem:[#allocation54_spill] sm:$0xff] %v18839_v58  ;;  %v18845_v38 = vcombine.high %v18830_v4, %v664_v34 }
  0x96   : > { %3251 = vmatprep.mubr.bf16.mxu1 %v18796_v36  ;;  %v18882_v36 = vld [vmem:[%s18167_s30 + $0x1a0] sm:$0xff]  ;;  %v695_v41 = vor.u32 %v693_v14, %v692_v63  ;;  %v912_v63 = vld [vmem:[%s18167_s30 + $0x178] sm:$0xff] }
  0x97   : > { %25515 = vst [vmem:[#allocation56_spill] sm:$0xff] %v18845_v38  ;;  %v671_v6 = vor.u32 %v669_v62, %v668_v61  ;;  %v680_v62 = vsel %vm18241_vm8, %v672_v18, %v679_v29  ;;  %v16807_v61 = vpack.c.bf16 %v18851_v55, %v18848_v30  ;;  %v18873_v18 = vpack.c.bf16 %v903_v35, %v18671_v33  ;;  %v333_v33 = vld [vmem:[%s18167_s30 + $0x1b8] sm:$0x7f] }
  0x98   : > { %v18879_v29 = vpack.c.bf16 %v908_v56, %v18737_v40  ;;  %v907_v40 = vld [vmem:[%s18167_s30 + $0x150] sm:$0xff]  ;;  %v18896_v35 = vsel %vm18253_vm9, %v687_v13, 0  ;;  %v696_v56 = vsel %vm18241_vm8, %v688_v21, %v695_v41 }
  0x99   : > { %v18866_v28 = vsel %vm18253_vm9, %v671_v6, 0  ;;  %25518 = vst [vmem:[#allocation59_spill] sm:$0xff] %v18873_v18  ;;  %v698_v6 = vshrl.u32 %v16807_v61, 16  ;;  %25521 = vst [vmem:[#allocation62_spill] sm:$0xff] %v18896_v35  ;;  %v701_v49 = vshll.u32 %v16807_v61, 16  ;;  %v18907_v13 = vpack.c.bf16 %v907_v40, %v18734_v57 }
  0x9a   : > { %25516 = vst [vmem:[#allocation57_spill] sm:$0xff] %v18866_v28  ;;  %v18876_v52 = vcombine.high %v18866_v28, %v680_v62  ;;  %25520 = vst [vmem:[#allocation61_spill] sm:$0xff] %v18879_v29  ;;  %v18904_v7 = vcombine.low %v18866_v28, %v680_v62  ;;  %v18910_v61 = vcombine.high %v18896_v35, %v696_v56  ;;  %v337_v40 = vld [vmem:[%s18167_s30 + $0x1d8] sm:$0x7f] }
  0x9b   : > { %v700_v14 = vrot.slane %v698_v6, 7  ;;  %25523 = vst [vmem:[#allocation64_spill] sm:$0xff] %v18907_v13  ;;  %v18913_v6 = vpack.c.bf16 %v912_v63, %v18805_v2  ;;  %v911_v2 = vld [vmem:[%s18167_s30 + $0x170] sm:$0xff] }
  0x9c   : > { %3059 = vmatmul.mubr.bf16.gmra.mxu0 %v18836_v60  ;;  %25519 = vst [vmem:[#allocation60_spill] sm:$0xff] %v18876_v52  ;;  %25522 = vst [vmem:[#allocation63_spill] sm:$0xff] %v18904_v7 }
  0x9d   : > { %3252 = vmatmul.mubr.bf16.gmra.mxu1 %v18839_v58  ;;  %3068 = vmatprep.mubr.bf16.mxu0 %v18845_v38  ;;  %v18870_v58 = vcombine.low %v18830_v4, %v664_v34  ;;  %v18885_v34 = vld [vmem:[%s18167_s30 + $0x1a8] sm:$0xff]  ;;  %25524 = vst [vmem:[#allocation65_spill] sm:$0xff] %v18910_v61  ;;  %25525 = vst [vmem:[#allocation66_spill] sm:$0xff] %v18913_v6  ;;  %v703_v21 = vor.u32 %v701_v49, %v700_v14  ;;  %v704_v62 = vrot.slane %v700_v14, 4 }
  0x9e   : > { %3261 = vmatprep.mubr.bf16.mxu1 %v18842_v51  ;;  %v16808_v51 = vpack.c.bf16 %v329_v23, %v328_v20  ;;  %v332_v23 = vld [vmem:[%s18167_s30 + $0x1b0] sm:$0x7f]  ;;  %v16809_v59 = vpack.c.bf16 %v18885_v34, %v18882_v36 }
  0x9f   : > { %25517 = vst [vmem:[#allocation58_spill] sm:$0xff] %v18870_v58  ;;  %v18933_v14 = vsel %vm18253_vm9, %v703_v21, 0  ;;  %v18944_v21 = vpack.c.bf16 %v911_v2, %v18802_v22  ;;  %v915_v22 = vld [vmem:[%s18167_s30 + $0x190] sm:$0xff] }
  0xa0   : > { %v706_v20 = vshrl.u32 %v16808_v51, 16  ;;  %v714_v41 = vshrl.u32 %v16809_v59, 16  ;;  %25526 = vst [vmem:[#allocation67_spill] sm:$0xff] %v18933_v14 }
  0xa1   : > { %25528 = vst [vmem:[#allocation69_spill] sm:$0xff] %v18944_v21 }
  0xa2   : > { %v708_v4 = vrot.slane %v706_v20, 7 }
  0xa4   : > { %3069 = vmatmul.mubr.bf16.gmra.mxu0 %v18870_v58 }
  0xa5   : > { %3262 = vmatmul.mubr.bf16.gmra.mxu1 %v18873_v18  ;;  %3078 = vmatprep.mubr.bf16.mxu0 %v18876_v52  ;;  %v16810_v18 = vpack.c.bf16 %v333_v33, %v332_v23  ;;  %v18922_v23 = vld [vmem:[%s18167_s30 + $0x1c8] sm:$0xff]  ;;  %v336_v33 = vld [vmem:[%s18167_s30 + $0x1d0] sm:$0x7f] }
  0xa6   : > { %3271 = vmatprep.mubr.bf16.mxu1 %v18879_v29  ;;  %v709_v29 = vshll.u32 %v16808_v51, 16  ;;  %v17239_v51 = vld [vmem:[%s25092_s1 + $0x574] ss:$8 sps:$4 sm:$0xff]   ;;  %v16811_v49 = vpack.c.bf16 %v18922_v23, %v18916_v17  ;;  %v16812_v9 = vpack.c.bf16 %v337_v40, %v336_v33 }
  0xa7   : > { %v722_v57 = vshrl.u32 %v16810_v18, 16  ;;  %5118 = vmatprep.subr.bf16.mxu1 %v17239_v51  ;;  %v916_v51 = vld [vmem:[%s18167_s30 + $0x198] sm:$0xff] }
  0xa8   : > { %v711_v20 = vor.u32 %v709_v29, %v708_v4  ;;  %v716_v4 = vrot.slane %v714_v41, 7  ;;  %v717_v29 = vshll.u32 %v16809_v59, 16  ;;  %v18950_v41 = vpack.c.bf16 %v916_v51, %v18851_v55  ;;  %v1155_v51 = vld [vmem:[%s18167_s30 + $0x10] sm:$0xff] }
  0xa9   : > { %v724_v28 = vrot.slane %v722_v57, 7  ;;  %v733_v40 = vshll.u32 %v16811_v49, 16 }
  0xaa   : > { %v712_v63 = vsel %vm18241_vm8, %v704_v62, %v711_v20  ;;  %25530 = vst [vmem:[#allocation71_spill] sm:$0xff] %v18950_v41  ;;  %v719_v62 = vor.u32 %v717_v29, %v716_v4  ;;  %v730_v20 = vshrl.u32 %v16811_v49, 16  ;;  %v720_v31 = vrot.slane %v716_v4, 4  ;;  %v1154_v29 = vld [vmem:[%s18167_s30 + $0x8] sm:$0xfe] }
  0xab   : > { %v18947_v59 = vcombine.high %v18933_v14, %v712_v63  ;;  %v741_v4 = vshll.u32 %v16812_v9, 16 }
  0xac   : > { %3079 = vmatmul.mubr.bf16.gmra.mxu0 %v18904_v7  ;;  %v18960_v55 = vsel %vm18253_vm9, %v719_v62, 0  ;;  %v732_v33 = vrot.slane %v730_v20, 7  ;;  %v18972_v62 = vpack.c.bf16 %v915_v22, %v18848_v30  ;;  %v924_v30 = vld [vmem:[%s18167_s30 + $0x1d8] sm:$0xff] }
  0xad   : > { %3272 = vmatmul.mubr.bf16.gmra.mxu1 %v18907_v13  ;;  %3088 = vmatprep.mubr.bf16.mxu0 %v18910_v61  ;;  %v725_v13 = vshll.u32 %v16810_v18, 16  ;;  %25529 = vst [vmem:[#allocation70_spill] sm:$0xff] %v18947_v59  ;;  %v738_v18 = vshrl.u32 %v16812_v9, 16  ;;  %25531 = vst [vmem:[#allocation72_spill] sm:$0xff] %v18960_v55 }
  0xae   : > { %3281 = vmatprep.mubr.bf16.mxu1 %v18913_v6  ;;  %v18941_v6 = vcombine.low %v18896_v35, %v696_v56  ;;  %v920_v56 = vld [vmem:[%s18167_s30 + $0x1b8] sm:$0xff]  ;;  %25533 = vst [vmem:[#allocation74_spill] sm:$0xff] %v18972_v62 }
  0xaf   : > { %v727_v57 = vor.u32 %v725_v13, %v724_v28  ;;  %v1153_v28 = vld [vmem:[%s18167_s30] sm:$0xfe]  ;;  %v740_v2 = vrot.slane %v738_v18, 7  ;;  %v1156_v35 = vld [vmem:[%s18167_s30 + $0x18] sm:$0xff]  ;;  %v18978_v20 = vpack.c.bf16 %v920_v56, %v18885_v34  ;;  %v1158_v56 = vld [vmem:[%s18167_s30 + $0x28] sm:$0xfe] }
  0xb0   : > { %25527 = vst [vmem:[#allocation68_spill] sm:$0xff] %v18941_v6  ;;  %v16847_v9 = vpack.c.bf16 %v1154_v29, %v1153_v28 }
  0xb1   : > { %v728_v13 = vsel %vm18241_vm8, %v720_v31, %v727_v57  ;;  %25535 = vst [vmem:[#allocation76_spill] sm:$0xff] %v18978_v20  ;;  %v735_v31 = vor.u32 %v733_v40, %v732_v33  ;;  %v736_v57 = vrot.slane %v732_v33, 4  ;;  %v743_v18 = vor.u32 %v741_v4, %v740_v2  ;;  %v1159_v33 = vld [vmem:[%s18167_s30 + $0x30] sm:$0xff]  ;;  %v1160_v4 = vld [vmem:[%s18167_s30 + $0x38] sm:$0xff] }
  0xb2   : > { %v18975_v49 = vcombine.high %v18960_v55, %v728_v13  ;;  %v1381_v22 = vshrl.u32 %v16847_v9, 16  ;;  %v1384_v40 = vshll.u32 %v16847_v9, 16  ;;  %v18997_v29 = vcombine.low %v18960_v55, %v728_v13  ;;  %v1161_v13 = vld [vmem:[%s18167_s30 + $0x40] sm:$0xfe] }
  0xb3   : > { %v18989_v34 = vsel %vm18253_vm9, %v735_v31, 0 }
  0xb4   : > { %3089 = vmatmul.mubr.bf16.gmra.mxu0 %v18941_v6  ;;  %25534 = vst [vmem:[#allocation75_spill] sm:$0xff] %v18975_v49  ;;  %25536 = vst [vmem:[#allocation77_spill] sm:$0xff] %v18989_v34  ;;  %v1383_v9 = vrot.slane %v1381_v22, 4  ;;  %v1163_v22 = vld [vmem:[%s18167_s30 + $0x50] sm:$0xff] }
  0xb5   : > { %3282 = vmatmul.mubr.bf16.gmra.mxu1 %v18944_v21  ;;  %3098 = vmatprep.mubr.bf16.mxu0 %v18947_v59  ;;  %v16848_v21 = vpack.c.bf16 %v1156_v35, %v1155_v51  ;;  %v744_v35 = vsel %vm18241_vm8, %v736_v57, %v743_v18  ;;  %25537 = vst [vmem:[#allocation78_spill] sm:$0xff] %v18997_v29 }
  0xb6   : > { %3291 = vmatprep.mubr.bf16.mxu1 %v18950_v41  ;;  %v18969_v41 = vcombine.low %v18933_v14, %v712_v63  ;;  %v1157_v63 = vld [vmem:[%s18167_s30 + $0x20] sm:$0xfe]  ;;  %v19000_v51 = vpack.c.bf16 %v919_v26, %v18882_v36  ;;  %v19003_v14 = vcombine.high %v18989_v34, %v744_v35  ;;  %v16850_v57 = vpack.c.bf16 %v1160_v4, %v1159_v33  ;;  %v923_v26 = vld [vmem:[%s18167_s30 + $0x1d0] sm:$0xff]  ;;  %v1164_v33 = vld [vmem:[%s18167_s30 + $0x58] sm:$0xff] }
  0xb7   : > { %v1390_v28 = vshll.u32 %v16848_v21, 16  ;;  %v1394_v2 = vshrl.u32 %v16848_v21, 16  ;;  %v16849_v31 = vpack.c.bf16 %v1158_v56, %v1157_v63  ;;  %v1386_v21 = vrot.slane %v1384_v40, 5  ;;  %v1162_v56 = vld [vmem:[%s18167_s30 + $0x48] sm:$0xfe] }
  0xb8   : > { %25532 = vst [vmem:[#allocation73_spill] sm:$0xff] %v18969_v41  ;;  %25538 = vst [vmem:[#allocation79_spill] sm:$0xff] %v19000_v51  ;;  %v16851_v4 = vpack.c.bf16 %v1162_v56, %v1161_v13  ;;  %v19021_v55 = vcombine.low %v18989_v34, %v744_v35  ;;  %v16852_v54 = vpack.c.bf16 %v1164_v33, %v1163_v22  ;;  %v1165_v56 = vld [vmem:[%s18167_s30 + $0x60] sm:$0xfe]  ;;  %v1167_v22 = vld [vmem:[%s18167_s30 + $0x70] sm:$0xff] }
  0xb9   : > { %25539 = vst [vmem:[#allocation80_spill] sm:$0xff] %v19003_v14  ;;  %v1392_v18 = vrot.slane %v1390_v28, 5  ;;  %v1400_v36 = vshrl.u32 %v16849_v31, 16  ;;  %v1403_v63 = vshll.u32 %v16849_v31, 16  ;;  %v1387_v40 = vor.u32 %v1386_v21, %v1383_v9 }
  0xba   : > { %25542 = vst [vmem:[#allocation83_spill] sm:$0xff] %v19021_v55  ;;  %v1422_v9 = vshll.u32 %v16851_v4, 16  ;;  %v1428_v21 = vshll.u32 %v16852_v54, 16 }
  0xbb   : > { %v1402_v31 = vrot.slane %v1400_v36, 4 }
  0xbc   : > { %3099 = vmatmul.mubr.bf16.gmra.mxu0 %v18969_v41 }
  0xbd   : > { %3292 = vmatmul.mubr.bf16.gmra.mxu1 %v18972_v62  ;;  %3108 = vmatprep.mubr.bf16.mxu0 %v18975_v49  ;;  %v1396_v62 = vrot.slane %v1394_v2, 4  ;;  %v19018_v2 = vpack.c.bf16 %v923_v26, %v18916_v17  ;;  %v1419_v17 = vshrl.u32 %v16851_v4, 16  ;;  %v1432_v26 = vshrl.u32 %v16852_v54, 16  ;;  %v17215_v4 = vld [vmem:[%s25092_s1 + $0x464] ss:$8 sps:$4 sm:$0xff]  }
  0xbe   : > { %3301 = vmatprep.mubr.bf16.mxu1 %v18978_v20  ;;  %v19006_v20 = vpack.c.bf16 %v924_v30, %v18922_v23  ;;  %v1409_v23 = vshll.u32 %v16850_v57, 16  ;;  %v1413_v30 = vshrl.u32 %v16850_v57, 16 }
  0xbf   : > { %v1397_v28 = vor.u32 %v1396_v62, %v1392_v18  ;;  %25541 = vst [vmem:[#allocation82_spill] sm:$0xff] %v19018_v2  ;;  %v25543_v62 = vmov 0 }
  0xc0   : > { %25540 = vst [vmem:[#allocation81_spill] sm:$0xff] %v19006_v20  ;;  %v1411_v48 = vrot.slane %v1409_v23, 5  ;;  %v1415_v12 = vrot.slane %v1413_v30, 4  ;;  %v25544_v62 = vsel %vm19024_vm0, 4294967295, %v25543_v62  ;;  %v1166_v23 = vld [vmem:[%s18167_s30 + $0x68] sm:$0xfe] }
  0xc1   : > { %v1398_v57 = vrot.slane %v1397_v28, 4  ;;  %25545 = vst [vmem:[#allocation84_spill] sm:$0xff] %v25544_v62  ;;  %v1421_v30 = vrot.slane %v1419_v17, 4  ;;  %v1430_v28 = vrot.slane %v1428_v21, 5  ;;  %v17213_v17 = vld [vmem:[%s25092_s1 + $0x460] ss:$8 sps:$4 sm:$0xff]  }
  0xc2   : > { %v1416_v13 = vor.u32 %v1415_v12, %v1411_v48  ;;  %v1169_v21 = vld [vmem:[%s18167_s30 + $0x80] sm:$0xfe] }
  0xc4   : > { %3109 = vmatmul.mubr.bf16.gmra.mxu0 %v18997_v29  ;;  %v1417_v54 = vrot.slane %v1416_v13, 4  ;;  %v17242_v13 = vld [vmem:[%s25092_s1 + $0x564] ss:$8 sps:$4 sm:$0xff]  }
  0xc5   : > { %3302 = vmatmul.mubr.bf16.gmra.mxu1 %v19000_v51  ;;  %3118 = vmatprep.mubr.bf16.mxu0 %v19003_v14  ;;  %v1405_v51 = vrot.slane %v1403_v63, 5  ;;  %v19036_v63 = vsel %vm18622_vm14, %v1398_v57, 0  ;;  %v17237_v57 = vld [vmem:[%s25092_s1 + $0x570] ss:$8 sps:$4 sm:$0xff]  }
  0xc6   : > { %3311 = vmatprep.mubr.bf16.mxu1 %v19006_v20  ;;  %v1388_v20 = vrot.slane %v1387_v40, 4  ;;  %25546 = vst [vmem:[#allocation85_spill] sm:$0xff] %v19036_v63  ;;  %v1424_v40 = vrot.slane %v1422_v9, 5  ;;  %v25706_v39 = vld [vmem:[#allocation82_spill] sm:$0xff] }
  0xc7   : > { %v1406_v35 = vor.u32 %v1405_v51, %v1402_v31  ;;  %v1168_v51 = vld [vmem:[%s18167_s30 + $0x78] sm:$0xff] }
  0xc8   : > { %v1393_v36 = vsel %vm19024_vm0, %v1388_v20, %v1392_v18  ;;  %v1434_v20 = vrot.slane %v1432_v26, 4  ;;  %v16853_v18 = vpack.c.bf16 %v1166_v23, %v1165_v56  ;;  %v16854_v31 = vpack.c.bf16 %v1168_v51, %v1167_v22  ;;  %v1170_v22 = vld [vmem:[%s18167_s30 + $0x88] sm:$0xfe] }
  0xc9   : > { %v1407_v33 = vrot.slane %v1406_v35, 4  ;;  %v19046_v12 = vcombine.high %v1393_v36, %v19036_v63  ;;  %v1425_v9 = vor.u32 %v1424_v40, %v1421_v30  ;;  %v1172_v40 = vld [vmem:[%s18167_s30 + $0x98] sm:$0xff] }
  0xca   : > { %v1435_v26 = vor.u32 %v1434_v20, %v1430_v28  ;;  %v1438_v56 = vshrl.u32 %v16853_v18, 16  ;;  %v1441_v23 = vshll.u32 %v16853_v18, 16  ;;  %v1447_v30 = vshll.u32 %v16854_v31, 16  ;;  %v17216_v18 = vld [vmem:[%s25092_s1 + $0x450] ss:$8 sps:$4 sm:$0xff]  }
  0xcb   : > { %v1412_v35 = vsel %vm19024_vm0, %v1407_v33, %v1411_v48  ;;  %v17218_v48 = vld [vmem:[%s25092_s1 + $0x454] ss:$8 sps:$4 sm:$0xff]   ;;  %v1451_v51 = vshrl.u32 %v16854_v31, 16  ;;  %v1426_v31 = vrot.slane %v1425_v9, 4  ;;  %v17219_v9 = vld [vmem:[%s25092_s1 + $0x440] ss:$8 sps:$4 sm:$0xff]  }
  0xcc   : > { %3119 = vmatmul.mubr.bf16.gmra.mxu0 %v19021_v55  ;;  %v1171_v33 = vld [vmem:[%s18167_s30 + $0x90] sm:$0xff]  ;;  %v1440_v34 = vrot.slane %v1438_v56, 4  ;;  %v1174_v56 = vld [vmem:[%s18167_s30 + $0xa8] sm:$0xfe] }
  0xcd   : > { %3312 = vmatmul.mubr.bf16.gmra.mxu1 %v19018_v2  ;;  %3354 = vmatprep.mubr.bf16.mxu0 %v18026_v3  ;;  %v19089_v3 = vrot.slane %v1447_v30, 5 }
  0xce   : > { %4764 = vmatprep.mubr.bf16.mxu1 %v18291_v46  ;;  %v17210_v46 = vld [vmem:[%s25092_s1 + $0x470] ss:$8 sps:$4 sm:$0xff]  }
  0xd4   : > { %3355 = vmatmul.mubr.bf16.vlgmr.msra.gmra.mxu0 %v18285_v44  ;;  %v1443_v44 = vrot.slane %v1441_v23, 5  ;;  %v17251_v23 = vld [vmem:[%s25092_s1 + $0x544] ss:$8 sps:$4 sm:$0xff]  }
  0xd5   : > { %4765 = vmatmul.mubr.bf16.vlgmr.msra.gmra.mxu1 %v18328_v10  ;;  %4926 = vmatpush1.bf16.msra.mxu0 %v17210_v46  ;;  %v19068_v10 = vsel %vm18622_vm14, %v1417_v54, 0  ;;  %v17240_v46 = vld [vmem:[%s25092_s1 + $0x560] ss:$8 sps:$4 sm:$0xff]   ;;  %v19081_v54 = vcombine.low %v1393_v36, %v19036_v63  ;;  %v1453_v36 = vrot.slane %v1451_v51, 4  ;;  %v16856_v63 = vpack.c.bf16 %v1172_v40, %v1171_v33  ;;  %v17224_v51 = vld [vmem:[%s25092_s1 + $0x434] ss:$8 sps:$4 sm:$0xff]  }
  0xd6   : > { %3364 = vmatprep.mubr.bf16.mxu0 %v19046_v12  ;;  %25547 = vst [vmem:[#allocation86_spill] sm:$0xff] %v19068_v10  ;;  %4774 = vmatprep.mubr.bf16.mxu1 %v18343_v15  ;;  %v19084_v20 = vcombine.high %v1412_v35, %v19068_v10  ;;  %v17248_v15 = vld [vmem:[%s25092_s1 + $0x554] ss:$8 sps:$4 sm:$0xff]   ;;  %v1444_v30 = vor.u32 %v1443_v44, %v1440_v34 }
  0xd7   : > { %4927 = vmatprep.subr.bf16.mxu0 %v17215_v4  ;;  %5119 = vmatpush1.bf16.msra.mxu1 %v17237_v57  ;;  %v16855_v4 = vpack.c.bf16 %v1170_v22, %v1169_v21  ;;  %v1436_v57 = vrot.slane %v1435_v26, 4  ;;  %v17221_v21 = vld [vmem:[%s25092_s1 + $0x444] ss:$8 sps:$4 sm:$0xff]   ;;  %v1431_v22 = vsel %vm19024_vm0, %v1426_v31, %v1430_v28  ;;  %v1175_v40 = vld [vmem:[%s18167_s30 + $0xb0] sm:$0xff]  ;;  %v1470_v2 = vshrl.u32 %v16856_v63, 16 }
  0xd8   : > { %25548 = vst [vmem:[#allocation87_spill] sm:$0xff] %v19084_v20  ;;  %5120 = vmatprep.subr.bf16.mxu1 %v17242_v13  ;;  %v1173_v26 = vld [vmem:[%s18167_s30 + $0xa0] sm:$0xfe]  ;;  %v19128_v44 = vcombine.low %v1412_v35, %v19068_v10  ;;  %v1178_v10 = vld [vmem:[%s18167_s30 + $0xc8] sm:$0xfe] }
  0xd9   : > { %4928 = vmatpush1.bf16.msra.mxu0 %v17213_v17  ;;  %v17246_v17 = vld [vmem:[%s25092_s1 + $0x550] ss:$8 sps:$4 sm:$0xff]   ;;  %v1457_v13 = vshrl.u32 %v16855_v4, 16  ;;  %v1460_v33 = vshll.u32 %v16855_v4, 16  ;;  %v17249_v28 = vld [vmem:[%s25092_s1 + $0x540] ss:$8 sps:$4 sm:$0xff]  }
  0xda   : > { %4929 = vmatprep.subr.bf16.mxu0 %v17218_v48  ;;  %v19116_v48 = vsel %vm18622_vm14, %v1436_v57, 0  ;;  %25550 = vst [vmem:[#allocation89_spill] sm:$0xff] %v19128_v44  ;;  %v1445_v4 = vrot.slane %v1444_v30, 4  ;;  %v17227_v35 = vld [vmem:[%s25092_s1 + $0x424] ss:$8 sps:$4 sm:$0xff]   ;;  %v16857_v57 = vpack.c.bf16 %v1174_v56, %v1173_v26 }
  0xdb   : > { %5121 = vmatpush1.bf16.msra.mxu1 %v17240_v46  ;;  %25549 = vst [vmem:[#allocation88_spill] sm:$0xff] %v19116_v48  ;;  %v1454_v46 = vor.u32 %v1453_v36, %v19089_v3  ;;  %v19131_v34 = vcombine.high %v1431_v22, %v19116_v48  ;;  %v1462_v31 = vrot.slane %v1460_v33, 5  ;;  %v17260_v30 = vld [vmem:[%s25092_s1 + $0x524] ss:$8 sps:$4 sm:$0xff]   ;;  %v17230_v56 = vld [vmem:[%s25092_s1 + $0x414] ss:$8 sps:$4 sm:$0xff]  }
  0xdc   : > { %3365 = vmatmul.mubr.bf16.gmra.mxu0 %v19081_v54  ;;  %5122 = vmatprep.subr.bf16.mxu1 %v17248_v15  ;;  %v17257_v15 = vld [vmem:[%s25092_s1 + $0x534] ss:$8 sps:$4 sm:$0xff]   ;;  %v1177_v33 = vld [vmem:[%s18167_s30 + $0xc0] sm:$0xfe] }
  0xdd   : > { %4775 = vmatmul.mubr.bf16.gmra.mxu1 %v18388_v45  ;;  %3374 = vmatprep.mubr.bf16.mxu0 %v19084_v20  ;;  %v1466_v45 = vshll.u32 %v16856_v63, 16  ;;  %25551 = vst [vmem:[#allocation90_spill] sm:$0xff] %v19131_v34  ;;  %v1459_v63 = vrot.slane %v1457_v13, 4 }
  0xde   : > { %4784 = vmatprep.mubr.bf16.mxu1 %v18400_v53  ;;  %4930 = vmatpush1.bf16.msra.mxu0 %v17216_v18  ;;  %v1176_v53 = vld [vmem:[%s18167_s30 + $0xb8] sm:$0xff] }
  0xdf   : > { %4931 = vmatprep.subr.bf16.mxu0 %v17221_v21  ;;  %5123 = vmatpush1.bf16.msra.mxu1 %v17246_v17  ;;  %v17222_v18 = vld [vmem:[%s25092_s1 + $0x430] ss:$8 sps:$4 sm:$0xff]   ;;  %v16858_v36 = vpack.c.bf16 %v1176_v53, %v1175_v40  ;;  %v1455_v17 = vrot.slane %v1454_v46, 4  ;;  %v1468_v13 = vrot.slane %v1466_v45, 5  ;;  %v17225_v53 = vld [vmem:[%s25092_s1 + $0x420] ss:$8 sps:$4 sm:$0xff]   ;;  %v1463_v45 = vor.u32 %v1462_v31, %v1459_v63 }
  0xe0   : > { %5124 = vmatprep.subr.bf16.mxu1 %v17251_v23  ;;  %v17255_v21 = vld [vmem:[%s25092_s1 + $0x530] ss:$8 sps:$4 sm:$0xff]   ;;  %v1472_v23 = vrot.slane %v1470_v2, 4  ;;  %v1476_v2 = vshrl.u32 %v16857_v57, 16  ;;  %v17258_v46 = vld [vmem:[%s25092_s1 + $0x520] ss:$8 sps:$4 sm:$0xff]  }
  0xe1   : > { %v1485_v26 = vshll.u32 %v16858_v36, 16  ;;  %v1180_v40 = vld [vmem:[%s18167_s30 + $0xd8] sm:$0xff]  ;;  %v19170_v63 = vsel %vm18622_vm14, %v1455_v17, 0 }
  0xe2   : > { %4932 = vmatpush1.bf16.msra.mxu0 %v17219_v9  ;;  %v1479_v9 = vshll.u32 %v16857_v57, 16  ;;  %25552 = vst [vmem:[#allocation91_spill] sm:$0xff] %v19170_v63  ;;  %v1473_v31 = vor.u32 %v1472_v23, %v1468_v13  ;;  %v1489_v57 = vshrl.u32 %v16858_v36, 16 }
  0xe3   : > { %4933 = vmatprep.subr.bf16.mxu0 %v17224_v51  ;;  %5125 = vmatpush1.bf16.msra.mxu1 %v17249_v28  ;;  %v1179_v51 = vld [vmem:[%s18167_s30 + $0xd0] sm:$0xff]  ;;  %v1450_v28 = vsel %vm19024_vm0, %v1445_v4, %v19089_v3 }
  0xe4   : > { %3375 = vmatmul.mubr.bf16.gmra.mxu0 %v19128_v44  ;;  %5126 = vmatprep.subr.bf16.mxu1 %v17257_v15  ;;  %v17266_v3 = vld [vmem:[%s25092_s1 + $0x514] ss:$8 sps:$4 sm:$0xff]   ;;  %v1464_v15 = vrot.slane %v1463_v45, 4  ;;  %v1481_v4 = vrot.slane %v1479_v9, 5  ;;  %v1474_v36 = vrot.slane %v1473_v31, 4  ;;  %v1491_v17 = vrot.slane %v1489_v57, 4 }
  0xe5   : > { %4785 = vmatmul.mubr.bf16.gmra.mxu1 %v18448_v25  ;;  %3384 = vmatprep.mubr.bf16.mxu0 %v19131_v34  ;;  %v17228_v25 = vld [vmem:[%s25092_s1 + $0x410] ss:$8 sps:$4 sm:$0xff]   ;;  %v16859_v34 = vpack.c.bf16 %v1178_v10, %v1177_v33  ;;  %v16860_v23 = vpack.c.bf16 %v1180_v40, %v1179_v51  ;;  %v1181_v33 = vld [vmem:[%s18167_s30 + $0xe0] sm:$0xfe]  ;;  %v1182_v45 = vld [vmem:[%s18167_s30 + $0xe8] sm:$0xfe] }
  0xe6   : > { %4794 = vmatprep.mubr.bf16.mxu1 %v18454_v27  ;;  %4934 = vmatpush1.bf16.msra.mxu0 %v17222_v18  ;;  %v19173_v27 = vcombine.low %v1431_v22, %v19116_v48  ;;  %v19182_v18 = vcombine.high %v1450_v28, %v19170_v63  ;;  %v1478_v22 = vrot.slane %v1476_v2, 4  ;;  %v17264_v10 = vld [vmem:[%s25092_s1 + $0x510] ss:$8 sps:$4 sm:$0xff]   ;;  %v17236_v40 = vld [vmem:[%s25092_s1 + $0x4f4] ss:$8 sps:$4 sm:$0xff]   ;;  %v19216_v57 = vsel %vm18622_vm14, %v1474_v36, 0 }
  0xe7   : > { %4935 = vmatprep.subr.bf16.mxu0 %v17227_v35  ;;  %5127 = vmatpush1.bf16.msra.mxu1 %v17255_v21  ;;  %v17233_v35 = vld [vmem:[%s25092_s1 + $0x404] ss:$8 sps:$4 sm:$0xff]   ;;  %v19190_v21 = vrot.slane %v1485_v26, 5  ;;  %v1183_v2 = vld [vmem:[%s18167_s30 + $0xf0] sm:$0xff]  ;;  %v1184_v9 = vld [vmem:[%s18167_s30 + $0xf8] sm:$0xff]  ;;  %v1495_v31 = vshrl.u32 %v16859_v34, 16  ;;  %v1469_v26 = vsel %vm19024_vm0, %v1464_v15, %v1468_v13  ;;  %v16861_v13 = vpack.c.bf16 %v1182_v45, %v1181_v33 }
  0xe8   : > { %25553 = vst [vmem:[#allocation92_spill] sm:$0xff] %v19173_v27  ;;  %5128 = vmatprep.subr.bf16.mxu1 %v17260_v30  ;;  %25554 = vst [vmem:[#allocation93_spill] sm:$0xff] %v19182_v18  ;;  %v17269_v30 = vld [vmem:[%s25092_s1 + $0x504] ss:$8 sps:$4 sm:$0xff]   ;;  %v1498_v51 = vshll.u32 %v16859_v34, 16  ;;  %v19220_v34 = vcombine.low %v1450_v28, %v19170_v63  ;;  %v16862_v15 = vpack.c.bf16 %v1184_v9, %v1183_v2 }
  0xe9   : > { %25555 = vst [vmem:[#allocation94_spill] sm:$0xff] %v19216_v57  ;;  %v1492_v48 = vor.u32 %v1491_v17, %v19190_v21  ;;  %v17273_v36 = vld [vmem:[%s25092_s1 + $0x5f0] ss:$8 sps:$4 sm:$0xff]   ;;  %v17278_v33 = vld [vmem:[%s25092_s1 + $0x5e4] ss:$8 sps:$4 sm:$0xff]   ;;  %v1514_v9 = vshrl.u32 %v16861_v13, 16 }
  0xea   : > { %4936 = vmatpush1.bf16.msra.mxu0 %v17225_v53  ;;  %v17231_v53 = vld [vmem:[%s25092_s1 + $0x400] ss:$8 sps:$4 sm:$0xff]   ;;  %25556 = vst [vmem:[#allocation95_spill] sm:$0xff] %v19220_v34  ;;  %v1500_v28 = vrot.slane %v1498_v51, 5  ;;  %v1188_v51 = vld [vmem:[%s18167_s30 + $0x118] sm:$0xff] }
  0xeb   : > { %4937 = vmatprep.subr.bf16.mxu0 %v17230_v56  ;;  %5129 = vmatpush1.bf16.msra.mxu1 %v17258_v46  ;;  %v1482_v56 = vor.u32 %v1481_v4, %v1478_v22  ;;  %v17267_v46 = vld [vmem:[%s25092_s1 + $0x500] ss:$8 sps:$4 sm:$0xff]   ;;  %v17234_v22 = vld [vmem:[%s25092_s1 + $0x4f0] ss:$8 sps:$4 sm:$0xff]   ;;  %v1493_v17 = vrot.slane %v1492_v48, 4  ;;  %v1523_v48 = vshll.u32 %v16862_v15, 16 }
  0xec   : > { %3385 = vmatmul.mubr.bf16.gmra.mxu0 %v19173_v27  ;;  %5130 = vmatprep.subr.bf16.mxu1 %v17266_v3  ;;  %v19229_v3 = vcombine.high %v1469_v26, %v19216_v57  ;;  %v1185_v45 = vld [vmem:[%s18167_s30 + $0x100] sm:$0xfe]  ;;  %v1186_v2 = vld [vmem:[%s18167_s30 + $0x108] sm:$0xfe] }
  0xed   : > { %4795 = vmatmul.mubr.bf16.gmra.mxu1 %v18510_v8  ;;  %3394 = vmatprep.mubr.bf16.mxu0 %v19182_v18  ;;  %v1508_v8 = vshrl.u32 %v16860_v23, 16  ;;  %v1483_v4 = vrot.slane %v1482_v56, 4  ;;  %v1187_v56 = vld [vmem:[%s18167_s30 + $0x110] sm:$0xff]  ;;  %v19262_v63 = vsel %vm18622_vm14, %v1493_v17, 0  ;;  %v1190_v17 = vld [vmem:[%s18167_s30 + $0x128] sm:$0xfe] }
  0xee   : > { %4804 = vmatprep.mubr.bf16.mxu1 %v18519_v16  ;;  %4938 = vmatpush1.bf16.msra.mxu0 %v17228_v25  ;;  %v1504_v16 = vshll.u32 %v16860_v23, 16  ;;  %v17275_v25 = vld [vmem:[%s25092_s1 + $0x5f4] ss:$8 sps:$4 sm:$0xff]   ;;  %25557 = vst [vmem:[#allocation96_spill] sm:$0xff] %v19229_v3  ;;  %25558 = vst [vmem:[#allocation97_spill] sm:$0xff] %v19262_v63 }
  0xef   : > { %4939 = vmatprep.subr.bf16.mxu0 %v17233_v35  ;;  %5131 = vmatpush1.bf16.msra.mxu1 %v17264_v10  ;;  %v1497_v35 = vrot.slane %v1495_v31, 4  ;;  %v17245_v10 = vld [vmem:[%s25092_s1 + $0x4e4] ss:$8 sps:$4 sm:$0xff]   ;;  %v1517_v31 = vshll.u32 %v16861_v13, 16  ;;  %v1488_v13 = vsel %vm19024_vm0, %v1483_v4, %v19190_v21  ;;  %v17252_v21 = vld [vmem:[%s25092_s1 + $0x4d0] ss:$8 sps:$4 sm:$0xff]  }
  0xf0   : > { %5132 = vmatprep.subr.bf16.mxu1 %v17269_v30  ;;  %v1506_v23 = vrot.slane %v1504_v16, 5  ;;  %v1510_v30 = vrot.slane %v1508_v8, 4  ;;  %v17243_v8 = vld [vmem:[%s25092_s1 + $0x4e0] ss:$8 sps:$4 sm:$0xff]  }
  0xf1   : > { %v1501_v16 = vor.u32 %v1500_v28, %v1497_v35  ;;  %v1516_v28 = vrot.slane %v1514_v9, 4  ;;  %v1191_v9 = vld [vmem:[%s18167_s30 + $0x130] sm:$0xff] }
  0xf2   : > { %4940 = vmatpush1.bf16.msra.mxu0 %v17231_v53  ;;  %v1527_v53 = vshrl.u32 %v16862_v15, 16  ;;  %v1511_v35 = vor.u32 %v1510_v30, %v1506_v23  ;;  %v19265_v15 = vcombine.low %v1469_v26, %v19216_v57  ;;  %v19276_v26 = vrot.slane %v1523_v48, 5  ;;  %v17263_v30 = vld [vmem:[%s25092_s1 + $0x4c4] ss:$8 sps:$4 sm:$0xff]  }
  0xf3   : > { %4941 = vmatprep.subr.bf16.mxu0 %v17236_v40  ;;  %5133 = vmatpush1.bf16.msra.mxu1 %v17267_v46  ;;  %v17254_v40 = vld [vmem:[%s25092_s1 + $0x4d4] ss:$8 sps:$4 sm:$0xff]   ;;  %v17276_v46 = vld [vmem:[%s25092_s1 + $0x5e0] ss:$8 sps:$4 sm:$0xff]   ;;  %v1502_v4 = vrot.slane %v1501_v16, 4 }
  0xf4   : > { %3395 = vmatmul.mubr.bf16.gmra.mxu0 %v19220_v34  ;;  %5134 = vmatprep.subr.bf16.mxu1 %v17275_v25  ;;  %25559 = vst [vmem:[#allocation98_spill] sm:$0xff] %v19265_v15  ;;  %v19274_v25 = vcombine.high %v1488_v13, %v19262_v63  ;;  %v17287_v48 = vld [vmem:[%s25092_s1 + $0x5c4] ss:$8 sps:$4 sm:$0xff]  }
  0xf5   : > { %4805 = vmatmul.mubr.bf16.gmra.mxu1 %v18588_v5  ;;  %3404 = vmatprep.mubr.bf16.mxu0 %v19229_v3  ;;  %v16863_v5 = vpack.c.bf16 %v1186_v2, %v1185_v45  ;;  %v1512_v45 = vrot.slane %v1511_v35, 4  ;;  %v16864_v2 = vpack.c.bf16 %v1188_v51, %v1187_v56  ;;  %v17261_v35 = vld [vmem:[%s25092_s1 + $0x4c0] ss:$8 sps:$4 sm:$0xff]  }
  0xf6   : > { %4814 = vmatprep.mubr.bf16.mxu1 %v18603_v50  ;;  %4942 = vmatpush2.bf16.msra.mxu0 %v17234_v22  ;;  %v1519_v50 = vrot.slane %v1517_v31, 5  ;;  %v17284_v22 = vld [vmem:[%s25092_s1 + $0x5d4] ss:$8 sps:$4 sm:$0xff]   ;;  %25560 = vst [vmem:[#allocation99_spill] sm:$0xff] %v19274_v25 }
  0xf7   : > { %4943 = vmatprep.subr.bf16.mxu0 %v17245_v10  ;;  %5135 = vmatpush2.bf16.msra.mxu1 %v17273_v36  ;;  %v1529_v10 = vrot.slane %v1527_v53, 4  ;;  %v1189_v36 = vld [vmem:[%s18167_s30 + $0x120] sm:$0xfe]  ;;  %v1192_v31 = vld [vmem:[%s18167_s30 + $0x138] sm:$0xff]  ;;  %v1533_v53 = vshrl.u32 %v16863_v5, 16  ;;  %v1536_v51 = vshll.u32 %v16863_v5, 16  ;;  %v19312_v5 = vcombine.low %v1488_v13, %v19262_v63 }
  0xf8   : > { %5136 = vmatprep.subr.bf16.mxu1 %v17278_v33  ;;  %v17282_v33 = vld [vmem:[%s25092_s1 + $0x5d0] ss:$8 sps:$4 sm:$0xff]   ;;  %v1520_v16 = vor.u32 %v1519_v50, %v1516_v28  ;;  %v17285_v50 = vld [vmem:[%s25092_s1 + $0x5c0] ss:$8 sps:$4 sm:$0xff]   ;;  %v1542_v28 = vshll.u32 %v16864_v2, 16  ;;  %v1546_v57 = vshrl.u32 %v16864_v2, 16 }
  0xf9   : > { %v1530_v56 = vor.u32 %v1529_v10, %v19276_v26  ;;  %25562 = vst [vmem:[#allocation101_spill] sm:$0xff] %v19312_v5  ;;  %v17270_v10 = vld [vmem:[%s25092_s1 + $0x4b0] ss:$8 sps:$4 sm:$0xff]   ;;  %v17281_v13 = vld [vmem:[%s25092_s1 + $0x4a4] ss:$8 sps:$4 sm:$0xff]  }
  0xfa   : > { %4944 = vmatpush2.bf16.msra.mxu0 %v17243_v8  ;;  %v1507_v8 = vsel %vm19024_vm0, %v1502_v4, %v1506_v23  ;;  %v16866_v23 = vpack.c.bf16 %v1192_v31, %v1191_v9  ;;  %v1521_v4 = vrot.slane %v1520_v16, 4  ;;  %v1548_v2 = vrot.slane %v1546_v57, 4  ;;  %v1193_v31 = vld [vmem:[%s18167_s30 + $0x140] sm:$0xfe]  ;;  %v1195_v63 = vld [vmem:[%s18167_s30 + $0x150] sm:$0xff] }
  0xfb   : > { %4945 = vmatprep.subr.bf16.mxu0 %v17254_v40  ;;  %5137 = vmatpush2.bf16.msra.mxu1 %v17276_v46  ;;  %v17272_v40 = vld [vmem:[%s25092_s1 + $0x4b4] ss:$8 sps:$4 sm:$0xff]   ;;  %v19309_v46 = vsel %vm18622_vm14, %v1512_v45, 0  ;;  %v19329_v45 = vrot.slane %v1542_v28, 5  ;;  %v17296_v16 = vld [vmem:[%s25092_s1 + $0x5a4] ss:$8 sps:$4 sm:$0xff]  }
  0xfc   : > { %3405 = vmatmul.mubr.bf16.gmra.mxu0 %v19265_v15  ;;  %25561 = vst [vmem:[#allocation100_spill] sm:$0xff] %v19309_v46  ;;  %5138 = vmatprep.subr.bf16.mxu1 %v17284_v22  ;;  %v1531_v22 = vrot.slane %v1530_v56, 4  ;;  %v1561_v56 = vshll.u32 %v16866_v23, 16  ;;  %v17279_v57 = vld [vmem:[%s25092_s1 + $0x4a0] ss:$8 sps:$4 sm:$0xff]  }
  0xfd   : > { %4815 = vmatmul.mubr.bf16.gmra.mxu1 %v18662_v32  ;;  %3414 = vmatprep.mubr.bf16.mxu0 %v19274_v25  ;;  %v1196_v32 = vld [vmem:[%s18167_s30 + $0x158] sm:$0xff] }
  0xfe   : > { %4824 = vmatprep.mubr.bf16.mxu1 %v18677_v1  ;;  %v16865_v1 = vpack.c.bf16 %v1190_v17, %v1189_v36  ;;  %4946 = vmatpush2.bf16.msra.mxu0 %v17252_v21  ;;  %v17293_v36 = vld [vmem:[%s25092_s1 + $0x5b4] ss:$8 sps:$4 sm:$0xff]   ;;  %v19321_v21 = vcombine.high %v1507_v8, %v19309_v46  ;;  %v1535_v17 = vrot.slane %v1533_v53, 4  ;;  %v16868_v25 = vpack.c.bf16 %v1196_v32, %v1195_v63  ;;  %v17300_v32 = vld [vmem:[%s25092_s1 + $0x590] ss:$8 sps:$4 sm:$0xff]  }
  0xff   : > { %4947 = vmatprep.subr.bf16.mxu0 %v17263_v30  ;;  %5139 = vmatpush2.bf16.msra.mxu1 %v17282_v33  ;;  %v1538_v30 = vrot.slane %v1536_v51, 5  ;;  %v17291_v33 = vld [vmem:[%s25092_s1 + $0x5b0] ss:$8 sps:$4 sm:$0xff]   ;;  %v1565_v51 = vshrl.u32 %v16866_v23, 16  ;;  %v1549_v23 = vor.u32 %v1548_v2, %v19329_v45 }
 0x100   : > { %5140 = vmatprep.subr.bf16.mxu1 %v17287_v48  ;;  %25563 = vst [vmem:[#allocation102_spill] sm:$0xff] %v19321_v21  ;;  %v1552_v9 = vshrl.u32 %v16865_v1, 16  ;;  %v1194_v48 = vld [vmem:[%s18167_s30 + $0x148] sm:$0xfe]  ;;  %v1555_v53 = vshll.u32 %v16865_v1, 16  ;;  %v1526_v1 = vsel %vm19024_vm0, %v1521_v4, %v19276_v26  ;;  %v19359_v26 = vrot.slane %v1561_v56, 5 }
 0x101   : > { %v1539_v28 = vor.u32 %v1538_v30, %v1535_v17  ;;  %v1567_v4 = vrot.slane %v1565_v51, 4  ;;  %v17299_v17 = vld [vmem:[%s25092_s1 + $0x484] ss:$8 sps:$4 sm:$0xff]   ;;  %v1199_v56 = vld [vmem:[%s18167_s30 + $0x170] sm:$0xff]  ;;  %v1200_v51 = vld [vmem:[%s18167_s30 + $0x178] sm:$0xff] }
 0x102   : > { %4948 = vmatpush2.bf16.msra.mxu0 %v17261_v35  ;;  %v17290_v35 = vld [vmem:[%s25092_s1 + $0x494] ss:$8 sps:$4 sm:$0xff]   ;;  %v17305_v30 = vld [vmem:[%s25092_s1 + $0x584] ss:$8 sps:$4 sm:$0xff]  }
 0x103   : > { %4949 = vmatprep.subr.bf16.mxu0 %v17272_v40  ;;  %5141 = vmatpush2.bf16.msra.mxu1 %v17285_v50  ;;  %v17294_v40 = vld [vmem:[%s25092_s1 + $0x5a0] ss:$8 sps:$4 sm:$0xff]   ;;  %v19356_v50 = vsel %vm18622_vm14, %v1531_v22, 0  ;;  %v17288_v22 = vld [vmem:[%s25092_s1 + $0x490] ss:$8 sps:$4 sm:$0xff]   ;;  %v1540_v63 = vrot.slane %v1539_v28, 4 }
 0x104   : > { %3415 = vmatmul.mubr.bf16.gmra.mxu0 %v19312_v5  ;;  %25564 = vst [vmem:[#allocation103_spill] sm:$0xff] %v19356_v50  ;;  %5142 = vmatprep.subr.bf16.mxu1 %v17293_v36  ;;  %v19362_v5 = vcombine.low %v1507_v8, %v19309_v46  ;;  %v19371_v36 = vcombine.high %v1526_v1, %v19356_v50  ;;  %v1550_v8 = vrot.slane %v1549_v23, 4  ;;  %v1201_v46 = vld [vmem:[%s18167_s30 + $0x180] sm:$0xfe] }
 0x105   : > { %4825 = vmatmul.mubr.bf16.gmra.mxu1 %v18728_v0  ;;  %3424 = vmatprep.mubr.bf16.mxu0 %v19321_v21  ;;  %v1557_v0 = vrot.slane %v1555_v53, 5  ;;  %v16867_v21 = vpack.c.bf16 %v1194_v48, %v1193_v31  ;;  %v1580_v31 = vshll.u32 %v16868_v25, 16  ;;  %v1584_v48 = vshrl.u32 %v16868_v25, 16  ;;  %v1198_v53 = vld [vmem:[%s18167_s30 + $0x168] sm:$0xfe] }
 0x106   : > { %4834 = vmatprep.mubr.bf16.mxu1 %v18741_v37  ;;  %v1554_v37 = vrot.slane %v1552_v9, 4  ;;  %4950 = vmatpush2.bf16.msra.mxu0 %v17270_v10  ;;  %25565 = vst [vmem:[#allocation104_spill] sm:$0xff] %v19362_v5  ;;  %v17302_v10 = vld [vmem:[%s25092_s1 + $0x594] ss:$8 sps:$4 sm:$0xff]   ;;  %25566 = vst [vmem:[#allocation105_spill] sm:$0xff] %v19371_v36  ;;  %v19408_v23 = vcombine.low %v1526_v1, %v19356_v50 }
 0x107   : > { %4951 = vmatprep.subr.bf16.mxu0 %v17281_v13  ;;  %5143 = vmatpush2.bf16.msra.mxu1 %v17291_v33  ;;  %v1568_v33 = vor.u32 %v1567_v4, %v19359_v26  ;;  %v1571_v2 = vshrl.u32 %v16867_v21, 16  ;;  %v1574_v9 = vshll.u32 %v16867_v21, 16  ;;  %v17308_v25 = vld [vmem:[%s25092_s1 + $0x674] ss:$8 sps:$4 sm:$0xff]   ;;  %v1545_v21 = vsel %vm19024_vm0, %v1540_v63, %v19329_v45 }
 0x108   : > { %5144 = vmatprep.subr.bf16.mxu1 %v17296_v16  ;;  %v1558_v13 = vor.u32 %v1557_v0, %v1554_v37  ;;  %v1197_v16 = vld [vmem:[%s18167_s30 + $0x160] sm:$0xfe]  ;;  %25568 = vst [vmem:[#allocation107_spill] sm:$0xff] %v19408_v23  ;;  %v19410_v45 = vrot.slane %v1580_v31, 5  ;;  %v1586_v63 = vrot.slane %v1584_v48, 4  ;;  %v1204_v1 = vld [vmem:[%s18167_s30 + $0x198] sm:$0xff] }
 0x109   : > { %v17297_v0 = vld [vmem:[%s25092_s1 + $0x480] ss:$8 sps:$4 sm:$0xff]   ;;  %v1573_v28 = vrot.slane %v1571_v2, 4  ;;  %v1576_v4 = vrot.slane %v1574_v9, 5 }
 0x10a   : > { %4952 = vmatpush2.bf16.msra.mxu0 %v17279_v57  ;;  %v17303_v37 = vld [vmem:[%s25092_s1 + $0x580] ss:$8 sps:$4 sm:$0xff]   ;;  %v19405_v57 = vsel %vm18622_vm14, %v1550_v8, 0  ;;  %v1587_v48 = vor.u32 %v1586_v63, %v19410_v45 }
 0x10b   : > { %4953 = vmatprep.subr.bf16.mxu0 %v17290_v35  ;;  %5145 = vmatpush2.bf16.msra.mxu1 %v17294_v40  ;;  %25567 = vst [vmem:[#allocation106_spill] sm:$0xff] %v19405_v57  ;;  %v1559_v35 = vrot.slane %v1558_v13, 4  ;;  %v1569_v40 = vrot.slane %v1568_v33, 4  ;;  %v19413_v8 = vcombine.high %v1545_v21, %v19405_v57  ;;  %v1202_v13 = vld [vmem:[%s18167_s30 + $0x188] sm:$0xfe]  ;;  %v1203_v33 = vld [vmem:[%s18167_s30 + $0x190] sm:$0xff]  ;;  %v1577_v31 = vor.u32 %v1576_v4, %v1573_v28 }
 0x10c   : > { %3425 = vmatmul.mubr.bf16.gmra.mxu0 %v19362_v5  ;;  %5146 = vmatprep.subr.bf16.mxu1 %v17302_v10  ;;  %v16870_v10 = vpack.c.bf16 %v1200_v51, %v1199_v56  ;;  %v19439_v63 = vcombine.low %v1545_v21, %v19405_v57  ;;  %v1207_v21 = vld [vmem:[%s18167_s30 + $0x1b0] sm:$0xff] }
 0x10d   : > { %4835 = vmatmul.mubr.bf16.gmra.mxu1 %v18790_v42  ;;  %3434 = vmatprep.mubr.bf16.mxu0 %v19371_v36  ;;  %25569 = vst [vmem:[#allocation108_spill] sm:$0xff] %v19413_v8  ;;  %v19429_v9 = vsel %vm18622_vm14, %v1569_v40, 0  ;;  %v16872_v40 = vpack.c.bf16 %v1204_v1, %v1203_v33 }
 0x10e   : > { %4844 = vmatprep.mubr.bf16.mxu1 %v18799_v43  ;;  %4954 = vmatpush2.bf16.msra.mxu0 %v17288_v22  ;;  %v16869_v22 = vpack.c.bf16 %v1198_v53, %v1197_v16  ;;  %25570 = vst [vmem:[#allocation109_spill] sm:$0xff] %v19429_v9  ;;  %v1599_v51 = vshll.u32 %v16870_v10, 16  ;;  %25571 = vst [vmem:[#allocation110_spill] sm:$0xff] %v19439_v63  ;;  %v1208_v43 = vld [vmem:[%s18167_s30 + $0x1b8] sm:$0xff] }
 0x10f   : > { %4955 = vmatprep.subr.bf16.mxu0 %v17299_v17  ;;  %5147 = vmatpush2.bf16.msra.mxu1 %v17300_v32  ;;  %v17335_v17 = vld [vmem:[%s25092_s1 + $0x774] ss:$8 sps:$4 sm:$0xff]   ;;  %v16874_v42 = vpack.c.bf16 %v1208_v43, %v1207_v21 }
 0x110   : > { %5148 = vmatprep.subr.bf16.mxu1 %v17305_v30  ;;  %v1564_v30 = vsel %vm19024_vm0, %v1559_v35, %v19359_v26  ;;  %v1590_v53 = vshrl.u32 %v16869_v22, 16  ;;  %v1593_v56 = vshll.u32 %v16869_v22, 16  ;;  %v16871_v26 = vpack.c.bf16 %v1202_v13, %v1201_v46 }
 0x111   : > { %v1578_v22 = vrot.slane %v1577_v31, 4  ;;  %v1601_v13 = vrot.slane %v1599_v51, 5 }
 0x112   : > { %4956 = vmatpush2.bf16.msra.mxu0 %v17297_v0  ;;  %v1595_v46 = vrot.slane %v1593_v56, 5  ;;  %v1609_v1 = vshrl.u32 %v16871_v26, 16 }
 0x113   : > { %5149 = vmatpush2.bf16.msra.mxu1 %v17303_v37  ;;  %6657 = vmatprep.subr.bf16.mxu0 %v17308_v25  ;;  %v1603_v25 = vshrl.u32 %v16870_v10, 16  ;;  %v1592_v10 = vrot.slane %v1590_v53, 4  ;;  %v1583_v56 = vsel %vm19024_vm0, %v1578_v22, %v19410_v45  ;;  %v19468_v45 = vcombine.low %v1564_v30, %v19429_v9 }
 0x114   : > { %v2970_v32 = vpop.f32.mrf.mxu0  ;;  %3435 = vmatmul.mubr.bf16.gmra.mxu0 %v19408_v23  ;;  %6850 = vmatprep.subr.bf16.mxu1 %v17335_v17 }
 0x115   : > { %v3163_v2 = vpop.f32.mrf.mxu1  ;;  %4845 = vmatmul.mubr.bf16.gmra.mxu1 %v18836_v60  ;;  %3444 = vmatprep.mubr.bf16.mxu0 %v19413_v8  ;;  %v1605_v33 = vrot.slane %v1603_v25, 4  ;;  %v1622_v60 = vshrl.u32 %v16872_v40, 16  ;;  %v1205_v25 = vld [vmem:[%s18167_s30 + $0x1a0] sm:$0xfe]  ;;  %25578 = vst [vmem:[#allocation117_spill] sm:$0xff] %v19468_v45 }
 0x116   : > { %v19432_v16 = vadd.f32 %v3163_v2, %v2970_v32  ;;  %4854 = vmatprep.mubr.bf16.mxu1 %v18845_v38  ;;  %v2972_v0 = vpop.f32.mrf.mxu0  ;;  %v19442_v32 = vcombine.high %v1564_v30, %v19429_v9  ;;  %v1588_v2 = vrot.slane %v1587_v48, 4  ;;  %v1618_v38 = vshll.u32 %v16872_v40, 16 }
 0x117   : > { %v3165_v37 = vpop.f32.mrf.mxu1 }
 0x118   : > { %v19436_v35 = vadd.f32 %v3165_v37, %v2972_v0  ;;  %v2974_v28 = vpop.f32.mrf.mxu0  ;;  %25572 = vst [vmem:[#allocation111_spill] sm:$0xff] %v19442_v32  ;;  %v1612_v37 = vshll.u32 %v16871_v26, 16  ;;  %v19461_v51 = vsel %vm18622_vm14, %v1588_v2, 0  ;;  %v1206_v26 = vld [vmem:[%s18167_s30 + $0x1a8] sm:$0xfe] }
 0x119   : > { %v3167_v4 = vpop.f32.mrf.mxu1  ;;  %25576 = vst [vmem:[#allocation115_spill] sm:$0xff] %v19461_v51  ;;  %v16873_v22 = vpack.c.bf16 %v1206_v26, %v1205_v25  ;;  %v1641_v25 = vshrl.u32 %v16874_v42, 16 }
 0x11a   : > { %v19444_v50 = vadd.f32 %v3167_v4, %v2974_v28  ;;  %v2976_v17 = vpop.f32.mrf.mxu0  ;;  %v1596_v4 = vor.u32 %v1595_v46, %v1592_v10 }
 0x11b   : > { %v3169_v0 = vpop.f32.mrf.mxu1 }
 0x11c   : > { %25573 = vst [vmem:[#allocation112_spill] sm:$0xff] %v19444_v50  ;;  %v19447_v57 = vadd.f32 %v3169_v0, %v2976_v17  ;;  %v2980_v31 = vpop.f32.mrf.mxu0  ;;  %3445 = vmatmul.mubr.bf16.gmra.mxu0 %v19439_v63  ;;  %v1606_v17 = vor.u32 %v1605_v33, %v1601_v13  ;;  %v1611_v0 = vrot.slane %v1609_v1, 4  ;;  %v19473_v50 = vcombine.high %v1583_v56, %v19461_v51 }
 0x11d   : > { %v3173_v48 = vpop.f32.mrf.mxu1  ;;  %4855 = vmatmul.mubr.bf16.gmra.mxu1 %v18870_v58  ;;  %3454 = vmatprep.mubr.bf16.mxu0 %v19442_v32  ;;  %v1620_v58 = vrot.slane %v1618_v38, 5  ;;  %v1597_v33 = vrot.slane %v1596_v4, 4 }
 0x11e   : > { %25574 = vst [vmem:[#allocation113_spill] sm:$0xff] %v19447_v57  ;;  %v19452_v53 = vadd.f32 %v3173_v48, %v2980_v31  ;;  %4864 = vmatprep.mubr.bf16.mxu1 %v18876_v52  ;;  %v2982_v40 = vpop.f32.mrf.mxu0  ;;  %v1614_v31 = vrot.slane %v1612_v37, 5  ;;  %v1624_v52 = vrot.slane %v1622_v60, 4  ;;  %25580 = vst [vmem:[#allocation119_spill] sm:$0xff] %v19473_v50  ;;  %v1607_v1 = vrot.slane %v1606_v17, 4 }
 0x11f   : > { %v3175_v28 = vpop.f32.mrf.mxu1  ;;  %v1637_v37 = vshll.u32 %v16874_v42, 16  ;;  %v1602_v17 = vsel %vm19024_vm0, %v1597_v33, %v1601_v13  ;;  %v1210_v42 = vld [vmem:[%s18167_s30 + $0x1c8] sm:$0xfe] }
 0x120   : > { %25575 = vst [vmem:[#allocation114_spill] sm:$0xff] %v19452_v53  ;;  %v19465_v48 = vadd.f32 %v3175_v28, %v2982_v40  ;;  %v2984_v53 = vpop.f32.mrf.mxu0  ;;  %v1615_v43 = vor.u32 %v1614_v31, %v1611_v0  ;;  %v1625_v60 = vor.u32 %v1624_v52, %v1620_v58  ;;  %v1209_v40 = vld [vmem:[%s18167_s30 + $0x1c0] sm:$0xfe]  ;;  %v1211_v52 = vld [vmem:[%s18167_s30 + $0x1d0] sm:$0xff]  ;;  %v19489_v0 = vsel %vm18622_vm14, %v1607_v1, 0 }
 0x121   : > { %v3177_v57 = vpop.f32.mrf.mxu1  ;;  %25583 = vst [vmem:[#allocation122_spill] sm:$0xff] %v19489_v0  ;;  %v338_v1 = vld [vmem:[%s18167_s30 + $0x1e0] sm:$0xff] }
 0x122   : > { %25577 = vst [vmem:[#allocation116_spill] sm:$0xff] %v19465_v48  ;;  %v19470_v2 = vadd.f32 %v3177_v57, %v2984_v53  ;;  %v2986_v10 = vpop.f32.mrf.mxu0  ;;  %v1628_v57 = vshrl.u32 %v16873_v22, 16  ;;  %v1631_v53 = vshll.u32 %v16873_v22, 16  ;;  %v1616_v22 = vrot.slane %v1615_v43, 4  ;;  %v341_v48 = vld [vmem:[%s18167_s30 + $0x1f8] sm:$0x7f] }
 0x123   : > { %v3179_v46 = vpop.f32.mrf.mxu1  ;;  %v19505_v43 = vcombine.high %v1602_v17, %v19489_v0 }
 0x124   : > { %25579 = vst [vmem:[#allocation118_spill] sm:$0xff] %v19470_v2  ;;  %v19475_v38 = vadd.f32 %v3179_v46, %v2986_v10  ;;  %v2990_v21 = vpop.f32.mrf.mxu0  ;;  %3455 = vmatmul.mubr.bf16.gmra.mxu0 %v19468_v45  ;;  %v1626_v10 = vrot.slane %v1625_v60, 4  ;;  %v19494_v46 = vrot.slane %v1637_v37, 5  ;;  %v1630_v13 = vrot.slane %v1628_v57, 4 }
 0x125   : > { %v3183_v30 = vpop.f32.mrf.mxu1  ;;  %4865 = vmatmul.mubr.bf16.gmra.mxu1 %v18904_v7  ;;  %3464 = vmatprep.mubr.bf16.mxu0 %v19473_v50  ;;  %v1633_v33 = vrot.slane %v1631_v53, 5  ;;  %v1643_v7 = vrot.slane %v1641_v25, 4  ;;  %25586 = vst [vmem:[#allocation125_spill] sm:$0xff] %v19505_v43  ;;  %v16875_v60 = vpack.c.bf16 %v1210_v42, %v1209_v40 }
 0x126   : > { %25581 = vst [vmem:[#allocation120_spill] sm:$0xff] %v19475_v38  ;;  %v19479_v26 = vadd.f32 %v3183_v30, %v2990_v21  ;;  %4874 = vmatprep.mubr.bf16.mxu1 %v18910_v61  ;;  %v2992_v28 = vpop.f32.mrf.mxu0  ;;  %v1212_v21 = vld [vmem:[%s18167_s30 + $0x1d8] sm:$0xff]  ;;  %v19498_v61 = vcombine.low %v1583_v56, %v19461_v51  ;;  %v19517_v57 = vsel %vm18622_vm14, %v1626_v10, 0 }
 0x127   : > { %v3185_v4 = vpop.f32.mrf.mxu1  ;;  %25587 = vst [vmem:[#allocation126_spill] sm:$0xff] %v19517_v57  ;;  %v1634_v53 = vor.u32 %v1633_v33, %v1630_v13  ;;  %v1644_v25 = vor.u32 %v1643_v7, %v19494_v46  ;;  %v1650_v42 = vshll.u32 %v16875_v60, 16  ;;  %v19527_v7 = vcombine.low %v1602_v17, %v19489_v0 }
 0x128   : > { %25582 = vst [vmem:[#allocation121_spill] sm:$0xff] %v19479_v26  ;;  %v19492_v31 = vadd.f32 %v3185_v4, %v2992_v28  ;;  %v2994_v30 = vpop.f32.mrf.mxu0  ;;  %25585 = vst [vmem:[#allocation124_spill] sm:$0xff] %v19498_v61  ;;  %v339_v26 = vld [vmem:[%s18167_s30 + $0x1e8] sm:$0xff]  ;;  %v16876_v4 = vpack.c.bf16 %v1212_v21, %v1211_v52  ;;  %v1647_v52 = vshrl.u32 %v16875_v60, 16 }
 0x129   : > { %v3187_v9 = vpop.f32.mrf.mxu1  ;;  %v16813_v21 = vpack.c.bf16 %v339_v26, %v338_v1  ;;  %25590 = vst [vmem:[#allocation129_spill] sm:$0xff] %v19527_v7  ;;  %v1635_v33 = vrot.slane %v1634_v53, 4  ;;  %v1652_v1 = vrot.slane %v1650_v42, 5 }
 0x12a   : > { %25584 = vst [vmem:[#allocation123_spill] sm:$0xff] %v19492_v31  ;;  %v19502_v38 = vadd.f32 %v3187_v9, %v2994_v30  ;;  %v2996_v37 = vpop.f32.mrf.mxu0  ;;  %v340_v31 = vld [vmem:[%s18167_s30 + $0x1f0] sm:$0x7f]  ;;  %v1621_v9 = vsel %vm19024_vm0, %v1616_v22, %v1620_v58  ;;  %v1660_v58 = vshrl.u32 %v16876_v4, 16  ;;  %v1649_v26 = vrot.slane %v1647_v52, 4 }
 0x12b   : > { %v3189_v28 = vpop.f32.mrf.mxu1  ;;  %v16814_v22 = vpack.c.bf16 %v341_v48, %v340_v31  ;;  %v746_v60 = vshrl.u32 %v16813_v21, 16 }
 0x12c   : > { %v19508_v2 = vadd.f32 %v3189_v28, %v2996_v37  ;;  %v3000_v56 = vpop.f32.mrf.mxu0  ;;  %3465 = vmatmul.mubr.bf16.gmra.mxu0 %v19498_v61  ;;  %v1656_v28 = vshll.u32 %v16876_v4, 16  ;;  %v1662_v31 = vrot.slane %v1660_v58, 4  ;;  %v1653_v52 = vor.u32 %v1652_v1, %v1649_v26 }
 0x12d   : > { %v3193_v51 = vpop.f32.mrf.mxu1  ;;  %4875 = vmatmul.mubr.bf16.gmra.mxu1 %v18941_v6  ;;  %3474 = vmatprep.mubr.bf16.mxu0 %v19505_v43  ;;  %v748_v42 = vrot.slane %v746_v60, 7  ;;  %v757_v0 = vshll.u32 %v16814_v22, 16 }
 0x12e   : > { %v19520_v40 = vadd.f32 %v3193_v51, %v3000_v56  ;;  %4884 = vmatprep.mubr.bf16.mxu1 %v18947_v59  ;;  %v3002_v30 = vpop.f32.mrf.mxu0  ;;  %v19530_v51 = vcombine.high %v1621_v9, %v19517_v57  ;;  %v1645_v56 = vrot.slane %v1644_v25, 4  ;;  %v1658_v48 = vrot.slane %v1656_v28, 5 }
 0x12f   : > { %v3195_v37 = vpop.f32.mrf.mxu1  ;;  %v1654_v1 = vrot.slane %v1653_v52, 4 }
 0x130   : > { %25588 = vst [vmem:[#allocation127_spill] sm:$0xff] %v19520_v40  ;;  %v19524_v6 = vadd.f32 %v3195_v37, %v3002_v30  ;;  %v3004_v10 = vpop.f32.mrf.mxu0  ;;  %25591 = vst [vmem:[#allocation130_spill] sm:$0xff] %v19530_v51  ;;  %v754_v30 = vshrl.u32 %v16814_v22, 16  ;;  %v19540_v53 = vsel %vm18622_vm14, %v1645_v56, 0 }
 0x131   : > { %v3197_v13 = vpop.f32.mrf.mxu1  ;;  %25592 = vst [vmem:[#allocation131_spill] sm:$0xff] %v19540_v53  ;;  %v1659_v52 = vsel %vm19024_vm0, %v1654_v1, %v1658_v48 }
 0x132   : > { %25589 = vst [vmem:[#allocation128_spill] sm:$0xff] %v19524_v6  ;;  %v19532_v59 = vadd.f32 %v3197_v13, %v3004_v10  ;;  %v3006_v40 = vpop.f32.mrf.mxu0  ;;  %v1663_v10 = vor.u32 %v1662_v31, %v1658_v48  ;;  %v749_v13 = vshll.u32 %v16813_v21, 16 }
 0x133   : > { %v3199_v4 = vpop.f32.mrf.mxu1 }
 0x134   : > { %v19534_v37 = vadd.f32 %v3199_v4, %v3006_v40  ;;  %v3010_v6 = vpop.f32.mrf.mxu0  ;;  %3475 = vmatmul.mubr.bf16.gmra.mxu0 %v19527_v7  ;;  %v1640_v40 = vsel %vm19024_vm0, %v1635_v33, %v19494_v46  ;;  %v756_v4 = vrot.slane %v754_v30, 7  ;;  %v752_v46 = vrot.slane %v748_v42, 4 }
 0x135   : > { %v3203_v17 = vpop.f32.mrf.mxu1  ;;  %4885 = vmatmul.mubr.bf16.gmra.mxu1 %v18969_v41  ;;  %3484 = vmatprep.mubr.bf16.mxu0 %v19530_v51  ;;  %v19552_v41 = vcombine.low %v1621_v9, %v19517_v57  ;;  %v1664_v60 = vrot.slane %v1663_v10, 4  ;;  %v751_v21 = vor.u32 %v749_v13, %v748_v42 }
 0x136   : > { %v19542_v25 = vadd.f32 %v3203_v17, %v3010_v6  ;;  %4894 = vmatprep.mubr.bf16.mxu1 %v18975_v49  ;;  %v3012_v28 = vpop.f32.mrf.mxu0  ;;  %v759_v31 = vor.u32 %v757_v0, %v756_v4 }
 0x137   : > { %v3205_v58 = vpop.f32.mrf.mxu1  ;;  %25594 = vst [vmem:[#allocation133_spill] sm:$0xff] %v19552_v41  ;;  %v19571_v0 = vsel %vm18622_vm14, %v1664_v60, 0  ;;  %v19577_v10 = vsel %vm18253_vm9, %v751_v21, 0 }
 0x138   : > { %25593 = vst [vmem:[#allocation132_spill] sm:$0xff] %v19542_v25  ;;  %v19549_v56 = vadd.f32 %v3205_v58, %v3012_v28  ;;  %v3014_v6 = vpop.f32.mrf.mxu0  ;;  %v19557_v25 = vcombine.high %v1640_v40, %v19540_v53  ;;  %25596 = vst [vmem:[#allocation135_spill] sm:$0xff] %v19571_v0  ;;  %v760_v42 = vsel %vm18241_vm8, %v752_v46, %v759_v31 }
 0x139   : > { %v3207_v17 = vpop.f32.mrf.mxu1  ;;  %25597 = vst [vmem:[#allocation136_spill] sm:$0xff] %v19577_v10  ;;  %v19587_v48 = vcombine.high %v1659_v52, %v19571_v0  ;;  %v19590_v1 = vcombine.high %v19577_v10, %v760_v42 }
 0x13a   : > { %v19554_v49 = vadd.f32 %v3207_v17, %v3014_v6  ;;  %25595 = vst [vmem:[#allocation134_spill] sm:$0xff] %v19557_v25  ;;  %v3016_v33 = vpop.f32.mrf.mxu0 }
 0x13b   : > { %v3209_v26 = vpop.f32.mrf.mxu1  ;;  %25599 = vst [vmem:[#allocation138_spill] sm:$0xff] %v19587_v48  ;;  %25600 = vst [vmem:[#allocation139_spill] sm:$0xff] %v19590_v1 }
 0x13c   : > { %v19559_v22 = vadd.f32 %v3209_v26, %v3016_v33  ;;  %v3020_v30 = vpop.f32.mrf.mxu0  ;;  %3485 = vmatmul.mubr.bf16.gmra.mxu0 %v19552_v41  ;;  %v19582_v33 = vcombine.low %v1640_v40, %v19540_v53 }
 0x13d   : > { %v3213_v28 = vpop.f32.mrf.mxu1  ;;  %4895 = vmatmul.mubr.bf16.gmra.mxu1 %v18997_v29  ;;  %3494 = vmatprep.mubr.bf16.mxu0 %v19557_v25  ;;  %v17315_v29 = vld [vmem:[%s25092_s1 + $0x640] ss:$8 sps:$4 sm:$0xff]  }
 0x13e   : > { %v19563_v9 = vadd.f32 %v3213_v28, %v3020_v30  ;;  %4904 = vmatprep.mubr.bf16.mxu1 %v19003_v14  ;;  %v3022_v58 = vpop.f32.mrf.mxu0  ;;  %25598 = vst [vmem:[#allocation137_spill] sm:$0xff] %v19582_v33 }
 0x13f   : > { %v3215_v6 = vpop.f32.mrf.mxu1 }
 0x140   : > { %v19579_v13 = vadd.f32 %v3215_v6, %v3022_v58  ;;  %v3024_v4 = vpop.f32.mrf.mxu0 }
 0x141   : > { %v3217_v17 = vpop.f32.mrf.mxu1 }
 0x142   : > { %v19584_v26 = vadd.f32 %v3217_v17, %v3024_v4  ;;  %v3026_v46 = vpop.f32.mrf.mxu0 }
 0x143   : > { %v3219_v60 = vpop.f32.mrf.mxu1 }
 0x144   : > { %v19592_v31 = vadd.f32 %v3219_v60, %v3026_v46  ;;  %v3030_v21 = vpop.f32.mrf.mxu0  ;;  %3495 = vmatmul.mubr.bf16.gmra.mxu0 %v19582_v33  ;;  %v19603_v46 = vcombine.low %v1659_v52, %v19571_v0  ;;  %v19606_v60 = vcombine.low %v19577_v10, %v760_v42  ;;  %v17309_v0 = vld [vmem:[%s25092_s1 + $0x660] ss:$8 sps:$4 sm:$0xff]  }
 0x145   : > { %v3223_v30 = vpop.f32.mrf.mxu1  ;;  %4905 = vmatmul.mubr.bf16.gmra.mxu1 %v19021_v55  ;;  %3504 = vmatprep.mubr.bf16.mxu0 %v19587_v48 }
 0x146   : > { %v19596_v40 = vadd.f32 %v3223_v30, %v3030_v21  ;;  %4914 = vmatprep.mubr.bf16.mxu1 %v19590_v1  ;;  %v3032_v28 = vpop.f32.mrf.mxu0  ;;  %25601 = vst [vmem:[#allocation140_spill] sm:$0xff] %v19603_v46  ;;  %25602 = vst [vmem:[#allocation141_spill] sm:$0xff] %v19606_v60 }
 0x147   : > { %v3225_v58 = vpop.f32.mrf.mxu1 }
 0x148   : > { %v19600_v6 = vadd.f32 %v3225_v58, %v3032_v28  ;;  %v3034_v4 = vpop.f32.mrf.mxu0 }
 0x149   : > { %v3227_v17 = vpop.f32.mrf.mxu1 }
 0x14a   : > { %v19608_v53 = vadd.f32 %v3227_v17, %v3034_v4  ;;  %v3036_v21 = vpop.f32.mrf.mxu0  ;;  %v17306_v4 = vld [vmem:[%s25092_s1 + $0x670] ss:$8 sps:$4 sm:$0xff]  }
 0x14b   : > { %v3229_v30 = vpop.f32.mrf.mxu1 }
 0x14c   : > { %v19610_v57 = vadd.f32 %v3229_v30, %v3036_v21  ;;  %v3040_v24 = vpop.f32.mrf.mxu0  ;;  %3505 = vmatmul.mubr.bf16.gmra.mxu0 %v19603_v46  ;;  %v17311_v30 = vld [vmem:[%s25092_s1 + $0x664] ss:$8 sps:$4 sm:$0xff]  }
 0x14d   : > { %v3233_v19 = vpop.f32.mrf.mxu1  ;;  %4915 = vmatmul.mubr.bf16.gmra.mxu1 %v19606_v60  ;;  %4957 = vmatprep.mubr.bf16.mxu0 %v18294_v47 }
 0x14e   : > { %v19614_v28 = vadd.f32 %v3233_v19, %v3040_v24  ;;  %5150 = vmatprep.mubr.bf16.mxu1 %v19046_v12  ;;  %v3042_v52 = vpop.f32.mrf.mxu0  ;;  %v17333_v24 = vld [vmem:[%s25092_s1 + $0x770] ss:$8 sps:$4 sm:$0xff]  }
 0x14f   : > { %v3235_v42 = vpop.f32.mrf.mxu1 }
 0x150   : > { %v19618_v58 = vadd.f32 %v3235_v42, %v3042_v52  ;;  %v3044_v17 = vpop.f32.mrf.mxu0  ;;  %v17338_v52 = vld [vmem:[%s25092_s1 + $0x764] ss:$8 sps:$4 sm:$0xff]  }
 0x151   : > { %v3237_v21 = vpop.f32.mrf.mxu1 }
 0x152   : > { %v19626_v19 = vadd.f32 %v3237_v21, %v3044_v17  ;;  %v3046_v47 = vpop.f32.mrf.mxu0  ;;  %v25603_v21 = vld [vmem:[#allocation14_spill] sm:$0xff] }
 0x153   : > { %v3239_v12 = vpop.f32.mrf.mxu1 }
 0x154   : > { %v19634_v42 = vadd.f32 %v3239_v12, %v3046_v47  ;;  %v3050_v10 = vpop.f32.mrf.mxu0  ;;  %4958 = vmatmul.mubr.bf16.vlgmr.msra.gmra.mxu0 %v18331_v11  ;;  %v17314_v47 = vld [vmem:[%s25092_s1 + $0x654] ss:$8 sps:$4 sm:$0xff]   ;;  %v17336_v12 = vld [vmem:[%s25092_s1 + $0x760] ss:$8 sps:$4 sm:$0xff]  }
 0x155   : > { %v3243_v60 = vpop.f32.mrf.mxu1  ;;  %5151 = vmatmul.mubr.bf16.vlgmr.msra.gmra.mxu1 %v19081_v54  ;;  %6658 = vmatpush1.bf16.msra.mxu0 %v17306_v4  ;;  %v17344_v4 = vld [vmem:[%s25092_s1 + $0x754] ss:$8 sps:$4 sm:$0xff]  }
 0x156   : > { %v19641_v17 = vadd.f32 %v3243_v60, %v3050_v10  ;;  %4967 = vmatprep.mubr.bf16.mxu0 %v25603_v21  ;;  %v3052_v1 = vpop.f32.mrf.mxu0  ;;  %5160 = vmatprep.mubr.bf16.mxu1 %v19084_v20  ;;  %v17312_v60 = vld [vmem:[%s25092_s1 + $0x650] ss:$8 sps:$4 sm:$0xff]  }
 0x157   : > { %v3245_v55 = vpop.f32.mrf.mxu1  ;;  %6659 = vmatprep.subr.bf16.mxu0 %v17311_v30  ;;  %6851 = vmatpush1.bf16.msra.mxu1 %v17333_v24 }
 0x158   : > { %v19651_v11 = vadd.f32 %v3245_v55, %v3052_v1  ;;  %v3054_v54 = vpop.f32.mrf.mxu0  ;;  %6852 = vmatprep.subr.bf16.mxu1 %v17338_v52  ;;  %v17317_v55 = vld [vmem:[%s25092_s1 + $0x644] ss:$8 sps:$4 sm:$0xff]   ;;  %v17342_v1 = vld [vmem:[%s25092_s1 + $0x750] ss:$8 sps:$4 sm:$0xff]  }
 0x159   : > { %v3247_v10 = vpop.f32.mrf.mxu1  ;;  %6660 = vmatpush1.bf16.msra.mxu0 %v17309_v0  ;;  %v17347_v52 = vld [vmem:[%s25092_s1 + $0x744] ss:$8 sps:$4 sm:$0xff]  }
 0x15a   : > { %25604 = vst [vmem:[#allocation14_spill] sm:$0xff] %v19651_v11  ;;  %v19659_v14 = vadd.f32 %v3247_v10, %v3054_v54  ;;  %v3056_v30 = vpop.f32.mrf.mxu0  ;;  %6661 = vmatprep.subr.bf16.mxu0 %v17314_v47  ;;  %v25607_v10 = vld [vmem:[#allocation18_spill] sm:$0xff]  ;;  %v25609_v47 = vld [vmem:[#allocation20_spill] sm:$0xff] }
 0x15b   : > { %v3249_v24 = vpop.f32.mrf.mxu1  ;;  %6853 = vmatpush1.bf16.msra.mxu1 %v17336_v12  ;;  %v25610_v11 = vld [vmem:[#allocation90_spill] sm:$0xff] }
 0x15c   : > { %25605 = vst [vmem:[#allocation142_spill] sm:$0xff] %v19659_v14  ;;  %v19670_v20 = vadd.f32 %v3249_v24, %v3056_v30  ;;  %v3060_v54 = vpop.f32.mrf.mxu0  ;;  %4968 = vmatmul.mubr.bf16.gmra.mxu0 %v25607_v10  ;;  %v17320_v12 = vld [vmem:[%s25092_s1 + $0x634] ss:$8 sps:$4 sm:$0xff]   ;;  %v17345_v30 = vld [vmem:[%s25092_s1 + $0x740] ss:$8 sps:$4 sm:$0xff]   ;;  %6854 = vmatprep.subr.bf16.mxu1 %v17344_v4 }
 0x15d   : > { %v3253_v0 = vpop.f32.mrf.mxu1  ;;  %5161 = vmatmul.mubr.bf16.gmra.mxu1 %v19128_v44  ;;  %4977 = vmatprep.mubr.bf16.mxu0 %v25609_v47 }
 0x15e   : > { %25606 = vst [vmem:[#allocation143_spill] sm:$0xff] %v19670_v20  ;;  %v19677_v14 = vadd.f32 %v3253_v0, %v3060_v54  ;;  %5170 = vmatprep.mubr.bf16.mxu1 %v25610_v11  ;;  %v3062_v24 = vpop.f32.mrf.mxu0  ;;  %6662 = vmatpush1.bf16.msra.mxu0 %v17312_v60  ;;  %v17318_v11 = vld [vmem:[%s25092_s1 + $0x630] ss:$8 sps:$4 sm:$0xff]  }
 0x15f   : > { %v3255_v44 = vpop.f32.mrf.mxu1  ;;  %6663 = vmatprep.subr.bf16.mxu0 %v17317_v55  ;;  %6855 = vmatpush1.bf16.msra.mxu1 %v17342_v1  ;;  %v17351_v60 = vld [vmem:[%s25092_s1 + $0x730] ss:$8 sps:$4 sm:$0xff]   ;;  %v17356_v1 = vld [vmem:[%s25092_s1 + $0x724] ss:$8 sps:$4 sm:$0xff]  }
 0x160   : > { %25608 = vst [vmem:[#allocation18_spill] sm:$0xff] %v19677_v14  ;;  %v19687_v20 = vadd.f32 %v3255_v44, %v3062_v24  ;;  %v3064_v54 = vpop.f32.mrf.mxu0  ;;  %6856 = vmatprep.subr.bf16.mxu1 %v17347_v52  ;;  %v17353_v14 = vld [vmem:[%s25092_s1 + $0x734] ss:$8 sps:$4 sm:$0xff]   ;;  %v17323_v44 = vld [vmem:[%s25092_s1 + $0x624] ss:$8 sps:$4 sm:$0xff]  }
 0x161   : > { %v3257_v0 = vpop.f32.mrf.mxu1 }
 0x162   : > { %25611 = vst [vmem:[#allocation144_spill] sm:$0xff] %v19687_v20  ;;  %v19695_v47 = vadd.f32 %v3257_v0, %v3064_v54  ;;  %v3066_v4 = vpop.f32.mrf.mxu0  ;;  %6664 = vmatpush1.bf16.msra.mxu0 %v17315_v29  ;;  %v25614_v0 = vld [vmem:[#allocation23_spill] sm:$0xff]  ;;  %v25616_v29 = vld [vmem:[#allocation25_spill] sm:$0xff] }
 0x163   : > { %v3259_v55 = vpop.f32.mrf.mxu1  ;;  %6665 = vmatprep.subr.bf16.mxu0 %v17320_v12  ;;  %6857 = vmatpush1.bf16.msra.mxu1 %v17345_v30  ;;  %v17326_v12 = vld [vmem:[%s25092_s1 + $0x614] ss:$8 sps:$4 sm:$0xff]   ;;  %v17354_v30 = vld [vmem:[%s25092_s1 + $0x720] ss:$8 sps:$4 sm:$0xff]  }
 0x164   : > { %25612 = vst [vmem:[#allocation145_spill] sm:$0xff] %v19695_v47  ;;  %v19706_v52 = vadd.f32 %v3259_v55, %v3066_v4  ;;  %v3070_v24 = vpop.f32.mrf.mxu0  ;;  %4978 = vmatmul.mubr.bf16.gmra.mxu0 %v25614_v0  ;;  %v17321_v47 = vld [vmem:[%s25092_s1 + $0x620] ss:$8 sps:$4 sm:$0xff]   ;;  %6858 = vmatprep.subr.bf16.mxu1 %v17353_v14  ;;  %v17329_v14 = vld [vmem:[%s25092_s1 + $0x604] ss:$8 sps:$4 sm:$0xff]  }
 0x165   : > { %v3263_v54 = vpop.f32.mrf.mxu1  ;;  %5171 = vmatmul.mubr.bf16.gmra.mxu1 %v19173_v27  ;;  %4987 = vmatprep.mubr.bf16.mxu0 %v25616_v29 }
 0x166   : > { %25613 = vst [vmem:[#allocation146_spill] sm:$0xff] %v19706_v52  ;;  %v19713_v20 = vadd.f32 %v3263_v54, %v3070_v24  ;;  %5180 = vmatprep.mubr.bf16.mxu1 %v19182_v18  ;;  %v3072_v4 = vpop.f32.mrf.mxu0  ;;  %6666 = vmatpush1.bf16.msra.mxu0 %v17318_v11  ;;  %v17324_v18 = vld [vmem:[%s25092_s1 + $0x610] ss:$8 sps:$4 sm:$0xff]  }
 0x167   : > { %v3265_v55 = vpop.f32.mrf.mxu1  ;;  %6667 = vmatprep.subr.bf16.mxu0 %v17323_v44  ;;  %6859 = vmatpush1.bf16.msra.mxu1 %v17351_v60  ;;  %v17360_v11 = vld [vmem:[%s25092_s1 + $0x710] ss:$8 sps:$4 sm:$0xff]  }
 0x168   : > { %25615 = vst [vmem:[#allocation23_spill] sm:$0xff] %v19713_v20  ;;  %v19723_v27 = vadd.f32 %v3265_v55, %v3072_v4  ;;  %v3074_v24 = vpop.f32.mrf.mxu0  ;;  %6860 = vmatprep.subr.bf16.mxu1 %v17356_v1  ;;  %v17362_v20 = vld [vmem:[%s25092_s1 + $0x714] ss:$8 sps:$4 sm:$0xff]   ;;  %v17365_v1 = vld [vmem:[%s25092_s1 + $0x704] ss:$8 sps:$4 sm:$0xff]  }
 0x169   : > { %v3267_v54 = vpop.f32.mrf.mxu1 }
 0x16a   : > { %25617 = vst [vmem:[#allocation25_spill] sm:$0xff] %v19723_v27  ;;  %v19731_v52 = vadd.f32 %v3267_v54, %v3074_v24  ;;  %v3076_v44 = vpop.f32.mrf.mxu0  ;;  %6668 = vmatpush1.bf16.msra.mxu0 %v17321_v47  ;;  %v25620_v54 = vld [vmem:[#allocation28_spill] sm:$0xff]  ;;  %v25622_v47 = vld [vmem:[#allocation30_spill] sm:$0xff] }
 0x16b   : > { %v3269_v60 = vpop.f32.mrf.mxu1  ;;  %6669 = vmatprep.subr.bf16.mxu0 %v17326_v12  ;;  %6861 = vmatpush1.bf16.msra.mxu1 %v17354_v30  ;;  %v17332_v12 = vld [vmem:[%s25092_s1 + $0x6f4] ss:$8 sps:$4 sm:$0xff]   ;;  %v17363_v30 = vld [vmem:[%s25092_s1 + $0x700] ss:$8 sps:$4 sm:$0xff]  }
 0x16c   : > { %25618 = vst [vmem:[#allocation147_spill] sm:$0xff] %v19731_v52  ;;  %v19742_v4 = vadd.f32 %v3269_v60, %v3076_v44  ;;  %v3080_v55 = vpop.f32.mrf.mxu0  ;;  %4988 = vmatmul.mubr.bf16.gmra.mxu0 %v25620_v54  ;;  %v17327_v52 = vld [vmem:[%s25092_s1 + $0x600] ss:$8 sps:$4 sm:$0xff]   ;;  %6862 = vmatprep.subr.bf16.mxu1 %v17362_v20  ;;  %v17341_v20 = vld [vmem:[%s25092_s1 + $0x6e4] ss:$8 sps:$4 sm:$0xff]  }
 0x16d   : > { %v3273_v24 = vpop.f32.mrf.mxu1  ;;  %5181 = vmatmul.mubr.bf16.gmra.mxu1 %v19220_v34  ;;  %4997 = vmatprep.mubr.bf16.mxu0 %v25622_v47  ;;  %v25628_v47 = vld [vmem:[#allocation99_spill] sm:$0xff] }
 0x16e   : > { %25619 = vst [vmem:[#allocation148_spill] sm:$0xff] %v19742_v4  ;;  %v19749_v27 = vadd.f32 %v3273_v24, %v3080_v55  ;;  %5190 = vmatprep.mubr.bf16.mxu1 %v19229_v3  ;;  %v3082_v44 = vpop.f32.mrf.mxu0  ;;  %6670 = vmatpush1.bf16.msra.mxu0 %v17324_v18  ;;  %v17330_v3 = vld [vmem:[%s25092_s1 + $0x6f0] ss:$8 sps:$4 sm:$0xff]  }
 0x16f   : > { %v3275_v60 = vpop.f32.mrf.mxu1  ;;  %6671 = vmatprep.subr.bf16.mxu0 %v17329_v14  ;;  %6863 = vmatpush1.bf16.msra.mxu1 %v17360_v11  ;;  %v17369_v18 = vld [vmem:[%s25092_s1 + $0x7f0] ss:$8 sps:$4 sm:$0xff]  }
 0x170   : > { %25621 = vst [vmem:[#allocation149_spill] sm:$0xff] %v19749_v27  ;;  %v19759_v34 = vadd.f32 %v3275_v60, %v3082_v44  ;;  %v3084_v55 = vpop.f32.mrf.mxu0  ;;  %6864 = vmatprep.subr.bf16.mxu1 %v17365_v1  ;;  %v17371_v27 = vld [vmem:[%s25092_s1 + $0x7f4] ss:$8 sps:$4 sm:$0xff]   ;;  %v17374_v1 = vld [vmem:[%s25092_s1 + $0x7e4] ss:$8 sps:$4 sm:$0xff]  }
 0x171   : > { %v3277_v24 = vpop.f32.mrf.mxu1 }
 0x172   : > { %25623 = vst [vmem:[#allocation150_spill] sm:$0xff] %v19759_v34  ;;  %v19767_v4 = vadd.f32 %v3277_v24, %v3084_v55  ;;  %v3086_v14 = vpop.f32.mrf.mxu0  ;;  %6672 = vmatpush1.bf16.msra.mxu0 %v17327_v52  ;;  %v25625_v24 = vld [vmem:[#allocation33_spill] sm:$0xff]  ;;  %v25627_v34 = vld [vmem:[#allocation35_spill] sm:$0xff] }
 0x173   : > { %v3279_v11 = vpop.f32.mrf.mxu1  ;;  %6673 = vmatprep.subr.bf16.mxu0 %v17332_v12  ;;  %6865 = vmatpush1.bf16.msra.mxu1 %v17363_v30  ;;  %v17339_v12 = vld [vmem:[%s25092_s1 + $0x6e0] ss:$8 sps:$4 sm:$0xff]  }
 0x174   : > { %25624 = vst [vmem:[#allocation151_spill] sm:$0xff] %v19767_v4  ;;  %v19778_v44 = vadd.f32 %v3279_v11, %v3086_v14  ;;  %v3090_v60 = vpop.f32.mrf.mxu0  ;;  %4998 = vmatmul.mubr.bf16.gmra.mxu0 %v25625_v24  ;;  %6866 = vmatprep.subr.bf16.mxu1 %v17371_v27  ;;  %v17350_v14 = vld [vmem:[%s25092_s1 + $0x6d4] ss:$8 sps:$4 sm:$0xff]   ;;  %v17372_v11 = vld [vmem:[%s25092_s1 + $0x7e0] ss:$8 sps:$4 sm:$0xff]  }
 0x175   : > { %v3283_v55 = vpop.f32.mrf.mxu1  ;;  %5191 = vmatmul.mubr.bf16.gmra.mxu1 %v19265_v15  ;;  %5007 = vmatprep.mubr.bf16.mxu0 %v25627_v34  ;;  %v17348_v27 = vld [vmem:[%s25092_s1 + $0x6d0] ss:$8 sps:$4 sm:$0xff]  }
 0x176   : > { %v19782_v4 = vadd.f32 %v3283_v55, %v3090_v60  ;;  %5200 = vmatprep.mubr.bf16.mxu1 %v25628_v47  ;;  %v3092_v52 = vpop.f32.mrf.mxu0  ;;  %6674 = vmatpush2.bf16.msra.mxu0 %v17330_v3 }
 0x177   : > { %v3285_v54 = vpop.f32.mrf.mxu1  ;;  %6675 = vmatprep.subr.bf16.mxu0 %v17341_v20  ;;  %6867 = vmatpush2.bf16.msra.mxu1 %v17369_v18  ;;  %v17359_v18 = vld [vmem:[%s25092_s1 + $0x6c4] ss:$8 sps:$4 sm:$0xff]  }
 0x178   : > { %25626 = vst [vmem:[#allocation33_spill] sm:$0xff] %v19782_v4  ;;  %v19789_v30 = vadd.f32 %v3285_v54, %v3092_v52  ;;  %v3094_v60 = vpop.f32.mrf.mxu0  ;;  %6868 = vmatprep.subr.bf16.mxu1 %v17374_v1  ;;  %v17380_v54 = vld [vmem:[%s25092_s1 + $0x7d4] ss:$8 sps:$4 sm:$0xff]   ;;  %v17378_v1 = vld [vmem:[%s25092_s1 + $0x7d0] ss:$8 sps:$4 sm:$0xff]  }
 0x179   : > { %v3287_v55 = vpop.f32.mrf.mxu1 }
 0x17a   : > { %25629 = vst [vmem:[#allocation35_spill] sm:$0xff] %v19789_v30  ;;  %v19797_v3 = vadd.f32 %v3287_v55, %v3094_v60  ;;  %v3096_v47 = vpop.f32.mrf.mxu0  ;;  %6676 = vmatpush2.bf16.msra.mxu0 %v17339_v12  ;;  %v25632_v60 = vld [vmem:[#allocation39_spill] sm:$0xff]  ;;  %v25633_v55 = vld [vmem:[#allocation101_spill] sm:$0xff] }
 0x17b   : > { %v3289_v15 = vpop.f32.mrf.mxu1  ;;  %6677 = vmatprep.subr.bf16.mxu0 %v17350_v14  ;;  %6869 = vmatpush2.bf16.msra.mxu1 %v17372_v11  ;;  %v25635_v14 = vld [vmem:[#allocation40_spill] sm:$0xff] }
 0x17c   : > { %25630 = vst [vmem:[#allocation152_spill] sm:$0xff] %v19797_v3  ;;  %v19805_v20 = vadd.f32 %v3289_v15, %v3096_v47  ;;  %v3100_v52 = vpop.f32.mrf.mxu0  ;;  %5008 = vmatmul.mubr.bf16.gmra.mxu0 %v25632_v60  ;;  %v17383_v15 = vld [vmem:[%s25092_s1 + $0x7c4] ss:$8 sps:$4 sm:$0xff]   ;;  %v17357_v30 = vld [vmem:[%s25092_s1 + $0x6c0] ss:$8 sps:$4 sm:$0xff]   ;;  %6870 = vmatprep.subr.bf16.mxu1 %v17380_v54 }
 0x17d   : > { %v3293_v12 = vpop.f32.mrf.mxu1  ;;  %5201 = vmatmul.mubr.bf16.gmra.mxu1 %v25633_v55  ;;  %5017 = vmatprep.mubr.bf16.mxu0 %v25635_v14  ;;  %v17389_v54 = vld [vmem:[%s25092_s1 + $0x7b4] ss:$8 sps:$4 sm:$0xff]  }
 0x17e   : > { %25631 = vst [vmem:[#allocation153_spill] sm:$0xff] %v19805_v20  ;;  %v19818_v47 = vadd.f32 %v3293_v12, %v3100_v52  ;;  %v25636_v20 = vld [vmem:[#allocation102_spill] sm:$0xff]  ;;  %v3102_v11 = vpop.f32.mrf.mxu0  ;;  %6678 = vmatpush2.bf16.msra.mxu0 %v17348_v27  ;;  %v17381_v12 = vld [vmem:[%s25092_s1 + $0x7c0] ss:$8 sps:$4 sm:$0xff]  }
 0x17f   : > { %5210 = vmatprep.mubr.bf16.mxu1 %v25636_v20  ;;  %v3295_v3 = vpop.f32.mrf.mxu1  ;;  %6679 = vmatprep.subr.bf16.mxu0 %v17359_v18  ;;  %v17368_v52 = vld [vmem:[%s25092_s1 + $0x6b4] ss:$8 sps:$4 sm:$0xff]  }
 0x180   : > { %25634 = vst [vmem:[#allocation39_spill] sm:$0xff] %v19818_v47  ;;  %v19825_v4 = vadd.f32 %v3295_v3, %v3102_v11  ;;  %6871 = vmatpush2.bf16.msra.mxu1 %v17378_v1  ;;  %v3104_v20 = vpop.f32.mrf.mxu0  ;;  %v17366_v3 = vld [vmem:[%s25092_s1 + $0x6b0] ss:$8 sps:$4 sm:$0xff]   ;;  %v17377_v1 = vld [vmem:[%s25092_s1 + $0x6a4] ss:$8 sps:$4 sm:$0xff]  }
 0x181   : > { %v3297_v55 = vpop.f32.mrf.mxu1  ;;  %6872 = vmatprep.subr.bf16.mxu1 %v17383_v15  ;;  %v25640_v15 = vld [vmem:[#allocation44_spill] sm:$0xff]  ;;  %v25642_v11 = vld [vmem:[#allocation46_spill] sm:$0xff] }
 0x182   : > { %25637 = vst [vmem:[#allocation154_spill] sm:$0xff] %v19825_v4  ;;  %v19833_v27 = vadd.f32 %v3297_v55, %v3104_v20  ;;  %v3106_v47 = vpop.f32.mrf.mxu0  ;;  %6680 = vmatpush2.bf16.msra.mxu0 %v17357_v30  ;;  %v17387_v30 = vld [vmem:[%s25092_s1 + $0x7b0] ss:$8 sps:$4 sm:$0xff]  }
 0x183   : > { %v3299_v14 = vpop.f32.mrf.mxu1  ;;  %6681 = vmatprep.subr.bf16.mxu0 %v17368_v52 }
 0x184   : > { %25638 = vst [vmem:[#allocation155_spill] sm:$0xff] %v19833_v27  ;;  %v19841_v18 = vadd.f32 %v3299_v14, %v3106_v47  ;;  %6873 = vmatpush2.bf16.msra.mxu1 %v17381_v12  ;;  %v3110_v20 = vpop.f32.mrf.mxu0  ;;  %5018 = vmatmul.mubr.bf16.gmra.mxu0 %v25640_v15  ;;  %v17392_v47 = vld [vmem:[%s25092_s1 + $0x7a4] ss:$8 sps:$4 sm:$0xff]  }
 0x185   : > { %v3303_v55 = vpop.f32.mrf.mxu1  ;;  %5211 = vmatmul.mubr.bf16.gmra.mxu1 %v19362_v5  ;;  %5027 = vmatprep.mubr.bf16.mxu0 %v25642_v11 }
 0x186   : > { %25639 = vst [vmem:[#allocation156_spill] sm:$0xff] %v19841_v18  ;;  %v19854_v14 = vadd.f32 %v3303_v55, %v3110_v20  ;;  %5220 = vmatprep.mubr.bf16.mxu1 %v19371_v36  ;;  %v3112_v52 = vpop.f32.mrf.mxu0  ;;  %6682 = vmatpush2.bf16.msra.mxu0 %v17366_v3  ;;  %v17375_v18 = vld [vmem:[%s25092_s1 + $0x6a0] ss:$8 sps:$4 sm:$0xff]   ;;  %v17386_v20 = vld [vmem:[%s25092_s1 + $0x694] ss:$8 sps:$4 sm:$0xff]  }
 0x187   : > { %v3305_v12 = vpop.f32.mrf.mxu1  ;;  %6874 = vmatprep.subr.bf16.mxu1 %v17389_v54  ;;  %6683 = vmatprep.subr.bf16.mxu0 %v17377_v1  ;;  %v17390_v55 = vld [vmem:[%s25092_s1 + $0x7a0] ss:$8 sps:$4 sm:$0xff]   ;;  %v17384_v54 = vld [vmem:[%s25092_s1 + $0x690] ss:$8 sps:$4 sm:$0xff]   ;;  %v17398_v1 = vld [vmem:[%s25092_s1 + $0x794] ss:$8 sps:$4 sm:$0xff]  }
 0x188   : > { %25641 = vst [vmem:[#allocation44_spill] sm:$0xff] %v19854_v14  ;;  %v19861_v27 = vadd.f32 %v3305_v12, %v3112_v52  ;;  %6875 = vmatpush2.bf16.msra.mxu1 %v17387_v30  ;;  %v3114_v36 = vpop.f32.mrf.mxu0  ;;  %v25646_v52 = vld [vmem:[#allocation49_spill] sm:$0xff]  ;;  %v25648_v12 = vld [vmem:[#allocation50_spill] sm:$0xff] }
 0x189   : > { %v3307_v5 = vpop.f32.mrf.mxu1  ;;  %6876 = vmatprep.subr.bf16.mxu1 %v17392_v47 }
 0x18a   : > { %25643 = vst [vmem:[#allocation46_spill] sm:$0xff] %v19861_v27  ;;  %v19869_v3 = vadd.f32 %v3307_v5, %v3114_v36  ;;  %v3116_v14 = vpop.f32.mrf.mxu0  ;;  %6684 = vmatpush2.bf16.msra.mxu0 %v17375_v18  ;;  %v17395_v5 = vld [vmem:[%s25092_s1 + $0x684] ss:$8 sps:$4 sm:$0xff]   ;;  %v17396_v36 = vld [vmem:[%s25092_s1 + $0x790] ss:$8 sps:$4 sm:$0xff]  }
 0x18b   : > { %v3309_v4 = vpop.f32.mrf.mxu1  ;;  %6685 = vmatprep.subr.bf16.mxu0 %v17386_v20 }
 0x18c   : > { %25644 = vst [vmem:[#allocation157_spill] sm:$0xff] %v19869_v3  ;;  %v19877_v30 = vadd.f32 %v3309_v4, %v3116_v14  ;;  %6877 = vmatpush2.bf16.msra.mxu1 %v17390_v55  ;;  %v3120_v18 = vpop.f32.mrf.mxu0  ;;  %5028 = vmatmul.mubr.bf16.gmra.mxu0 %v25646_v52  ;;  %v17401_v4 = vld [vmem:[%s25092_s1 + $0x784] ss:$8 sps:$4 sm:$0xff]  }
 0x18d   : > { %v3313_v47 = vpop.f32.mrf.mxu1  ;;  %5221 = vmatmul.mubr.bf16.gmra.mxu1 %v19408_v23  ;;  %5037 = vmatprep.mubr.bf16.mxu0 %v25648_v12 }
 0x18e   : > { %25645 = vst [vmem:[#allocation158_spill] sm:$0xff] %v19877_v30  ;;  %v19890_v14 = vadd.f32 %v3313_v47, %v3120_v18  ;;  %5230 = vmatprep.mubr.bf16.mxu1 %v19413_v8  ;;  %v3122_v20 = vpop.f32.mrf.mxu0  ;;  %6686 = vmatpush2.bf16.msra.mxu0 %v17384_v54  ;;  %v17393_v30 = vld [vmem:[%s25092_s1 + $0x680] ss:$8 sps:$4 sm:$0xff]   ;;  %v17404_v47 = vld [vmem:[%s25092_s1 + $0x874] ss:$8 sps:$4 sm:$0xff]  }
 0x18f   : > { %v3315_v55 = vpop.f32.mrf.mxu1  ;;  %6878 = vmatprep.subr.bf16.mxu1 %v17398_v1  ;;  %6687 = vmatprep.subr.bf16.mxu0 %v17395_v5  ;;  %v17399_v18 = vld [vmem:[%s25092_s1 + $0x780] ss:$8 sps:$4 sm:$0xff]  }
 0x190   : > { %25647 = vst [vmem:[#allocation49_spill] sm:$0xff] %v19890_v14  ;;  %v19897_v3 = vadd.f32 %v3315_v55, %v3122_v20  ;;  %6879 = vmatpush2.bf16.msra.mxu1 %v17396_v36  ;;  %v3124_v8 = vpop.f32.mrf.mxu0  ;;  %v25651_v20 = vld [vmem:[#allocation54_spill] sm:$0xff] }
 0x191   : > { %v3317_v23 = vpop.f32.mrf.mxu1  ;;  %6880 = vmatprep.subr.bf16.mxu1 %v17401_v4  ;;  %v25653_v4 = vld [vmem:[#allocation55_spill] sm:$0xff] }
 0x192   : > { %v19905_v54 = vadd.f32 %v3317_v23, %v3124_v8  ;;  %v3126_v14 = vpop.f32.mrf.mxu0  ;;  %6688 = vmatpush2.bf16.msra.mxu0 %v17393_v30 }
 0x193   : > { %v3319_v27 = vpop.f32.mrf.mxu1  ;;  %7043 = vmatprep.subr.bf16.mxu0 %v17404_v47 }
 0x194   : > { %v19907_v1 = vadd.f32 %v3319_v27, %v3126_v14  ;;  %6881 = vmatpush2.bf16.msra.mxu1 %v17399_v18  ;;  %v3356_v5 = vpop.f32.mrf.mxu0  ;;  %5038 = vmatmul.mubr.bf16.gmra.mxu0 %v25651_v20  ;;  %v25657_v18 = vld [vmem:[#allocation112_spill] sm:$0xff] }
 0x195   : > { %v19909_v36 = vpop.f32.mrf.mxu1  ;;  %5231 = vmatmul.mubr.bf16.gmra.mxu1 %v19439_v63  ;;  %v19914_v55 = vadd.f32 %v3356_v5, %v19432_v16  ;;  %5047 = vmatprep.mubr.bf16.mxu0 %v25653_v4  ;;  %v25660_v16 = vld [vmem:[#allocation113_spill] sm:$0xff] }
 0x196   : > { %25649 = vst [vmem:[#allocation50_spill] sm:$0xff] %v19907_v1  ;;  %25650 = vst [vmem:[#allocation159_spill] sm:$0xff] %v19909_v36  ;;  %5240 = vmatprep.mubr.bf16.mxu1 %v19442_v32  ;;  %v3358_v23 = vpop.f32.mrf.mxu0  ;;  %v25663_v1 = vld [vmem:[#allocation59_spill] sm:$0xff] }
 0x197   : > { %25652 = vst [vmem:[#allocation54_spill] sm:$0xff] %v19914_v55  ;;  %v19918_v8 = vpop.f32.mrf.mxu1  ;;  %v19921_v27 = vadd.f32 %v3358_v23, %v19436_v35  ;;  %v25664_v35 = vld [vmem:[#allocation114_spill] sm:$0xff] }
 0x198   : > { %25654 = vst [vmem:[#allocation55_spill] sm:$0xff] %v19918_v8  ;;  %v3360_v30 = vpop.f32.mrf.mxu0 }
 0x199   : > { %25655 = vst [vmem:[#allocation160_spill] sm:$0xff] %v19921_v27  ;;  %v19923_v14 = vpop.f32.mrf.mxu1  ;;  %v19926_v47 = vadd.f32 %v3360_v30, %v25657_v18  ;;  %v25666_v27 = vld [vmem:[#allocation61_spill] sm:$0xff] }
 0x19a   : > { %25656 = vst [vmem:[#allocation161_spill] sm:$0xff] %v19923_v14  ;;  %v3362_v63 = vpop.f32.mrf.mxu0 }
 0x19b   : > { %25658 = vst [vmem:[#allocation112_spill] sm:$0xff] %v19926_v47  ;;  %v19928_v36 = vpop.f32.mrf.mxu1  ;;  %v19931_v5 = vadd.f32 %v3362_v63, %v25660_v16  ;;  %v25668_v47 = vld [vmem:[#allocation116_spill] sm:$0xff] }
 0x19c   : > { %25659 = vst [vmem:[#allocation162_spill] sm:$0xff] %v19928_v36  ;;  %v3366_v55 = vpop.f32.mrf.mxu0  ;;  %5048 = vmatmul.mubr.bf16.gmra.mxu0 %v25663_v1 }
 0x19d   : > { %25661 = vst [vmem:[#allocation113_spill] sm:$0xff] %v19931_v5  ;;  %v19933_v32 = vpop.f32.mrf.mxu1  ;;  %5241 = vmatmul.mubr.bf16.gmra.mxu1 %v19468_v45  ;;  %v19938_v23 = vadd.f32 %v3366_v55, %v25664_v35  ;;  %5057 = vmatprep.mubr.bf16.mxu0 %v25666_v27 }
 0x19e   : > { %25662 = vst [vmem:[#allocation163_spill] sm:$0xff] %v19933_v32  ;;  %5250 = vmatprep.mubr.bf16.mxu1 %v19473_v50  ;;  %v3368_v30 = vpop.f32.mrf.mxu0  ;;  %v25671_v32 = vld [vmem:[#allocation118_spill] sm:$0xff]  ;;  %v25674_v50 = vld [vmem:[#allocation120_spill] sm:$0xff] }
 0x19f   : > { %25665 = vst [vmem:[#allocation59_spill] sm:$0xff] %v19938_v23  ;;  %v19942_v18 = vpop.f32.mrf.mxu1  ;;  %v19945_v63 = vadd.f32 %v3368_v30, %v25668_v47  ;;  %v25677_v47 = vld [vmem:[#allocation64_spill] sm:$0xff]  ;;  %v25678_v30 = vld [vmem:[#allocation121_spill] sm:$0xff] }
 0x1a0   : > { %25667 = vst [vmem:[#allocation114_spill] sm:$0xff] %v19942_v18  ;;  %v3370_v16 = vpop.f32.mrf.mxu0 }
 0x1a1   : > { %25669 = vst [vmem:[#allocation61_spill] sm:$0xff] %v19945_v63  ;;  %v19947_v5 = vpop.f32.mrf.mxu1  ;;  %v19950_v45 = vadd.f32 %v3370_v16, %v25671_v32  ;;  %v25680_v32 = vld [vmem:[#allocation66_spill] sm:$0xff] }
 0x1a2   : > { %25670 = vst [vmem:[#allocation116_spill] sm:$0xff] %v19947_v5  ;;  %v3372_v55 = vpop.f32.mrf.mxu0  ;;  %v19977_v5 = vld [vmem:[%s18167_s30 + $0x1f0] sm:$0xff] }
 0x1a3   : > { %25672 = vst [vmem:[#allocation118_spill] sm:$0xff] %v19950_v45  ;;  %v19952_v35 = vpop.f32.mrf.mxu1  ;;  %v19955_v23 = vadd.f32 %v3372_v55, %v25674_v50  ;;  %v25682_v50 = vld [vmem:[#allocation123_spill] sm:$0xff] }
 0x1a4   : > { %25673 = vst [vmem:[#allocation164_spill] sm:$0xff] %v19952_v35  ;;  %v3376_v18 = vpop.f32.mrf.mxu0  ;;  %5058 = vmatmul.mubr.bf16.gmra.mxu0 %v25677_v47  ;;  %v19969_v35 = vld [vmem:[%s18167_s30 + $0x1f8] sm:$0xff] }
 0x1a5   : > { %25675 = vst [vmem:[#allocation120_spill] sm:$0xff] %v19955_v23  ;;  %v19957_v36 = vpop.f32.mrf.mxu1  ;;  %5251 = vmatmul.mubr.bf16.gmra.mxu1 %v19498_v61  ;;  %v19962_v63 = vadd.f32 %v3376_v18, %v25678_v30  ;;  %5067 = vmatprep.mubr.bf16.mxu0 %v25680_v32  ;;  %v1213_v23 = vld [vmem:[%s18167_s30 + $0x1e0] sm:$0xfe]  ;;  %v25689_v32 = vld [vmem:[#allocation69_spill] sm:$0xff] }
 0x1a6   : > { %25676 = vst [vmem:[#allocation165_spill] sm:$0xff] %v19957_v36  ;;  %5260 = vmatprep.mubr.bf16.mxu1 %v19505_v43  ;;  %v3378_v16 = vpop.f32.mrf.mxu0  ;;  %v1214_v36 = vld [vmem:[%s18167_s30 + $0x1e8] sm:$0xfe] }
 0x1a7   : > { %25679 = vst [vmem:[#allocation121_spill] sm:$0xff] %v19962_v63  ;;  %v19966_v45 = vpop.f32.mrf.mxu1  ;;  %v19972_v55 = vadd.f32 %v3378_v16, %v25682_v50  ;;  %v16877_v63 = vpack.c.bf16 %v1214_v36, %v1213_v23 }
 0x1a8   : > { %25681 = vst [vmem:[#allocation166_spill] sm:$0xff] %v19966_v45  ;;  %v3380_v61 = vpop.f32.mrf.mxu0  ;;  %v16878_v45 = vpack.c.bf16 %v19969_v35, %v19977_v5 }
 0x1a9   : > { %25683 = vst [vmem:[#allocation123_spill] sm:$0xff] %v19972_v55  ;;  %v19979_v47 = vpop.f32.mrf.mxu1  ;;  %v19982_v18 = vadd.f32 %v3380_v61, %v19502_v38  ;;  %v25692_v38 = vld [vmem:[#allocation71_spill] sm:$0xff] }
 0x1aa   : > { %25684 = vst [vmem:[#allocation167_spill] sm:$0xff] %v19979_v47  ;;  %v3382_v30 = vpop.f32.mrf.mxu0  ;;  %v25690_v47 = vld [vmem:[#allocation127_spill] sm:$0xff] }
 0x1ab   : > { %25685 = vst [vmem:[#allocation168_spill] sm:$0xff] %v19982_v18  ;;  %v19984_v43 = vpop.f32.mrf.mxu1  ;;  %v19989_v16 = vadd.f32 %v3382_v30, %v19508_v2  ;;  %v1666_v18 = vshrl.u32 %v16877_v63, 16  ;;  %v1669_v2 = vshll.u32 %v16877_v63, 16  ;;  %v1675_v30 = vshll.u32 %v16878_v45, 16 }
 0x1ac   : > { %25686 = vst [vmem:[#allocation169_spill] sm:$0xff] %v19984_v43  ;;  %v3386_v50 = vpop.f32.mrf.mxu0  ;;  %5068 = vmatmul.mubr.bf16.gmra.mxu0 %v25689_v32  ;;  %v25694_v43 = vld [vmem:[#allocation128_spill] sm:$0xff] }
 0x1ad   : > { %25687 = vst [vmem:[#allocation170_spill] sm:$0xff] %v19989_v16  ;;  %v19991_v55 = vpop.f32.mrf.mxu1  ;;  %5261 = vmatmul.mubr.bf16.gmra.mxu1 %v19527_v7  ;;  %v19996_v61 = vadd.f32 %v3386_v50, %v25690_v47  ;;  %5077 = vmatprep.mubr.bf16.mxu0 %v25692_v38  ;;  %v1679_v16 = vshrl.u32 %v16878_v45, 16  ;;  %v1677_v38 = vrot.slane %v1675_v30, 5 }
 0x1ae   : > { %25688 = vst [vmem:[#allocation171_spill] sm:$0xff] %v19991_v55  ;;  %5270 = vmatprep.mubr.bf16.mxu1 %v19530_v51  ;;  %v3388_v36 = vpop.f32.mrf.mxu0  ;;  %v1668_v51 = vrot.slane %v1666_v18, 4 }
 0x1af   : > { %25691 = vst [vmem:[#allocation127_spill] sm:$0xff] %v19996_v61  ;;  %v20000_v23 = vpop.f32.mrf.mxu1  ;;  %v20003_v55 = vadd.f32 %v3388_v36, %v25694_v43  ;;  %v1671_v61 = vrot.slane %v1669_v2, 5  ;;  %v25697_v43 = vld [vmem:[#allocation74_spill] sm:$0xff]  ;;  %v25698_v36 = vld [vmem:[#allocation132_spill] sm:$0xff] }
 0x1b0   : > { %25693 = vst [vmem:[#allocation172_spill] sm:$0xff] %v20000_v23  ;;  %v3390_v32 = vpop.f32.mrf.mxu0  ;;  %v1681_v23 = vrot.slane %v1679_v16, 4 }
 0x1b1   : > { %v20005_v14 = vpop.f32.mrf.mxu1  ;;  %v20008_v47 = vadd.f32 %v3390_v32, %v19532_v59  ;;  %v25700_v32 = vld [vmem:[#allocation76_spill] sm:$0xff]  ;;  %v1672_v16 = vor.u32 %v1671_v61, %v1668_v51 }
 0x1b2   : > { %v3392_v50 = vpop.f32.mrf.mxu0 }
 0x1b3   : > { %v20010_v7 = vpop.f32.mrf.mxu1  ;;  %v20013_v63 = vadd.f32 %v3392_v50, %v19534_v37  ;;  %v1682_v37 = vor.u32 %v1681_v23, %v1677_v38 }
 0x1b4   : > { %v3396_v45 = vpop.f32.mrf.mxu0  ;;  %5078 = vmatmul.mubr.bf16.gmra.mxu0 %v25697_v43 }
 0x1b5   : > { %25695 = vst [vmem:[#allocation128_spill] sm:$0xff] %v20013_v63  ;;  %v20015_v8 = vpop.f32.mrf.mxu1  ;;  %5271 = vmatmul.mubr.bf16.gmra.mxu1 %v19552_v41  ;;  %v20020_v59 = vadd.f32 %v3396_v45, %v25698_v36  ;;  %5087 = vmatprep.mubr.bf16.mxu0 %v25700_v32 }
 0x1b6   : > { %25696 = vst [vmem:[#allocation173_spill] sm:$0xff] %v20015_v8  ;;  %5280 = vmatprep.mubr.bf16.mxu1 %v19557_v25  ;;  %v3398_v18 = vpop.f32.mrf.mxu0  ;;  %v1683_v8 = vrot.slane %v1682_v37, 4 }
 0x1b7   : > { %25699 = vst [vmem:[#allocation74_spill] sm:$0xff] %v20020_v59  ;;  %v20024_v2 = vpop.f32.mrf.mxu1  ;;  %v20027_v30 = vadd.f32 %v3398_v18, %v19549_v56  ;;  %v1673_v59 = vrot.slane %v1672_v16, 4  ;;  %v25701_v56 = vld [vmem:[#allocation79_spill] sm:$0xff] }
 0x1b8   : > { %v3400_v50 = vpop.f32.mrf.mxu0  ;;  %v20054_v37 = vsel %vm18622_vm14, %v1683_v8, 0 }
 0x1b9   : > { %v20029_v63 = vpop.f32.mrf.mxu1  ;;  %v20032_v41 = vadd.f32 %v3400_v50, %v19554_v49  ;;  %v25702_v49 = vld [vmem:[#allocation81_spill] sm:$0xff]  ;;  %25703 = vst [vmem:[#allocation132_spill] sm:$0xff] %v20054_v37 }
 0x1ba   : > { %v3402_v45 = vpop.f32.mrf.mxu0 }
 0x1bb   : > { %v20034_v36 = vpop.f32.mrf.mxu1  ;;  %v20037_v25 = vadd.f32 %v3402_v45, %v19559_v22  ;;  %v1678_v22 = vsel %vm19024_vm0, %v1673_v59, %v1677_v38 }
 0x1bc   : > { %v3406_v51 = vpop.f32.mrf.mxu0  ;;  %5088 = vmatmul.mubr.bf16.gmra.mxu0 %v25701_v56  ;;  %v20069_v62 = vcombine.high %v1678_v22, %v20054_v37 }
 0x1bd   : > { %v20039_v61 = vpop.f32.mrf.mxu1  ;;  %5281 = vmatmul.mubr.bf16.gmra.mxu1 %v19582_v33  ;;  %v20044_v23 = vadd.f32 %v3406_v51, %v19563_v9  ;;  %5097 = vmatprep.mubr.bf16.mxu0 %v25702_v49 }
 0x1be   : > { %5290 = vmatprep.mubr.bf16.mxu1 %v19587_v48  ;;  %v3408_v18 = vpop.f32.mrf.mxu0  ;;  %v17882_v48 = vld [vmem:[%s18167_s30 + $0x1e8] sm:$0xff]  ;;  %25704 = vst [vmem:[#allocation76_spill] sm:$0xff] %v20069_v62 }
 0x1bf   : > { %v20048_v16 = vpop.f32.mrf.mxu1  ;;  %v20057_v50 = vadd.f32 %v3408_v18, %v19579_v13  ;;  %v20066_v33 = vpack.c.bf16 %v19969_v35, %v17882_v48 }
 0x1c0   : > { %v3410_v45 = vpop.f32.mrf.mxu0 }
 0x1c1   : > { %v20059_v9 = vpop.f32.mrf.mxu1  ;;  %v20062_v51 = vadd.f32 %v3410_v45, %v19584_v26 }
 0x1c2   : > { %v3412_v38 = vpop.f32.mrf.mxu0 }
 0x1c3   : > { %v20071_v8 = vpop.f32.mrf.mxu1  ;;  %v20074_v13 = vadd.f32 %v3412_v38, %v19592_v31 }
 0x1c4   : > { %v3416_v59 = vpop.f32.mrf.mxu0  ;;  %5098 = vmatmul.mubr.bf16.gmra.mxu0 %v25706_v39 }
 0x1c5   : > { %25705 = vst [vmem:[#allocation79_spill] sm:$0xff] %v20074_v13  ;;  %v20076_v18 = vpop.f32.mrf.mxu1  ;;  %5291 = vmatmul.mubr.bf16.gmra.mxu1 %v19603_v46  ;;  %v20081_v26 = vadd.f32 %v3416_v59, %v19596_v40  ;;  %5107 = vmatprep.mubr.bf16.mxu0 %v20066_v33  ;;  %v20093_v13 = vcombine.low %v1678_v22, %v20054_v37  ;;  %v17883_v46 = vld [vmem:[%s18167_s30 + $0x1e0] sm:$0xff] }
 0x1c6   : > { %5300 = vmatprep.mubr.bf16.mxu1 %v20069_v62  ;;  %v3418_v48 = vpop.f32.mrf.mxu0  ;;  %v20097_v40 = vpack.c.bf16 %v19977_v5, %v17883_v46  ;;  %v25710_v46 = vld [vmem:[#allocation15_spill] sm:$0xff] }
 0x1c7   : > { %25707 = vst [vmem:[#allocation81_spill] sm:$0xff] %v20081_v26  ;;  %v20085_v35 = vpop.f32.mrf.mxu1  ;;  %v20088_v31 = vadd.f32 %v3418_v48, %v19600_v6  ;;  %25709 = vst [vmem:[#allocation174_spill] sm:$0xff] %v20093_v13 }
 0x1c8   : > { %25708 = vst [vmem:[#allocation82_spill] sm:$0xff] %v20085_v35  ;;  %v3420_v45 = vpop.f32.mrf.mxu0 }
 0x1c9   : > { %v20090_v38 = vpop.f32.mrf.mxu1  ;;  %v20100_v59 = vadd.f32 %v3420_v45, %v19608_v53 }
 0x1ca   : > { %v3422_v62 = vpop.f32.mrf.mxu0 }
 0x1cb   : > { %v20102_v26 = vpop.f32.mrf.mxu1  ;;  %v20105_v35 = vadd.f32 %v3422_v62, %v19610_v57 }
 0x1cc   : > { %v3426_v6 = vpop.f32.mrf.mxu0  ;;  %5108 = vmatmul.mubr.bf16.gmra.mxu0 %v20097_v40 }
 0x1cd   : > { %v20107_v48 = vpop.f32.mrf.mxu1  ;;  %5301 = vmatmul.mubr.bf16.gmra.mxu1 %v20093_v13  ;;  %v20112_v22 = vadd.f32 %v3426_v6, %v19614_v28  ;;  %6689 = vmatprep.mubr.bf16.mxu0 %v25710_v46  ;;  %v17402_v28 = vld [vmem:[%s25092_s1 + $0x870] ss:$8 sps:$4 sm:$0xff]  }
 0x1ce   : > { %6882 = vmatprep.mubr.bf16.mxu1 %v25603_v21  ;;  %v3428_v53 = vpop.f32.mrf.mxu0  ;;  %v17407_v21 = vld [vmem:[%s25092_s1 + $0x864] ss:$8 sps:$4 sm:$0xff]  }
 0x1cf   : > { %v20116_v5 = vpop.f32.mrf.mxu1  ;;  %v20119_v62 = vadd.f32 %v3428_v53, %v19618_v58 }
 0x1d0   : > { %v3430_v57 = vpop.f32.mrf.mxu0 }
 0x1d1   : > { %25711 = vst [vmem:[#allocation15_spill] sm:$0xff] %v20119_v62  ;;  %v20121_v45 = vpop.f32.mrf.mxu1  ;;  %v20124_v37 = vadd.f32 %v3430_v57, %v19626_v19  ;;  %v25716_v62 = vld [vmem:[#allocation17_spill] sm:$0xff]  ;;  %v25718_v57 = vld [vmem:[#allocation19_spill] sm:$0xff] }
 0x1d2   : > { %v3432_v6 = vpop.f32.mrf.mxu0 }
 0x1d3   : > { %25712 = vst [vmem:[#allocation175_spill] sm:$0xff] %v20124_v37  ;;  %v20129_v46 = vpop.f32.mrf.mxu1  ;;  %v20135_v58 = vadd.f32 %v3432_v6, %v19634_v42  ;;  %v17405_v37 = vld [vmem:[%s25092_s1 + $0x860] ss:$8 sps:$4 sm:$0xff]  }
 0x1d4   : > { %25713 = vst [vmem:[#allocation176_spill] sm:$0xff] %v20129_v46  ;;  %v3436_v53 = vpop.f32.mrf.mxu0  ;;  %6690 = vmatmul.mubr.bf16.vlgmr.msra.gmra.mxu0 %v25716_v62  ;;  %v25720_v6 = vld [vmem:[#allocation20_spill] sm:$0xff]  ;;  %v25721_v62 = vld [vmem:[#allocation14_spill] sm:$0xff] }
 0x1d5   : > { %25714 = vst [vmem:[#allocation177_spill] sm:$0xff] %v20135_v58  ;;  %v20137_v13 = vpop.f32.mrf.mxu1  ;;  %6883 = vmatmul.mubr.bf16.vlgmr.msra.gmra.mxu1 %v25607_v10  ;;  %v20142_v19 = vadd.f32 %v3436_v53, %v19641_v17  ;;  %7044 = vmatpush1.bf16.msra.mxu0 %v17402_v28  ;;  %v17410_v10 = vld [vmem:[%s25092_s1 + $0x854] ss:$8 sps:$4 sm:$0xff]  }
 0x1d6   : > { %25715 = vst [vmem:[#allocation178_spill] sm:$0xff] %v20137_v13  ;;  %6699 = vmatprep.mubr.bf16.mxu0 %v25718_v57  ;;  %v3438_v46 = vpop.f32.mrf.mxu0  ;;  %6892 = vmatprep.mubr.bf16.mxu1 %v25720_v6  ;;  %v25723_v57 = vld [vmem:[#allocation142_spill] sm:$0xff]  ;;  %v25725_v6 = vld [vmem:[#allocation143_spill] sm:$0xff] }
 0x1d7   : > { %25717 = vst [vmem:[#allocation17_spill] sm:$0xff] %v20142_v19  ;;  %v20148_v42 = vpop.f32.mrf.mxu1  ;;  %7045 = vmatprep.subr.bf16.mxu0 %v17407_v21  ;;  %v20155_v17 = vadd.f32 %v3438_v46, %v25721_v62  ;;  %v17408_v21 = vld [vmem:[%s25092_s1 + $0x850] ss:$8 sps:$4 sm:$0xff]   ;;  %v17413_v46 = vld [vmem:[%s25092_s1 + $0x844] ss:$8 sps:$4 sm:$0xff]  }
 0x1d8   : > { %25719 = vst [vmem:[#allocation19_spill] sm:$0xff] %v20148_v42  ;;  %v3440_v28 = vpop.f32.mrf.mxu0 }
 0x1d9   : > { %25722 = vst [vmem:[#allocation20_spill] sm:$0xff] %v20155_v17  ;;  %v20157_v53 = vpop.f32.mrf.mxu1  ;;  %v20160_v19 = vadd.f32 %v3440_v28, %v25723_v57  ;;  %7046 = vmatpush1.bf16.msra.mxu0 %v17405_v37  ;;  %v25728_v28 = vld [vmem:[#allocation22_spill] sm:$0xff] }
 0x1da   : > { %v3442_v58 = vpop.f32.mrf.mxu0  ;;  %7047 = vmatprep.subr.bf16.mxu0 %v17410_v10  ;;  %v25729_v37 = vld [vmem:[#allocation18_spill] sm:$0xff] }
 0x1db   : > { %25724 = vst [vmem:[#allocation14_spill] sm:$0xff] %v20160_v19  ;;  %v20162_v13 = vpop.f32.mrf.mxu1  ;;  %v20168_v42 = vadd.f32 %v3442_v58, %v25725_v6  ;;  %v25731_v19 = vld [vmem:[#allocation24_spill] sm:$0xff] }
 0x1dc   : > { %v3446_v62 = vpop.f32.mrf.mxu0  ;;  %6700 = vmatmul.mubr.bf16.gmra.mxu0 %v25728_v28  ;;  %v17411_v6 = vld [vmem:[%s25092_s1 + $0x840] ss:$8 sps:$4 sm:$0xff]  }
 0x1dd   : > { %25726 = vst [vmem:[#allocation142_spill] sm:$0xff] %v20168_v42  ;;  %v20173_v17 = vpop.f32.mrf.mxu1  ;;  %6893 = vmatmul.mubr.bf16.gmra.mxu1 %v25614_v0  ;;  %v20178_v57 = vadd.f32 %v3446_v62, %v25729_v37  ;;  %6709 = vmatprep.mubr.bf16.mxu0 %v25731_v19  ;;  %v25733_v42 = vld [vmem:[#allocation144_spill] sm:$0xff]  ;;  %v17416_v0 = vld [vmem:[%s25092_s1 + $0x834] ss:$8 sps:$4 sm:$0xff]  }
 0x1de   : > { %25727 = vst [vmem:[#allocation143_spill] sm:$0xff] %v20173_v17  ;;  %6902 = vmatprep.mubr.bf16.mxu1 %v25616_v29  ;;  %v3448_v58 = vpop.f32.mrf.mxu0  ;;  %7048 = vmatpush1.bf16.msra.mxu0 %v17408_v21  ;;  %v25736_v29 = vld [vmem:[#allocation145_spill] sm:$0xff] }
 0x1df   : > { %25730 = vst [vmem:[#allocation22_spill] sm:$0xff] %v20178_v57  ;;  %v20182_v10 = vpop.f32.mrf.mxu1  ;;  %v20188_v17 = vadd.f32 %v3448_v58, %v25733_v42  ;;  %7049 = vmatprep.subr.bf16.mxu0 %v17413_v46  ;;  %v17414_v42 = vld [vmem:[%s25092_s1 + $0x830] ss:$8 sps:$4 sm:$0xff]  }
 0x1e0   : > { %25732 = vst [vmem:[#allocation18_spill] sm:$0xff] %v20182_v10  ;;  %v3450_v62 = vpop.f32.mrf.mxu0  ;;  %v25739_v58 = vld [vmem:[#allocation146_spill] sm:$0xff] }
 0x1e1   : > { %25734 = vst [vmem:[#allocation24_spill] sm:$0xff] %v20188_v17  ;;  %v20193_v19 = vpop.f32.mrf.mxu1  ;;  %v20196_v28 = vadd.f32 %v3450_v62, %v25736_v29  ;;  %v17419_v17 = vld [vmem:[%s25092_s1 + $0x824] ss:$8 sps:$4 sm:$0xff]   ;;  %v25742_v62 = vld [vmem:[#allocation27_spill] sm:$0xff]  ;;  %v25747_v10 = vld [vmem:[#allocation30_spill] sm:$0xff] }
 0x1e2   : > { %25735 = vst [vmem:[#allocation144_spill] sm:$0xff] %v20193_v19  ;;  %v3452_v37 = vpop.f32.mrf.mxu0  ;;  %7050 = vmatpush1.bf16.msra.mxu0 %v17411_v6  ;;  %v25743_v29 = vld [vmem:[#allocation28_spill] sm:$0xff]  ;;  %v25744_v6 = vld [vmem:[#allocation23_spill] sm:$0xff] }
 0x1e3   : > { %25737 = vst [vmem:[#allocation145_spill] sm:$0xff] %v20196_v28  ;;  %v20198_v21 = vpop.f32.mrf.mxu1  ;;  %v20204_v46 = vadd.f32 %v3452_v37, %v25739_v58  ;;  %7051 = vmatprep.subr.bf16.mxu0 %v17416_v0  ;;  %v17417_v58 = vld [vmem:[%s25092_s1 + $0x820] ss:$8 sps:$4 sm:$0xff]  }
 0x1e4   : > { %25738 = vst [vmem:[#allocation179_spill] sm:$0xff] %v20198_v21  ;;  %v3456_v19 = vpop.f32.mrf.mxu0  ;;  %6710 = vmatmul.mubr.bf16.gmra.mxu0 %v25742_v62  ;;  %v25746_v21 = vld [vmem:[#allocation29_spill] sm:$0xff] }
 0x1e5   : > { %25740 = vst [vmem:[#allocation146_spill] sm:$0xff] %v20204_v46  ;;  %v20209_v57 = vpop.f32.mrf.mxu1  ;;  %6903 = vmatmul.mubr.bf16.gmra.mxu1 %v25743_v29  ;;  %v20214_v28 = vadd.f32 %v3456_v19, %v25744_v6  ;;  %6719 = vmatprep.mubr.bf16.mxu0 %v25746_v21  ;;  %v25748_v46 = vld [vmem:[#allocation25_spill] sm:$0xff]  ;;  %v17422_v19 = vld [vmem:[%s25092_s1 + $0x814] ss:$8 sps:$4 sm:$0xff]  }
 0x1e6   : > { %25741 = vst [vmem:[#allocation180_spill] sm:$0xff] %v20209_v57  ;;  %6912 = vmatprep.mubr.bf16.mxu1 %v25747_v10  ;;  %v3458_v37 = vpop.f32.mrf.mxu0  ;;  %7052 = vmatpush1.bf16.msra.mxu0 %v17414_v42  ;;  %v25751_v10 = vld [vmem:[#allocation147_spill] sm:$0xff] }
 0x1e7   : > { %25745 = vst [vmem:[#allocation27_spill] sm:$0xff] %v20214_v28  ;;  %v20218_v0 = vpop.f32.mrf.mxu1  ;;  %v20224_v57 = vadd.f32 %v3458_v37, %v25748_v46  ;;  %7053 = vmatprep.subr.bf16.mxu0 %v17419_v17  ;;  %v17420_v46 = vld [vmem:[%s25092_s1 + $0x810] ss:$8 sps:$4 sm:$0xff]   ;;  %v25753_v37 = vld [vmem:[#allocation148_spill] sm:$0xff] }
 0x1e8   : > { %v3460_v62 = vpop.f32.mrf.mxu0 }
 0x1e9   : > { %25749 = vst [vmem:[#allocation28_spill] sm:$0xff] %v20224_v57  ;;  %v20229_v21 = vpop.f32.mrf.mxu1  ;;  %v20232_v29 = vadd.f32 %v3460_v62, %v25751_v10  ;;  %v17425_v57 = vld [vmem:[%s25092_s1 + $0x804] ss:$8 sps:$4 sm:$0xff]  }
 0x1ea   : > { %25750 = vst [vmem:[#allocation23_spill] sm:$0xff] %v20229_v21  ;;  %v3462_v6 = vpop.f32.mrf.mxu0  ;;  %7054 = vmatpush1.bf16.msra.mxu0 %v17417_v58  ;;  %v25756_v62 = vld [vmem:[#allocation32_spill] sm:$0xff]  ;;  %v25757_v58 = vld [vmem:[#allocation149_spill] sm:$0xff] }
 0x1eb   : > { %25752 = vst [vmem:[#allocation29_spill] sm:$0xff] %v20232_v29  ;;  %v20234_v42 = vpop.f32.mrf.mxu1  ;;  %v20240_v17 = vadd.f32 %v3462_v6, %v25753_v37  ;;  %7055 = vmatprep.subr.bf16.mxu0 %v17422_v19  ;;  %v25758_v29 = vld [vmem:[#allocation34_spill] sm:$0xff]  ;;  %v17423_v37 = vld [vmem:[%s25092_s1 + $0x800] ss:$8 sps:$4 sm:$0xff]  }
 0x1ec   : > { %v3466_v21 = vpop.f32.mrf.mxu0  ;;  %6720 = vmatmul.mubr.bf16.gmra.mxu0 %v25756_v62 }
 0x1ed   : > { %25754 = vst [vmem:[#allocation30_spill] sm:$0xff] %v20240_v17  ;;  %v20245_v28 = vpop.f32.mrf.mxu1  ;;  %6913 = vmatmul.mubr.bf16.gmra.mxu1 %v25625_v24  ;;  %v20250_v10 = vadd.f32 %v3466_v21, %v25757_v58  ;;  %6729 = vmatprep.mubr.bf16.mxu0 %v25758_v29  ;;  %v25759_v17 = vld [vmem:[#allocation150_spill] sm:$0xff] }
 0x1ee   : > { %25755 = vst [vmem:[#allocation25_spill] sm:$0xff] %v20245_v28  ;;  %6922 = vmatprep.mubr.bf16.mxu1 %v25627_v34  ;;  %v3468_v6 = vpop.f32.mrf.mxu0  ;;  %7056 = vmatpush1.bf16.msra.mxu0 %v17420_v46  ;;  %v17428_v24 = vld [vmem:[%s25092_s1 + $0x8f4] ss:$8 sps:$4 sm:$0xff]  }
 0x1ef   : > { %v20254_v19 = vpop.f32.mrf.mxu1  ;;  %v20260_v28 = vadd.f32 %v3468_v6, %v25759_v17  ;;  %7057 = vmatprep.subr.bf16.mxu0 %v17425_v57  ;;  %v25762_v34 = vld [vmem:[#allocation151_spill] sm:$0xff]  ;;  %v17431_v6 = vld [vmem:[%s25092_s1 + $0x8e4] ss:$8 sps:$4 sm:$0xff]  }
 0x1f0   : > { %v3470_v21 = vpop.f32.mrf.mxu0  ;;  %v17426_v17 = vld [vmem:[%s25092_s1 + $0x8f0] ss:$8 sps:$4 sm:$0xff]  }
 0x1f1   : > { %25760 = vst [vmem:[#allocation147_spill] sm:$0xff] %v20260_v28  ;;  %v20265_v29 = vpop.f32.mrf.mxu1  ;;  %v20268_v62 = vadd.f32 %v3470_v21, %v25762_v34  ;;  %v25767_v21 = vld [vmem:[#allocation38_spill] sm:$0xff] }
 0x1f2   : > { %25761 = vst [vmem:[#allocation148_spill] sm:$0xff] %v20265_v29  ;;  %v3472_v58 = vpop.f32.mrf.mxu0  ;;  %7058 = vmatpush1.bf16.msra.mxu0 %v17423_v37  ;;  %v25768_v37 = vld [vmem:[#allocation33_spill] sm:$0xff] }
 0x1f3   : > { %25763 = vst [vmem:[#allocation32_spill] sm:$0xff] %v20268_v62  ;;  %v20270_v46 = vpop.f32.mrf.mxu1  ;;  %v20276_v57 = vadd.f32 %v3472_v58, %v19778_v44  ;;  %7059 = vmatprep.subr.bf16.mxu0 %v17428_v24  ;;  %v25770_v62 = vld [vmem:[#allocation41_spill] sm:$0xff] }
 0x1f4   : > { %25764 = vst [vmem:[#allocation149_spill] sm:$0xff] %v20270_v46  ;;  %v3476_v28 = vpop.f32.mrf.mxu0  ;;  %6730 = vmatmul.mubr.bf16.gmra.mxu0 %v25767_v21  ;;  %v25771_v46 = vld [vmem:[#allocation40_spill] sm:$0xff] }
 0x1f5   : > { %25765 = vst [vmem:[#allocation34_spill] sm:$0xff] %v20276_v57  ;;  %v20281_v29 = vpop.f32.mrf.mxu1  ;;  %6923 = vmatmul.mubr.bf16.gmra.mxu1 %v25632_v60  ;;  %v20286_v34 = vadd.f32 %v3476_v28, %v25768_v37  ;;  %6739 = vmatprep.mubr.bf16.mxu0 %v25770_v62  ;;  %v17429_v58 = vld [vmem:[%s25092_s1 + $0x8e0] ss:$8 sps:$4 sm:$0xff]   ;;  %v25772_v57 = vld [vmem:[#allocation35_spill] sm:$0xff] }
 0x1f6   : > { %25766 = vst [vmem:[#allocation150_spill] sm:$0xff] %v20281_v29  ;;  %6932 = vmatprep.mubr.bf16.mxu1 %v25771_v46  ;;  %v3478_v44 = vpop.f32.mrf.mxu0  ;;  %7060 = vmatpush2.bf16.msra.mxu0 %v17426_v17  ;;  %v17434_v60 = vld [vmem:[%s25092_s1 + $0x8d4] ss:$8 sps:$4 sm:$0xff]   ;;  %v25775_v46 = vld [vmem:[#allocation152_spill] sm:$0xff] }
 0x1f7   : > { %25769 = vst [vmem:[#allocation151_spill] sm:$0xff] %v20286_v34  ;;  %v20290_v24 = vpop.f32.mrf.mxu1  ;;  %v20296_v29 = vadd.f32 %v3478_v44, %v25772_v57  ;;  %7061 = vmatprep.subr.bf16.mxu0 %v17431_v6  ;;  %v17432_v57 = vld [vmem:[%s25092_s1 + $0x8d0] ss:$8 sps:$4 sm:$0xff]   ;;  %v25778_v44 = vld [vmem:[#allocation153_spill] sm:$0xff] }
 0x1f8   : > { %v3480_v28 = vpop.f32.mrf.mxu0 }
 0x1f9   : > { %25773 = vst [vmem:[#allocation38_spill] sm:$0xff] %v20296_v29  ;;  %v20301_v62 = vpop.f32.mrf.mxu1  ;;  %v20304_v21 = vadd.f32 %v3480_v28, %v25775_v46  ;;  %v17437_v29 = vld [vmem:[%s25092_s1 + $0x8c4] ss:$8 sps:$4 sm:$0xff]   ;;  %v25781_v28 = vld [vmem:[#allocation43_spill] sm:$0xff] }
 0x1fa   : > { %25774 = vst [vmem:[#allocation33_spill] sm:$0xff] %v20301_v62  ;;  %v3482_v37 = vpop.f32.mrf.mxu0  ;;  %7062 = vmatpush2.bf16.msra.mxu0 %v17429_v58  ;;  %v25782_v58 = vld [vmem:[#allocation39_spill] sm:$0xff] }
 0x1fb   : > { %25776 = vst [vmem:[#allocation41_spill] sm:$0xff] %v20304_v21  ;;  %v20306_v17 = vpop.f32.mrf.mxu1  ;;  %v20312_v6 = vadd.f32 %v3482_v37, %v25778_v44  ;;  %7063 = vmatprep.subr.bf16.mxu0 %v17434_v60  ;;  %v25784_v21 = vld [vmem:[#allocation45_spill] sm:$0xff] }
 0x1fc   : > { %25777 = vst [vmem:[#allocation40_spill] sm:$0xff] %v20306_v17  ;;  %v3486_v62 = vpop.f32.mrf.mxu0  ;;  %6740 = vmatmul.mubr.bf16.gmra.mxu0 %v25781_v28  ;;  %v17435_v44 = vld [vmem:[%s25092_s1 + $0x8c0] ss:$8 sps:$4 sm:$0xff]  }
 0x1fd   : > { %25779 = vst [vmem:[#allocation35_spill] sm:$0xff] %v20312_v6  ;;  %v20317_v34 = vpop.f32.mrf.mxu1  ;;  %6933 = vmatmul.mubr.bf16.gmra.mxu1 %v25640_v15  ;;  %v20322_v46 = vadd.f32 %v3486_v62, %v25782_v58  ;;  %6749 = vmatprep.mubr.bf16.mxu0 %v25784_v21  ;;  %v25786_v6 = vld [vmem:[#allocation154_spill] sm:$0xff]  ;;  %v25845_v17 = vld [vmem:[#allocation164_spill] sm:$0xff] }
 0x1fe   : > { %25780 = vst [vmem:[#allocation152_spill] sm:$0xff] %v20317_v34  ;;  %6942 = vmatprep.mubr.bf16.mxu1 %v25642_v11  ;;  %v3488_v37 = vpop.f32.mrf.mxu0  ;;  %7064 = vmatpush2.bf16.msra.mxu0 %v17432_v57  ;;  %v17440_v15 = vld [vmem:[%s25092_s1 + $0x8b4] ss:$8 sps:$4 sm:$0xff]  }
 0x1ff   : > { %25783 = vst [vmem:[#allocation153_spill] sm:$0xff] %v20322_v46  ;;  %v20326_v60 = vpop.f32.mrf.mxu1  ;;  %v20332_v34 = vadd.f32 %v3488_v37, %v25786_v6  ;;  %7065 = vmatprep.subr.bf16.mxu0 %v17437_v29  ;;  %v25789_v11 = vld [vmem:[#allocation155_spill] sm:$0xff]  ;;  %v25792_v37 = vld [vmem:[#allocation156_spill] sm:$0xff] }
 0x200   : > { %25785 = vst [vmem:[#allocation43_spill] sm:$0xff] %v20326_v60  ;;  %v3490_v62 = vpop.f32.mrf.mxu0  ;;  %v17438_v6 = vld [vmem:[%s25092_s1 + $0x8b0] ss:$8 sps:$4 sm:$0xff]  }
 0x201   : > { %25787 = vst [vmem:[#allocation39_spill] sm:$0xff] %v20332_v34  ;;  %v20337_v21 = vpop.f32.mrf.mxu1  ;;  %v20340_v28 = vadd.f32 %v3490_v62, %v25789_v11  ;;  %v17443_v34 = vld [vmem:[%s25092_s1 + $0x8a4] ss:$8 sps:$4 sm:$0xff]  }
 0x202   : > { %25788 = vst [vmem:[#allocation45_spill] sm:$0xff] %v20337_v21  ;;  %v3492_v58 = vpop.f32.mrf.mxu0  ;;  %7066 = vmatpush2.bf16.msra.mxu0 %v17435_v44  ;;  %v25795_v62 = vld [vmem:[#allocation48_spill] sm:$0xff] }
 0x203   : > { %25790 = vst [vmem:[#allocation154_spill] sm:$0xff] %v20340_v28  ;;  %v20342_v57 = vpop.f32.mrf.mxu1  ;;  %v20348_v29 = vadd.f32 %v3492_v58, %v25792_v37  ;;  %7067 = vmatprep.subr.bf16.mxu0 %v17440_v15  ;;  %v25796_v44 = vld [vmem:[#allocation44_spill] sm:$0xff]  ;;  %v25798_v28 = vld [vmem:[#allocation51_spill] sm:$0xff] }
 0x204   : > { %25791 = vst [vmem:[#allocation155_spill] sm:$0xff] %v20342_v57  ;;  %v3496_v21 = vpop.f32.mrf.mxu0  ;;  %6750 = vmatmul.mubr.bf16.gmra.mxu0 %v25795_v62  ;;  %v17441_v37 = vld [vmem:[%s25092_s1 + $0x8a0] ss:$8 sps:$4 sm:$0xff]  }
 0x205   : > { %25793 = vst [vmem:[#allocation156_spill] sm:$0xff] %v20348_v29  ;;  %v20353_v46 = vpop.f32.mrf.mxu1  ;;  %6943 = vmatmul.mubr.bf16.gmra.mxu1 %v25646_v52  ;;  %v20358_v11 = vadd.f32 %v3496_v21, %v25796_v44  ;;  %6759 = vmatprep.mubr.bf16.mxu0 %v25798_v28  ;;  %v25800_v29 = vld [vmem:[#allocation46_spill] sm:$0xff] }
 0x206   : > { %25794 = vst [vmem:[#allocation181_spill] sm:$0xff] %v20353_v46  ;;  %6952 = vmatprep.mubr.bf16.mxu1 %v25648_v12  ;;  %v3498_v58 = vpop.f32.mrf.mxu0  ;;  %7068 = vmatpush2.bf16.msra.mxu0 %v17438_v6  ;;  %v17446_v52 = vld [vmem:[%s25092_s1 + $0x894] ss:$8 sps:$4 sm:$0xff]   ;;  %v25803_v12 = vld [vmem:[#allocation157_spill] sm:$0xff] }
 0x207   : > { %25797 = vst [vmem:[#allocation48_spill] sm:$0xff] %v20358_v11  ;;  %v20362_v15 = vpop.f32.mrf.mxu1  ;;  %v20368_v46 = vadd.f32 %v3498_v58, %v25800_v29  ;;  %7069 = vmatprep.subr.bf16.mxu0 %v17443_v34  ;;  %v17444_v29 = vld [vmem:[%s25092_s1 + $0x890] ss:$8 sps:$4 sm:$0xff]  }
 0x208   : > { %25799 = vst [vmem:[#allocation44_spill] sm:$0xff] %v20362_v15  ;;  %v3500_v21 = vpop.f32.mrf.mxu0  ;;  %v25806_v58 = vld [vmem:[#allocation158_spill] sm:$0xff] }
 0x209   : > { %25801 = vst [vmem:[#allocation51_spill] sm:$0xff] %v20368_v46  ;;  %v20373_v28 = vpop.f32.mrf.mxu1  ;;  %v20376_v62 = vadd.f32 %v3500_v21, %v25803_v12  ;;  %v17449_v46 = vld [vmem:[%s25092_s1 + $0x884] ss:$8 sps:$4 sm:$0xff]  }
 0x20a   : > { %25802 = vst [vmem:[#allocation46_spill] sm:$0xff] %v20373_v28  ;;  %v3502_v44 = vpop.f32.mrf.mxu0  ;;  %7070 = vmatpush2.bf16.msra.mxu0 %v17441_v37  ;;  %v25809_v21 = vld [vmem:[#allocation53_spill] sm:$0xff] }
 0x20b   : > { %25804 = vst [vmem:[#allocation157_spill] sm:$0xff] %v20376_v62  ;;  %v20378_v6 = vpop.f32.mrf.mxu1  ;;  %v20384_v34 = vadd.f32 %v3502_v44, %v25806_v58  ;;  %7071 = vmatprep.subr.bf16.mxu0 %v17446_v52  ;;  %v25810_v37 = vld [vmem:[#allocation49_spill] sm:$0xff]  ;;  %v25812_v62 = vld [vmem:[#allocation56_spill] sm:$0xff] }
 0x20c   : > { %25805 = vst [vmem:[#allocation182_spill] sm:$0xff] %v20378_v6  ;;  %v3506_v28 = vpop.f32.mrf.mxu0  ;;  %6760 = vmatmul.mubr.bf16.gmra.mxu0 %v25809_v21  ;;  %v17447_v58 = vld [vmem:[%s25092_s1 + $0x880] ss:$8 sps:$4 sm:$0xff]  }
 0x20d   : > { %25807 = vst [vmem:[#allocation158_spill] sm:$0xff] %v20384_v34  ;;  %v20389_v11 = vpop.f32.mrf.mxu1  ;;  %6953 = vmatmul.mubr.bf16.gmra.mxu1 %v25651_v20  ;;  %v20394_v12 = vadd.f32 %v3506_v28, %v25810_v37  ;;  %6769 = vmatprep.mubr.bf16.mxu0 %v25812_v62  ;;  %v25818_v37 = vld [vmem:[#allocation50_spill] sm:$0xff] }
 0x20e   : > { %25808 = vst [vmem:[#allocation183_spill] sm:$0xff] %v20389_v11  ;;  %6962 = vmatprep.mubr.bf16.mxu1 %v25653_v4  ;;  %v3508_v44 = vpop.f32.mrf.mxu0  ;;  %7072 = vmatpush2.bf16.msra.mxu0 %v17444_v29  ;;  %v25820_v11 = vld [vmem:[#allocation58_spill] sm:$0xff] }
 0x20f   : > { %25811 = vst [vmem:[#allocation53_spill] sm:$0xff] %v20394_v12  ;;  %v20398_v52 = vpop.f32.mrf.mxu1  ;;  %v20404_v34 = vadd.f32 %v3508_v44, %v19897_v3  ;;  %7073 = vmatprep.subr.bf16.mxu0 %v17449_v46  ;;  %v25821_v3 = vld [vmem:[#allocation159_spill] sm:$0xff]  ;;  %v25822_v44 = vld [vmem:[#allocation60_spill] sm:$0xff] }
 0x210   : > { %25813 = vst [vmem:[#allocation49_spill] sm:$0xff] %v20398_v52  ;;  %v3510_v20 = vpop.f32.mrf.mxu0 }
 0x211   : > { %25814 = vst [vmem:[#allocation56_spill] sm:$0xff] %v20404_v34  ;;  %v20406_v21 = vpop.f32.mrf.mxu1  ;;  %v20409_v28 = vadd.f32 %v3510_v20, %v19905_v54 }
 0x212   : > { %25815 = vst [vmem:[#allocation184_spill] sm:$0xff] %v20406_v21  ;;  %v3512_v62 = vpop.f32.mrf.mxu0  ;;  %7074 = vmatpush2.bf16.msra.mxu0 %v17447_v58 }
 0x213   : > { %25816 = vst [vmem:[#allocation185_spill] sm:$0xff] %v20409_v28  ;;  %v20411_v4 = vpop.f32.mrf.mxu1  ;;  %v20414_v29 = vadd.f32 %v3512_v62, %v25818_v37  ;;  %v25824_v37 = vld [vmem:[#allocation54_spill] sm:$0xff] }
 0x214   : > { %25817 = vst [vmem:[#allocation186_spill] sm:$0xff] %v20411_v4  ;;  %v4959_v12 = vpop.f32.mrf.mxu0  ;;  %6770 = vmatmul.mubr.bf16.gmra.mxu0 %v25820_v11  ;;  %v25823_v4 = vld [vmem:[#allocation55_spill] sm:$0xff]  ;;  %v25826_v11 = vld [vmem:[#allocation161_spill] sm:$0xff] }
 0x215   : > { %25819 = vst [vmem:[#allocation50_spill] sm:$0xff] %v20414_v29  ;;  %v5152_v52 = vpop.f32.mrf.mxu1  ;;  %6963 = vmatmul.mubr.bf16.gmra.mxu1 %v25663_v1  ;;  %v4960_v46 = vadd.f32 %v4959_v12, %v25821_v3  ;;  %6779 = vmatprep.mubr.bf16.mxu0 %v25822_v44  ;;  %v25827_v12 = vld [vmem:[#allocation160_spill] sm:$0xff] }
 0x216   : > { %6972 = vmatprep.mubr.bf16.mxu1 %v25666_v27  ;;  %v4961_v54 = vpop.f32.mrf.mxu0  ;;  %v25829_v27 = vld [vmem:[#allocation162_spill] sm:$0xff] }
 0x217   : > { %v5154_v20 = vpop.f32.mrf.mxu1  ;;  %v5153_v28 = vadd.f32 %v5152_v52, %v4960_v46  ;;  %v4962_v58 = vadd.f32 %v4961_v54, %v25823_v4  ;;  %v25830_v46 = vld [vmem:[#allocation63_spill] sm:$0xff]  ;;  %v25831_v4 = vld [vmem:[#allocation64_spill] sm:$0xff] }
 0x218   : > { %v4963_v34 = vpop.f32.mrf.mxu0  ;;  %v25832_v54 = vld [vmem:[#allocation112_spill] sm:$0xff] }
 0x219   : > { %v5156_v62 = vpop.f32.mrf.mxu1  ;;  %v20423_v29 = vadd.f32 %v5153_v28, %v25824_v37  ;;  %v5155_v21 = vadd.f32 %v5154_v20, %v4962_v58  ;;  %v4964_v6 = vadd.f32 %v4963_v34, %v25826_v11  ;;  %v25834_v58 = vld [vmem:[#allocation163_spill] sm:$0xff]  ;;  %v25835_v37 = vld [vmem:[#allocation65_spill] sm:$0xff]  ;;  %v25836_v11 = vld [vmem:[#allocation66_spill] sm:$0xff] }
 0x21a   : > { %v4965_v1 = vpop.f32.mrf.mxu0 }
 0x21b   : > { %25825 = vst [vmem:[#allocation58_spill] sm:$0xff] %v20423_v29  ;;  %v5158_v15 = vpop.f32.mrf.mxu1  ;;  %v20427_v3 = vadd.f32 %v5155_v21, %v25827_v12  ;;  %v5157_v44 = vadd.f32 %v5156_v62, %v4964_v6  ;;  %v4966_v57 = vadd.f32 %v4965_v1, %v25829_v27  ;;  %v25837_v62 = vld [vmem:[#allocation113_spill] sm:$0xff]  ;;  %v25839_v27 = vld [vmem:[#allocation114_spill] sm:$0xff]  ;;  %v25840_v29 = vld [vmem:[#allocation59_spill] sm:$0xff] }
 0x21c   : > { %v4969_v60 = vpop.f32.mrf.mxu0  ;;  %6780 = vmatmul.mubr.bf16.gmra.mxu0 %v25830_v46 }
 0x21d   : > { %25828 = vst [vmem:[#allocation159_spill] sm:$0xff] %v20427_v3  ;;  %v5162_v52 = vpop.f32.mrf.mxu1  ;;  %6973 = vmatmul.mubr.bf16.gmra.mxu1 %v25831_v4  ;;  %v20433_v28 = vadd.f32 %v5157_v44, %v25832_v54  ;;  %v5159_v20 = vadd.f32 %v5158_v15, %v4966_v57  ;;  %v4970_v34 = vadd.f32 %v4969_v60, %v25834_v58  ;;  %v25842_v15 = vld [vmem:[#allocation116_spill] sm:$0xff] }
 0x21e   : > { %6789 = vmatprep.mubr.bf16.mxu0 %v25835_v37  ;;  %6982 = vmatprep.mubr.bf16.mxu1 %v25836_v11  ;;  %v4971_v21 = vpop.f32.mrf.mxu0  ;;  %v25843_v37 = vld [vmem:[#allocation61_spill] sm:$0xff] }
 0x21f   : > { %25833 = vst [vmem:[#allocation60_spill] sm:$0xff] %v20433_v28  ;;  %v5164_v6 = vpop.f32.mrf.mxu1  ;;  %v20439_v1 = vadd.f32 %v5159_v20, %v25837_v62  ;;  %v5163_v12 = vadd.f32 %v5162_v52, %v4970_v34  ;;  %v4972_v46 = vadd.f32 %v4971_v21, %v25839_v27  ;;  %v25846_v34 = vld [vmem:[#allocation68_spill] sm:$0xff]  ;;  %v25847_v21 = vld [vmem:[#allocation69_spill] sm:$0xff]  ;;  %v25848_v27 = vld [vmem:[#allocation118_spill] sm:$0xff] }
 0x220   : > { %v4973_v3 = vpop.f32.mrf.mxu0 }
 0x221   : > { %25838 = vst [vmem:[#allocation55_spill] sm:$0xff] %v20439_v1  ;;  %v5166_v4 = vpop.f32.mrf.mxu1  ;;  %v20443_v44 = vadd.f32 %v5163_v12, %v25840_v29  ;;  %v5165_v57 = vadd.f32 %v5164_v6, %v4972_v46  ;;  %v4974_v60 = vadd.f32 %v4973_v3, %v25842_v15  ;;  %v25850_v12 = vld [vmem:[#allocation165_spill] sm:$0xff]  ;;  %v25851_v46 = vld [vmem:[#allocation70_spill] sm:$0xff]  ;;  %v25852_v15 = vld [vmem:[#allocation71_spill] sm:$0xff] }
 0x222   : > { %v4975_v54 = vpop.f32.mrf.mxu0 }
 0x223   : > { %25841 = vst [vmem:[#allocation54_spill] sm:$0xff] %v20443_v44  ;;  %v5168_v58 = vpop.f32.mrf.mxu1  ;;  %v20447_v11 = vadd.f32 %v5165_v57, %v25843_v37  ;;  %v5167_v28 = vadd.f32 %v5166_v4, %v4974_v60  ;;  %v4976_v20 = vadd.f32 %v4975_v54, %v25845_v17  ;;  %v25853_v60 = vld [vmem:[#allocation120_spill] sm:$0xff]  ;;  %v25855_v37 = vld [vmem:[#allocation166_spill] sm:$0xff]  ;;  %v25856_v44 = vld [vmem:[#allocation121_spill] sm:$0xff] }
 0x224   : > { %v4979_v62 = vpop.f32.mrf.mxu0  ;;  %6790 = vmatmul.mubr.bf16.gmra.mxu0 %v25846_v34 }
 0x225   : > { %25844 = vst [vmem:[#allocation161_spill] sm:$0xff] %v20447_v11  ;;  %v5172_v52 = vpop.f32.mrf.mxu1  ;;  %6983 = vmatmul.mubr.bf16.gmra.mxu1 %v25847_v21  ;;  %v20453_v29 = vadd.f32 %v5167_v28, %v25848_v27  ;;  %v5169_v6 = vadd.f32 %v5168_v58, %v4976_v20  ;;  %v4980_v3 = vadd.f32 %v4979_v62, %v25850_v12  ;;  %v25858_v20 = vld [vmem:[#allocation167_spill] sm:$0xff] }
 0x226   : > { %6799 = vmatprep.mubr.bf16.mxu0 %v25851_v46  ;;  %6992 = vmatprep.mubr.bf16.mxu1 %v25852_v15  ;;  %v4981_v57 = vpop.f32.mrf.mxu0  ;;  %v17452_v27 = vld [vmem:[%s25092_s1 + $0x974] ss:$8 sps:$4 sm:$0xff]  }
 0x227   : > { %25849 = vst [vmem:[#allocation160_spill] sm:$0xff] %v20453_v29  ;;  %v5174_v4 = vpop.f32.mrf.mxu1  ;;  %v20459_v17 = vadd.f32 %v5169_v6, %v25853_v60  ;;  %v5173_v54 = vadd.f32 %v5172_v52, %v4980_v3  ;;  %v4982_v34 = vadd.f32 %v4981_v57, %v25855_v37  ;;  %v17450_v52 = vld [vmem:[%s25092_s1 + $0x970] ss:$8 sps:$4 sm:$0xff]   ;;  %v25861_v57 = vld [vmem:[#allocation169_spill] sm:$0xff]  ;;  %9966 = vmatprep.subr.bf16.mxu1 %v17452_v27 }
 0x228   : > { %v4983_v11 = vpop.f32.mrf.mxu0  ;;  %v25859_v6 = vld [vmem:[#allocation123_spill] sm:$0xff]  ;;  %9967 = vmatpush1.bf16.msra.mxu1 %v17450_v52 }
 0x229   : > { %25854 = vst [vmem:[#allocation162_spill] sm:$0xff] %v20459_v17  ;;  %v5176_v21 = vpop.f32.mrf.mxu1  ;;  %v20463_v28 = vadd.f32 %v5173_v54, %v25856_v44  ;;  %v5175_v58 = vadd.f32 %v5174_v4, %v4982_v34  ;;  %v4984_v62 = vadd.f32 %v4983_v11, %v25858_v20  ;;  %v25862_v11 = vld [vmem:[#allocation73_spill] sm:$0xff]  ;;  %v25863_v54 = vld [vmem:[#allocation168_spill] sm:$0xff]  ;;  %v25865_v20 = vld [vmem:[#allocation171_spill] sm:$0xff] }
 0x22a   : > { %v4985_v12 = vpop.f32.mrf.mxu0  ;;  %v25866_v17 = vld [vmem:[#allocation75_spill] sm:$0xff] }
 0x22b   : > { %25857 = vst [vmem:[#allocation63_spill] sm:$0xff] %v20463_v28  ;;  %v5178_v46 = vpop.f32.mrf.mxu1  ;;  %v20473_v3 = vadd.f32 %v5175_v58, %v25859_v6  ;;  %v5177_v15 = vadd.f32 %v5176_v21, %v4984_v62  ;;  %v4986_v44 = vadd.f32 %v4985_v12, %v25861_v57  ;;  %v25867_v62 = vld [vmem:[#allocation170_spill] sm:$0xff]  ;;  %v25869_v6 = vld [vmem:[#allocation172_spill] sm:$0xff] }
 0x22c   : > { %v4989_v4 = vpop.f32.mrf.mxu0  ;;  %6800 = vmatmul.mubr.bf16.gmra.mxu0 %v25862_v11 }
 0x22d   : > { %25860 = vst [vmem:[#allocation64_spill] sm:$0xff] %v20473_v3  ;;  %v5182_v60 = vpop.f32.mrf.mxu1  ;;  %6993 = vmatmul.mubr.bf16.gmra.mxu1 %v25697_v43  ;;  %v20479_v37 = vadd.f32 %v5177_v15, %v25863_v54  ;;  %v5179_v34 = vadd.f32 %v5178_v46, %v4986_v44  ;;  %v4990_v28 = vadd.f32 %v4989_v4, %v25865_v20  ;;  %v25870_v15 = vld [vmem:[#allocation127_spill] sm:$0xff] }
 0x22e   : > { %6809 = vmatprep.mubr.bf16.mxu0 %v25866_v17  ;;  %7002 = vmatprep.mubr.bf16.mxu1 %v25700_v32  ;;  %v4991_v21 = vpop.f32.mrf.mxu0  ;;  %v17455_v32 = vld [vmem:[%s25092_s1 + $0x964] ss:$8 sps:$4 sm:$0xff]  }
 0x22f   : > { %25864 = vst [vmem:[#allocation112_spill] sm:$0xff] %v20479_v37  ;;  %v5184_v58 = vpop.f32.mrf.mxu1  ;;  %v20485_v27 = vadd.f32 %v5179_v34, %v25867_v62  ;;  %v5183_v12 = vadd.f32 %v5182_v60, %v4990_v28  ;;  %v4992_v57 = vadd.f32 %v4991_v21, %v25869_v6  ;;  %v17453_v28 = vld [vmem:[%s25092_s1 + $0x960] ss:$8 sps:$4 sm:$0xff]   ;;  %9968 = vmatprep.subr.bf16.mxu1 %v17455_v32 }
 0x230   : > { %v4993_v43 = vpop.f32.mrf.mxu0  ;;  %9969 = vmatpush1.bf16.msra.mxu1 %v17453_v28  ;;  %v17555_v37 = vld [vmem:[%s25092_s1 + $0xb40] ss:$8 sps:$4 sm:$0xff]  }
 0x231   : > { %25868 = vst [vmem:[#allocation163_spill] sm:$0xff] %v20485_v27  ;;  %v5186_v11 = vpop.f32.mrf.mxu1  ;;  %v20489_v54 = vadd.f32 %v5183_v12, %v25870_v15  ;;  %v5185_v46 = vadd.f32 %v5184_v58, %v4992_v57  ;;  %v4994_v44 = vadd.f32 %v4993_v43, %v20005_v14  ;;  %v25873_v14 = vld [vmem:[#allocation78_spill] sm:$0xff]  ;;  %v25875_v12 = vld [vmem:[#allocation173_spill] sm:$0xff]  ;;  %v25876_v57 = vld [vmem:[#allocation80_spill] sm:$0xff] }
 0x232   : > { %v4995_v17 = vpop.f32.mrf.mxu0 }
 0x233   : > { %25871 = vst [vmem:[#allocation65_spill] sm:$0xff] %v20489_v54  ;;  %v5188_v52 = vpop.f32.mrf.mxu1  ;;  %v20499_v4 = vadd.f32 %v5185_v46, %v20003_v55  ;;  %v5187_v60 = vadd.f32 %v5186_v11, %v4994_v44  ;;  %v4996_v34 = vadd.f32 %v4995_v17, %v20010_v7  ;;  %v25877_v7 = vld [vmem:[#allocation128_spill] sm:$0xff] }
 0x234   : > { %v4999_v20 = vpop.f32.mrf.mxu0  ;;  %6810 = vmatmul.mubr.bf16.gmra.mxu0 %v25873_v14 }
 0x235   : > { %25872 = vst [vmem:[#allocation66_spill] sm:$0xff] %v20499_v4  ;;  %v5192_v21 = vpop.f32.mrf.mxu1  ;;  %7003 = vmatmul.mubr.bf16.gmra.mxu1 %v25701_v56  ;;  %v20505_v58 = vadd.f32 %v5187_v60, %v20008_v47  ;;  %v5189_v62 = vadd.f32 %v5188_v52, %v4996_v34  ;;  %v5000_v6 = vadd.f32 %v4999_v20, %v25875_v12  ;;  %v25879_v47 = vld [vmem:[#allocation74_spill] sm:$0xff] }
 0x236   : > { %6819 = vmatprep.mubr.bf16.mxu0 %v25876_v57  ;;  %7012 = vmatprep.mubr.bf16.mxu1 %v25702_v49  ;;  %v5001_v55 = vpop.f32.mrf.mxu0  ;;  %v17458_v49 = vld [vmem:[%s25092_s1 + $0x954] ss:$8 sps:$4 sm:$0xff]   ;;  %v17456_v34 = vld [vmem:[%s25092_s1 + $0x950] ss:$8 sps:$4 sm:$0xff]  }
 0x237   : > { %25874 = vst [vmem:[#allocation113_spill] sm:$0xff] %v20505_v58  ;;  %v5194_v43 = vpop.f32.mrf.mxu1  ;;  %v20511_v11 = vadd.f32 %v5189_v62, %v25877_v7  ;;  %v5193_v15 = vadd.f32 %v5192_v21, %v5000_v6  ;;  %v5002_v46 = vadd.f32 %v5001_v55, %v20024_v2  ;;  %9970 = vmatprep.subr.bf16.mxu1 %v17458_v49  ;;  %v25884_v55 = vld [vmem:[#allocation139_spill] sm:$0xff] }
 0x238   : > { %v5003_v56 = vpop.f32.mrf.mxu0  ;;  %9971 = vmatpush1.bf16.msra.mxu1 %v17456_v34 }
 0x239   : > { %25878 = vst [vmem:[#allocation114_spill] sm:$0xff] %v20511_v11  ;;  %v5196_v44 = vpop.f32.mrf.mxu1  ;;  %v20515_v32 = vadd.f32 %v5193_v15, %v25879_v47  ;;  %v5195_v17 = vadd.f32 %v5194_v43, %v5002_v46  ;;  %v5004_v52 = vadd.f32 %v5003_v56, %v20029_v63  ;;  %v25882_v63 = vld [vmem:[#allocation83_spill] sm:$0xff] }
 0x23a   : > { %v5005_v60 = vpop.f32.mrf.mxu0 }
 0x23b   : > { %25880 = vst [vmem:[#allocation59_spill] sm:$0xff] %v20515_v32  ;;  %v5198_v28 = vpop.f32.mrf.mxu1  ;;  %v20525_v2 = vadd.f32 %v5195_v17, %v20027_v30  ;;  %v5197_v20 = vadd.f32 %v5196_v44, %v5004_v52  ;;  %v5006_v21 = vadd.f32 %v5005_v60, %v20034_v36  ;;  %v26026_v32 = vld [vmem:[#allocation174_spill] sm:$0xff] }
 0x23c   : > { %v5009_v14 = vpop.f32.mrf.mxu0  ;;  %6820 = vmatmul.mubr.bf16.gmra.mxu0 %v25882_v63  ;;  %v25893_v63 = vld [vmem:[#allocation82_spill] sm:$0xff] }
 0x23d   : > { %25881 = vst [vmem:[#allocation116_spill] sm:$0xff] %v20525_v2  ;;  %v5202_v62 = vpop.f32.mrf.mxu1  ;;  %7013 = vmatmul.mubr.bf16.gmra.mxu1 %v25706_v39  ;;  %v20531_v12 = vadd.f32 %v5197_v20, %v20032_v41  ;;  %v5199_v6 = vadd.f32 %v5198_v28, %v5006_v21  ;;  %v5010_v57 = vadd.f32 %v5009_v14, %v20039_v61  ;;  %v25890_v20 = vld [vmem:[#allocation8_spill] sm:$0xff] }
 0x23e   : > { %6829 = vmatprep.mubr.bf16.mxu0 %v25884_v55  ;;  %7022 = vmatprep.mubr.bf16.mxu1 %v20066_v33  ;;  %v5011_v30 = vpop.f32.mrf.mxu0  ;;  %v17461_v33 = vld [vmem:[%s25092_s1 + $0x944] ss:$8 sps:$4 sm:$0xff]  }
 0x23f   : > { %25883 = vst [vmem:[#allocation61_spill] sm:$0xff] %v20531_v12  ;;  %v5204_v43 = vpop.f32.mrf.mxu1  ;;  %v20537_v36 = vadd.f32 %v5199_v6, %v20037_v25  ;;  %v5203_v7 = vadd.f32 %v5202_v62, %v5010_v57  ;;  %v5012_v15 = vadd.f32 %v5011_v30, %v20048_v16  ;;  %v17459_v25 = vld [vmem:[%s25092_s1 + $0x940] ss:$8 sps:$4 sm:$0xff]   ;;  %9972 = vmatprep.subr.bf16.mxu1 %v17461_v33  ;;  %v17554_v12 = vld [vmem:[%s25092_s1 + $0xb54] ss:$8 sps:$4 sm:$0xff]  }
 0x240   : > { %v5013_v39 = vpop.f32.mrf.mxu0  ;;  %9973 = vmatpush1.bf16.msra.mxu1 %v17459_v25 }
 0x241   : > { %25885 = vst [vmem:[#allocation164_spill] sm:$0xff] %v20537_v36  ;;  %v5206_v46 = vpop.f32.mrf.mxu1  ;;  %v20541_v41 = vadd.f32 %v5203_v7, %v20044_v23  ;;  %v5205_v56 = vadd.f32 %v5204_v43, %v5012_v15  ;;  %v5014_v61 = vadd.f32 %v5013_v39, %v20059_v9  ;;  %v25888_v9 = vld [vmem:[#allocation141_spill] sm:$0xff]  ;;  %v17462_v43 = vld [vmem:[%s25092_s1 + $0x930] ss:$8 sps:$4 sm:$0xff]   ;;  %v17464_v7 = vld [vmem:[%s25092_s1 + $0x934] ss:$8 sps:$4 sm:$0xff]  }
 0x242   : > { %v5015_v44 = vpop.f32.mrf.mxu0  ;;  %9974 = vmatprep.subr.bf16.mxu1 %v17464_v7  ;;  %v25908_v7 = vld [vmem:[#allocation178_spill] sm:$0xff] }
 0x243   : > { %25886 = vst [vmem:[#allocation68_spill] sm:$0xff] %v20541_v41  ;;  %v5208_v47 = vpop.f32.mrf.mxu1  ;;  %v20551_v16 = vadd.f32 %v5205_v56, %v20057_v50  ;;  %v5207_v17 = vadd.f32 %v5206_v46, %v5014_v61  ;;  %v5016_v23 = vadd.f32 %v5015_v44, %v20071_v8  ;;  %v25891_v8 = vld [vmem:[#allocation79_spill] sm:$0xff] }
 0x244   : > { %v5019_v52 = vpop.f32.mrf.mxu0  ;;  %6830 = vmatmul.mubr.bf16.gmra.mxu0 %v25888_v9  ;;  %9975 = vmatpush1.bf16.msra.mxu1 %v17462_v43 }
 0x245   : > { %25887 = vst [vmem:[#allocation69_spill] sm:$0xff] %v20551_v16  ;;  %v5212_v49 = vpop.f32.mrf.mxu1  ;;  %7023 = vmatmul.mubr.bf16.gmra.mxu1 %v20097_v40  ;;  %v20557_v60 = vadd.f32 %v5207_v17, %v20062_v51  ;;  %v5209_v28 = vadd.f32 %v5208_v47, %v5016_v23  ;;  %v5020_v34 = vadd.f32 %v5019_v52, %v20076_v18  ;;  %v25894_v51 = vld [vmem:[#allocation81_spill] sm:$0xff]  ;;  %v25899_v23 = vld [vmem:[#allocation87_spill] sm:$0xff] }
 0x246   : > { %6839 = vmatprep.mubr.bf16.mxu0 %v25890_v20  ;;  %7032 = vmatprep.mubr.bf16.mxu1 %v25890_v20  ;;  %v5021_v50 = vpop.f32.mrf.mxu0 }
 0x247   : > { %25889 = vst [vmem:[#allocation118_spill] sm:$0xff] %v20557_v60  ;;  %v5214_v21 = vpop.f32.mrf.mxu1  ;;  %v20563_v14 = vadd.f32 %v5209_v28, %v25891_v8  ;;  %v5213_v62 = vadd.f32 %v5212_v49, %v5020_v34  ;;  %v5022_v6 = vadd.f32 %v5021_v50, %v25893_v63  ;;  %v25902_v63 = vld [vmem:[#allocation15_spill] sm:$0xff] }
 0x248   : > { %v5023_v40 = vpop.f32.mrf.mxu0 }
 0x249   : > { %25892 = vst [vmem:[#allocation165_spill] sm:$0xff] %v20563_v14  ;;  %v5216_v57 = vpop.f32.mrf.mxu1  ;;  %v20567_v55 = vadd.f32 %v5213_v62, %v25894_v51  ;;  %v5215_v30 = vadd.f32 %v5214_v21, %v5022_v6  ;;  %v5024_v18 = vadd.f32 %v5023_v40, %v20090_v38  ;;  %v25897_v38 = vld [vmem:[#allocation12_spill] sm:$0xff] }
 0x24a   : > { %v5025_v15 = vpop.f32.mrf.mxu0  ;;  %v17465_v21 = vld [vmem:[%s25092_s1 + $0x920] ss:$8 sps:$4 sm:$0xff]  }
 0x24b   : > { %25895 = vst [vmem:[#allocation70_spill] sm:$0xff] %v20567_v55  ;;  %v5218_v39 = vpop.f32.mrf.mxu1  ;;  %v20577_v46 = vadd.f32 %v5215_v30, %v20088_v31  ;;  %v5217_v56 = vadd.f32 %v5216_v57, %v5024_v18  ;;  %v5026_v61 = vadd.f32 %v5025_v15, %v20102_v26  ;;  %v25904_v40 = vld [vmem:[#allocation176_spill] sm:$0xff]  ;;  %v25906_v30 = vld [vmem:[#allocation175_spill] sm:$0xff] }
 0x24c   : > { %v5029_v33 = vpop.f32.mrf.mxu0  ;;  %6840 = vmatmul.mubr.bf16.gmra.mxu0 %v25897_v38  ;;  %v26024_v55 = vld [vmem:[#allocation140_spill] sm:$0xff] }
 0x24d   : > { %25896 = vst [vmem:[#allocation71_spill] sm:$0xff] %v20577_v46  ;;  %v5222_v44 = vpop.f32.mrf.mxu1  ;;  %7033 = vmatmul.mubr.bf16.gmra.mxu1 %v25897_v38  ;;  %v20583_v47 = vadd.f32 %v5217_v56, %v20100_v59  ;;  %v5219_v25 = vadd.f32 %v5218_v39, %v5026_v61  ;;  %v5030_v17 = vadd.f32 %v5029_v33, %v20107_v48  ;;  %v25909_v39 = vld [vmem:[#allocation90_spill] sm:$0xff]  ;;  %v25910_v33 = vld [vmem:[#allocation177_spill] sm:$0xff]  ;;  %v26025_v14 = vld [vmem:[#allocation76_spill] sm:$0xff] }
 0x24e   : > { %7075 = vmatprep.mubr.bf16.mxu0 %v25899_v23  ;;  %v5031_v31 = vpop.f32.mrf.mxu0  ;;  %9998 = vmatprep.mubr.bf16.mxu1 %v25890_v20 }
 0x24f   : > { %25898 = vst [vmem:[#allocation120_spill] sm:$0xff] %v20583_v47  ;;  %v5224_v52 = vpop.f32.mrf.mxu1  ;;  %v20589_v26 = vadd.f32 %v5219_v25, %v20105_v35  ;;  %v5223_v49 = vadd.f32 %v5222_v44, %v5030_v17  ;;  %v5032_v9 = vadd.f32 %v5031_v31, %v20116_v5  ;;  %v17467_v35 = vld [vmem:[%s25092_s1 + $0x924] ss:$8 sps:$4 sm:$0xff]   ;;  %v25912_v17 = vld [vmem:[#allocation19_spill] sm:$0xff] }
 0x250   : > { %v5033_v28 = vpop.f32.mrf.mxu0  ;;  %9976 = vmatprep.subr.bf16.mxu1 %v17467_v35  ;;  %v17551_v47 = vld [vmem:[%s25092_s1 + $0xb64] ss:$8 sps:$4 sm:$0xff]  }
 0x251   : > { %25900 = vst [vmem:[#allocation166_spill] sm:$0xff] %v20589_v26  ;;  %v5226_v34 = vpop.f32.mrf.mxu1  ;;  %v20593_v59 = vadd.f32 %v5223_v49, %v20112_v22  ;;  %v5225_v50 = vadd.f32 %v5224_v52, %v5032_v9  ;;  %v5034_v48 = vadd.f32 %v5033_v28, %v20121_v45  ;;  %v25905_v45 = vld [vmem:[#allocation89_spill] sm:$0xff]  ;;  %9977 = vmatpush1.bf16.msra.mxu1 %v17465_v21 }
 0x252   : > { %v5035_v8 = vpop.f32.mrf.mxu0  ;;  %v25913_v49 = vld [vmem:[#allocation17_spill] sm:$0xff] }
 0x253   : > { %25901 = vst [vmem:[#allocation121_spill] sm:$0xff] %v20593_v59  ;;  %v5228_v62 = vpop.f32.mrf.mxu1  ;;  %v20603_v5 = vadd.f32 %v5225_v50, %v25902_v63  ;;  %v5227_v6 = vadd.f32 %v5226_v34, %v5034_v48  ;;  %v5036_v22 = vadd.f32 %v5035_v8, %v25904_v40  ;;  %v17468_v50 = vld [vmem:[%s25092_s1 + $0x910] ss:$8 sps:$4 sm:$0xff]   ;;  %v17470_v48 = vld [vmem:[%s25092_s1 + $0x914] ss:$8 sps:$4 sm:$0xff]   ;;  %v25915_v8 = vld [vmem:[#allocation20_spill] sm:$0xff] }
 0x254   : > { %v5039_v57 = vpop.f32.mrf.mxu0  ;;  %7076 = vmatmul.mubr.bf16.vlgmr.msra.gmra.mxu0 %v25905_v45  ;;  %9978 = vmatprep.subr.bf16.mxu1 %v17470_v48 }
 0x255   : > { %25903 = vst [vmem:[#allocation167_spill] sm:$0xff] %v20603_v5  ;;  %v5232_v51 = vpop.f32.mrf.mxu1  ;;  %v20608_v18 = vadd.f32 %v5227_v6, %v25906_v30  ;;  %v5229_v43 = vadd.f32 %v5228_v62, %v5036_v22  ;;  %v5040_v15 = vadd.f32 %v5039_v57, %v25908_v7  ;;  %7085 = vmatprep.mubr.bf16.mxu0 %v25909_v39  ;;  %v25918_v57 = vld [vmem:[#allocation14_spill] sm:$0xff]  ;;  %v25920_v30 = vld [vmem:[#allocation143_spill] sm:$0xff]  ;;  %v25921_v7 = vld [vmem:[#allocation93_spill] sm:$0xff] }
 0x256   : > { %v5041_v56 = vpop.f32.mrf.mxu0  ;;  %9979 = vmatpush1.bf16.msra.mxu1 %v17468_v50  ;;  %v25927_v50 = vld [vmem:[#allocation144_spill] sm:$0xff] }
 0x257   : > { %25907 = vst [vmem:[#allocation123_spill] sm:$0xff] %v20608_v18  ;;  %v5234_v61 = vpop.f32.mrf.mxu1  ;;  %v20613_v44 = vadd.f32 %v5229_v43, %v25910_v33  ;;  %v5233_v25 = vadd.f32 %v5232_v51, %v5040_v15  ;;  %v5042_v23 = vadd.f32 %v5041_v56, %v25912_v17  ;;  %v25922_v56 = vld [vmem:[#allocation142_spill] sm:$0xff] }
 0x258   : > { %v5043_v31 = vpop.f32.mrf.mxu0 }
 0x259   : > { %25911 = vst [vmem:[#allocation169_spill] sm:$0xff] %v20613_v44  ;;  %v5236_v52 = vpop.f32.mrf.mxu1  ;;  %v20617_v9 = vadd.f32 %v5233_v25, %v25913_v49  ;;  %v5235_v28 = vadd.f32 %v5234_v61, %v5042_v23  ;;  %v5044_v34 = vadd.f32 %v5043_v31, %v20157_v53  ;;  %v25917_v53 = vld [vmem:[#allocation92_spill] sm:$0xff]  ;;  %v25924_v25 = vld [vmem:[#allocation18_spill] sm:$0xff]  ;;  %v26022_v44 = vld [vmem:[#allocation137_spill] sm:$0xff] }
 0x25a   : > { %v5045_v21 = vpop.f32.mrf.mxu0  ;;  %v17471_v23 = vld [vmem:[%s25092_s1 + $0xa70] ss:$8 sps:$4 sm:$0xff]  }
 0x25b   : > { %25914 = vst [vmem:[#allocation73_spill] sm:$0xff] %v20617_v9  ;;  %v5238_v35 = vpop.f32.mrf.mxu1  ;;  %v20627_v62 = vadd.f32 %v5235_v28, %v25915_v8  ;;  %v5237_v63 = vadd.f32 %v5236_v52, %v5044_v34  ;;  %v5046_v6 = vadd.f32 %v5045_v21, %v20162_v13  ;;  %v17473_v13 = vld [vmem:[%s25092_s1 + $0xa74] ss:$8 sps:$4 sm:$0xff]   ;;  %v17474_v21 = vld [vmem:[%s25092_s1 + $0x900] ss:$8 sps:$4 sm:$0xff]  }
 0x25c   : > { %v5049_v40 = vpop.f32.mrf.mxu0  ;;  %7086 = vmatmul.mubr.bf16.gmra.mxu0 %v25917_v53  ;;  %10159 = vmatprep.subr.bf16.mxu0 %v17473_v13  ;;  %v25925_v49 = vld [vmem:[#allocation22_spill] sm:$0xff] }
 0x25d   : > { %25916 = vst [vmem:[#allocation168_spill] sm:$0xff] %v20627_v62  ;;  %v5242_v22 = vpop.f32.mrf.mxu1  ;;  %v20632_v51 = vadd.f32 %v5237_v63, %v25918_v57  ;;  %v5239_v45 = vadd.f32 %v5238_v35, %v5046_v6  ;;  %v5050_v43 = vadd.f32 %v5049_v40, %v25920_v30  ;;  %7095 = vmatprep.mubr.bf16.mxu0 %v25921_v7  ;;  %v17476_v35 = vld [vmem:[%s25092_s1 + $0x904] ss:$8 sps:$4 sm:$0xff]   ;;  %v25930_v57 = vld [vmem:[#allocation179_spill] sm:$0xff]  ;;  %v17477_v30 = vld [vmem:[%s25092_s1 + $0xa60] ss:$8 sps:$4 sm:$0xff]  }
 0x25e   : > { %v5051_v15 = vpop.f32.mrf.mxu0  ;;  %10160 = vmatpush1.bf16.msra.mxu0 %v17471_v23  ;;  %v17479_v6 = vld [vmem:[%s25092_s1 + $0xa64] ss:$8 sps:$4 sm:$0xff]   ;;  %9980 = vmatprep.subr.bf16.mxu1 %v17476_v35  ;;  %v26023_v9 = vld [vmem:[#allocation138_spill] sm:$0xff] }
 0x25f   : > { %25919 = vst [vmem:[#allocation171_spill] sm:$0xff] %v20632_v51  ;;  %v5244_v39 = vpop.f32.mrf.mxu1  ;;  %v20640_v61 = vadd.f32 %v5239_v45, %v25922_v56  ;;  %v5243_v33 = vadd.f32 %v5242_v22, %v5050_v43  ;;  %v5052_v17 = vadd.f32 %v5051_v15, %v25924_v25  ;;  %v25928_v40 = vld [vmem:[#allocation24_spill] sm:$0xff]  ;;  %v25931_v15 = vld [vmem:[#allocation95_spill] sm:$0xff]  ;;  %9981 = vmatpush1.bf16.msra.mxu1 %v17474_v21 }
 0x260   : > { %v5053_v31 = vpop.f32.mrf.mxu0  ;;  %10161 = vmatprep.subr.bf16.mxu0 %v17479_v6  ;;  %v17480_v21 = vld [vmem:[%s25092_s1 + $0xa50] ss:$8 sps:$4 sm:$0xff]  }
 0x261   : > { %25923 = vst [vmem:[#allocation75_spill] sm:$0xff] %v20640_v61  ;;  %v5246_v52 = vpop.f32.mrf.mxu1  ;;  %v20647_v28 = vadd.f32 %v5243_v33, %v25925_v49  ;;  %v5245_v34 = vadd.f32 %v5244_v39, %v5052_v17  ;;  %v5054_v48 = vadd.f32 %v5053_v31, %v25927_v50  ;;  %v25932_v39 = vld [vmem:[#allocation145_spill] sm:$0xff]  ;;  %v25934_v33 = vld [vmem:[#allocation180_spill] sm:$0xff]  ;;  %v25936_v49 = vld [vmem:[#allocation146_spill] sm:$0xff] }
 0x262   : > { %v5055_v8 = vpop.f32.mrf.mxu0  ;;  %v25935_v17 = vld [vmem:[#allocation96_spill] sm:$0xff]  ;;  %10162 = vmatpush1.bf16.msra.mxu0 %v17477_v30  ;;  %v17548_v61 = vld [vmem:[%s25092_s1 + $0xb74] ss:$8 sps:$4 sm:$0xff]  }
 0x263   : > { %25926 = vst [vmem:[#allocation170_spill] sm:$0xff] %v20647_v28  ;;  %v5248_v63 = vpop.f32.mrf.mxu1  ;;  %v20660_v22 = vadd.f32 %v5245_v34, %v25928_v40  ;;  %v5247_v53 = vadd.f32 %v5246_v52, %v5054_v48  ;;  %v5056_v45 = vadd.f32 %v5055_v8, %v25930_v57  ;;  %v17482_v52 = vld [vmem:[%s25092_s1 + $0xa54] ss:$8 sps:$4 sm:$0xff]   ;;  %v17546_v28 = vld [vmem:[%s25092_s1 + $0xb70] ss:$8 sps:$4 sm:$0xff]  }
 0x264   : > { %v5059_v43 = vpop.f32.mrf.mxu0  ;;  %7096 = vmatmul.mubr.bf16.gmra.mxu0 %v25931_v15  ;;  %10163 = vmatprep.subr.bf16.mxu0 %v17482_v52  ;;  %v25941_v15 = vld [vmem:[#allocation28_spill] sm:$0xff]  ;;  %v25944_v52 = vld [vmem:[#allocation29_spill] sm:$0xff] }
 0x265   : > { %25929 = vst [vmem:[#allocation172_spill] sm:$0xff] %v20660_v22  ;;  %v5252_v7 = vpop.f32.mrf.mxu1  ;;  %v20668_v13 = vadd.f32 %v5247_v53, %v25932_v39  ;;  %v5249_v56 = vadd.f32 %v5248_v63, %v5056_v45  ;;  %v5060_v25 = vadd.f32 %v5059_v43, %v25934_v33  ;;  %7105 = vmatprep.mubr.bf16.mxu0 %v25935_v17  ;;  %v25938_v63 = vld [vmem:[#allocation27_spill] sm:$0xff] }
 0x266   : > { %v5061_v23 = vpop.f32.mrf.mxu0  ;;  %v25940_v53 = vld [vmem:[#allocation23_spill] sm:$0xff]  ;;  %10164 = vmatpush1.bf16.msra.mxu0 %v17480_v21 }
 0x267   : > { %25933 = vst [vmem:[#allocation127_spill] sm:$0xff] %v20668_v13  ;;  %v5254_v31 = vpop.f32.mrf.mxu1  ;;  %v20676_v34 = vadd.f32 %v5249_v56, %v25936_v49  ;;  %v5253_v50 = vadd.f32 %v5252_v7, %v5060_v25  ;;  %v5062_v48 = vadd.f32 %v5061_v23, %v20218_v0  ;;  %v17483_v45 = vld [vmem:[%s25092_s1 + $0x9f0] ss:$8 sps:$4 sm:$0xff]   ;;  %v17485_v0 = vld [vmem:[%s25092_s1 + $0x9f4] ss:$8 sps:$4 sm:$0xff]  }
 0x268   : > { %v5063_v35 = vpop.f32.mrf.mxu0  ;;  %v17488_v7 = vld [vmem:[%s25092_s1 + $0xa44] ss:$8 sps:$4 sm:$0xff]   ;;  %9982 = vmatprep.subr.bf16.mxu1 %v17485_v0  ;;  %v17486_v25 = vld [vmem:[%s25092_s1 + $0xa40] ss:$8 sps:$4 sm:$0xff]   ;;  %v17489_v0 = vld [vmem:[%s25092_s1 + $0xa30] ss:$8 sps:$4 sm:$0xff]  }
 0x269   : > { %25937 = vst [vmem:[#allocation78_spill] sm:$0xff] %v20676_v34  ;;  %v5256_v8 = vpop.f32.mrf.mxu1  ;;  %v20683_v6 = vadd.f32 %v5253_v50, %v25938_v63  ;;  %v5255_v40 = vadd.f32 %v5254_v31, %v5062_v48  ;;  %v5064_v57 = vadd.f32 %v5063_v35, %v25940_v53  ;;  %v25943_v31 = vld [vmem:[#allocation98_spill] sm:$0xff]  ;;  %9983 = vmatpush2.bf16.msra.mxu1 %v17483_v45  ;;  %v25946_v48 = vld [vmem:[#allocation25_spill] sm:$0xff]  ;;  %v25947_v35 = vld [vmem:[#allocation99_spill] sm:$0xff] }
 0x26a   : > { %v5065_v30 = vpop.f32.mrf.mxu0  ;;  %10165 = vmatprep.subr.bf16.mxu0 %v17488_v7  ;;  %v17491_v63 = vld [vmem:[%s25092_s1 + $0xa34] ss:$8 sps:$4 sm:$0xff]  }
 0x26b   : > { %25939 = vst [vmem:[#allocation173_spill] sm:$0xff] %v20683_v6  ;;  %v5258_v43 = vpop.f32.mrf.mxu1  ;;  %v20696_v39 = vadd.f32 %v5255_v40, %v25941_v15  ;;  %v5257_v56 = vadd.f32 %v5256_v8, %v5064_v57  ;;  %v5066_v33 = vadd.f32 %v5065_v30, %v20234_v42  ;;  %10166 = vmatpush1.bf16.msra.mxu0 %v17486_v25  ;;  %v25948_v40 = vld [vmem:[#allocation30_spill] sm:$0xff]  ;;  %v17492_v25 = vld [vmem:[%s25092_s1 + $0x9e0] ss:$8 sps:$4 sm:$0xff]  }
 0x26c   : > { %v5069_v17 = vpop.f32.mrf.mxu0  ;;  %7106 = vmatmul.mubr.bf16.gmra.mxu0 %v25943_v31  ;;  %10167 = vmatprep.subr.bf16.mxu0 %v17491_v63  ;;  %v17497_v31 = vld [vmem:[%s25092_s1 + $0xa24] ss:$8 sps:$4 sm:$0xff]  }
 0x26d   : > { %25942 = vst [vmem:[#allocation80_spill] sm:$0xff] %v20696_v39  ;;  %v5262_v23 = vpop.f32.mrf.mxu1  ;;  %v20704_v49 = vadd.f32 %v5257_v56, %v25944_v52  ;;  %v5259_v50 = vadd.f32 %v5258_v43, %v5066_v33  ;;  %v5070_v21 = vadd.f32 %v5069_v17, %v25946_v48  ;;  %7115 = vmatprep.mubr.bf16.mxu0 %v25947_v35  ;;  %v25951_v56 = vld [vmem:[#allocation148_spill] sm:$0xff]  ;;  %v25954_v48 = vld [vmem:[#allocation149_spill] sm:$0xff] }
 0x26e   : > { %v5071_v42 = vpop.f32.mrf.mxu0  ;;  %v17495_v35 = vld [vmem:[%s25092_s1 + $0xa20] ss:$8 sps:$4 sm:$0xff]  }
 0x26f   : > { %25945 = vst [vmem:[#allocation128_spill] sm:$0xff] %v20704_v49  ;;  %v5264_v8 = vpop.f32.mrf.mxu1  ;;  %v20712_v53 = vadd.f32 %v5259_v50, %v25948_v40  ;;  %v5263_v57 = vadd.f32 %v5262_v23, %v5070_v21  ;;  %v5072_v45 = vadd.f32 %v5071_v42, %v20254_v19  ;;  %v17494_v19 = vld [vmem:[%s25092_s1 + $0x9e4] ss:$8 sps:$4 sm:$0xff]   ;;  %10168 = vmatpush1.bf16.msra.mxu0 %v17489_v0  ;;  %v25958_v0 = vld [vmem:[#allocation150_spill] sm:$0xff] }
 0x270   : > { %v5073_v30 = vpop.f32.mrf.mxu0  ;;  %9984 = vmatprep.subr.bf16.mxu1 %v17494_v19  ;;  %v25955_v63 = vld [vmem:[#allocation101_spill] sm:$0xff]  ;;  %v25956_v40 = vld [vmem:[#allocation32_spill] sm:$0xff]  ;;  %10169 = vmatprep.subr.bf16.mxu0 %v17497_v31  ;;  %v25960_v19 = vld [vmem:[#allocation34_spill] sm:$0xff] }
 0x271   : > { %25949 = vst [vmem:[#allocation74_spill] sm:$0xff] %v20712_v53  ;;  %v5266_v43 = vpop.f32.mrf.mxu1  ;;  %v20719_v7 = vadd.f32 %v5263_v57, %v20250_v10  ;;  %v5265_v15 = vadd.f32 %v5264_v8, %v5072_v45  ;;  %v5074_v33 = vadd.f32 %v5073_v30, %v25951_v56  ;;  %v25952_v10 = vld [vmem:[#allocation147_spill] sm:$0xff]  ;;  %9985 = vmatpush2.bf16.msra.mxu1 %v17492_v25  ;;  %v26020_v6 = vld [vmem:[#allocation133_spill] sm:$0xff] }
 0x272   : > { %v5075_v17 = vpop.f32.mrf.mxu0  ;;  %v25962_v31 = vld [vmem:[#allocation151_spill] sm:$0xff] }
 0x273   : > { %25950 = vst [vmem:[#allocation83_spill] sm:$0xff] %v20719_v7  ;;  %v5268_v23 = vpop.f32.mrf.mxu1  ;;  %v20732_v52 = vadd.f32 %v5265_v15, %v25952_v10  ;;  %v5267_v50 = vadd.f32 %v5266_v43, %v5074_v33  ;;  %v5076_v21 = vadd.f32 %v5075_v17, %v25954_v48  ;;  %v25959_v15 = vld [vmem:[#allocation102_spill] sm:$0xff]  ;;  %10170 = vmatpush1.bf16.msra.mxu0 %v17495_v35 }
 0x274   : > { %v5079_v42 = vpop.f32.mrf.mxu0  ;;  %7116 = vmatmul.mubr.bf16.gmra.mxu0 %v25955_v63  ;;  %v17500_v33 = vld [vmem:[%s25092_s1 + $0xa14] ss:$8 sps:$4 sm:$0xff]  }
 0x275   : > { %25953 = vst [vmem:[#allocation139_spill] sm:$0xff] %v20732_v52  ;;  %v5272_v8 = vpop.f32.mrf.mxu1  ;;  %v20740_v57 = vadd.f32 %v5267_v50, %v25956_v40  ;;  %v5269_v45 = vadd.f32 %v5268_v23, %v5076_v21  ;;  %v5080_v30 = vadd.f32 %v5079_v42, %v25958_v0  ;;  %7125 = vmatprep.mubr.bf16.mxu0 %v25959_v15  ;;  %v17498_v23 = vld [vmem:[%s25092_s1 + $0xa10] ss:$8 sps:$4 sm:$0xff]   ;;  %v25964_v42 = vld [vmem:[#allocation33_spill] sm:$0xff] }
 0x276   : > { %v5081_v43 = vpop.f32.mrf.mxu0  ;;  %10171 = vmatprep.subr.bf16.mxu0 %v17500_v33  ;;  %v17501_v40 = vld [vmem:[%s25092_s1 + $0x9d0] ss:$8 sps:$4 sm:$0xff]   ;;  %v17506_v0 = vld [vmem:[%s25092_s1 + $0xa04] ss:$8 sps:$4 sm:$0xff]  }
 0x277   : > { %25957 = vst [vmem:[#allocation141_spill] sm:$0xff] %v20740_v57  ;;  %v5274_v56 = vpop.f32.mrf.mxu1  ;;  %v20748_v17 = vadd.f32 %v5269_v45, %v25960_v19  ;;  %v5273_v25 = vadd.f32 %v5272_v8, %v5080_v30  ;;  %v5082_v10 = vadd.f32 %v5081_v43, %v20290_v24  ;;  %v17503_v24 = vld [vmem:[%s25092_s1 + $0x9d4] ss:$8 sps:$4 sm:$0xff]   ;;  %10172 = vmatpush1.bf16.msra.mxu0 %v17498_v23  ;;  %v17504_v19 = vld [vmem:[%s25092_s1 + $0xa00] ss:$8 sps:$4 sm:$0xff]  }
 0x278   : > { %v5083_v50 = vpop.f32.mrf.mxu0  ;;  %v25965_v30 = vld [vmem:[#allocation38_spill] sm:$0xff]  ;;  %9986 = vmatprep.subr.bf16.mxu1 %v17503_v24  ;;  %v25969_v23 = vld [vmem:[#allocation41_spill] sm:$0xff]  ;;  %10173 = vmatprep.subr.bf16.mxu0 %v17506_v0 }
 0x279   : > { %25961 = vst [vmem:[#allocation79_spill] sm:$0xff] %v20748_v17  ;;  %v5276_v48 = vpop.f32.mrf.mxu1  ;;  %v20755_v21 = vadd.f32 %v5273_v25, %v25962_v31  ;;  %v5275_v35 = vadd.f32 %v5274_v56, %v5082_v10  ;;  %v5084_v63 = vadd.f32 %v5083_v50, %v25964_v42  ;;  %v25967_v56 = vld [vmem:[#allocation40_spill] sm:$0xff]  ;;  %9987 = vmatpush2.bf16.msra.mxu1 %v17501_v40  ;;  %v17509_v24 = vld [vmem:[%s25092_s1 + $0xaf4] ss:$8 sps:$4 sm:$0xff]   ;;  %v25976_v0 = vld [vmem:[#allocation153_spill] sm:$0xff] }
 0x27a   : > { %v5085_v8 = vpop.f32.mrf.mxu0  ;;  %v25968_v50 = vld [vmem:[#allocation104_spill] sm:$0xff] }
 0x27b   : > { %25963 = vst [vmem:[#allocation82_spill] sm:$0xff] %v20755_v21  ;;  %v5278_v45 = vpop.f32.mrf.mxu1  ;;  %v20768_v15 = vadd.f32 %v5275_v35, %v25965_v30  ;;  %v5277_v43 = vadd.f32 %v5276_v48, %v5084_v63  ;;  %v5086_v33 = vadd.f32 %v5085_v8, %v25967_v56  ;;  %v25971_v17 = vld [vmem:[#allocation152_spill] sm:$0xff]  ;;  %v25972_v30 = vld [vmem:[#allocation105_spill] sm:$0xff]  ;;  %10174 = vmatpush1.bf16.msra.mxu0 %v17504_v19  ;;  %v25973_v8 = vld [vmem:[#allocation35_spill] sm:$0xff] }
 0x27c   : > { %v5089_v25 = vpop.f32.mrf.mxu0  ;;  %7126 = vmatmul.mubr.bf16.gmra.mxu0 %v25968_v50  ;;  %v25975_v50 = vld [vmem:[#allocation43_spill] sm:$0xff]  ;;  %10175 = vmatprep.subr.bf16.mxu0 %v17509_v24  ;;  %v17515_v24 = vld [vmem:[%s25092_s1 + $0xae4] ss:$8 sps:$4 sm:$0xff]   ;;  %v26019_v21 = vld [vmem:[#allocation130_spill] sm:$0xff] }
 0x27d   : > { %25966 = vst [vmem:[#allocation81_spill] sm:$0xff] %v20768_v15  ;;  %v5282_v10 = vpop.f32.mrf.mxu1  ;;  %v20776_v31 = vadd.f32 %v5277_v43, %v25969_v23  ;;  %v5279_v42 = vadd.f32 %v5278_v45, %v5086_v33  ;;  %v5090_v35 = vadd.f32 %v5089_v25, %v25971_v17  ;;  %7135 = vmatprep.mubr.bf16.mxu0 %v25972_v30  ;;  %v17507_v17 = vld [vmem:[%s25092_s1 + $0xaf0] ss:$8 sps:$4 sm:$0xff]   ;;  %v25978_v23 = vld [vmem:[#allocation45_spill] sm:$0xff] }
 0x27e   : > { %v5091_v48 = vpop.f32.mrf.mxu0  ;;  %v25985_v15 = vld [vmem:[#allocation181_spill] sm:$0xff] }
 0x27f   : > { %25970 = vst [vmem:[#allocation87_spill] sm:$0xff] %v20776_v31  ;;  %v5284_v63 = vpop.f32.mrf.mxu1  ;;  %v20784_v56 = vadd.f32 %v5279_v42, %v25973_v8  ;;  %v5283_v40 = vadd.f32 %v5282_v10, %v5090_v35  ;;  %v5092_v43 = vadd.f32 %v5091_v48, %v25975_v50  ;;  %v17510_v42 = vld [vmem:[%s25092_s1 + $0x9c0] ss:$8 sps:$4 sm:$0xff]   ;;  %v17512_v10 = vld [vmem:[%s25092_s1 + $0x9c4] ss:$8 sps:$4 sm:$0xff]   ;;  %10176 = vmatpush2.bf16.msra.mxu0 %v17507_v17  ;;  %v25979_v8 = vld [vmem:[#allocation39_spill] sm:$0xff] }
 0x280   : > { %v5093_v45 = vpop.f32.mrf.mxu0  ;;  %v25981_v50 = vld [vmem:[#allocation155_spill] sm:$0xff]  ;;  %9988 = vmatprep.subr.bf16.mxu1 %v17512_v10  ;;  %v25983_v17 = vld [vmem:[#allocation154_spill] sm:$0xff]  ;;  %10177 = vmatprep.subr.bf16.mxu0 %v17515_v24  ;;  %v25990_v24 = vld [vmem:[#allocation48_spill] sm:$0xff] }
 0x281   : > { %25974 = vst [vmem:[#allocation15_spill] sm:$0xff] %v20784_v56  ;;  %v5286_v33 = vpop.f32.mrf.mxu1  ;;  %v20791_v25 = vadd.f32 %v5283_v40, %v25976_v0  ;;  %v5285_v19 = vadd.f32 %v5284_v63, %v5092_v43  ;;  %v5094_v30 = vadd.f32 %v5093_v45, %v25978_v23  ;;  %v17513_v45 = vld [vmem:[%s25092_s1 + $0xae0] ss:$8 sps:$4 sm:$0xff]   ;;  %9989 = vmatpush2.bf16.msra.mxu1 %v17510_v42  ;;  %v17518_v10 = vld [vmem:[%s25092_s1 + $0xad4] ss:$8 sps:$4 sm:$0xff]  }
 0x282   : > { %v5095_v35 = vpop.f32.mrf.mxu0  ;;  %v25989_v42 = vld [vmem:[#allocation44_spill] sm:$0xff] }
 0x283   : > { %25977 = vst [vmem:[#allocation176_spill] sm:$0xff] %v20791_v25  ;;  %v5288_v48 = vpop.f32.mrf.mxu1  ;;  %v20804_v40 = vadd.f32 %v5285_v19, %v25979_v8  ;;  %v5287_v63 = vadd.f32 %v5286_v33, %v5094_v30  ;;  %v5096_v43 = vadd.f32 %v5095_v35, %v25981_v50  ;;  %v25982_v25 = vld [vmem:[#allocation107_spill] sm:$0xff]  ;;  %v25986_v8 = vld [vmem:[#allocation108_spill] sm:$0xff]  ;;  %10178 = vmatpush2.bf16.msra.mxu0 %v17513_v45 }
 0x284   : > { %v5099_v0 = vpop.f32.mrf.mxu0  ;;  %7136 = vmatmul.mubr.bf16.gmra.mxu0 %v25982_v25  ;;  %v25987_v35 = vld [vmem:[#allocation156_spill] sm:$0xff]  ;;  %10179 = vmatprep.subr.bf16.mxu0 %v17518_v10 }
 0x285   : > { %25980 = vst [vmem:[#allocation89_spill] sm:$0xff] %v20804_v40  ;;  %v5292_v23 = vpop.f32.mrf.mxu1  ;;  %v20812_v56 = vadd.f32 %v5287_v63, %v25983_v17  ;;  %v5289_v31 = vadd.f32 %v5288_v48, %v5096_v43  ;;  %v5100_v19 = vadd.f32 %v5099_v0, %v25985_v15  ;;  %7145 = vmatprep.mubr.bf16.mxu0 %v25986_v8  ;;  %v17516_v15 = vld [vmem:[%s25092_s1 + $0xad0] ss:$8 sps:$4 sm:$0xff]   ;;  %v17524_v10 = vld [vmem:[%s25092_s1 + $0xac4] ss:$8 sps:$4 sm:$0xff]  }
 0x286   : > { %v5101_v33 = vpop.f32.mrf.mxu0  ;;  %v25992_v17 = vld [vmem:[#allocation46_spill] sm:$0xff]  ;;  %v25999_v40 = vld [vmem:[#allocation183_spill] sm:$0xff] }
 0x287   : > { %25984 = vst [vmem:[#allocation175_spill] sm:$0xff] %v20812_v56  ;;  %v5294_v30 = vpop.f32.mrf.mxu1  ;;  %v20820_v50 = vadd.f32 %v5289_v31, %v25987_v35  ;;  %v5293_v25 = vadd.f32 %v5292_v23, %v5100_v19  ;;  %v5102_v63 = vadd.f32 %v5101_v33, %v25989_v42  ;;  %v17519_v31 = vld [vmem:[%s25092_s1 + $0x9b0] ss:$8 sps:$4 sm:$0xff]   ;;  %v17521_v23 = vld [vmem:[%s25092_s1 + $0x9b4] ss:$8 sps:$4 sm:$0xff]   ;;  %10180 = vmatpush2.bf16.msra.mxu0 %v17516_v15  ;;  %v25997_v15 = vld [vmem:[#allocation157_spill] sm:$0xff] }
 0x288   : > { %v5103_v48 = vpop.f32.mrf.mxu0  ;;  %v25993_v35 = vld [vmem:[#allocation51_spill] sm:$0xff]  ;;  %v25995_v42 = vld [vmem:[#allocation182_spill] sm:$0xff]  ;;  %9990 = vmatprep.subr.bf16.mxu1 %v17521_v23  ;;  %10181 = vmatprep.subr.bf16.mxu0 %v17524_v10  ;;  %v26004_v10 = vld [vmem:[#allocation53_spill] sm:$0xff] }
 0x289   : > { %25988 = vst [vmem:[#allocation178_spill] sm:$0xff] %v20820_v50  ;;  %v5296_v43 = vpop.f32.mrf.mxu1  ;;  %v20827_v0 = vadd.f32 %v5293_v25, %v25990_v24  ;;  %v5295_v45 = vadd.f32 %v5294_v30, %v5102_v63  ;;  %v5104_v8 = vadd.f32 %v5103_v48, %v25992_v17  ;;  %v17522_v48 = vld [vmem:[%s25092_s1 + $0xac0] ss:$8 sps:$4 sm:$0xff]   ;;  %9991 = vmatpush2.bf16.msra.mxu1 %v17519_v31  ;;  %v17527_v23 = vld [vmem:[%s25092_s1 + $0xab4] ss:$8 sps:$4 sm:$0xff]  }
 0x28a   : > { %v5105_v19 = vpop.f32.mrf.mxu0  ;;  %v26003_v31 = vld [vmem:[#allocation49_spill] sm:$0xff] }
 0x28b   : > { %25991 = vst [vmem:[#allocation90_spill] sm:$0xff] %v20827_v0  ;;  %v5298_v33 = vpop.f32.mrf.mxu1  ;;  %v20840_v25 = vadd.f32 %v5295_v45, %v25993_v35  ;;  %v5297_v30 = vadd.f32 %v5296_v43, %v5104_v8  ;;  %v5106_v63 = vadd.f32 %v5105_v19, %v25995_v42  ;;  %v25996_v0 = vld [vmem:[#allocation110_spill] sm:$0xff]  ;;  %v26000_v35 = vld [vmem:[#allocation111_spill] sm:$0xff]  ;;  %10182 = vmatpush2.bf16.msra.mxu0 %v17522_v48 }
 0x28c   : > { %v5109_v24 = vpop.f32.mrf.mxu0  ;;  %7146 = vmatmul.mubr.bf16.gmra.mxu0 %v25996_v0  ;;  %v26001_v19 = vld [vmem:[#allocation158_spill] sm:$0xff]  ;;  %10183 = vmatprep.subr.bf16.mxu0 %v17527_v23  ;;  %v17533_v23 = vld [vmem:[%s25092_s1 + $0xaa4] ss:$8 sps:$4 sm:$0xff]  }
 0x28d   : > { %25994 = vst [vmem:[#allocation177_spill] sm:$0xff] %v20840_v25  ;;  %v5302_v17 = vpop.f32.mrf.mxu1  ;;  %v20848_v50 = vadd.f32 %v5297_v30, %v25997_v15  ;;  %v5299_v56 = vadd.f32 %v5298_v33, %v5106_v63  ;;  %v5110_v45 = vadd.f32 %v5109_v24, %v25999_v40  ;;  %7155 = vmatprep.mubr.bf16.mxu0 %v26000_v35  ;;  %v17525_v40 = vld [vmem:[%s25092_s1 + $0xab0] ss:$8 sps:$4 sm:$0xff]   ;;  %v26006_v15 = vld [vmem:[#allocation184_spill] sm:$0xff] }
 0x28e   : > { %v5111_v43 = vpop.f32.mrf.mxu0 }
 0x28f   : > { %25998 = vst [vmem:[#allocation19_spill] sm:$0xff] %v20848_v50  ;;  %v5304_v8 = vpop.f32.mrf.mxu1  ;;  %v20856_v42 = vadd.f32 %v5299_v56, %v26001_v19  ;;  %v5303_v0 = vadd.f32 %v5302_v17, %v5110_v45  ;;  %v5112_v30 = vadd.f32 %v5111_v43, %v26003_v31  ;;  %v17528_v56 = vld [vmem:[%s25092_s1 + $0x9a0] ss:$8 sps:$4 sm:$0xff]   ;;  %v17530_v17 = vld [vmem:[%s25092_s1 + $0x9a4] ss:$8 sps:$4 sm:$0xff]   ;;  %10184 = vmatpush2.bf16.msra.mxu0 %v17525_v40  ;;  %v26009_v31 = vld [vmem:[#allocation186_spill] sm:$0xff] }
 0x290   : > { %v5113_v33 = vpop.f32.mrf.mxu0  ;;  %v26007_v19 = vld [vmem:[#allocation56_spill] sm:$0xff]  ;;  %9992 = vmatprep.subr.bf16.mxu1 %v17530_v17  ;;  %v26010_v40 = vld [vmem:[#allocation117_spill] sm:$0xff]  ;;  %10185 = vmatprep.subr.bf16.mxu0 %v17533_v23  ;;  %v17536_v17 = vld [vmem:[%s25092_s1 + $0xa94] ss:$8 sps:$4 sm:$0xff]  }
 0x291   : > { %26002 = vst [vmem:[#allocation17_spill] sm:$0xff] %v20856_v42  ;;  %v5306_v63 = vpop.f32.mrf.mxu1  ;;  %v20863_v24 = vadd.f32 %v5303_v0, %v26004_v10  ;;  %v5305_v48 = vadd.f32 %v5304_v8, %v5112_v30  ;;  %v5114_v35 = vadd.f32 %v5113_v33, %v26006_v15  ;;  %v17531_v33 = vld [vmem:[%s25092_s1 + $0xaa0] ss:$8 sps:$4 sm:$0xff]   ;;  %9993 = vmatpush2.bf16.msra.mxu1 %v17528_v56  ;;  %v17539_v23 = vld [vmem:[%s25092_s1 + $0x994] ss:$8 sps:$4 sm:$0xff]  }
 0x292   : > { %v5115_v45 = vpop.f32.mrf.mxu0  ;;  %9994 = vmatprep.subr.bf16.mxu1 %v17539_v23 }
 0x293   : > { %26005 = vst [vmem:[#allocation20_spill] sm:$0xff] %v20863_v24  ;;  %v5308_v43 = vpop.f32.mrf.mxu1  ;;  %v20876_v0 = vadd.f32 %v5305_v48, %v26007_v19  ;;  %v5307_v8 = vadd.f32 %v5306_v63, %v5114_v35  ;;  %v5116_v30 = vadd.f32 %v5115_v45, %v26009_v31  ;;  %v26011_v24 = vld [vmem:[#allocation185_spill] sm:$0xff]  ;;  %v26013_v19 = vld [vmem:[#allocation119_spill] sm:$0xff]  ;;  %10186 = vmatpush2.bf16.msra.mxu0 %v17531_v33  ;;  %v26014_v45 = vld [vmem:[#allocation50_spill] sm:$0xff] }
 0x294   : > { %v20882_v10 = vpop.f32.mrf.mxu0  ;;  %7156 = vmatmul.mubr.bf16.gmra.mxu0 %v26010_v40  ;;  %10187 = vmatprep.subr.bf16.mxu0 %v17536_v17  ;;  %v17537_v33 = vld [vmem:[%s25092_s1 + $0x990] ss:$8 sps:$4 sm:$0xff]   ;;  %v17542_v40 = vld [vmem:[%s25092_s1 + $0xa84] ss:$8 sps:$4 sm:$0xff]  }
 0x295   : > { %26008 = vst [vmem:[#allocation92_spill] sm:$0xff] %v20876_v0  ;;  %v20884_v15 = vpop.f32.mrf.mxu1  ;;  %v20888_v42 = vadd.f32 %v5307_v8, %v26011_v24  ;;  %v5309_v48 = vadd.f32 %v5308_v43, %v5116_v30  ;;  %7165 = vmatprep.mubr.bf16.mxu0 %v26013_v19  ;;  %v17534_v24 = vld [vmem:[%s25092_s1 + $0xa90] ss:$8 sps:$4 sm:$0xff]   ;;  %9995 = vmatpush2.bf16.msra.mxu1 %v17537_v33  ;;  %v17543_v0 = vld [vmem:[%s25092_s1 + $0x980] ss:$8 sps:$4 sm:$0xff]  }
 0x296   : > { %v20891_v63 = vpop.f32.mrf.mxu0 }
 0x297   : > { %26012 = vst [vmem:[#allocation14_spill] sm:$0xff] %v20888_v42  ;;  %v20893_v35 = vpop.f32.mrf.mxu1  ;;  %v20899_v31 = vadd.f32 %v5309_v48, %v26014_v45  ;;  %10188 = vmatpush2.bf16.msra.mxu0 %v17534_v24  ;;  %v17540_v48 = vld [vmem:[%s25092_s1 + $0xa80] ss:$8 sps:$4 sm:$0xff]   ;;  %v17545_v24 = vld [vmem:[%s25092_s1 + $0x984] ss:$8 sps:$4 sm:$0xff]  }
 0x298   : > { %v20904_v56 = vpop.f32.mrf.mxu0  ;;  %v26016_v45 = vld [vmem:[#allocation124_spill] sm:$0xff]  ;;  %10189 = vmatprep.subr.bf16.mxu0 %v17542_v40  ;;  %9996 = vmatprep.subr.bf16.mxu1 %v17545_v24 }
 0x299   : > { %26015 = vst [vmem:[#allocation143_spill] sm:$0xff] %v20899_v31  ;;  %v20906_v43 = vpop.f32.mrf.mxu1  ;;  %v26017_v31 = vld [vmem:[#allocation125_spill] sm:$0xff]  ;;  %9997 = vmatpush2.bf16.msra.mxu1 %v17543_v0 }
 0x29a   : > { %v20911_v8 = vpop.f32.mrf.mxu0  ;;  %10352 = vmatprep.subr.bf16.mxu1 %v17548_v61  ;;  %v17549_v61 = vld [vmem:[%s25092_s1 + $0xb60] ss:$8 sps:$4 sm:$0xff]  }
 0x29b   : > { %v20913_v30 = vpop.f32.mrf.mxu1  ;;  %10190 = vmatpush2.bf16.msra.mxu0 %v17540_v48  ;;  %v26018_v48 = vld [vmem:[#allocation129_spill] sm:$0xff] }
 0x29c   : > { %v20924_v19 = vpop.f32.mrf.mxu0  ;;  %7166 = vmatmul.mubr.bf16.gmra.mxu0 %v26016_v45  ;;  %9999 = vmatmul.mubr.bf16.vlgmr.msra.gmra.mxu1 %v25897_v38 }
 0x29d   : > { %v20926_v17 = vpop.f32.mrf.mxu1  ;;  %7175 = vmatprep.mubr.bf16.mxu0 %v26017_v31  ;;  %10353 = vmatpush1.bf16.msra.mxu1 %v17546_v28 }
 0x29e   : > { %v20933_v42 = vpop.f32.mrf.mxu0  ;;  %10354 = vmatprep.subr.bf16.mxu1 %v17551_v47  ;;  %v17552_v47 = vld [vmem:[%s25092_s1 + $0xb50] ss:$8 sps:$4 sm:$0xff]  }
 0x29f   : > { %v20935_v23 = vpop.f32.mrf.mxu1 }
 0x2a0   : > { %v20940_v50 = vpop.f32.mrf.mxu0 }
 0x2a1   : > { %v20942_v33 = vpop.f32.mrf.mxu1  ;;  %10355 = vmatpush1.bf16.msra.mxu1 %v17549_v61 }
 0x2a2   : > { %v20944_v31 = vpop.f32.mrf.mxu0  ;;  %10356 = vmatprep.subr.bf16.mxu1 %v17554_v12 }
 0x2a3   : > { %v20946_v40 = vpop.f32.mrf.mxu1 }
 0x2a4   : > { %v20949_v45 = vpop.f32.mrf.mxu0  ;;  %7176 = vmatmul.mubr.bf16.gmra.mxu0 %v26018_v48  ;;  %v26021_v48 = vld [vmem:[#allocation134_spill] sm:$0xff] }
 0x2a5   : > { %v20951_v25 = vpop.f32.mrf.mxu1  ;;  %7185 = vmatprep.mubr.bf16.mxu0 %v26019_v21  ;;  %10357 = vmatpush1.bf16.msra.mxu1 %v17552_v47 }
 0x2a6   : > { %v20955_v24 = vpop.f32.mrf.mxu0 }
 0x2a7   : > { %v20957_v57 = vpop.f32.mrf.mxu1 }
 0x2a8   : > { %v20959_v53 = vpop.f32.mrf.mxu0 }
 0x2a9   : > { %v20961_v0 = vpop.f32.mrf.mxu1 }
 0x2aa   : > { %v20963_v52 = vpop.f32.mrf.mxu0 }
 0x2ab   : > { %v20965_v7 = vpop.f32.mrf.mxu1 }
 0x2ac   : > { %v20967_v49 = vpop.f32.mrf.mxu0  ;;  %7186 = vmatmul.mubr.bf16.gmra.mxu0 %v26020_v6 }
 0x2ad   : > { %v20969_v39 = vpop.f32.mrf.mxu1  ;;  %7195 = vmatprep.mubr.bf16.mxu0 %v26021_v48 }
 0x2ae   : > { %v20973_v21 = vpop.f32.mrf.mxu0 }
 0x2af   : > { %v20975_v34 = vpop.f32.mrf.mxu1 }
 0x2b0   : > { %v20977_v13 = vpop.f32.mrf.mxu0 }
 0x2b1   : > { %v20979_v22 = vpop.f32.mrf.mxu1 }
 0x2b2   : > { %v20987_v51 = vpop.f32.mrf.mxu0 }
 0x2b3   : > { %v20989_v6 = vpop.f32.mrf.mxu1 }
 0x2b4   : > { %v20991_v48 = vpop.f32.mrf.mxu0  ;;  %7196 = vmatmul.mubr.bf16.gmra.mxu0 %v26022_v44 }
 0x2b5   : > { %v20993_v62 = vpop.f32.mrf.mxu1  ;;  %7205 = vmatprep.mubr.bf16.mxu0 %v26023_v9 }
 0x2b6   : > { %v20997_v18 = vpop.f32.mrf.mxu0 }
 0x2b7   : > { %v20999_v5 = vpop.f32.mrf.mxu1 }
 0x2b8   : > { %v21001_v59 = vpop.f32.mrf.mxu0 }
 0x2b9   : > { %v21003_v26 = vpop.f32.mrf.mxu1 }
 0x2ba   : > { %v21011_v44 = vpop.f32.mrf.mxu0 }
 0x2bb   : > { %v21013_v28 = vpop.f32.mrf.mxu1 }
 0x2bc   : > { %v21015_v9 = vpop.f32.mrf.mxu0  ;;  %7206 = vmatmul.mubr.bf16.gmra.mxu0 %v26024_v55 }
 0x2bd   : > { %v21017_v46 = vpop.f32.mrf.mxu1  ;;  %7215 = vmatprep.mubr.bf16.mxu0 %v26025_v14 }
 0x2be   : > { %v21021_v60 = vpop.f32.mrf.mxu0 }
 0x2bf   : > { %v21023_v16 = vpop.f32.mrf.mxu1 }
 0x2c0   : > { %v21025_v41 = vpop.f32.mrf.mxu0 }
 0x2c1   : > { %v21027_v36 = vpop.f32.mrf.mxu1 }
 0x2c2   : > { %v21035_v55 = vpop.f32.mrf.mxu0 }
 0x2c3   : > { %v21037_v61 = vpop.f32.mrf.mxu1 }
 0x2c4   : > { %v21039_v14 = vpop.f32.mrf.mxu0  ;;  %7216 = vmatmul.mubr.bf16.gmra.mxu0 %v26026_v32  ;;  %v17557_v32 = vld [vmem:[%s25092_s1 + $0xb44] ss:$8 sps:$4 sm:$0xff]  }
 0x2c5   : > { %v21041_v2 = vpop.f32.mrf.mxu1  ;;  %7225 = vmatprep.mubr.bf16.mxu0 %v25890_v20  ;;  %10358 = vmatprep.subr.bf16.mxu1 %v17557_v32  ;;  %v17558_v32 = vld [vmem:[%s25092_s1 + $0xb30] ss:$8 sps:$4 sm:$0xff]  }
 0x2c6   : > { %v21045_v11 = vpop.f32.mrf.mxu0  ;;  %10359 = vmatpush1.bf16.msra.mxu1 %v17555_v37  ;;  %v17560_v37 = vld [vmem:[%s25092_s1 + $0xb34] ss:$8 sps:$4 sm:$0xff]  }
 0x2c7   : > { %26027 = vst [vmem:[#allocation93_spill] sm:$0xff] %v21045_v11  ;;  %v21047_v58 = vpop.f32.mrf.mxu1  ;;  %10360 = vmatprep.subr.bf16.mxu1 %v17560_v37  ;;  %v17561_v37 = vld [vmem:[%s25092_s1 + $0xb20] ss:$8 sps:$4 sm:$0xff]   ;;  %v21299_v11 = vadd.f32 %v20913_v30, %v20911_v8  ;;  %v21322_v8 = vadd.f32 %v20942_v33, %v20940_v50  ;;  %v21326_v30 = vadd.f32 %v20946_v40, %v20944_v31 }
 0x2c8   : > { %26028 = vst [vmem:[#allocation142_spill] sm:$0xff] %v21047_v58  ;;  %v21049_v4 = vpop.f32.mrf.mxu0  ;;  %v21343_v50 = vadd.f32 %v20961_v0, %v20959_v53  ;;  %v21362_v53 = vadd.f32 %v20979_v22, %v20977_v13  ;;  %v21372_v33 = vadd.f32 %v20993_v62, %v20991_v48  ;;  %v21384_v22 = vadd.f32 %v21013_v28, %v21011_v44  ;;  %v17603_v0 = vld [vmem:[%s25092_s1 + $0xcf0] ss:$8 sps:$4 sm:$0xff]  }
 0x2c9   : > { %26029 = vst [vmem:[#allocation18_spill] sm:$0xff] %v21049_v4  ;;  %v21051_v54 = vpop.f32.mrf.mxu1  ;;  %v21390_v13 = vadd.f32 %v21017_v46, %v21015_v9  ;;  %v21394_v62 = vadd.f32 %v21023_v16, %v21021_v60  ;;  %v21411_v46 = vadd.f32 %v21041_v2, %v21039_v14 }
 0x2ca   : > { %26030 = vst [vmem:[#allocation22_spill] sm:$0xff] %v21051_v54  ;;  %v21053_v27 = vpop.f32.mrf.mxu0  ;;  %10361 = vmatpush1.bf16.msra.mxu1 %v17558_v32  ;;  %v17563_v32 = vld [vmem:[%s25092_s1 + $0xb24] ss:$8 sps:$4 sm:$0xff]  }
 0x2cb   : > { %26031 = vst [vmem:[#allocation144_spill] sm:$0xff] %v21053_v27  ;;  %v21055_v12 = vpop.f32.mrf.mxu1  ;;  %10362 = vmatprep.subr.bf16.mxu1 %v17563_v32 }
 0x2cc   : > { %26032 = vst [vmem:[#allocation24_spill] sm:$0xff] %v21055_v12  ;;  %v21063_v47 = vpop.f32.mrf.mxu0  ;;  %7226 = vmatmul.mubr.bf16.gmra.mxu0 %v25897_v38 }
 0x2cd   : > { %26033 = vst [vmem:[#allocation179_spill] sm:$0xff] %v21063_v47  ;;  %v21065_v3 = vpop.f32.mrf.mxu1  ;;  %10191 = vmatprep.mubr.bf16.mxu0 %v25890_v20 }
 0x2ce   : > { %26034 = vst [vmem:[#allocation95_spill] sm:$0xff] %v21065_v3  ;;  %v21069_v29 = vpop.f32.mrf.mxu0  ;;  %10363 = vmatpush1.bf16.msra.mxu1 %v17561_v37  ;;  %v17566_v37 = vld [vmem:[%s25092_s1 + $0xb14] ss:$8 sps:$4 sm:$0xff]   ;;  %v26096_v16 = vld [vmem:[#allocation93_spill] sm:$0xff] }
 0x2cf   : > { %26035 = vst [vmem:[#allocation145_spill] sm:$0xff] %v21069_v29  ;;  %v21071_v1 = vpop.f32.mrf.mxu1  ;;  %10364 = vmatprep.subr.bf16.mxu1 %v17566_v37  ;;  %v17570_v37 = vld [vmem:[%s25092_s1 + $0xb00] ss:$8 sps:$4 sm:$0xff]   ;;  %v26097_v60 = vld [vmem:[#allocation142_spill] sm:$0xff] }
 0x2d0   : > { %26036 = vst [vmem:[#allocation180_spill] sm:$0xff] %v21071_v1  ;;  %v21073_v12 = vpop.f32.mrf.mxu0 }
 0x2d1   : > { %26037 = vst [vmem:[#allocation96_spill] sm:$0xff] %v21073_v12  ;;  %v21075_v27 = vpop.f32.mrf.mxu1 }
 0x2d2   : > { %26038 = vst [vmem:[#allocation146_spill] sm:$0xff] %v21075_v27  ;;  %v21077_v54 = vpop.f32.mrf.mxu0  ;;  %v26100_v40 = vld [vmem:[#allocation144_spill] sm:$0xff] }
 0x2d3   : > { %26039 = vst [vmem:[#allocation27_spill] sm:$0xff] %v21077_v54  ;;  %v21079_v4 = vpop.f32.mrf.mxu1 }
 0x2d4   : > { %26040 = vst [vmem:[#allocation23_spill] sm:$0xff] %v21079_v4  ;;  %v21081_v47 = vpop.f32.mrf.mxu0  ;;  %10192 = vmatmul.mubr.bf16.vlgmr.msra.gmra.mxu0 %v25897_v38 }
 0x2d5   : > { %26041 = vst [vmem:[#allocation28_spill] sm:$0xff] %v21081_v47  ;;  %v21083_v3 = vpop.f32.mrf.mxu1 }
 0x2d6   : > { %26042 = vst [vmem:[#allocation98_spill] sm:$0xff] %v21083_v3  ;;  %v21092_v20 = vpop.f32.mrf.mxu0  ;;  %v26104_v48 = vld [vmem:[#allocation145_spill] sm:$0xff] }
 0x2d7   : > { %26043 = vst [vmem:[#allocation29_spill] sm:$0xff] %v21092_v20  ;;  %v21094_v27 = vpop.f32.mrf.mxu1  ;;  %v17585_v20 = vld [vmem:[%s25092_s1 + $0xc30] ss:$8 sps:$4 sm:$0xff]   ;;  %v26105_v44 = vld [vmem:[#allocation180_spill] sm:$0xff] }
 0x2d8   : > { %26044 = vst [vmem:[#allocation25_spill] sm:$0xff] %v21094_v27  ;;  %v21096_v4 = vpop.f32.mrf.mxu0  ;;  %v21434_v28 = vadd.f32 %v26105_v44, %v26104_v48  ;;  %v26106_v9 = vld [vmem:[#allocation96_spill] sm:$0xff] }
 0x2d9   : > { %26045 = vst [vmem:[#allocation99_spill] sm:$0xff] %v21096_v4  ;;  %v21098_v47 = vpop.f32.mrf.mxu1 }
 0x2da   : > { %26046 = vst [vmem:[#allocation30_spill] sm:$0xff] %v21098_v47  ;;  %v21100_v3 = vpop.f32.mrf.mxu0  ;;  %v26108_v14 = vld [vmem:[#allocation27_spill] sm:$0xff] }
 0x2db   : > { %26047 = vst [vmem:[#allocation148_spill] sm:$0xff] %v21100_v3  ;;  %v21102_v38 = vpop.f32.mrf.mxu1 }
 0x2dc   : > { %26048 = vst [vmem:[#allocation147_spill] sm:$0xff] %v21102_v38  ;;  %v21104_v54 = vpop.f32.mrf.mxu0 }
 0x2dd   : > { %26049 = vst [vmem:[#allocation149_spill] sm:$0xff] %v21104_v54  ;;  %v21106_v12 = vpop.f32.mrf.mxu1 }
 0x2de   : > { %26050 = vst [vmem:[#allocation101_spill] sm:$0xff] %v21106_v12  ;;  %v21108_v1 = vpop.f32.mrf.mxu0 }
 0x2df   : > { %26051 = vst [vmem:[#allocation32_spill] sm:$0xff] %v21108_v1  ;;  %v21110_v29 = vpop.f32.mrf.mxu1 }
 0x2e0   : > { %26052 = vst [vmem:[#allocation150_spill] sm:$0xff] %v21110_v29  ;;  %v21118_v47 = vpop.f32.mrf.mxu0 }
 0x2e1   : > { %26053 = vst [vmem:[#allocation102_spill] sm:$0xff] %v21118_v47  ;;  %v21120_v3 = vpop.f32.mrf.mxu1  ;;  %v17564_v47 = vld [vmem:[%s25092_s1 + $0xb10] ss:$8 sps:$4 sm:$0xff]  }
 0x2e2   : > { %26054 = vst [vmem:[#allocation34_spill] sm:$0xff] %v21120_v3  ;;  %v21122_v54 = vpop.f32.mrf.mxu0  ;;  %10365 = vmatpush1.bf16.msra.mxu1 %v17564_v47  ;;  %v17569_v47 = vld [vmem:[%s25092_s1 + $0xc74] ss:$8 sps:$4 sm:$0xff]   ;;  %v26119_v44 = vld [vmem:[#allocation148_spill] sm:$0xff] }
 0x2e3   : > { %26055 = vst [vmem:[#allocation151_spill] sm:$0xff] %v21122_v54  ;;  %v21124_v12 = vpop.f32.mrf.mxu1  ;;  %11762 = vmatprep.subr.bf16.mxu0 %v17569_v47  ;;  %v17578_v47 = vld [vmem:[%s25092_s1 + $0xc54] ss:$8 sps:$4 sm:$0xff]  }
 0x2e4   : > { %26056 = vst [vmem:[#allocation33_spill] sm:$0xff] %v21124_v12  ;;  %v21126_v1 = vpop.f32.mrf.mxu0 }
 0x2e5   : > { %26057 = vst [vmem:[#allocation38_spill] sm:$0xff] %v21126_v1  ;;  %v21128_v29 = vpop.f32.mrf.mxu1 }
 0x2e6   : > { %26058 = vst [vmem:[#allocation40_spill] sm:$0xff] %v21128_v29  ;;  %v21130_v38 = vpop.f32.mrf.mxu0 }
 0x2e7   : > { %26059 = vst [vmem:[#allocation104_spill] sm:$0xff] %v21130_v38  ;;  %v21132_v4 = vpop.f32.mrf.mxu1 }
 0x2e8   : > { %26060 = vst [vmem:[#allocation41_spill] sm:$0xff] %v21132_v4  ;;  %v21140_v32 = vpop.f32.mrf.mxu0 }
 0x2e9   : > { %26061 = vst [vmem:[#allocation152_spill] sm:$0xff] %v21140_v32  ;;  %v21142_v54 = vpop.f32.mrf.mxu1  ;;  %v17567_v32 = vld [vmem:[%s25092_s1 + $0xc70] ss:$8 sps:$4 sm:$0xff]  }
 0x2ea   : > { %26062 = vst [vmem:[#allocation105_spill] sm:$0xff] %v21142_v54  ;;  %v21144_v1 = vpop.f32.mrf.mxu0  ;;  %11763 = vmatpush1.bf16.msra.mxu0 %v17567_v32  ;;  %v17575_v54 = vld [vmem:[%s25092_s1 + $0xc64] ss:$8 sps:$4 sm:$0xff]  }
 0x2eb   : > { %26063 = vst [vmem:[#allocation35_spill] sm:$0xff] %v21144_v1  ;;  %v21146_v29 = vpop.f32.mrf.mxu1  ;;  %v17573_v1 = vld [vmem:[%s25092_s1 + $0xc60] ss:$8 sps:$4 sm:$0xff]   ;;  %11764 = vmatprep.subr.bf16.mxu0 %v17575_v54  ;;  %v17579_v54 = vld [vmem:[%s25092_s1 + $0xbf0] ss:$8 sps:$4 sm:$0xff]  }
 0x2ec   : > { %26064 = vst [vmem:[#allocation43_spill] sm:$0xff] %v21146_v29  ;;  %v21148_v38 = vpop.f32.mrf.mxu0 }
 0x2ed   : > { %26065 = vst [vmem:[#allocation153_spill] sm:$0xff] %v21148_v38  ;;  %v21150_v4 = vpop.f32.mrf.mxu1 }
 0x2ee   : > { %26066 = vst [vmem:[#allocation45_spill] sm:$0xff] %v21150_v4  ;;  %v21152_v12 = vpop.f32.mrf.mxu0  ;;  %v17572_v4 = vld [vmem:[%s25092_s1 + $0xb04] ss:$8 sps:$4 sm:$0xff]   ;;  %11765 = vmatpush1.bf16.msra.mxu0 %v17573_v1 }
 0x2ef   : > { %26067 = vst [vmem:[#allocation39_spill] sm:$0xff] %v21152_v12  ;;  %v21154_v3 = vpop.f32.mrf.mxu1  ;;  %10366 = vmatprep.subr.bf16.mxu1 %v17572_v4  ;;  %11766 = vmatprep.subr.bf16.mxu0 %v17578_v47  ;;  %v17584_v47 = vld [vmem:[%s25092_s1 + $0xc44] ss:$8 sps:$4 sm:$0xff]  }
 0x2f0   : > { %26068 = vst [vmem:[#allocation155_spill] sm:$0xff] %v21154_v3  ;;  %v21168_v38 = vpop.f32.mrf.mxu0  ;;  %10367 = vmatpush1.bf16.msra.mxu1 %v17570_v37 }
 0x2f1   : > { %26069 = vst [vmem:[#allocation107_spill] sm:$0xff] %v21168_v38  ;;  %v21170_v12 = vpop.f32.mrf.mxu1 }
 0x2f2   : > { %26070 = vst [vmem:[#allocation154_spill] sm:$0xff] %v21170_v12  ;;  %v21172_v3 = vpop.f32.mrf.mxu0 }
 0x2f3   : > { %26071 = vst [vmem:[#allocation181_spill] sm:$0xff] %v21172_v3  ;;  %v21174_v29 = vpop.f32.mrf.mxu1 }
 0x2f4   : > { %26072 = vst [vmem:[#allocation108_spill] sm:$0xff] %v21174_v29  ;;  %v21182_v27 = vpop.f32.mrf.mxu0 }
 0x2f5   : > { %26073 = vst [vmem:[#allocation156_spill] sm:$0xff] %v21182_v27  ;;  %v21184_v38 = vpop.f32.mrf.mxu1  ;;  %v17576_v27 = vld [vmem:[%s25092_s1 + $0xc50] ss:$8 sps:$4 sm:$0xff]  }
 0x2f6   : > { %26074 = vst [vmem:[#allocation44_spill] sm:$0xff] %v21184_v38  ;;  %v21186_v4 = vpop.f32.mrf.mxu0  ;;  %11767 = vmatpush1.bf16.msra.mxu0 %v17576_v27  ;;  %v7494_v27 = vlaneseq }
 0x2f7   : > { %26075 = vst [vmem:[#allocation48_spill] sm:$0xff] %v21186_v4  ;;  %v21188_v32 = vpop.f32.mrf.mxu1  ;;  %11768 = vmatprep.subr.bf16.mxu0 %v17584_v47  ;;  %v17588_v47 = vld [vmem:[%s25092_s1 + $0xbe0] ss:$8 sps:$4 sm:$0xff]  }
 0x2f8   : > { %26076 = vst [vmem:[#allocation46_spill] sm:$0xff] %v21188_v32  ;;  %v21193_v37 = vpop.f32.mrf.mxu0  ;;  %v17581_v32 = vld [vmem:[%s25092_s1 + $0xbf4] ss:$8 sps:$4 sm:$0xff]  }
 0x2f9   : > { %26077 = vst [vmem:[#allocation51_spill] sm:$0xff] %v21193_v37  ;;  %v21195_v29 = vpop.f32.mrf.mxu1  ;;  %10368 = vmatprep.subr.bf16.mxu1 %v17581_v32  ;;  %v17587_v32 = vld [vmem:[%s25092_s1 + $0xc34] ss:$8 sps:$4 sm:$0xff]  }
 0x2fa   : > { %26078 = vst [vmem:[#allocation182_spill] sm:$0xff] %v21195_v29  ;;  %v21200_v38 = vpop.f32.mrf.mxu0  ;;  %v17582_v29 = vld [vmem:[%s25092_s1 + $0xc40] ss:$8 sps:$4 sm:$0xff]   ;;  %10369 = vmatpush2.bf16.msra.mxu1 %v17579_v54 }
 0x2fb   : > { %26079 = vst [vmem:[#allocation110_spill] sm:$0xff] %v21200_v38  ;;  %v21202_v1 = vpop.f32.mrf.mxu1  ;;  %11769 = vmatpush1.bf16.msra.mxu0 %v17582_v29  ;;  %v17590_v29 = vld [vmem:[%s25092_s1 + $0xbe4] ss:$8 sps:$4 sm:$0xff]  }
 0x2fc   : > { %26080 = vst [vmem:[#allocation157_spill] sm:$0xff] %v21202_v1  ;;  %v21216_v38 = vpop.f32.mrf.mxu0  ;;  %11770 = vmatprep.subr.bf16.mxu0 %v17587_v32  ;;  %10370 = vmatprep.subr.bf16.mxu1 %v17590_v29  ;;  %v15878_v29 = vld [vmem:[%s25093_s2 + $0x1] ss:$4 sm:$0x3] }
 0x2fd   : > { %26081 = vst [vmem:[#allocation183_spill] sm:$0xff] %v21216_v38  ;;  %v21218_v1 = vpop.f32.mrf.mxu1  ;;  %v21290_v38 = vadd.f32 %v20906_v43, %v20904_v56  ;;  %v21314_v56 = vadd.f32 %v20926_v17, %v20924_v19  ;;  %v21318_v43 = vadd.f32 %v20935_v23, %v20933_v42  ;;  %v21335_v19 = vadd.f32 %v20951_v25, %v20949_v45  ;;  %v17600_v23 = vld [vmem:[%s25092_s1 + $0xc00] ss:$8 sps:$4 sm:$0xff]  }
 0x2fe   : > { %26082 = vst [vmem:[#allocation111_spill] sm:$0xff] %v21218_v1  ;;  %v21220_v37 = vpop.f32.mrf.mxu0  ;;  %10371 = vmatpush2.bf16.msra.mxu1 %v17588_v47  ;;  %v17596_v47 = vld [vmem:[%s25092_s1 + $0xc14] ss:$8 sps:$4 sm:$0xff]   ;;  %v21339_v42 = vadd.f32 %v20957_v57, %v20955_v24  ;;  %v21347_v17 = vadd.f32 %v20965_v7, %v20963_v52  ;;  %v21354_v25 = vadd.f32 %v20969_v39, %v20967_v49  ;;  %v26101_v45 = vld [vmem:[#allocation24_spill] sm:$0xff] }
 0x2ff   : > { %26083 = vst [vmem:[#allocation158_spill] sm:$0xff] %v21220_v37  ;;  %v21222_v4 = vpop.f32.mrf.mxu1  ;;  %11771 = vmatpush1.bf16.msra.mxu0 %v17585_v20  ;;  %v7492_v20 = vld [vmem:[%s25093_s2] ss:$4 sm:$0x3]  ;;  %v21358_v57 = vadd.f32 %v20975_v34, %v20973_v21  ;;  %v21366_v7 = vadd.f32 %v20989_v6, %v20987_v51  ;;  %v21376_v39 = vadd.f32 %v20999_v5, %v20997_v18  ;;  %v17605_v18 = vld [vmem:[%s25092_s1 + $0xcf4] ss:$8 sps:$4 sm:$0xff]  }
 0x300   : > { %26084 = vst [vmem:[#allocation49_spill] sm:$0xff] %v21222_v4  ;;  %v21224_v3 = vpop.f32.mrf.mxu0  ;;  %v17591_v4 = vld [vmem:[%s25092_s1 + $0xc20] ss:$8 sps:$4 sm:$0xff]   ;;  %v21380_v34 = vadd.f32 %v21003_v26, %v21001_v59  ;;  %v21398_v5 = vadd.f32 %v21027_v36, %v21025_v41  ;;  %v21402_v26 = vadd.f32 %v21037_v61, %v21035_v55  ;;  %v21415_v49 = vadd.f32 %v26097_v60, %v26096_v16  ;;  %v26098_v36 = vld [vmem:[#allocation18_spill] sm:$0xff]  ;;  %v26102_v21 = vld [vmem:[#allocation179_spill] sm:$0xff] }
 0x301   : > { %26085 = vst [vmem:[#allocation53_spill] sm:$0xff] %v21224_v3  ;;  %v21226_v12 = vpop.f32.mrf.mxu1  ;;  %v7495_v3 = vshrl.u32 %v7494_v27, 7  ;;  %v26099_v41 = vld [vmem:[#allocation22_spill] sm:$0xff]  ;;  %v21423_v24 = vadd.f32 %v26101_v45, %v26100_v40  ;;  %v26103_v6 = vld [vmem:[#allocation95_spill] sm:$0xff] }
 0x302   : > { %26086 = vst [vmem:[#allocation184_spill] sm:$0xff] %v21226_v12  ;;  %v21234_v54 = vpop.f32.mrf.mxu0  ;;  %v21419_v31 = vadd.f32 %v26099_v41, %v26098_v36  ;;  %v21430_v2 = vadd.f32 %v26103_v6, %v26102_v21  ;;  %v26107_v55 = vld [vmem:[#allocation146_spill] sm:$0xff]  ;;  %v26113_v36 = vld [vmem:[#allocation29_spill] sm:$0xff]  ;;  %v26116_v45 = vld [vmem:[#allocation99_spill] sm:$0xff] }
 0x303   : > { %26087 = vst [vmem:[#allocation56_spill] sm:$0xff] %v21234_v54  ;;  %v17593_v54 = vld [vmem:[%s25092_s1 + $0xc24] ss:$8 sps:$4 sm:$0xff]   ;;  %v21250_v37 = vpop.f32.mrf.mxu1  ;;  %v21254_v27 = vsub.s32 0, %v7495_v3  ;;  %v21438_v61 = vadd.f32 %v26107_v55, %v26106_v9  ;;  %v26111_v16 = vld [vmem:[#allocation98_spill] sm:$0xff]  ;;  %v26120_v9 = vld [vmem:[#allocation147_spill] sm:$0xff] }
 0x304   : > { %v21242_v12 = vpop.f32.mrf.mxu0  ;;  %26089 = vst [vmem:[#allocation117_spill] sm:$0xff] %v21250_v37  ;;  %11772 = vmatprep.subr.bf16.mxu0 %v17593_v54  ;;  %v21266_v37 = vsub.s32 1, %v7495_v3  ;;  %v17594_v54 = vld [vmem:[%s25092_s1 + $0xc10] ss:$8 sps:$4 sm:$0xff]   ;;  %v6885_v3 = vadd.f32 %v20884_v15, %v20882_v10  ;;  %v26114_v41 = vld [vmem:[#allocation25_spill] sm:$0xff]  ;;  %v21466_v55 = vadd.f32 %v26120_v9, %v26119_v44 }
 0x305   : > { %26088 = vst [vmem:[#allocation186_spill] sm:$0xff] %v21242_v12  ;;  %26091 = vst [vmem:[#allocation119_spill] sm:$0xff] %v21254_v27  ;;  %11773 = vmatpush1.bf16.msra.mxu0 %v17591_v4  ;;  %v21264_v12 = vpop.f32.mrf.mxu1  ;;  %v17599_v4 = vld [vmem:[%s25092_s1 + $0xbd4] ss:$8 sps:$4 sm:$0xff]   ;;  %v21295_v58 = vrot.slane %v7492_v20, %v21254_v27  ;;  %v21304_v15 = vrot.slane %v15878_v29, %v21254_v27  ;;  %v21456_v40 = vadd.f32 %v26114_v41, %v26113_v36 }
 0x306   : > { %v21252_v1 = vpop.f32.mrf.mxu0  ;;  %26093 = vst [vmem:[#allocation124_spill] sm:$0xff] %v21264_v12  ;;  %26094 = vst [vmem:[#allocation125_spill] sm:$0xff] %v21266_v37  ;;  %11774 = vmatprep.subr.bf16.mxu0 %v17596_v47  ;;  %v21286_v12 = vadd.f32 %v20893_v35, %v20891_v63  ;;  %10372 = vmatprep.subr.bf16.mxu1 %v17599_v4  ;;  %v21307_v63 = vrot.slane %v7492_v20, %v21266_v37  ;;  %v17606_v4 = vld [vmem:[%s25092_s1 + $0xbc0] ss:$8 sps:$4 sm:$0xff]   ;;  %v26117_v21 = vld [vmem:[#allocation30_spill] sm:$0xff] }
 0x307   : > { %26090 = vst [vmem:[#allocation185_spill] sm:$0xff] %v21252_v1  ;;  %v17597_v1 = vld [vmem:[%s25092_s1 + $0xbd0] ss:$8 sps:$4 sm:$0xff]   ;;  %v21301_v10 = vpop.f32.mrf.mxu1  ;;  %v21310_v35 = vrot.slane %v15878_v29, %v21266_v37  ;;  %26115 = vst [vmem:[#allocation133_spill] sm:$0xff] %v21456_v40  ;;  %v21460_v6 = vadd.f32 %v26117_v21, %v26116_v45 }
 0x308   : > { %v21256_v32 = vpop.f32.mrf.mxu0  ;;  %10373 = vmatpush2.bf16.msra.mxu1 %v17597_v1  ;;  %v17602_v1 = vld [vmem:[%s25092_s1 + $0xc04] ss:$8 sps:$4 sm:$0xff]   ;;  %v26109_v29 = vld [vmem:[#allocation23_spill] sm:$0xff]  ;;  %26121 = vst [vmem:[#allocation137_spill] sm:$0xff] %v21466_v55  ;;  %v26126_v37 = vld [vmem:[#allocation150_spill] sm:$0xff] }
 0x309   : > { %26092 = vst [vmem:[#allocation50_spill] sm:$0xff] %v21256_v32  ;;  %11775 = vmatpush1.bf16.msra.mxu0 %v17594_v54  ;;  %v21386_v51 = vpop.f32.mrf.mxu1  ;;  %v21442_v54 = vadd.f32 %v26109_v29, %v26108_v14  ;;  %26118 = vst [vmem:[#allocation134_spill] sm:$0xff] %v21460_v6  ;;  %v26122_v14 = vld [vmem:[#allocation149_spill] sm:$0xff]  ;;  %v26128_v41 = vld [vmem:[#allocation102_spill] sm:$0xff] }
 0x30a   : > { %v21274_v32 = vpop.f32.mrf.mxu0  ;;  %11776 = vmatprep.subr.bf16.mxu0 %v17602_v1  ;;  %v17608_v1 = vld [vmem:[%s25092_s1 + $0xbc4] ss:$8 sps:$4 sm:$0xff]   ;;  %v26129_v27 = vld [vmem:[#allocation34_spill] sm:$0xff] }
 0x30b   : > { %26095 = vst [vmem:[#allocation129_spill] sm:$0xff] %v21274_v32  ;;  %v26123_v29 = vld [vmem:[#allocation101_spill] sm:$0xff]  ;;  %v21478_v45 = vadd.f32 %v26129_v27, %v26128_v41  ;;  %10374 = vmatprep.subr.bf16.mxu1 %v17608_v1  ;;  %v26134_v9 = vld [vmem:[#allocation38_spill] sm:$0xff]  ;;  %v26138_v1 = vld [vmem:[#allocation104_spill] sm:$0xff] }
 0x30c   : > { %v21292_v32 = vpop.f32.mrf.mxu0  ;;  %10375 = vmatpush2.bf16.msra.mxu1 %v17606_v4  ;;  %v17609_v27 = vld [vmem:[%s25092_s1 + $0xce0] ss:$8 sps:$4 sm:$0xff]  }
 0x30d   : > { %11777 = vmatpush1.bf16.msra.mxu0 %v17600_v23  ;;  %v26110_v23 = vld [vmem:[#allocation28_spill] sm:$0xff]  ;;  %26130 = vst [vmem:[#allocation76_spill] sm:$0xff] %v21478_v45  ;;  %v26139_v41 = vld [vmem:[#allocation41_spill] sm:$0xff] }
 0x30e   : > { %v21328_v20 = vpop.f32.mrf.mxu0  ;;  %11778 = vmatprep.subr.bf16.mxu0 %v17605_v18  ;;  %v21452_v60 = vadd.f32 %v26111_v16, %v26110_v23  ;;  %v21462_v18 = vpop.f32.mrf.mxu1  ;;  %v21470_v23 = vadd.f32 %v26123_v29, %v26122_v14  ;;  %v26125_v16 = vld [vmem:[#allocation32_spill] sm:$0xff]  ;;  %v21498_v45 = vadd.f32 %v26139_v41, %v26138_v1 }
 0x30f   : > { %v21474_v36 = vadd.f32 %v26126_v37, %v26125_v16  ;;  %v26135_v14 = vld [vmem:[#allocation40_spill] sm:$0xff]  ;;  %v26137_v37 = vld [vmem:[#allocation58_spill] sm:$0xff] }
 0x310   : > { %v21368_v52 = vpop.f32.mrf.mxu0  ;;  %26112 = vst [vmem:[#allocation130_spill] sm:$0xff] %v21452_v60  ;;  %26124 = vst [vmem:[#allocation138_spill] sm:$0xff] %v21470_v23  ;;  %v21489_v29 = vadd.f32 %v26135_v14, %v26134_v9  ;;  %v26141_v23 = vld [vmem:[#allocation152_spill] sm:$0xff]  ;;  %v26145_v9 = vld [vmem:[#allocation43_spill] sm:$0xff]  ;;  %v7034_v1 = vpop.f32.mrf.mxu1 }
 0x311   : > { %11779 = vmatpush2.bf16.msra.mxu0 %v17603_v0  ;;  %26127 = vst [vmem:[#allocation140_spill] sm:$0xff] %v21474_v36  ;;  %v26131_v0 = vld [vmem:[#allocation151_spill] sm:$0xff]  ;;  %26140 = vst [vmem:[#allocation142_spill] sm:$0xff] %v21498_v45  ;;  %v26185_v6 = vld [vmem:[#allocation124_spill] sm:$0xff] }
 0x312   : > { %v21404_v59 = vpop.f32.mrf.mxu0  ;;  %26136 = vst [vmem:[#allocation93_spill] sm:$0xff] %v21489_v29  ;;  %v26151_v29 = vld [vmem:[#allocation155_spill] sm:$0xff] }
 0x313   : > { %v26153_v45 = vld [vmem:[#allocation159_spill] sm:$0xff] }
 0x314   : > { %v7077_v47 = vpop.f32.mrf.mxu0 }
 0x315   : > { %v7078_v48 = vadd.f32 %v7077_v47, %v6885_v3  ;;  %v17611_v3 = vld [vmem:[%s25092_s1 + $0xce4] ss:$8 sps:$4 sm:$0xff]  }
 0x316   : > { %v7079_v21 = vpop.f32.mrf.mxu0  ;;  %v26132_v47 = vld [vmem:[#allocation33_spill] sm:$0xff]  ;;  %11780 = vmatprep.subr.bf16.mxu0 %v17611_v3  ;;  %v26160_v3 = vld [vmem:[#allocation156_spill] sm:$0xff] }
 0x317   : > { %v21485_v44 = vadd.f32 %v26132_v47, %v26131_v0  ;;  %v7300_v16 = vadd.f32 %v7078_v48, %v26137_v37  ;;  %v7080_v36 = vadd.f32 %v7079_v21, %v21286_v12  ;;  %v26142_v0 = vld [vmem:[#allocation105_spill] sm:$0xff]  ;;  %v26150_v21 = vld [vmem:[#allocation39_spill] sm:$0xff]  ;;  %11781 = vmatpush2.bf16.msra.mxu0 %v17609_v27 }
 0x318   : > { %v21502_v47 = vadd.f32 %v26142_v0, %v26141_v23  ;;  %v26147_v48 = vld [vmem:[#allocation153_spill] sm:$0xff]  ;;  %v7081_v4 = vpop.f32.mrf.mxu0  ;;  %v21514_v55 = vadd.f32 %v26151_v29, %v26150_v21  ;;  %v26163_v21 = vld [vmem:[#allocation48_spill] sm:$0xff] }
 0x319   : > { %26133 = vst [vmem:[#allocation174_spill] sm:$0xff] %v21485_v44  ;;  %v26144_v44 = vld [vmem:[#allocation35_spill] sm:$0xff]  ;;  %v26148_v37 = vld [vmem:[#allocation45_spill] sm:$0xff]  ;;  %v7504_v41 = vmul.f32 %v21295_v58, %v7300_v16  ;;  %v7301_v23 = vadd.f32 %v7080_v36, %v26153_v45  ;;  %v7082_v0 = vadd.f32 %v7081_v4, %v21290_v38  ;;  %v26167_v38 = vld [vmem:[#allocation182_spill] sm:$0xff] }
 0x31a   : > { %26143 = vst [vmem:[#allocation18_spill] sm:$0xff] %v21502_v47  ;;  %v21506_v14 = vadd.f32 %v26145_v9, %v26144_v44  ;;  %v21510_v12 = vadd.f32 %v26148_v37, %v26147_v48  ;;  %26152 = vst [vmem:[#allocation24_spill] sm:$0xff] %v21514_v55  ;;  %v26154_v44 = vld [vmem:[#allocation107_spill] sm:$0xff]  ;;  %v26155_v9 = vld [vmem:[#allocation154_spill] sm:$0xff]  ;;  %v7083_v36 = vpop.f32.mrf.mxu0 }
 0x31b   : > { %v26157_v48 = vld [vmem:[#allocation181_spill] sm:$0xff]  ;;  %v26158_v37 = vld [vmem:[#allocation108_spill] sm:$0xff]  ;;  %v26164_v55 = vld [vmem:[#allocation46_spill] sm:$0xff]  ;;  %v7505_v4 = vmul.f32 %v21307_v63, %v7301_v23 }
 0x31c   : > { %26146 = vst [vmem:[#allocation22_spill] sm:$0xff] %v21506_v14  ;;  %26149 = vst [vmem:[#allocation144_spill] sm:$0xff] %v21510_v12  ;;  %v21521_v14 = vadd.f32 %v26155_v9, %v26154_v44  ;;  %v21525_v12 = vadd.f32 %v26158_v37, %v26157_v48  ;;  %v26161_v47 = vld [vmem:[#allocation44_spill] sm:$0xff]  ;;  %v21533_v16 = vadd.f32 %v26164_v55, %v26163_v21  ;;  %v26166_v45 = vld [vmem:[#allocation51_spill] sm:$0xff] }
 0x31d   : > { %v21529_v29 = vadd.f32 %v26161_v47, %v26160_v3  ;;  %v21537_v27 = vadd.f32 %v26167_v38, %v26166_v45  ;;  %v26169_v44 = vld [vmem:[#allocation60_spill] sm:$0xff]  ;;  %v7084_v48 = vadd.f32 %v7083_v36, %v21299_v11  ;;  %v17612_v47 = vld [vmem:[%s25092_s1 + $0xcd0] ss:$8 sps:$4 sm:$0xff]   ;;  %v17614_v55 = vld [vmem:[%s25092_s1 + $0xcd4] ss:$8 sps:$4 sm:$0xff]   ;;  %v7581_v11 = vadd.f32 %v21304_v15, %v7504_v41  ;;  %v7087_v36 = vpop.f32.mrf.mxu0 }
 0x31e   : > { %26156 = vst [vmem:[#allocation179_spill] sm:$0xff] %v21521_v14  ;;  %26159 = vst [vmem:[#allocation95_spill] sm:$0xff] %v21525_v12  ;;  %v7302_v9 = vadd.f32 %v7082_v0, %v26169_v44  ;;  %v26170_v37 = vld [vmem:[#allocation110_spill] sm:$0xff]  ;;  %v26171_v3 = vld [vmem:[#allocation157_spill] sm:$0xff]  ;;  %v7088_v41 = vadd.f32 %v7087_v36, %v21314_v56  ;;  %11782 = vmatprep.subr.bf16.mxu0 %v17614_v55 }
 0x31f   : > { %26162 = vst [vmem:[#allocation145_spill] sm:$0xff] %v21529_v29  ;;  %26165 = vst [vmem:[#allocation180_spill] sm:$0xff] %v21533_v16  ;;  %v21550_v21 = vadd.f32 %v26171_v3, %v26170_v37  ;;  %v26173_v45 = vld [vmem:[#allocation183_spill] sm:$0xff]  ;;  %v26176_v23 = vld [vmem:[#allocation158_spill] sm:$0xff]  ;;  %v7089_v60 = vpop.f32.mrf.mxu0  ;;  %11783 = vmatpush2.bf16.msra.mxu0 %v17612_v47 }
 0x320   : > { %26168 = vst [vmem:[#allocation96_spill] sm:$0xff] %v21537_v27  ;;  %v26174_v38 = vld [vmem:[#allocation111_spill] sm:$0xff]  ;;  %v26177_v0 = vld [vmem:[#allocation49_spill] sm:$0xff]  ;;  %v26184_v14 = vld [vmem:[#allocation186_spill] sm:$0xff]  ;;  %v7090_v55 = vadd.f32 %v7089_v60, %v21318_v43 }
 0x321   : > { %26172 = vst [vmem:[#allocation146_spill] sm:$0xff] %v21550_v21  ;;  %v21554_v27 = vadd.f32 %v26174_v38, %v26173_v45  ;;  %v21558_v44 = vadd.f32 %v26177_v0, %v26176_v23  ;;  %v17615_v16 = vld [vmem:[%s25092_s1 + $0xbb0] ss:$8 sps:$4 sm:$0xff]   ;;  %v17617_v37 = vld [vmem:[%s25092_s1 + $0xbb4] ss:$8 sps:$4 sm:$0xff]   ;;  %v26179_v3 = vld [vmem:[#allocation53_spill] sm:$0xff]  ;;  %v7036_v45 = vpop.f32.mrf.mxu1  ;;  %v7506_v38 = vmul.f32 %v21295_v58, %v7302_v9  ;;  %v21580_v40 = vadd.f32 %v26185_v6, %v26184_v14  ;;  %v7091_v36 = vpop.f32.mrf.mxu0 }
 0x322   : > { %v26180_v21 = vld [vmem:[#allocation184_spill] sm:$0xff]  ;;  %v26181_v23 = vld [vmem:[#allocation55_spill] sm:$0xff]  ;;  %10376 = vmatprep.subr.bf16.mxu1 %v17617_v37  ;;  %v26188_v6 = vld [vmem:[#allocation50_spill] sm:$0xff] }
 0x323   : > { %26175 = vst [vmem:[#allocation27_spill] sm:$0xff] %v21554_v27  ;;  %26178 = vst [vmem:[#allocation23_spill] sm:$0xff] %v21558_v44  ;;  %v21569_v29 = vadd.f32 %v26180_v21, %v26179_v3  ;;  %v7303_v0 = vadd.f32 %v7084_v48, %v26181_v23  ;;  %v26182_v44 = vld [vmem:[#allocation56_spill] sm:$0xff]  ;;  %v26183_v27 = vld [vmem:[#allocation117_spill] sm:$0xff]  ;;  %v7582_v21 = vadd.f32 %v21310_v35, %v7505_v4  ;;  %10377 = vmatpush2.bf16.msra.mxu1 %v17615_v16 }
 0x324   : > { %v21576_v12 = vadd.f32 %v26183_v27, %v26182_v44  ;;  %v7583_v9 = vadd.f32 %v21304_v15, %v7506_v38  ;;  %v26186_v3 = vld [vmem:[#allocation54_spill] sm:$0xff]  ;;  %v26187_v27 = vld [vmem:[#allocation185_spill] sm:$0xff]  ;;  %v21593_v14 = vadd.f32 %v21386_v51, %v26188_v6  ;;  %v7645_v4 = vmax.f32 %v7581_v11, 0.0  ;;  %v7038_v38 = vpop.f32.mrf.mxu1 }
 0x325   : > { %v7507_v48 = vmul.f32 %v21307_v63, %v7303_v0  ;;  %v7304_v56 = vadd.f32 %v7088_v41, %v26186_v3  ;;  %v21589_v44 = vadd.f32 %v21301_v10, %v26187_v27  ;;  %v7646_v47 = vmax.f32 %v7582_v21, 0.0  ;;  %v17620_v37 = vld [vmem:[%s25092_s1 + $0xcc4] ss:$8 sps:$4 sm:$0xff]   ;;  %v17618_v51 = vld [vmem:[%s25092_s1 + $0xcc0] ss:$8 sps:$4 sm:$0xff]   ;;  %v7093_v21 = vpop.f32.mrf.mxu0 }
 0x326   : > { %v7647_v23 = vmax.f32 %v7583_v9, 0.0  ;;  %v26189_v60 = vld [vmem:[#allocation161_spill] sm:$0xff]  ;;  %v7092_v10 = vadd.f32 %v7091_v36, %v21322_v8  ;;  %v21609_v41 = vadd.f32 %v7034_v1, %v21292_v32  ;;  %11784 = vmatprep.subr.bf16.mxu0 %v17620_v37  ;;  %v7094_v6 = vadd.f32 %v7093_v21, %v21326_v30 }
 0x327   : > { %v7508_v43 = vmul.f32 %v21295_v58, %v7304_v56  ;;  %v7305_v16 = vadd.f32 %v7090_v55, %v26189_v60  ;;  %v26190_v0 = vld [vmem:[#allocation129_spill] sm:$0xff]  ;;  %v7584_v9 = vadd.f32 %v21310_v35, %v7507_v48  ;;  %v21612_v3 = vpack.c.bf16 %v7646_v47, %v7645_v4  ;;  %v26191_v55 = vld [vmem:[#allocation160_spill] sm:$0xff]  ;;  %11785 = vmatpush2.bf16.msra.mxu0 %v17618_v51  ;;  %v7097_v32 = vpop.f32.mrf.mxu0  ;;  %v26193_v60 = vld [vmem:[#allocation162_spill] sm:$0xff] }
 0x328   : > { %v21606_v11 = vadd.f32 %v21462_v18, %v26190_v0  ;;  %v21615_v56 = vadd.f32 %v7036_v45, %v21328_v20  ;;  %v7306_v27 = vadd.f32 %v7092_v10, %v26191_v55  ;;  %v21624_v36 = vpack.c.bf16 %v7647_v23, %v7645_v4  ;;  %v7040_v20 = vpop.f32.mrf.mxu1 }
 0x329   : > { %v7509_v8 = vmul.f32 %v21307_v63, %v7305_v16  ;;  %v21621_v18 = vadd.f32 %v21304_v15, %v7508_v43  ;;  %v7648_v1 = vmax.f32 %v7584_v9, 0.0  ;;  %v25265_v48 = vshrl.u32 %v21612_v3, 16  ;;  %v17623_v43 = vld [vmem:[%s25092_s1 + $0xcb4] ss:$8 sps:$4 sm:$0xff]   ;;  %v7099_v10 = vpop.f32.mrf.mxu0 }
 0x32a   : > { %26192 = vst [vmem:[#allocation28_spill] sm:$0xff] %v21624_v36  ;;  %v21627_v37 = vadd.f32 %v7038_v38, %v21368_v52  ;;  %v7510_v45 = vmul.f32 %v21295_v58, %v7306_v27  ;;  %v7307_v16 = vadd.f32 %v7094_v6, %v26193_v60  ;;  %v7098_v30 = vadd.f32 %v7097_v32, %v21335_v19  ;;  %v17621_v38 = vld [vmem:[%s25092_s1 + $0xcb0] ss:$8 sps:$4 sm:$0xff]   ;;  %v26196_v60 = vld [vmem:[#allocation64_spill] sm:$0xff] }
 0x32b   : > { %v21635_v51 = vpack.c.bf16 %v7648_v1, %v7647_v23  ;;  %v21637_v0 = vpack.c.bf16 %v7648_v1, %v7646_v47  ;;  %v7586_v4 = vadd.f32 %v21310_v35, %v7509_v8  ;;  %v7968_v52 = vrot.slane %v25265_v48, 7  ;;  %v26195_v9 = vld [vmem:[#allocation63_spill] sm:$0xff]  ;;  %11786 = vmatprep.subr.bf16.mxu0 %v17623_v43  ;;  %v17624_v47 = vld [vmem:[%s25092_s1 + $0xba0] ss:$8 sps:$4 sm:$0xff]   ;;  %v17626_v8 = vld [vmem:[%s25092_s1 + $0xba4] ss:$8 sps:$4 sm:$0xff]   ;;  %v7101_v1 = vpop.f32.mrf.mxu0 }
 0x32c   : > { %v21646_v19 = vadd.f32 %v21304_v15, %v7510_v45  ;;  %v7511_v21 = vmul.f32 %v21307_v63, %v7307_v16  ;;  %v7308_v55 = vadd.f32 %v7098_v30, %v26195_v9  ;;  %v7100_v23 = vadd.f32 %v7099_v10, %v21339_v42  ;;  %11787 = vmatpush2.bf16.msra.mxu0 %v17621_v38 }
 0x32d   : > { %26194 = vst [vmem:[#allocation98_spill] sm:$0xff] %v21637_v0  ;;  %v21658_v27 = vadd.f32 %v7040_v20, %v21404_v59  ;;  %v25267_v6 = vmax.f32 %v21621_v18, 0.0  ;;  %v25266_v32 = vshrl.u32 %v21635_v51, 16  ;;  %10201 = vmatprep.mubr.bf16.mxu0 %v21637_v0  ;;  %v7650_v42 = vmax.f32 %v7586_v4, 0.0  ;;  %10378 = vmatprep.subr.bf16.mxu1 %v17626_v8  ;;  %v17629_v59 = vld [vmem:[%s25092_s1 + $0xca4] ss:$8 sps:$4 sm:$0xff]   ;;  %v7103_v10 = vpop.f32.mrf.mxu0 }
 0x32e   : > { %v7512_v45 = vmul.f32 %v21295_v58, %v7308_v55  ;;  %v7309_v16 = vadd.f32 %v7100_v23, %v26196_v60  ;;  %v25268_v30 = vshll.u32 %v21612_v3, 16  ;;  %v7102_v43 = vadd.f32 %v7101_v1, %v21343_v50  ;;  %10202 = vmatmul.mubr.bf16.gmra.mxu0 %v21624_v36  ;;  %10379 = vmatpush2.bf16.msra.mxu1 %v17624_v47  ;;  %v17627_v50 = vld [vmem:[%s25092_s1 + $0xca0] ss:$8 sps:$4 sm:$0xff]  }
 0x32f   : > { %v25269_v20 = vshll.u32 %v21635_v51, 16  ;;  %v7588_v4 = vadd.f32 %v21310_v35, %v7511_v21  ;;  %v21675_v38 = vpack.c.bf16 %v7650_v42, %v25267_v6  ;;  %v7976_v9 = vrot.slane %v25266_v32, 7  ;;  %v26197_v23 = vld [vmem:[#allocation112_spill] sm:$0xff]  ;;  %11788 = vmatprep.subr.bf16.mxu0 %v17629_v59  ;;  %v7107_v48 = vpop.f32.mrf.mxu0 }
 0x330   : > { %v7651_v55 = vmax.f32 %v21646_v19, 0.0  ;;  %v7310_v8 = vadd.f32 %v7102_v43, %v26197_v23  ;;  %v7104_v1 = vadd.f32 %v7103_v10, %v21347_v17  ;;  %v7971_v21 = vor.u32 %v25268_v30, %v7968_v52  ;;  %11789 = vmatpush2.bf16.msra.mxu0 %v17627_v50  ;;  %v26198_v23 = vld [vmem:[#allocation163_spill] sm:$0xff] }
 0x331   : > { %v21688_v60 = vadd.f32 %v21304_v15, %v7512_v45  ;;  %v7652_v32 = vmax.f32 %v7588_v4, 0.0  ;;  %v7972_v47 = vrot.slane %v7968_v52, 4  ;;  %v7979_v6 = vor.u32 %v25269_v20, %v7976_v9  ;;  %v17632_v45 = vld [vmem:[%s25092_s1 + $0xc94] ss:$8 sps:$4 sm:$0xff]   ;;  %v7109_v59 = vpop.f32.mrf.mxu0  ;;  %v17630_v50 = vld [vmem:[%s25092_s1 + $0xc90] ss:$8 sps:$4 sm:$0xff]  }
 0x332   : > { %v7513_v19 = vmul.f32 %v21307_v63, %v7309_v16  ;;  %v7514_v43 = vmul.f32 %v21295_v58, %v7310_v8  ;;  %v7311_v17 = vadd.f32 %v7104_v1, %v26198_v23  ;;  %v7108_v10 = vadd.f32 %v7107_v48, %v21354_v25  ;;  %v26201_v48 = vld [vmem:[#allocation65_spill] sm:$0xff]  ;;  %v26202_v23 = vld [vmem:[#allocation11_spill] sm:$0xff]  ;;  %11790 = vmatprep.subr.bf16.mxu0 %v17632_v45  ;;  %v26494_v20 = vld [vmem:[#allocation126_spill] sm:$0xff] }
 0x333   : > { %v21699_v30 = vpack.c.bf16 %v7652_v32, %v7651_v55  ;;  %v25271_v52 = vshrl.u32 %v21675_v38, 16  ;;  %v21702_v4 = vpack.c.bf16 %v7652_v32, %v7650_v42  ;;  %v7980_v16 = vsel %vm18241_vm8, %v7972_v47, %v7979_v6  ;;  %v17633_v32 = vld [vmem:[%s25092_s1 + $0xb90] ss:$8 sps:$4 sm:$0xff]   ;;  %v17635_v6 = vld [vmem:[%s25092_s1 + $0xb94] ss:$8 sps:$4 sm:$0xff]  }
 0x334   : > { %v7515_v25 = vmul.f32 %v21307_v63, %v7311_v17  ;;  %v7312_v8 = vadd.f32 %v7108_v10, %v26201_v48  ;;  %v7110_v1 = vadd.f32 %v7109_v59, %v21358_v57  ;;  %v8254_v36 = vsel %vm18253_vm9, %v7971_v21, %v26202_v23  ;;  %v7111_v57 = vpop.f32.mrf.mxu0  ;;  %11791 = vmatpush2.bf16.msra.mxu0 %v17630_v50  ;;  %v17638_v10 = vld [vmem:[%s25092_s1 + $0xc84] ss:$8 sps:$4 sm:$0xff]   ;;  %v17636_v47 = vld [vmem:[%s25092_s1 + $0xc80] ss:$8 sps:$4 sm:$0xff]  }
 0x335   : > { %26199 = vst [vmem:[#allocation29_spill] sm:$0xff] %v21702_v4  ;;  %v21722_v42 = vadd.f32 %v21304_v15, %v7514_v43  ;;  %10211 = vmatprep.mubr.bf16.mxu0 %v21702_v4  ;;  %v21726_v17 = vcombine.low %v8254_v36, %v7980_v16  ;;  %v21728_v21 = vcombine.high %v8254_v36, %v7980_v16  ;;  %v7653_v45 = vmax.f32 %v21688_v60, 0.0  ;;  %v26204_v43 = vld [vmem:[#allocation66_spill] sm:$0xff] }
 0x336   : > { %v7516_v59 = vmul.f32 %v21295_v58, %v7312_v8  ;;  %v7313_v48 = vadd.f32 %v7110_v1, %v26204_v43  ;;  %v7112_v23 = vadd.f32 %v7111_v57, %v21362_v53  ;;  %10380 = vmatprep.subr.bf16.mxu1 %v17635_v6  ;;  %v26205_v16 = vmax.f32 %v21621_v18, 0.0  ;;  %v7113_v60 = vpop.f32.mrf.mxu0  ;;  %v26207_v6 = vld [vmem:[#allocation113_spill] sm:$0xff]  ;;  %11792 = vmatprep.subr.bf16.mxu0 %v17638_v10  ;;  %v26211_v10 = vld [vmem:[#allocation59_spill] sm:$0xff] }
 0x337   : > { %10008 = vmatprep.mubr.bf16.mxu1 %v21728_v21  ;;  %v7590_v8 = vadd.f32 %v21310_v35, %v7513_v19  ;;  %v7592_v1 = vadd.f32 %v21310_v35, %v7515_v25  ;;  %10381 = vmatpush2.bf16.msra.mxu1 %v17633_v32  ;;  %v7114_v43 = vadd.f32 %v7113_v60, %v21366_v7  ;;  %v7984_v36 = vrot.slane %v25271_v52, 7 }
 0x338   : > { %v21744_v50 = vpack.c.bf16 %v7651_v55, %v26205_v16  ;;  %v7314_v57 = vadd.f32 %v7112_v23, %v26207_v6  ;;  %10009 = vmatmul.mubr.bf16.gmra.mxu1 %v21726_v17  ;;  %v7655_v18 = vmax.f32 %v21722_v42, 0.0  ;;  %v21756_v55 = vadd.f32 %v21304_v15, %v7516_v59  ;;  %v7117_v19 = vpop.f32.mrf.mxu0  ;;  %v26208_v6 = vld [vmem:[#allocation114_spill] sm:$0xff]  ;;  %11793 = vmatpush2.bf16.msra.mxu0 %v17636_v47  ;;  %v17641_v47 = vld [vmem:[%s25092_s1 + $0xb84] ss:$8 sps:$4 sm:$0xff]  }
 0x339   : > { %v7654_v25 = vmax.f32 %v7590_v8, 0.0  ;;  %v7656_v32 = vmax.f32 %v7592_v1, 0.0  ;;  %v7517_v23 = vmul.f32 %v21307_v63, %v7313_v48  ;;  %v7315_v7 = vadd.f32 %v7114_v43, %v26208_v6  ;;  %10382 = vmatprep.subr.bf16.mxu1 %v17641_v47 }
 0x33a   : > { %26206 = vst [vmem:[#allocation25_spill] sm:$0xff] %v21744_v50  ;;  %10212 = vmatmul.mubr.bf16.gmra.mxu0 %v21744_v50  ;;  %v7518_v16 = vmul.f32 %v21295_v58, %v7314_v57  ;;  %v7118_v60 = vadd.f32 %v7117_v19, %v21372_v33  ;;  %v7119_v52 = vpop.f32.mrf.mxu0  ;;  %v26210_v8 = vshrl.u32 %v21699_v30, 16  ;;  %v26212_v57 = vshll.u32 %v21675_v38, 16  ;;  %v17639_v33 = vld [vmem:[%s25092_s1 + $0xb80] ss:$8 sps:$4 sm:$0xff]  }
 0x33b   : > { %v21763_v42 = vpack.c.bf16 %v7654_v25, %v7653_v45  ;;  %v21765_v59 = vpack.c.bf16 %v7656_v32, %v7655_v18  ;;  %v21767_v53 = vpack.c.bf16 %v7656_v32, %v7654_v25  ;;  %v7120_v48 = vadd.f32 %v7119_v52, %v21376_v39  ;;  %10383 = vmatpush2.bf16.msra.mxu1 %v17639_v33 }
 0x33c   : > { %v7992_v1 = vrot.slane %v26210_v8, 7  ;;  %v7316_v50 = vadd.f32 %v7118_v60, %v26211_v10  ;;  %v7987_v43 = vor.u32 %v26212_v57, %v7984_v36  ;;  %v7988_v6 = vrot.slane %v7984_v36, 4  ;;  %v7121_v52 = vpop.f32.mrf.mxu0  ;;  %v26213_v60 = vld [vmem:[#allocation116_spill] sm:$0xff]  ;;  %v26217_v10 = vld [vmem:[#allocation13_spill] sm:$0xff] }
 0x33d   : > { %26209 = vst [vmem:[#allocation99_spill] sm:$0xff] %v21767_v53  ;;  %v7657_v19 = vmax.f32 %v21756_v55, 0.0  ;;  %v7595_v25 = vadd.f32 %v21304_v15, %v7518_v16  ;;  %v7519_v32 = vmul.f32 %v21307_v63, %v7315_v7  ;;  %10221 = vmatprep.mubr.bf16.mxu0 %v21767_v53  ;;  %v7317_v8 = vadd.f32 %v7120_v48, %v26213_v60  ;;  %v26216_v48 = vld [vmem:[#allocation61_spill] sm:$0xff] }
 0x33e   : > { %v7520_v36 = vmul.f32 %v21295_v58, %v7316_v50  ;;  %v7122_v57 = vadd.f32 %v7121_v52, %v21380_v34  ;;  %v26214_v16 = vshll.u32 %v21699_v30, 16  ;;  %v21793_v7 = vpack.c.bf16 %v7655_v18, %v7653_v45  ;;  %v7123_v39 = vpop.f32.mrf.mxu0 }
 0x33f   : > { %v7594_v53 = vadd.f32 %v21310_v35, %v7517_v23  ;;  %v8258_v34 = vsel %vm18253_vm9, %v7987_v43, %v26217_v10  ;;  %v7124_v47 = vadd.f32 %v7123_v39, %v21384_v22  ;;  %v7596_v18 = vadd.f32 %v21310_v35, %v7519_v32  ;;  %v26221_v22 = vld [vmem:[#allocation164_spill] sm:$0xff] }
 0x340   : > { %v7995_v4 = vor.u32 %v26214_v16, %v7992_v1  ;;  %26215 = vst [vmem:[#allocation30_spill] sm:$0xff] %v21793_v7  ;;  %v21797_v50 = vadd.f32 %v21304_v15, %v7520_v36  ;;  %v7318_v60 = vadd.f32 %v7122_v57, %v26216_v48  ;;  %v7127_v45 = vpop.f32.mrf.mxu0  ;;  %v26218_v33 = vshrl.u32 %v21763_v42, 16 }
 0x341   : > { %v7658_v23 = vmax.f32 %v7594_v53, 0.0  ;;  %v7659_v36 = vmax.f32 %v7595_v25, 0.0  ;;  %v7319_v39 = vadd.f32 %v7124_v47, %v26221_v22  ;;  %v7660_v10 = vmax.f32 %v7596_v18, 0.0  ;;  %v26222_v47 = vld [vmem:[#allocation68_spill] sm:$0xff]  ;;  %v26224_v22 = vld [vmem:[#allocation69_spill] sm:$0xff] }
 0x342   : > { %v7996_v1 = vsel %vm18241_vm8, %v7988_v6, %v7995_v4  ;;  %10222 = vmatmul.mubr.bf16.gmra.mxu0 %v21793_v7  ;;  %v8000_v52 = vrot.slane %v26218_v33, 7  ;;  %v7522_v57 = vmul.f32 %v21295_v58, %v7318_v60  ;;  %v7128_v4 = vadd.f32 %v7127_v45, %v21390_v13  ;;  %v7129_v6 = vpop.f32.mrf.mxu0 }
 0x343   : > { %v21811_v16 = vcombine.low %v8258_v34, %v7996_v1  ;;  %v21813_v43 = vcombine.high %v8258_v34, %v7996_v1  ;;  %v21817_v48 = vpack.c.bf16 %v7658_v23, %v7657_v19  ;;  %v7521_v53 = vmul.f32 %v21307_v63, %v7317_v8  ;;  %v17644_v34 = vld [vmem:[%s25092_s1 + $0xd74] ss:$8 sps:$4 sm:$0xff]  }
 0x344   : > { %v21822_v25 = vadd.f32 %v21304_v15, %v7522_v57  ;;  %v7130_v60 = vadd.f32 %v7129_v6, %v21394_v62  ;;  %v7320_v1 = vadd.f32 %v7128_v4, %v26222_v47  ;;  %v21832_v8 = vpack.c.bf16 %v7660_v10, %v7659_v36  ;;  %v7131_v45 = vpop.f32.mrf.mxu0  ;;  %11955 = vmatprep.subr.bf16.mxu1 %v17644_v34 }
 0x345   : > { %26219 = vst [vmem:[#allocation148_spill] sm:$0xff] %v21811_v16  ;;  %26220 = vst [vmem:[#allocation147_spill] sm:$0xff] %v21813_v43  ;;  %10018 = vmatprep.mubr.bf16.mxu1 %v21813_v43  ;;  %v26223_v18 = vshll.u32 %v21763_v42, 16  ;;  %v7523_v57 = vmul.f32 %v21307_v63, %v7319_v39  ;;  %v21838_v6 = vpack.c.bf16 %v7660_v10, %v7658_v23  ;;  %v8004_v32 = vrot.slane %v8000_v52, 4  ;;  %v26228_v10 = vld [vmem:[#allocation118_spill] sm:$0xff] }
 0x346   : > { %10019 = vmatmul.mubr.bf16.gmra.mxu1 %v21811_v16  ;;  %v7321_v62 = vadd.f32 %v7130_v60, %v26224_v22  ;;  %v7663_v13 = vmax.f32 %v21822_v25, 0.0  ;;  %v7524_v55 = vmul.f32 %v21295_v58, %v7320_v1  ;;  %v25281_v4 = vshrl.u32 %v21817_v48, 16  ;;  %v7133_v7 = vpop.f32.mrf.mxu0  ;;  %v26229_v60 = vld [vmem:[#allocation16_spill] sm:$0xff] }
 0x347   : > { %v8003_v33 = vor.u32 %v26223_v18, %v8000_v52  ;;  %26225 = vst [vmem:[#allocation149_spill] sm:$0xff] %v21838_v6  ;;  %v7132_v47 = vadd.f32 %v7131_v45, %v21398_v5  ;;  %10231 = vmatprep.mubr.bf16.mxu0 %v21838_v6  ;;  %v26226_v23 = vshrl.u32 %v21765_v59, 16  ;;  %v21849_v52 = vpack.c.bf16 %v7659_v36, %v7657_v19 }
 0x348   : > { %v7134_v5 = vadd.f32 %v7133_v7, %v21402_v26  ;;  %v7137_v1 = vpop.f32.mrf.mxu0  ;;  %v7598_v45 = vadd.f32 %v21310_v35, %v7521_v53  ;;  %v21858_v22 = vadd.f32 %v21304_v15, %v7524_v55  ;;  %v26230_v18 = vshll.u32 %v21765_v59, 16 }
 0x349   : > { %v8008_v39 = vrot.slane %v26226_v23, 7  ;;  %26227 = vst [vmem:[#allocation101_spill] sm:$0xff] %v21849_v52  ;;  %v7322_v25 = vadd.f32 %v7132_v47, %v26228_v10  ;;  %v8262_v34 = vsel %vm18253_vm9, %v8003_v33, %v26229_v60  ;;  %v7138_v19 = vadd.f32 %v7137_v1, %v21411_v46  ;;  %v26231_v33 = vld [vmem:[#allocation165_spill] sm:$0xff]  ;;  %v26232_v10 = vld [vmem:[#allocation70_spill] sm:$0xff] }
 0x34a   : > { %10232 = vmatmul.mubr.bf16.gmra.mxu0 %v21849_v52  ;;  %v7600_v36 = vadd.f32 %v21310_v35, %v7523_v57  ;;  %v7323_v23 = vadd.f32 %v7134_v5, %v26231_v33  ;;  %v7139_v26 = vpop.f32.mrf.mxu0  ;;  %v7662_v7 = vmax.f32 %v7598_v45, 0.0  ;;  %v8016_v53 = vrot.slane %v25281_v4, 7  ;;  %v26235_v33 = vld [vmem:[#allocation71_spill] sm:$0xff]  ;;  %v26242_v46 = vld [vmem:[#allocation21_spill] sm:$0xff] }
 0x34b   : > { %v8011_v0 = vor.u32 %v26230_v18, %v8008_v39  ;;  %v7526_v47 = vmul.f32 %v21295_v58, %v7322_v25  ;;  %v7324_v18 = vadd.f32 %v7138_v19, %v26232_v10  ;;  %v7140_v39 = vadd.f32 %v7139_v26, %v21415_v49 }
 0x34c   : > { %v7664_v60 = vmax.f32 %v7600_v36, 0.0  ;;  %v7141_v1 = vpop.f32.mrf.mxu0  ;;  %v7525_v19 = vmul.f32 %v21307_v63, %v7321_v62  ;;  %v7665_v10 = vmax.f32 %v21858_v22, 0.0 }
 0x34d   : > { %v8012_v55 = vsel %vm18241_vm8, %v8004_v32, %v8011_v0  ;;  %v21875_v57 = vadd.f32 %v21304_v15, %v7526_v47  ;;  %v7528_v45 = vmul.f32 %v21295_v58, %v7324_v18  ;;  %v7325_v4 = vadd.f32 %v7140_v39, %v26235_v33 }
 0x34e   : > { %v21877_v25 = vcombine.low %v8262_v34, %v8012_v55  ;;  %v21879_v5 = vcombine.high %v8262_v34, %v8012_v55  ;;  %v26236_v0 = vmax.f32 %v21797_v50, 0.0  ;;  %v21887_v49 = vpack.c.bf16 %v7664_v60, %v7663_v13  ;;  %v7143_v55 = vpop.f32.mrf.mxu0 }
 0x34f   : > { %v21891_v36 = vpack.c.bf16 %v7664_v60, %v7662_v7  ;;  %v7142_v34 = vadd.f32 %v7141_v1, %v21419_v31  ;;  %v26239_v47 = vshll.u32 %v21817_v48, 16  ;;  %v7667_v18 = vmax.f32 %v21875_v57, 0.0  ;;  %v26240_v60 = vld [vmem:[#allocation120_spill] sm:$0xff] }
 0x350   : > { %26233 = vst [vmem:[#allocation32_spill] sm:$0xff] %v21877_v25  ;;  %26234 = vst [vmem:[#allocation150_spill] sm:$0xff] %v21879_v5  ;;  %v21885_v32 = vpack.c.bf16 %v7662_v7, %v26236_v0  ;;  %10028 = vmatprep.mubr.bf16.mxu1 %v21879_v5  ;;  %v7527_v39 = vmul.f32 %v21307_v63, %v7323_v23  ;;  %v21902_v33 = vadd.f32 %v21304_v15, %v7528_v45  ;;  %v7147_v22 = vpop.f32.mrf.mxu0 }
 0x351   : > { %26237 = vst [vmem:[#allocation102_spill] sm:$0xff] %v21887_v49  ;;  %26238 = vst [vmem:[#allocation34_spill] sm:$0xff] %v21891_v36  ;;  %v8019_v26 = vor.u32 %v26239_v47, %v8016_v53  ;;  %10029 = vmatmul.mubr.bf16.gmra.mxu1 %v21877_v25  ;;  %v7529_v7 = vmul.f32 %v21307_v63, %v7325_v4  ;;  %10241 = vmatprep.mubr.bf16.mxu0 %v21891_v36  ;;  %v8020_v0 = vrot.slane %v8016_v53, 4 }
 0x352   : > { %v7326_v1 = vadd.f32 %v7142_v34, %v26240_v60  ;;  %v26241_v57 = vshrl.u32 %v21832_v8, 16  ;;  %v26243_v45 = vmax.f32 %v21797_v50, 0.0  ;;  %v7144_v31 = vadd.f32 %v7143_v55, %v21423_v24  ;;  %v7149_v34 = vpop.f32.mrf.mxu0  ;;  %v26247_v24 = vld [vmem:[#allocation166_spill] sm:$0xff]  ;;  %v26248_v55 = vld [vmem:[#allocation121_spill] sm:$0xff] }
 0x353   : > { %v8266_v23 = vsel %vm18253_vm9, %v8019_v26, %v26242_v46  ;;  %v7148_v36 = vadd.f32 %v7147_v22, %v21430_v2  ;;  %v7602_v53 = vadd.f32 %v21310_v35, %v7525_v19  ;;  %v26245_v60 = vshll.u32 %v21832_v8, 16 }
 0x354   : > { %v8024_v47 = vrot.slane %v26241_v57, 7  ;;  %v21915_v62 = vpack.c.bf16 %v7663_v13, %v26243_v45  ;;  %v7530_v4 = vmul.f32 %v21295_v58, %v7326_v1  ;;  %v7150_v46 = vadd.f32 %v7149_v34, %v21434_v28  ;;  %v7151_v45 = vpop.f32.mrf.mxu0 }
 0x355   : > { %v7604_v50 = vadd.f32 %v21310_v35, %v7527_v39  ;;  %v26246_v13 = vshrl.u32 %v21885_v32, 16  ;;  %v7327_v2 = vadd.f32 %v7144_v31, %v26247_v24  ;;  %v7328_v22 = vadd.f32 %v7148_v36, %v26248_v55 }
 0x356   : > { %26244 = vst [vmem:[#allocation151_spill] sm:$0xff] %v21915_v62  ;;  %v8027_v57 = vor.u32 %v26245_v60, %v8024_v47  ;;  %10242 = vmatmul.mubr.bf16.gmra.mxu0 %v21915_v62  ;;  %v21929_v1 = vadd.f32 %v21304_v15, %v7530_v4  ;;  %v7666_v19 = vmax.f32 %v7602_v53, 0.0  ;;  %v26249_v60 = vld [vmem:[#allocation167_spill] sm:$0xff]  ;;  %v7152_v39 = vadd.f32 %v7151_v45, %v21438_v61  ;;  %v7153_v31 = vpop.f32.mrf.mxu0 }
 0x357   : > { %v8032_v26 = vrot.slane %v26246_v13, 7  ;;  %v7329_v62 = vadd.f32 %v7150_v46, %v26249_v60  ;;  %v7668_v28 = vmax.f32 %v7604_v50, 0.0  ;;  %v25292_v34 = vshrl.u32 %v21887_v49, 16  ;;  %v26255_v46 = vld [vmem:[#allocation123_spill] sm:$0xff]  ;;  %v26259_v60 = vld [vmem:[#allocation26_spill] sm:$0xff] }
 0x358   : > { %v8028_v47 = vsel %vm18241_vm8, %v8020_v0, %v8027_v57  ;;  %v25295_v13 = vshll.u32 %v21887_v49, 16  ;;  %v7669_v36 = vmax.f32 %v21902_v33, 0.0  ;;  %v7532_v53 = vmul.f32 %v21295_v58, %v7328_v22  ;;  %v7157_v45 = vpop.f32.mrf.mxu0 }
 0x359   : > { %v21939_v4 = vcombine.low %v8266_v23, %v8028_v47  ;;  %v21941_v52 = vcombine.high %v8266_v23, %v8028_v47  ;;  %v21945_v24 = vpack.c.bf16 %v7666_v19, %v7665_v10  ;;  %v21947_v0 = vpack.c.bf16 %v7668_v28, %v7667_v18 }
 0x35a   : > { %v7671_v57 = vmax.f32 %v21929_v1, 0.0  ;;  %v21951_v61 = vpack.c.bf16 %v7668_v28, %v7666_v19  ;;  %v7330_v50 = vadd.f32 %v7152_v39, %v26255_v46  ;;  %v26256_v23 = vshll.u32 %v21885_v32, 16  ;;  %v7159_v46 = vpop.f32.mrf.mxu0 }
 0x35b   : > { %26250 = vst [vmem:[#allocation33_spill] sm:$0xff] %v21939_v4  ;;  %26251 = vst [vmem:[#allocation38_spill] sm:$0xff] %v21941_v52  ;;  %10038 = vmatprep.mubr.bf16.mxu1 %v21941_v52  ;;  %v7531_v33 = vmul.f32 %v21307_v63, %v7327_v2  ;;  %v21959_v22 = vadd.f32 %v21304_v15, %v7532_v53  ;;  %v21962_v47 = vmul.f32 %v21307_v63, %v7329_v62 }
 0x35c   : > { %26252 = vst [vmem:[#allocation40_spill] sm:$0xff] %v21945_v24  ;;  %26253 = vst [vmem:[#allocation58_spill] sm:$0xff] %v21947_v0  ;;  %v8035_v55 = vor.u32 %v26256_v23, %v8032_v26  ;;  %10039 = vmatmul.mubr.bf16.gmra.mxu1 %v21939_v4  ;;  %v8036_v1 = vrot.slane %v8032_v26, 4  ;;  %10251 = vmatprep.mubr.bf16.mxu0 %v21951_v61  ;;  %v7534_v28 = vmul.f32 %v21295_v58, %v7330_v50  ;;  %v26258_v23 = vld [vmem:[#allocation130_spill] sm:$0xff]  ;;  %v26260_v50 = vld [vmem:[#allocation133_spill] sm:$0xff]  ;;  %v7161_v4 = vpop.f32.mrf.mxu0 }
 0x35d   : > { %26254 = vst [vmem:[#allocation104_spill] sm:$0xff] %v21951_v61  ;;  %v8040_v39 = vrot.slane %v25292_v34, 7  ;;  %v21971_v53 = vpack.c.bf16 %v7667_v18, %v7665_v10  ;;  %v7154_v62 = vadd.f32 %v7153_v31, %v21442_v54  ;;  %v7158_v26 = vadd.f32 %v7157_v45, %v26258_v23  ;;  %v26261_v54 = vld [vmem:[#allocation73_spill] sm:$0xff]  ;;  %v26262_v31 = vld [vmem:[#allocation134_spill] sm:$0xff] }
 0x35e   : > { %v8270_v61 = vsel %vm18253_vm9, %v8035_v55, %v26259_v60  ;;  %v7160_v6 = vadd.f32 %v7159_v46, %v26260_v50  ;;  %v7606_v34 = vadd.f32 %v21310_v35, %v7529_v7  ;;  %v21983_v2 = vadd.f32 %v21304_v15, %v7534_v28  ;;  %v26263_v55 = vld [vmem:[#allocation169_spill] sm:$0xff]  ;;  %v26264_v46 = vld [vmem:[#allocation168_spill] sm:$0xff]  ;;  %v7163_v50 = vpop.f32.mrf.mxu0 }
 0x35f   : > { %26257 = vst [vmem:[#allocation41_spill] sm:$0xff] %v21971_v53  ;;  %v8043_v19 = vor.u32 %v25295_v13, %v8040_v39  ;;  %10252 = vmatmul.mubr.bf16.gmra.mxu0 %v21971_v53  ;;  %v7332_v10 = vadd.f32 %v7158_v26, %v26261_v54  ;;  %v7608_v18 = vadd.f32 %v21310_v35, %v7531_v33  ;;  %v25304_v28 = vshll.u32 %v21947_v0, 16 }
 0x360   : > { %v7162_v45 = vadd.f32 %v7161_v4, %v26262_v31  ;;  %v7331_v60 = vadd.f32 %v7154_v62, %v26263_v55  ;;  %v7333_v23 = vadd.f32 %v7160_v6, %v26264_v46  ;;  %v7670_v7 = vmax.f32 %v7606_v34, 0.0  ;;  %v7167_v62 = vpop.f32.mrf.mxu0 }
 0x361   : > { %v8044_v39 = vsel %vm18241_vm8, %v8036_v1, %v8043_v19  ;;  %v7536_v26 = vmul.f32 %v21295_v58, %v7332_v10  ;;  %v7672_v4 = vmax.f32 %v7608_v18, 0.0  ;;  %v26268_v1 = vld [vmem:[#allocation171_spill] sm:$0xff]  ;;  %v26269_v34 = vshrl.u32 %v21945_v24, 16 }
 0x362   : > { %v21994_v13 = vcombine.low %v8270_v61, %v8044_v39  ;;  %v21996_v53 = vcombine.high %v8270_v61, %v8044_v39  ;;  %v22000_v54 = vpack.c.bf16 %v7670_v7, %v7669_v36  ;;  %v7334_v19 = vadd.f32 %v7162_v45, %v26268_v1  ;;  %v7169_v1 = vpop.f32.mrf.mxu0 }
 0x363   : > { %v8048_v31 = vrot.slane %v26269_v34, 7  ;;  %v26270_v61 = vshrl.u32 %v21947_v0, 16  ;;  %v22009_v55 = vpack.c.bf16 %v7671_v57, %v7669_v36  ;;  %v7535_v10 = vmul.f32 %v21307_v63, %v7331_v60 }
 0x364   : > { %26265 = vst [vmem:[#allocation152_spill] sm:$0xff] %v21994_v13  ;;  %26266 = vst [vmem:[#allocation105_spill] sm:$0xff] %v21996_v53  ;;  %10048 = vmatprep.mubr.bf16.mxu1 %v21996_v53  ;;  %v22014_v18 = vmul.f32 %v21307_v63, %v7333_v23  ;;  %v22016_v45 = vpack.c.bf16 %v7672_v4, %v7671_v57  ;;  %v22018_v46 = vpack.c.bf16 %v7672_v4, %v7670_v7  ;;  %v26275_v7 = vld [vmem:[#allocation137_spill] sm:$0xff]  ;;  %v26277_v53 = vld [vmem:[#allocation140_spill] sm:$0xff] }
 0x365   : > { %26267 = vst [vmem:[#allocation35_spill] sm:$0xff] %v22000_v54  ;;  %v8056_v39 = vrot.slane %v26270_v61, 7  ;;  %26271 = vst [vmem:[#allocation43_spill] sm:$0xff] %v22009_v55  ;;  %10049 = vmatmul.mubr.bf16.gmra.mxu1 %v21994_v13  ;;  %v22021_v6 = vadd.f32 %v21304_v15, %v7536_v26  ;;  %v7538_v36 = vmul.f32 %v21295_v58, %v7334_v19  ;;  %v26274_v61 = vshll.u32 %v21945_v24, 16  ;;  %v7171_v13 = vpop.f32.mrf.mxu0  ;;  %v26276_v19 = vld [vmem:[#allocation138_spill] sm:$0xff] }
 0x366   : > { %26272 = vst [vmem:[#allocation153_spill] sm:$0xff] %v22016_v45  ;;  %26273 = vst [vmem:[#allocation45_spill] sm:$0xff] %v22018_v46  ;;  %10261 = vmatprep.mubr.bf16.mxu0 %v22018_v46  ;;  %v8052_v23 = vrot.slane %v8048_v31, 4  ;;  %v7164_v4 = vadd.f32 %v7163_v50, %v26275_v7  ;;  %v7170_v60 = vadd.f32 %v7169_v1, %v26277_v53  ;;  %v26278_v46 = vld [vmem:[#allocation31_spill] sm:$0xff]  ;;  %v26282_v53 = vld [vmem:[#allocation170_spill] sm:$0xff] }
 0x367   : > { %v8051_v33 = vor.u32 %v26274_v61, %v8048_v31  ;;  %v8059_v57 = vor.u32 %v25304_v28, %v8056_v39  ;;  %v22034_v34 = vadd.f32 %v21304_v15, %v7538_v36  ;;  %10262 = vmatmul.mubr.bf16.gmra.mxu0 %v22009_v55  ;;  %v7168_v61 = vadd.f32 %v7167_v62, %v26276_v19  ;;  %v7173_v36 = vpop.f32.mrf.mxu0  ;;  %v26281_v62 = vld [vmem:[#allocation75_spill] sm:$0xff] }
 0x368   : > { %v7610_v50 = vadd.f32 %v21310_v35, %v21962_v47  ;;  %v7612_v7 = vadd.f32 %v21310_v35, %v7535_v10  ;;  %v7335_v19 = vadd.f32 %v7164_v4, %v26281_v62  ;;  %v26284_v10 = vld [vmem:[#allocation76_spill] sm:$0xff]  ;;  %v26286_v4 = vshrl.u32 %v22016_v45, 16 }
 0x369   : > { %v8060_v31 = vsel %vm18241_vm8, %v8052_v23, %v8059_v57  ;;  %v8274_v39 = vsel %vm18253_vm9, %v8051_v33, %v26278_v46  ;;  %v7336_v1 = vadd.f32 %v7168_v61, %v26282_v53  ;;  %v26283_v57 = vld [vmem:[#allocation172_spill] sm:$0xff]  ;;  %v7177_v46 = vpop.f32.mrf.mxu0  ;;  %v7172_v24 = vadd.f32 %v7171_v13, %v26284_v10 }
 0x36a   : > { %v22047_v28 = vcombine.low %v8274_v39, %v8060_v31  ;;  %v22049_v26 = vcombine.high %v8274_v39, %v8060_v31  ;;  %v7337_v55 = vadd.f32 %v7170_v60, %v26283_v57  ;;  %v7674_v0 = vmax.f32 %v7610_v50, 0.0 }
 0x36b   : > { %v7676_v33 = vmax.f32 %v7612_v7, 0.0  ;;  %v7540_v47 = vmul.f32 %v21295_v58, %v7336_v1  ;;  %v26285_v31 = vshrl.u32 %v22000_v54, 16  ;;  %v8072_v62 = vrot.slane %v26286_v4, 7  ;;  %v7179_v13 = vpop.f32.mrf.mxu0 }
 0x36c   : > { %26279 = vst [vmem:[#allocation39_spill] sm:$0xff] %v22047_v28  ;;  %26280 = vst [vmem:[#allocation155_spill] sm:$0xff] %v22049_v26  ;;  %10058 = vmatprep.mubr.bf16.mxu1 %v22049_v26  ;;  %v26287_v60 = vmax.f32 %v21959_v22, 0.0  ;;  %v26289_v7 = vmax.f32 %v21983_v2, 0.0  ;;  %v7679_v57 = vmax.f32 %v22034_v34, 0.0  ;;  %v7539_v10 = vmul.f32 %v21307_v63, %v7335_v19  ;;  %v26300_v26 = vld [vmem:[#allocation93_spill] sm:$0xff] }
 0x36d   : > { %v8064_v39 = vrot.slane %v26285_v31, 7  ;;  %10059 = vmatmul.mubr.bf16.gmra.mxu1 %v22047_v28  ;;  %v22072_v1 = vpack.c.bf16 %v7676_v33, %v7674_v0  ;;  %v26292_v31 = vld [vmem:[#allocation127_spill] sm:$0xff]  ;;  %v26293_v23 = vshll.u32 %v22000_v54, 16  ;;  %v22080_v28 = vadd.f32 %v21304_v15, %v7540_v47  ;;  %v26295_v54 = vld [vmem:[#allocation37_spill] sm:$0xff]  ;;  %v26301_v34 = vld [vmem:[#allocation142_spill] sm:$0xff] }
 0x36e   : > { %v22066_v50 = vpack.c.bf16 %v7674_v0, %v26287_v60  ;;  %v22070_v53 = vpack.c.bf16 %v7676_v33, %v26289_v7  ;;  %v7338_v4 = vadd.f32 %v7172_v24, %v26292_v31  ;;  %v7541_v60 = vmul.f32 %v21307_v63, %v7337_v55  ;;  %v7181_v33 = vpop.f32.mrf.mxu0 }
 0x36f   : > { %26291 = vst [vmem:[#allocation154_spill] sm:$0xff] %v22072_v1  ;;  %v8067_v61 = vor.u32 %v26293_v23, %v8064_v39  ;;  %10271 = vmatprep.mubr.bf16.mxu0 %v22072_v1  ;;  %v8068_v0 = vrot.slane %v8064_v39, 4  ;;  %v26294_v24 = vshll.u32 %v22016_v45, 16  ;;  %v26296_v47 = vmax.f32 %v21959_v22, 0.0  ;;  %v26299_v1 = vld [vmem:[#allocation174_spill] sm:$0xff] }
 0x370   : > { %26288 = vst [vmem:[#allocation159_spill] sm:$0xff] %v22066_v50  ;;  %26290 = vst [vmem:[#allocation107_spill] sm:$0xff] %v22070_v53  ;;  %v7542_v19 = vmul.f32 %v21295_v58, %v7338_v4  ;;  %v26297_v55 = vmov %v26289_v7  ;;  %v7174_v39 = vadd.f32 %v7173_v36, %v26299_v1  ;;  %v7178_v52 = vadd.f32 %v7177_v46, %v26300_v26  ;;  %v7183_v4 = vpop.f32.mrf.mxu0  ;;  %v26304_v26 = vld [vmem:[#allocation78_spill] sm:$0xff]  ;;  %v26305_v46 = vld [vmem:[#allocation173_spill] sm:$0xff] }
 0x371   : > { %v8075_v31 = vor.u32 %v26294_v24, %v8072_v62  ;;  %v8278_v23 = vsel %vm18253_vm9, %v8067_v61, %v26295_v54  ;;  %v22096_v7 = vpack.c.bf16 %v26297_v55, %v26296_v47  ;;  %v7180_v25 = vadd.f32 %v7179_v13, %v26301_v34  ;;  %v26319_v34 = vld [vmem:[#allocation144_spill] sm:$0xff] }
 0x372   : > { %v22102_v45 = vadd.f32 %v21304_v15, %v7542_v19  ;;  %v7614_v22 = vadd.f32 %v21310_v35, %v22014_v18  ;;  %v7616_v2 = vadd.f32 %v21310_v35, %v7539_v10  ;;  %v7339_v36 = vadd.f32 %v7174_v39, %v26304_v26  ;;  %v7187_v13 = vpop.f32.mrf.mxu0  ;;  %v26306_v19 = vld [vmem:[#allocation80_spill] sm:$0xff] }
 0x373   : > { %26298 = vst [vmem:[#allocation181_spill] sm:$0xff] %v22096_v7  ;;  %v8076_v62 = vsel %vm18241_vm8, %v8068_v0, %v8075_v31  ;;  %10272 = vmatmul.mubr.bf16.gmra.mxu0 %v22096_v7  ;;  %v7340_v1 = vadd.f32 %v7178_v52, %v26305_v46  ;;  %v7341_v0 = vadd.f32 %v7180_v25, %v26306_v19  ;;  %v26308_v55 = vshrl.u32 %v22066_v50, 16 }
 0x374   : > { %v22109_v54 = vcombine.low %v8278_v23, %v8076_v62  ;;  %v22111_v61 = vcombine.high %v8278_v23, %v8076_v62  ;;  %v7678_v24 = vmax.f32 %v7614_v22, 0.0  ;;  %v7680_v31 = vmax.f32 %v7616_v2, 0.0  ;;  %v26307_v23 = vld [vmem:[#allocation18_spill] sm:$0xff]  ;;  %v7189_v62 = vpop.f32.mrf.mxu0 }
 0x375   : > { %v7544_v10 = vmul.f32 %v21295_v58, %v7340_v1  ;;  %v7182_v47 = vadd.f32 %v7181_v33, %v26307_v23  ;;  %v8080_v39 = vrot.slane %v26308_v55, 7  ;;  %v26309_v25 = vmax.f32 %v22021_v6, 0.0  ;;  %v26313_v1 = vld [vmem:[#allocation128_spill] sm:$0xff] }
 0x376   : > { %26302 = vst [vmem:[#allocation108_spill] sm:$0xff] %v22109_v54  ;;  %26303 = vst [vmem:[#allocation156_spill] sm:$0xff] %v22111_v61  ;;  %10068 = vmatprep.mubr.bf16.mxu1 %v22111_v61  ;;  %v22130_v2 = vpack.c.bf16 %v7680_v31, %v7679_v57  ;;  %v22132_v26 = vpack.c.bf16 %v7680_v31, %v7678_v24  ;;  %v7683_v46 = vmax.f32 %v22102_v45, 0.0  ;;  %v26314_v23 = vshll.u32 %v22066_v50, 16  ;;  %v7191_v52 = vpop.f32.mrf.mxu0 }
 0x377   : > { %10069 = vmatmul.mubr.bf16.gmra.mxu1 %v22109_v54  ;;  %v22128_v22 = vpack.c.bf16 %v7678_v24, %v26309_v25  ;;  %v7543_v33 = vmul.f32 %v21307_v63, %v7339_v36  ;;  %v7342_v19 = vadd.f32 %v7182_v47, %v26313_v1  ;;  %v22140_v18 = vadd.f32 %v21304_v15, %v7544_v10  ;;  %v26322_v36 = vld [vmem:[#allocation42_spill] sm:$0xff] }
 0x378   : > { %26311 = vst [vmem:[#allocation48_spill] sm:$0xff] %v22130_v2  ;;  %26312 = vst [vmem:[#allocation46_spill] sm:$0xff] %v22132_v26  ;;  %v8083_v55 = vor.u32 %v26314_v23, %v8080_v39  ;;  %v22143_v25 = vmul.f32 %v21307_v63, %v7341_v0  ;;  %10281 = vmatprep.mubr.bf16.mxu0 %v22132_v26  ;;  %v8084_v24 = vrot.slane %v8080_v39, 4  ;;  %v26315_v47 = vshrl.u32 %v22070_v53, 16  ;;  %v7193_v23 = vpop.f32.mrf.mxu0  ;;  %v26318_v0 = vld [vmem:[#allocation22_spill] sm:$0xff]  ;;  %v26320_v26 = vld [vmem:[#allocation24_spill] sm:$0xff] }
 0x379   : > { %26310 = vst [vmem:[#allocation44_spill] sm:$0xff] %v22128_v22  ;;  %v7546_v31 = vmul.f32 %v21295_v58, %v7342_v19  ;;  %v26316_v10 = vmax.f32 %v22021_v6, 0.0  ;;  %v7184_v50 = vadd.f32 %v7183_v4, %v26318_v0  ;;  %v7188_v54 = vadd.f32 %v7187_v13, %v26319_v34  ;;  %v26323_v13 = vld [vmem:[#allocation83_spill] sm:$0xff] }
 0x37a   : > { %v8088_v1 = vrot.slane %v26315_v47, 7  ;;  %v7190_v39 = vadd.f32 %v7189_v62, %v26320_v26  ;;  %v26321_v45 = vshll.u32 %v22070_v53, 16  ;;  %v8282_v19 = vsel %vm18253_vm9, %v8083_v55, %v26322_v36  ;;  %v7197_v6 = vpop.f32.mrf.mxu0  ;;  %v26324_v62 = vld [vmem:[#allocation139_spill] sm:$0xff] }
 0x37b   : > { %v22154_v7 = vpack.c.bf16 %v7679_v57, %v26316_v10  ;;  %v7618_v47 = vadd.f32 %v21310_v35, %v7541_v60  ;;  %v7620_v49 = vadd.f32 %v21310_v35, %v7543_v33  ;;  %v17665_v57 = vld [vmem:[%s25092_s1 + $0xe74] ss:$8 sps:$4 sm:$0xff]   ;;  %v22170_v4 = vadd.f32 %v21304_v15, %v7546_v31 }
 0x37c   : > { %v8091_v61 = vor.u32 %v26321_v45, %v8088_v1  ;;  %v7344_v34 = vadd.f32 %v7188_v54, %v26323_v13  ;;  %v7345_v26 = vadd.f32 %v7190_v39, %v26324_v62  ;;  %v26325_v45 = vld [vmem:[#allocation179_spill] sm:$0xff]  ;;  %v26326_v33 = vld [vmem:[#allocation74_spill] sm:$0xff]  ;;  %v7199_v0 = vpop.f32.mrf.mxu0  ;;  %12148 = vmatprep.subr.bf16.mxu0 %v17665_v57  ;;  %v25349_v31 = vshll.u32 %v22130_v2, 16 }
 0x37d   : > { %26317 = vst [vmem:[#allocation51_spill] sm:$0xff] %v22154_v7  ;;  %10282 = vmatmul.mubr.bf16.gmra.mxu0 %v22154_v7  ;;  %v7192_v55 = vadd.f32 %v7191_v52, %v26325_v45  ;;  %v7343_v36 = vadd.f32 %v7184_v50, %v26326_v33  ;;  %v7682_v1 = vmax.f32 %v7618_v47, 0.0  ;;  %v7684_v10 = vmax.f32 %v7620_v49, 0.0  ;;  %v26333_v47 = vld [vmem:[#allocation141_spill] sm:$0xff]  ;;  %v26339_v39 = vld [vmem:[#allocation95_spill] sm:$0xff] }
 0x37e   : > { %v8092_v60 = vsel %vm18241_vm8, %v8084_v24, %v8091_v61  ;;  %v7548_v54 = vmul.f32 %v21295_v58, %v7344_v34  ;;  %v26329_v52 = vmax.f32 %v22080_v28, 0.0  ;;  %v7201_v49 = vpop.f32.mrf.mxu0  ;;  %v26334_v57 = vshrl.u32 %v22128_v22, 16 }
 0x37f   : > { %v22180_v53 = vcombine.low %v8282_v19, %v8092_v60  ;;  %v22182_v7 = vcombine.high %v8282_v19, %v8092_v60  ;;  %v22190_v61 = vpack.c.bf16 %v7684_v10, %v7683_v46  ;;  %v22192_v50 = vpack.c.bf16 %v7684_v10, %v7682_v1 }
 0x380   : > { %v22188_v13 = vpack.c.bf16 %v7682_v1, %v26329_v52  ;;  %v7346_v19 = vadd.f32 %v7192_v55, %v26333_v47  ;;  %v8096_v34 = vrot.slane %v26334_v57, 7  ;;  %v26335_v62 = vshrl.u32 %v22130_v2, 16  ;;  %v7203_v55 = vpop.f32.mrf.mxu0 }
 0x381   : > { %26327 = vst [vmem:[#allocation182_spill] sm:$0xff] %v22180_v53  ;;  %26328 = vst [vmem:[#allocation60_spill] sm:$0xff] %v22182_v7  ;;  %10078 = vmatprep.mubr.bf16.mxu1 %v22182_v7  ;;  %v7547_v60 = vmul.f32 %v21307_v63, %v7343_v36  ;;  %v22204_v33 = vadd.f32 %v21304_v15, %v7548_v54  ;;  %v22207_v1 = vmul.f32 %v21307_v63, %v7345_v26 }
 0x382   : > { %26330 = vst [vmem:[#allocation110_spill] sm:$0xff] %v22188_v13  ;;  %26331 = vst [vmem:[#allocation157_spill] sm:$0xff] %v22190_v61  ;;  %v8104_v45 = vrot.slane %v26335_v62, 7  ;;  %10079 = vmatmul.mubr.bf16.gmra.mxu1 %v22180_v53  ;;  %10291 = vmatprep.mubr.bf16.mxu0 %v22192_v50  ;;  %v7550_v47 = vmul.f32 %v21295_v58, %v7346_v19  ;;  %v26336_v57 = vshll.u32 %v22128_v22, 16  ;;  %v8100_v24 = vrot.slane %v8096_v34, 4  ;;  %v26340_v53 = vld [vmem:[#allocation145_spill] sm:$0xff]  ;;  %v7207_v7 = vpop.f32.mrf.mxu0 }
 0x383   : > { %26332 = vst [vmem:[#allocation183_spill] sm:$0xff] %v22192_v50  ;;  %v26337_v54 = vmov %v26329_v52  ;;  %v7194_v10 = vadd.f32 %v7193_v23, %v26339_v39  ;;  %v7198_v50 = vadd.f32 %v7197_v6, %v26340_v53  ;;  %v26341_v22 = vld [vmem:[#allocation180_spill] sm:$0xff]  ;;  %v26343_v53 = vld [vmem:[#allocation82_spill] sm:$0xff]  ;;  %v7624_v39 = vadd.f32 %v21310_v35, %v7547_v60 }
 0x384   : > { %v8099_v62 = vor.u32 %v26336_v57, %v8096_v34  ;;  %v8107_v36 = vor.u32 %v25349_v31, %v8104_v45  ;;  %v22219_v26 = vpack.c.bf16 %v7683_v46, %v26337_v54  ;;  %v22225_v19 = vadd.f32 %v21304_v15, %v7550_v47  ;;  %v26342_v46 = vld [vmem:[#allocation47_spill] sm:$0xff]  ;;  %v7209_v45 = vpop.f32.mrf.mxu0  ;;  %v26348_v60 = vld [vmem:[#allocation96_spill] sm:$0xff] }
 0x385   : > { %v7200_v57 = vadd.f32 %v7199_v0, %v26341_v22  ;;  %v7622_v34 = vadd.f32 %v21310_v35, %v22143_v25  ;;  %v7348_v6 = vadd.f32 %v7198_v50, %v26343_v53  ;;  %v26346_v25 = vld [vmem:[#allocation81_spill] sm:$0xff]  ;;  %v7202_v53 = vadd.f32 %v7201_v49, %v26348_v60 }
 0x386   : > { %26338 = vst [vmem:[#allocation111_spill] sm:$0xff] %v22219_v26  ;;  %v8108_v28 = vsel %vm18241_vm8, %v8100_v24, %v8107_v36  ;;  %v8286_v23 = vsel %vm18253_vm9, %v8099_v62, %v26342_v46  ;;  %10292 = vmatmul.mubr.bf16.gmra.mxu0 %v22219_v26  ;;  %v26347_v24 = vld [vmem:[#allocation79_spill] sm:$0xff]  ;;  %v7688_v46 = vmax.f32 %v7624_v39, 0.0  ;;  %v7211_v52 = vpop.f32.mrf.mxu0  ;;  %v26349_v47 = vshrl.u32 %v22188_v13, 16 }
 0x387   : > { %v22239_v22 = vcombine.low %v8286_v23, %v8108_v28  ;;  %v22241_v0 = vcombine.high %v8286_v23, %v8108_v28  ;;  %v7349_v54 = vadd.f32 %v7200_v57, %v26346_v25  ;;  %v7347_v36 = vadd.f32 %v7194_v10, %v26347_v24  ;;  %v26354_v24 = vld [vmem:[#allocation87_spill] sm:$0xff] }
 0x388   : > { %v7552_v31 = vmul.f32 %v21295_v58, %v7348_v6  ;;  %v7686_v62 = vmax.f32 %v7622_v34, 0.0  ;;  %v8112_v26 = vrot.slane %v26349_v47, 7  ;;  %v26350_v28 = vshrl.u32 %v22190_v61, 16  ;;  %v7213_v49 = vpop.f32.mrf.mxu0 }
 0x389   : > { %26344 = vst [vmem:[#allocation158_spill] sm:$0xff] %v22239_v22  ;;  %26345 = vst [vmem:[#allocation49_spill] sm:$0xff] %v22241_v0  ;;  %10088 = vmatprep.mubr.bf16.mxu1 %v22241_v0  ;;  %v26351_v10 = vmax.f32 %v22140_v18, 0.0  ;;  %v26352_v6 = vmax.f32 %v22170_v4, 0.0  ;;  %v7350_v47 = vadd.f32 %v7202_v53, %v26354_v24  ;;  %v26355_v60 = vshll.u32 %v22188_v13, 16  ;;  %v26363_v53 = vld [vmem:[#allocation146_spill] sm:$0xff] }
 0x38a   : > { %v8120_v23 = vrot.slane %v26350_v28, 7  ;;  %10089 = vmatmul.mubr.bf16.gmra.mxu1 %v22239_v22  ;;  %v22263_v25 = vpack.c.bf16 %v7688_v46, %v7686_v62  ;;  %v8116_v50 = vrot.slane %v8112_v26, 4  ;;  %v26356_v57 = vshll.u32 %v22190_v61, 16  ;;  %v26365_v61 = vld [vmem:[#allocation23_spill] sm:$0xff] }
 0x38b   : > { %v22257_v34 = vpack.c.bf16 %v7686_v62, %v26351_v10  ;;  %v22261_v39 = vpack.c.bf16 %v7688_v46, %v26352_v6  ;;  %v8115_v28 = vor.u32 %v26355_v60, %v8112_v26  ;;  %v7551_v2 = vmul.f32 %v21307_v63, %v7347_v36  ;;  %v7217_v46 = vpop.f32.mrf.mxu0 }
 0x38c   : > { %26353 = vst [vmem:[#allocation53_spill] sm:$0xff] %v22263_v25  ;;  %v8123_v22 = vor.u32 %v26356_v57, %v8120_v23  ;;  %v22272_v10 = vadd.f32 %v21304_v15, %v7552_v31  ;;  %v7553_v6 = vmul.f32 %v21307_v63, %v7349_v54  ;;  %10301 = vmatprep.mubr.bf16.mxu0 %v22263_v25  ;;  %v26357_v23 = vld [vmem:[#allocation52_spill] sm:$0xff]  ;;  %v26360_v54 = vmax.f32 %v22140_v18, 0.0 }
 0x38d   : > { %v7554_v24 = vmul.f32 %v21295_v58, %v7350_v47  ;;  %v8290_v36 = vsel %vm18253_vm9, %v8115_v28, %v26357_v23  ;;  %v26361_v60 = vmax.f32 %v22170_v4, 0.0  ;;  %v7204_v25 = vadd.f32 %v7203_v55, %v26363_v53  ;;  %v7219_v47 = vpop.f32.mrf.mxu0 }
 0x38e   : > { %v8124_v26 = vsel %vm18241_vm8, %v8116_v50, %v8123_v22  ;;  %v26364_v22 = vld [vmem:[#allocation27_spill] sm:$0xff]  ;;  %v7210_v28 = vadd.f32 %v7209_v45, %v26365_v61  ;;  %v7628_v18 = vadd.f32 %v21310_v35, %v7551_v2  ;;  %v7212_v4 = vadd.f32 %v7211_v52, %v21569_v29  ;;  %v26368_v61 = vld [vmem:[#allocation176_spill] sm:$0xff] }
 0x38f   : > { %v22284_v31 = vcombine.low %v8290_v36, %v8124_v26  ;;  %v22286_v57 = vcombine.high %v8290_v36, %v8124_v26  ;;  %v22292_v62 = vpack.c.bf16 %v26361_v60, %v26360_v54  ;;  %v22296_v13 = vadd.f32 %v21304_v15, %v7554_v24  ;;  %v7221_v24 = vpop.f32.mrf.mxu0  ;;  %v26369_v54 = vld [vmem:[#allocation89_spill] sm:$0xff] }
 0x390   : > { %v7208_v50 = vadd.f32 %v7207_v7, %v26364_v22  ;;  %v7626_v26 = vadd.f32 %v21310_v35, %v22207_v1  ;;  %v26366_v55 = vshrl.u32 %v22257_v34, 16  ;;  %v26367_v7 = vld [vmem:[#allocation15_spill] sm:$0xff]  ;;  %v7353_v1 = vadd.f32 %v7210_v28, %v26369_v54 }
 0x391   : > { %26358 = vst [vmem:[#allocation184_spill] sm:$0xff] %v22284_v31  ;;  %26359 = vst [vmem:[#allocation55_spill] sm:$0xff] %v22286_v57  ;;  %10098 = vmatprep.mubr.bf16.mxu1 %v22286_v57  ;;  %10302 = vmatmul.mubr.bf16.gmra.mxu0 %v22292_v62  ;;  %v7351_v36 = vadd.f32 %v7204_v25, %v26367_v7  ;;  %v7692_v23 = vmax.f32 %v7628_v18, 0.0  ;;  %v26371_v29 = vshll.u32 %v22257_v34, 16  ;;  %v26373_v7 = vmax.f32 %v22225_v19, 0.0 }
 0x392   : > { %26362 = vst [vmem:[#allocation56_spill] sm:$0xff] %v22292_v62  ;;  %v8128_v53 = vrot.slane %v26366_v55, 7  ;;  %v7352_v45 = vadd.f32 %v7208_v50, %v26368_v61  ;;  %v7690_v60 = vmax.f32 %v7626_v26, 0.0  ;;  %10099 = vmatmul.mubr.bf16.gmra.mxu1 %v22284_v31  ;;  %v26370_v62 = vld [vmem:[#allocation175_spill] sm:$0xff]  ;;  %v25368_v55 = vshll.u32 %v22261_v39, 16  ;;  %v22324_v26 = vpop.f32.mrf.mxu0 }
 0x393   : > { %v7354_v2 = vadd.f32 %v7212_v4, %v26370_v62  ;;  %v26372_v50 = vmax.f32 %v22204_v33, 0.0  ;;  %v22328_v18 = vpack.c.bf16 %v7692_v23, %v26373_v7  ;;  %v26375_v61 = vshrl.u32 %v22261_v39, 16 }
 0x394   : > { %v8131_v52 = vor.u32 %v26371_v29, %v8128_v53  ;;  %v7556_v25 = vmul.f32 %v21295_v58, %v7352_v45  ;;  %v22330_v62 = vpack.c.bf16 %v7692_v23, %v7690_v60  ;;  %v7555_v29 = vmul.f32 %v21307_v63, %v7351_v36  ;;  %v7227_v22 = vpop.f32.mrf.mxu0 }
 0x395   : > { %v22322_v28 = vpack.c.bf16 %v7690_v60, %v26372_v50  ;;  %v7558_v4 = vmul.f32 %v21295_v58, %v7354_v2  ;;  %v8136_v54 = vrot.slane %v26375_v61, 7  ;;  %v7557_v50 = vmul.f32 %v21307_v63, %v7353_v1  ;;  %v26376_v60 = vld [vmem:[#allocation57_spill] sm:$0xff] }
 0x396   : > { %26374 = vst [vmem:[#allocation117_spill] sm:$0xff] %v22330_v62  ;;  %v22337_v45 = vadd.f32 %v21304_v15, %v7556_v25  ;;  %v8132_v57 = vrot.slane %v8128_v53, 4  ;;  %10311 = vmatprep.mubr.bf16.mxu0 %v22330_v62  ;;  %v8294_v2 = vsel %vm18253_vm9, %v8131_v52, %v26376_v60  ;;  %v25369_v36 = vshrl.u32 %v22328_v18, 16 }
 0x397   : > { %v8139_v23 = vor.u32 %v25368_v55, %v8136_v54  ;;  %v26377_v25 = vmax.f32 %v22204_v33, 0.0  ;;  %v26378_v1 = vmov %v26373_v7  ;;  %v7214_v61 = vadd.f32 %v7213_v49, %v21576_v12  ;;  %v26382_v12 = vld [vmem:[#allocation178_spill] sm:$0xff] }
 0x398   : > { %v7218_v7 = vadd.f32 %v7217_v46, %v21580_v40  ;;  %v22358_v62 = vadd.f32 %v21304_v15, %v7558_v4  ;;  %v7220_v52 = vadd.f32 %v7219_v47, %v21589_v44  ;;  %v7630_v60 = vadd.f32 %v21310_v35, %v7553_v6  ;;  %v26383_v40 = vld [vmem:[#allocation90_spill] sm:$0xff] }
 0x399   : > { %v22353_v53 = vpack.c.bf16 %v26378_v1, %v26377_v25  ;;  %v8140_v54 = vsel %vm18241_vm8, %v8132_v57, %v8139_v23  ;;  %v7355_v49 = vadd.f32 %v7214_v61, %v26382_v12  ;;  %v26384_v25 = vld [vmem:[#allocation177_spill] sm:$0xff]  ;;  %v7632_v1 = vadd.f32 %v21310_v35, %v7555_v29 }
 0x39a   : > { %v22364_v33 = vcombine.low %v8294_v2, %v8140_v54  ;;  %v22366_v19 = vcombine.high %v8294_v2, %v8140_v54  ;;  %v7356_v46 = vadd.f32 %v7218_v7, %v26383_v40  ;;  %v7357_v4 = vadd.f32 %v7220_v52, %v26384_v25  ;;  %v7229_v7 = vpop.f32.mrf.mxu0  ;;  %v26387_v54 = vld [vmem:[#allocation19_spill] sm:$0xff] }
 0x39b   : > { %26379 = vst [vmem:[#allocation186_spill] sm:$0xff] %v22353_v53  ;;  %10312 = vmatmul.mubr.bf16.gmra.mxu0 %v22353_v53  ;;  %v7694_v55 = vmax.f32 %v7630_v60, 0.0  ;;  %v7222_v57 = vadd.f32 %v7221_v24, %v21593_v14  ;;  %v25370_v6 = vshll.u32 %v22328_v18, 16  ;;  %v26385_v47 = vshrl.u32 %v22322_v28, 16 }
 0x39c   : > { %26380 = vst [vmem:[#allocation124_spill] sm:$0xff] %v22364_v33  ;;  %26381 = vst [vmem:[#allocation54_spill] sm:$0xff] %v22366_v19  ;;  %10108 = vmatprep.mubr.bf16.mxu1 %v22366_v19  ;;  %v8152_v2 = vrot.slane %v25369_v36, 7  ;;  %v7560_v29 = vmul.f32 %v21295_v58, %v7356_v46  ;;  %v7696_v61 = vmax.f32 %v7632_v1, 0.0  ;;  %v26386_v14 = vmax.f32 %v22272_v10, 0.0 }
 0x39d   : > { %v8144_v23 = vrot.slane %v26385_v47, 7  ;;  %10109 = vmatmul.mubr.bf16.gmra.mxu1 %v22364_v33  ;;  %v7358_v52 = vadd.f32 %v7222_v57, %v26387_v54  ;;  %v7699_v60 = vmax.f32 %v22358_v62, 0.0  ;;  %v26388_v12 = vshll.u32 %v22322_v28, 16  ;;  %v26391_v54 = vld [vmem:[#allocation62_spill] sm:$0xff] }
 0x39e   : > { %v22385_v24 = vpack.c.bf16 %v7694_v55, %v26386_v14  ;;  %v8155_v47 = vor.u32 %v25370_v6, %v8152_v2  ;;  %v7559_v36 = vmul.f32 %v21307_v63, %v7355_v49  ;;  %v7561_v46 = vmul.f32 %v21307_v63, %v7357_v4  ;;  %v7231_v49 = vpop.f32.mrf.mxu0 }
 0x39f   : > { %v8147_v40 = vor.u32 %v26388_v12, %v8144_v23  ;;  %v8148_v25 = vrot.slane %v8144_v23, 4  ;;  %v26389_v1 = vmax.f32 %v22296_v13, 0.0  ;;  %v22399_v14 = vpack.c.bf16 %v7696_v61, %v7694_v55  ;;  %v26397_v13 = vld [vmem:[#allocation17_spill] sm:$0xff] }
 0x3a0   : > { %v25373_v57 = vshrl.u32 %v22385_v24, 16  ;;  %v7562_v62 = vmul.f32 %v21295_v58, %v7358_v52  ;;  %v22409_v4 = vadd.f32 %v21304_v15, %v7560_v29  ;;  %v25372_v12 = vshll.u32 %v22385_v24, 16 }
 0x3a1   : > { %v22397_v44 = vpack.c.bf16 %v7696_v61, %v26389_v1  ;;  %26390 = vst [vmem:[#allocation185_spill] sm:$0xff] %v22399_v14  ;;  %v8156_v23 = vsel %vm18241_vm8, %v8148_v25, %v8155_v47  ;;  %v8298_v2 = vsel %vm18253_vm9, %v8147_v40, %v26391_v54  ;;  %10321 = vmatprep.mubr.bf16.mxu0 %v22399_v14  ;;  %v26394_v25 = vmax.f32 %v22272_v10, 0.0 }
 0x3a2   : > { %v22413_v55 = vcombine.low %v8298_v2, %v8156_v23  ;;  %v22415_v61 = vcombine.high %v8298_v2, %v8156_v23  ;;  %v26395_v47 = vmov %v26389_v1  ;;  %v7224_v29 = vadd.f32 %v22324_v26, %v21606_v11 }
 0x3a3   : > { %v25371_v52 = vshrl.u32 %v22397_v44, 16  ;;  %v22422_v1 = vpack.c.bf16 %v26395_v47, %v26394_v25  ;;  %v7228_v40 = vadd.f32 %v7227_v22, %v21609_v41  ;;  %v7230_v54 = vadd.f32 %v7229_v7, %v21615_v56  ;;  %v26398_v47 = vld [vmem:[#allocation20_spill] sm:$0xff] }
 0x3a4   : > { %26392 = vst [vmem:[#allocation50_spill] sm:$0xff] %v22413_v55  ;;  %26393 = vst [vmem:[#allocation161_spill] sm:$0xff] %v22415_v61  ;;  %10118 = vmatprep.mubr.bf16.mxu1 %v22415_v61  ;;  %v7634_v23 = vadd.f32 %v21310_v35, %v7557_v50  ;;  %v7636_v2 = vadd.f32 %v21310_v35, %v7559_v36  ;;  %v7232_v6 = vadd.f32 %v7231_v49, %v21627_v37  ;;  %v26399_v56 = vld [vmem:[#allocation92_spill] sm:$0xff]  ;;  %v26400_v36 = vld [vmem:[#allocation14_spill] sm:$0xff] }
 0x3a5   : > { %26396 = vst [vmem:[#allocation129_spill] sm:$0xff] %v22422_v1  ;;  %v7639_v10 = vadd.f32 %v21304_v15, %v7562_v62  ;;  %10322 = vmatmul.mubr.bf16.gmra.mxu0 %v22422_v1  ;;  %v7359_v25 = vadd.f32 %v7224_v29, %v26397_v13  ;;  %v7360_v11 = vadd.f32 %v7228_v40, %v26398_v47  ;;  %v8160_v41 = vrot.slane %v25373_v57, 7 }
 0x3a6   : > { %10119 = vmatmul.mubr.bf16.gmra.mxu1 %v22413_v55  ;;  %v7361_v22 = vadd.f32 %v7230_v54, %v26399_v56  ;;  %v7698_v26 = vmax.f32 %v7634_v23, 0.0  ;;  %v7700_v50 = vmax.f32 %v7636_v2, 0.0  ;;  %v7362_v7 = vadd.f32 %v7232_v6, %v26400_v36  ;;  %v7233_v56 = vpop.f32.mrf.mxu0 }
 0x3a7   : > { %v7701_v37 = vmax.f32 %v22409_v4, 0.0  ;;  %v25385_v62 = vshll.u32 %v22397_v44, 16  ;;  %v7564_v49 = vmul.f32 %v21295_v58, %v7360_v11  ;;  %v8163_v29 = vor.u32 %v25372_v12, %v8160_v41 }
 0x3a8   : > { %v7565_v40 = vmul.f32 %v21307_v63, %v7361_v22  ;;  %v26401_v13 = vmax.f32 %v22337_v45, 0.0  ;;  %v22451_v54 = vpack.c.bf16 %v7700_v50, %v7699_v60  ;;  %v22453_v23 = vpack.c.bf16 %v7700_v50, %v7698_v26 }
 0x3a9   : > { %v7703_v6 = vmax.f32 %v7639_v10, 0.0  ;;  %v7563_v4 = vmul.f32 %v21307_v63, %v7359_v25  ;;  %v22457_v2 = vadd.f32 %v21304_v15, %v7564_v49  ;;  %v8168_v11 = vrot.slane %v25371_v52, 7 }
 0x3aa   : > { %v22449_v47 = vpack.c.bf16 %v7698_v26, %v26401_v13  ;;  %26402 = vst [vmem:[#allocation160_spill] sm:$0xff] %v22453_v23  ;;  %v22462_v22 = vadd.f32 %v21310_v35, %v7565_v40  ;;  %10331 = vmatprep.mubr.bf16.mxu0 %v22453_v23  ;;  %v7566_v26 = vmul.f32 %v21295_v58, %v7362_v7  ;;  %v8164_v50 = vrot.slane %v8160_v41, 4  ;;  %v26403_v13 = vld [vmem:[#allocation67_spill] sm:$0xff] }
 0x3ab   : > { %v25374_v10 = vmax.f32 %v22457_v2, 0.0  ;;  %v8171_v49 = vor.u32 %v25385_v62, %v8168_v11  ;;  %v8302_v52 = vsel %vm18253_vm9, %v8163_v29, %v26403_v13  ;;  %v26404_v12 = vmax.f32 %v22337_v45, 0.0 }
 0x3ac   : > { %v25384_v36 = vshrl.u32 %v22449_v47, 16  ;;  %v25375_v40 = vmax.f32 %v22462_v22, 0.0  ;;  %v7234_v58 = vadd.f32 %v7233_v56, %v21658_v27  ;;  %v7638_v41 = vadd.f32 %v21310_v35, %v7561_v46  ;;  %v26408_v46 = vld [vmem:[#allocation143_spill] sm:$0xff] }
 0x3ad   : > { %v22477_v57 = vpack.c.bf16 %v7699_v60, %v26404_v12  ;;  %v25376_v7 = vshll.u32 %v22449_v47, 16  ;;  %v8172_v25 = vsel %vm18241_vm8, %v8164_v50, %v8171_v49  ;;  %v7640_v11 = vadd.f32 %v21310_v35, %v7563_v4 }
 0x3ae   : > { %v8176_v29 = vrot.slane %v25384_v36, 7  ;;  %v22491_v45 = vpack.c.bf16 %v25375_v40, %v25374_v10  ;;  %v22493_v60 = vcombine.low %v8302_v52, %v8172_v25  ;;  %v22495_v27 = vcombine.high %v8302_v52, %v8172_v25 }
 0x3af   : > { %26405 = vst [vmem:[#allocation162_spill] sm:$0xff] %v22477_v57  ;;  %10332 = vmatmul.mubr.bf16.gmra.mxu0 %v22477_v57  ;;  %v7363_v12 = vadd.f32 %v7234_v58, %v26408_v46  ;;  %v22500_v56 = vadd.f32 %v21304_v15, %v7566_v26  ;;  %v7702_v4 = vmax.f32 %v7638_v41, 0.0  ;;  %v7704_v50 = vmax.f32 %v7640_v11, 0.0 }
 0x3b0   : > { %26406 = vst [vmem:[#allocation63_spill] sm:$0xff] %v22493_v60  ;;  %26407 = vst [vmem:[#allocation64_spill] sm:$0xff] %v22495_v27  ;;  %v8179_v49 = vor.u32 %v25376_v7, %v8176_v29  ;;  %v25377_v13 = vshll.u32 %v22451_v54, 16  ;;  %10128 = vmatprep.mubr.bf16.mxu1 %v22495_v27  ;;  %v26409_v52 = vshrl.u32 %v22451_v54, 16  ;;  %v8180_v11 = vrot.slane %v8176_v29, 4  ;;  %v26412_v7 = vld [vmem:[#allocation72_spill] sm:$0xff] }
 0x3b1   : > { %v7567_v10 = vmul.f32 %v21307_v63, %v7363_v12  ;;  %10129 = vmatmul.mubr.bf16.gmra.mxu1 %v22493_v60  ;;  %v22510_v58 = vpack.c.bf16 %v7702_v4, %v7701_v37  ;;  %v22512_v15 = vpack.c.bf16 %v7704_v50, %v7703_v6  ;;  %v22514_v26 = vpack.c.bf16 %v7704_v50, %v7702_v4 }
 0x3b2   : > { %v8184_v25 = vrot.slane %v26409_v52, 7  ;;  %v22521_v40 = vpack.c.bf16 %v7703_v6, %v7701_v37  ;;  %v25378_v63 = vmax.f32 %v22500_v56, 0.0  ;;  %v8306_v4 = vsel %vm18253_vm9, %v8179_v49, %v26412_v7 }
 0x3b3   : > { %26410 = vst [vmem:[#allocation112_spill] sm:$0xff] %v22514_v26  ;;  %v22517_v41 = vadd.f32 %v21310_v35, %v7567_v10  ;;  %v25381_v12 = vshrl.u32 %v22510_v58, 16  ;;  %v25380_v52 = vshrl.u32 %v22512_v15, 16  ;;  %10341 = vmatprep.mubr.bf16.mxu0 %v22514_v26  ;;  %v25382_v10 = vshll.u32 %v22510_v58, 16 }
 0x3b4   : > { %v8187_v46 = vor.u32 %v25377_v13, %v8184_v25  ;;  %26411 = vst [vmem:[#allocation163_spill] sm:$0xff] %v22521_v40  ;;  %v25383_v29 = vshll.u32 %v22512_v15, 16  ;;  %v26421_v36 = vshll.u32 %v21612_v3, 16  ;;  %v26427_v62 = vshll.u32 %v21765_v59, 16 }
 0x3b5   : > { %v25379_v35 = vmax.f32 %v22517_v41, 0.0  ;;  %v8192_v25 = vrot.slane %v25381_v12, 7  ;;  %v8200_v13 = vrot.slane %v25380_v52, 7 }
 0x3b6   : > { %v8188_v37 = vsel %vm18241_vm8, %v8180_v11, %v8187_v46 }
 0x3b7   : > { %v22535_v6 = vcombine.low %v8306_v4, %v8188_v37  ;;  %v22537_v50 = vcombine.high %v8306_v4, %v8188_v37  ;;  %v22547_v7 = vpack.c.bf16 %v25379_v35, %v25378_v63  ;;  %10342 = vmatmul.mubr.bf16.gmra.mxu0 %v22521_v40  ;;  %v8195_v49 = vor.u32 %v25382_v10, %v8192_v25  ;;  %v26415_v37 = vld [vmem:[#allocation77_spill] sm:$0xff] }
 0x3b8   : > { %11794 = vmatprep.mubr.bf16.mxu0 %v21728_v21  ;;  %v8196_v11 = vrot.slane %v8192_v25, 4  ;;  %v8203_v46 = vor.u32 %v25383_v29, %v8200_v13  ;;  %v26416_v35 = vshll.u32 %v21635_v51, 16  ;;  %v26417_v21 = vshrl.u32 %v21635_v51, 16  ;;  %v17671_v51 = vld [vmem:[%s25092_s1 + $0xe64] ss:$8 sps:$4 sm:$0xff]  }
 0x3b9   : > { %26413 = vst [vmem:[#allocation9_spill] sm:$0xff] %v22535_v6  ;;  %26414 = vst [vmem:[#allocation65_spill] sm:$0xff] %v22537_v50  ;;  %10138 = vmatprep.mubr.bf16.mxu1 %v22537_v50  ;;  %v8310_v63 = vsel %vm18253_vm9, %v8195_v49, %v26415_v37  ;;  %v26420_v13 = vshrl.u32 %v21612_v3, 16  ;;  %v17663_v49 = vld [vmem:[%s25092_s1 + $0xe70] ss:$8 sps:$4 sm:$0xff]  }
 0x3ba   : > { %10139 = vmatmul.mubr.bf16.gmra.mxu1 %v22535_v6  ;;  %v8204_v4 = vsel %vm18241_vm8, %v8196_v11, %v8203_v46  ;;  %v8425_v52 = vrot.slane %v26416_v35, 5  ;;  %v8429_v12 = vrot.slane %v26417_v21, 4  ;;  %v8419_v11 = vrot.slane %v26421_v36, 5  ;;  %v17669_v3 = vld [vmem:[%s25092_s1 + $0xe60] ss:$8 sps:$4 sm:$0xff]  }
 0x3bb   : > { %v22566_v10 = vcombine.low %v8310_v63, %v8204_v4  ;;  %v22568_v25 = vcombine.high %v8310_v63, %v8204_v4  ;;  %v8416_v29 = vrot.slane %v26420_v13, 4  ;;  %v17674_v36 = vld [vmem:[%s25092_s1 + $0xe54] ss:$8 sps:$4 sm:$0xff]   ;;  %v26425_v21 = vshrl.u32 %v21675_v38, 16 }
 0x3bc   : > { %v8430_v35 = vor.u32 %v8429_v12, %v8425_v52  ;;  %v26422_v12 = vshll.u32 %v21699_v30, 16 }
 0x3bd   : > { %26418 = vst [vmem:[#allocation11_spill] sm:$0xff] %v22566_v10  ;;  %26419 = vst [vmem:[#allocation10_spill] sm:$0xff] %v22568_v25  ;;  %10148 = vmatprep.mubr.bf16.mxu1 %v22568_v25  ;;  %v8420_v63 = vor.u32 %v8419_v11, %v8416_v29  ;;  %v26424_v29 = vld [vmem:[#allocation8_spill] sm:$0xff]  ;;  %v8435_v13 = vrot.slane %v26425_v21, 4  ;;  %v26426_v11 = vshll.u32 %v21675_v38, 16  ;;  %v26429_v38 = vld [vmem:[#allocation85_spill] sm:$0xff] }
 0x3be   : > { %v8431_v46 = vrot.slane %v8430_v35, 4  ;;  %v8444_v4 = vrot.slane %v26422_v12, 5  ;;  %v26428_v35 = vshrl.u32 %v21765_v59, 16  ;;  %v17680_v12 = vld [vmem:[%s25092_s1 + $0xe44] ss:$8 sps:$4 sm:$0xff]   ;;  %v26432_v59 = vshll.u32 %v21763_v42, 16 }
 0x3bf   : > { %11795 = vmatmul.mubr.bf16.vlgmr.msra.gmra.mxu0 %v21726_v17  ;;  %v26423_v17 = vshrl.u32 %v21699_v30, 16  ;;  %v17672_v30 = vld [vmem:[%s25092_s1 + $0xe50] ss:$8 sps:$4 sm:$0xff]  }
 0x3c0   : > { %11804 = vmatprep.mubr.bf16.mxu0 %v21813_v43  ;;  %12149 = vmatpush1.bf16.msra.mxu0 %v17663_v49  ;;  %v8438_v49 = vrot.slane %v26426_v11, 5  ;;  %v22601_v43 = vrot.slane %v26427_v62, 5  ;;  %v8467_v40 = vrot.slane %v26428_v35, 4  ;;  %v26431_v62 = vshrl.u32 %v21763_v42, 16 }
 0x3c1   : > { %12150 = vmatprep.subr.bf16.mxu0 %v17671_v51  ;;  %v8448_v37 = vrot.slane %v26423_v17, 4  ;;  %v8421_v51 = vrot.slane %v8420_v63, 4  ;;  %v8751_v63 = vsel %vm18622_vm14, %v8431_v46, %v26429_v38  ;;  %v17647_v46 = vld [vmem:[%s25092_s1 + $0xd64] ss:$8 sps:$4 sm:$0xff]   ;;  %v26434_v42 = vshll.u32 %v21832_v8, 16 }
 0x3c2   : > { %10149 = vmatmul.mubr.bf16.gmra.mxu1 %v22566_v10  ;;  %v8454_v11 = vrot.slane %v26431_v62, 4  ;;  %v8439_v35 = vor.u32 %v8438_v49, %v8435_v13  ;;  %v26435_v62 = vshrl.u32 %v21832_v8, 16  ;;  %v17678_v13 = vld [vmem:[%s25092_s1 + $0xe40] ss:$8 sps:$4 sm:$0xff]  }
 0x3c3   : > { %10384 = vmatprep.mubr.bf16.mxu1 %v26424_v29  ;;  %v8449_v21 = vor.u32 %v8448_v37, %v8444_v4  ;;  %v8426_v26 = vsel %vm19024_vm0, %v8421_v51, %v8425_v52  ;;  %v8468_v37 = vor.u32 %v8467_v40, %v22601_v43  ;;  %v22631_v38 = vrot.slane %v26434_v42, 5  ;;  %v17683_v52 = vld [vmem:[%s25092_s1 + $0xe34] ss:$8 sps:$4 sm:$0xff]   ;;  %v26436_v40 = vld [vmem:[#allocation12_spill] sm:$0xff] }
 0x3c4   : > { %12151 = vmatpush1.bf16.msra.mxu0 %v17669_v3  ;;  %v8457_v3 = vrot.slane %v26432_v59, 5  ;;  %v8486_v59 = vrot.slane %v26435_v62, 4  ;;  %v22638_v49 = vcombine.high %v8426_v26, %v8751_v63 }
 0x3c5   : > { %12152 = vmatprep.subr.bf16.mxu0 %v17674_v36  ;;  %v17642_v36 = vld [vmem:[%s25092_s1 + $0xd70] ss:$8 sps:$4 sm:$0xff]   ;;  %v8450_v51 = vrot.slane %v8449_v21, 4 }
 0x3c6   : > { %v8458_v42 = vor.u32 %v8457_v3, %v8454_v11  ;;  %v8440_v11 = vrot.slane %v8439_v35, 4  ;;  %v8487_v3 = vor.u32 %v8486_v59, %v22631_v38  ;;  %v26444_v35 = vld [vmem:[#allocation86_spill] sm:$0xff]  ;;  %v17689_v59 = vld [vmem:[%s25092_s1 + $0xe24] ss:$8 sps:$4 sm:$0xff]  }
 0x3c7   : > { %11805 = vmatmul.mubr.bf16.gmra.mxu0 %v21811_v16  ;;  %v26439_v16 = vshrl.u32 %v21885_v32, 16 }
 0x3c8   : > { %11814 = vmatprep.mubr.bf16.mxu0 %v21879_v5  ;;  %12153 = vmatpush1.bf16.msra.mxu0 %v17672_v30  ;;  %v26437_v5 = vshrl.u32 %v21817_v48, 16  ;;  %v26438_v30 = vshll.u32 %v21817_v48, 16  ;;  %v17650_v48 = vld [vmem:[%s25092_s1 + $0xd54] ss:$8 sps:$4 sm:$0xff]  }
 0x3c9   : > { %12154 = vmatprep.subr.bf16.mxu0 %v17680_v12  ;;  %v17645_v12 = vld [vmem:[%s25092_s1 + $0xd60] ss:$8 sps:$4 sm:$0xff]   ;;  %v8492_v57 = vrot.slane %v26439_v16, 4 }
 0x3ca   : > { %10385 = vmatmul.mubr.bf16.vlgmr.msra.gmra.mxu1 %v26436_v40  ;;  %v8473_v8 = vrot.slane %v26437_v5, 4  ;;  %v8476_v62 = vrot.slane %v26438_v30, 5  ;;  %v26440_v40 = vshll.u32 %v21885_v32, 16  ;;  %v8469_v5 = vrot.slane %v8468_v37, 4  ;;  %v17681_v32 = vld [vmem:[%s25092_s1 + $0xe30] ss:$8 sps:$4 sm:$0xff]  }
 0x3cb   : > { %10394 = vmatprep.mubr.bf16.mxu1 %v22638_v49  ;;  %11956 = vmatpush1.bf16.msra.mxu1 %v17642_v36  ;;  %v26441_v36 = vld [vmem:[#allocation102_spill] sm:$0xff]  ;;  %v8459_v37 = vrot.slane %v8458_v42, 4  ;;  %v26448_v42 = vld [vmem:[#allocation88_spill] sm:$0xff] }
 0x3cc   : > { %v8495_v21 = vrot.slane %v26440_v40, 5  ;;  %11957 = vmatprep.subr.bf16.mxu1 %v17647_v46  ;;  %12155 = vmatpush1.bf16.msra.mxu0 %v17678_v13  ;;  %v26442_v30 = vshll.u32 %v26441_v36, 16  ;;  %v26443_v1 = vshrl.u32 %v26441_v36, 16  ;;  %v8755_v46 = vsel %vm18622_vm14, %v8450_v51, %v26444_v35  ;;  %v26445_v13 = vld [vmem:[#allocation32_spill] sm:$0xff] }
 0x3cd   : > { %12156 = vmatprep.subr.bf16.mxu0 %v17683_v52  ;;  %v8477_v40 = vor.u32 %v8476_v62, %v8473_v8  ;;  %v26447_v52 = vld [vmem:[#allocation38_spill] sm:$0xff]  ;;  %v8445_v51 = vsel %vm19024_vm0, %v8440_v11, %v8444_v4  ;;  %v8759_v8 = vsel %vm18622_vm14, %v8469_v5, %v26448_v42  ;;  %v17653_v62 = vld [vmem:[%s25092_s1 + $0xd44] ss:$8 sps:$4 sm:$0xff]   ;;  %v17687_v4 = vld [vmem:[%s25092_s1 + $0xe20] ss:$8 sps:$4 sm:$0xff]  }
 0x3ce   : > { %v22662_v23 = vrot.slane %v26442_v30, 5  ;;  %v8505_v16 = vrot.slane %v26443_v1, 4  ;;  %v17648_v1 = vld [vmem:[%s25092_s1 + $0xd50] ss:$8 sps:$4 sm:$0xff]   ;;  %v8496_v36 = vor.u32 %v8495_v21, %v8492_v57  ;;  %v22679_v30 = vcombine.low %v8426_v26, %v8751_v63 }
 0x3cf   : > { %11815 = vmatmul.mubr.bf16.gmra.mxu0 %v26445_v13  ;;  %11958 = vmatpush1.bf16.msra.mxu1 %v17645_v12  ;;  %v8488_v12 = vrot.slane %v8487_v3, 4  ;;  %v22692_v26 = vcombine.high %v8445_v51, %v8755_v46  ;;  %v22700_v11 = vcombine.low %v8445_v51, %v8755_v46  ;;  %v8478_v5 = vrot.slane %v8477_v40, 4  ;;  %v17692_v3 = vld [vmem:[%s25092_s1 + $0xe14] ss:$8 sps:$4 sm:$0xff]   ;;  %v26452_v51 = vld [vmem:[#allocation40_spill] sm:$0xff] }
 0x3d0   : > { %26446 = vst [vmem:[#allocation66_spill] sm:$0xff] %v22679_v30  ;;  %11824 = vmatprep.mubr.bf16.mxu0 %v26447_v52  ;;  %11959 = vmatprep.subr.bf16.mxu1 %v17650_v48  ;;  %v8506_v63 = vor.u32 %v8505_v16, %v22662_v23  ;;  %v8464_v48 = vsel %vm19024_vm0, %v8459_v37, %v22601_v43  ;;  %v8497_v46 = vrot.slane %v8496_v36, 4  ;;  %v26453_v42 = vshrl.u32 %v26452_v51, 16  ;;  %v26455_v40 = vld [vmem:[#allocation91_spill] sm:$0xff]  ;;  %v26457_v36 = vld [vmem:[#allocation58_spill] sm:$0xff] }
 0x3d1   : > { %26449 = vst [vmem:[#allocation113_spill] sm:$0xff] %v22692_v26  ;;  %12157 = vmatpush1.bf16.msra.mxu0 %v17681_v32  ;;  %26450 = vst [vmem:[#allocation114_spill] sm:$0xff] %v22700_v11  ;;  %v22709_v16 = vcombine.low %v8464_v48, %v8759_v8  ;;  %v17651_v32 = vld [vmem:[%s25092_s1 + $0xd40] ss:$8 sps:$4 sm:$0xff]   ;;  %v26454_v43 = vshrl.u32 %v22257_v34, 16  ;;  %v26456_v57 = vshll.u32 %v26452_v51, 16 }
 0x3d2   : > { %10395 = vmatmul.mubr.bf16.gmra.mxu1 %v22679_v30  ;;  %12158 = vmatprep.subr.bf16.mxu0 %v17689_v59  ;;  %v22716_v21 = vrot.slane %v26453_v42, 4  ;;  %v8763_v59 = vsel %vm18622_vm14, %v8488_v12, %v26455_v40  ;;  %v26458_v52 = vshll.u32 %v26457_v36, 16  ;;  %v26459_v13 = vshll.u32 %v22257_v34, 16  ;;  %v17690_v12 = vld [vmem:[%s25092_s1 + $0xe10] ss:$8 sps:$4 sm:$0xff]  }
 0x3d3   : > { %10404 = vmatprep.mubr.bf16.mxu1 %v22692_v26  ;;  %26451 = vst [vmem:[#allocation59_spill] sm:$0xff] %v22709_v16  ;;  %11960 = vmatpush1.bf16.msra.mxu1 %v17648_v1  ;;  %v8606_v37 = vrot.slane %v26454_v43, 4  ;;  %v17656_v1 = vld [vmem:[%s25092_s1 + $0xd34] ss:$8 sps:$4 sm:$0xff]   ;;  %v22728_v35 = vrot.slane %v26456_v57, 5  ;;  %v26460_v14 = vshrl.u32 %v26457_v36, 16  ;;  %v22747_v26 = vcombine.high %v8464_v48, %v8759_v8 }
 0x3d4   : > { %11961 = vmatprep.subr.bf16.mxu1 %v17653_v62  ;;  %v22732_v42 = vrot.slane %v26458_v52, 5  ;;  %v8609_v43 = vrot.slane %v26459_v13, 5  ;;  %v8507_v62 = vrot.slane %v8506_v63, 4  ;;  %v26461_v57 = vshll.u32 %v22261_v39, 16  ;;  %v17698_v13 = vld [vmem:[%s25092_s1 + $0xe04] ss:$8 sps:$4 sm:$0xff]  }
 0x3d5   : > { %v22738_v53 = vrot.slane %v26460_v14, 4  ;;  %12159 = vmatpush1.bf16.msra.mxu0 %v17687_v4  ;;  %v26462_v40 = vshrl.u32 %v22261_v39, 16  ;;  %26463 = vst [vmem:[#allocation116_spill] sm:$0xff] %v22747_v26  ;;  %v8483_v34 = vsel %vm19024_vm0, %v8478_v5, %v22631_v38  ;;  %v26464_v63 = vshrl.u32 %v22322_v28, 16  ;;  %v26465_v36 = vld [vmem:[#allocation33_spill] sm:$0xff] }
 0x3d6   : > { %v8615_v51 = vrot.slane %v26461_v57, 5  ;;  %12160 = vmatprep.subr.bf16.mxu0 %v17692_v3  ;;  %v8610_v14 = vor.u32 %v8609_v43, %v8606_v37  ;;  %v22758_v57 = vcombine.low %v8483_v34, %v8763_v59  ;;  %v22760_v39 = vcombine.high %v8483_v34, %v8763_v59  ;;  %v17654_v38 = vld [vmem:[%s25092_s1 + $0xd30] ss:$8 sps:$4 sm:$0xff]   ;;  %v26469_v3 = vld [vmem:[#allocation105_spill] sm:$0xff] }
 0x3d7   : > { %v8619_v52 = vrot.slane %v26462_v40, 4  ;;  %v8625_v4 = vrot.slane %v26464_v63, 4  ;;  %11825 = vmatmul.mubr.bf16.gmra.mxu0 %v26465_v36  ;;  %11962 = vmatpush1.bf16.msra.mxu1 %v17651_v32  ;;  %v26468_v48 = vshll.u32 %v22322_v28, 16  ;;  %v22771_v37 = vsel %vm19024_vm0, %v8497_v46, %v22662_v23  ;;  %v17659_v32 = vld [vmem:[%s25092_s1 + $0xd24] ss:$8 sps:$4 sm:$0xff]  }
 0x3d8   : > { %26466 = vst [vmem:[#allocation61_spill] sm:$0xff] %v22758_v57  ;;  %26467 = vst [vmem:[#allocation13_spill] sm:$0xff] %v22760_v39  ;;  %11834 = vmatprep.mubr.bf16.mxu0 %v26469_v3  ;;  %11963 = vmatprep.subr.bf16.mxu1 %v17656_v1  ;;  %v8611_v43 = vrot.slane %v8610_v14, 4  ;;  %v26470_v40 = vshll.u32 %v22328_v18, 16  ;;  %v26472_v46 = vld [vmem:[#allocation153_spill] sm:$0xff]  ;;  %v26476_v59 = vshrl.u32 %v22385_v24, 16 }
 0x3d9   : > { %v8620_v8 = vor.u32 %v8619_v52, %v8615_v51  ;;  %v8628_v5 = vrot.slane %v26468_v48, 5  ;;  %v26471_v52 = vld [vmem:[#allocation94_spill] sm:$0xff]  ;;  %v26473_v34 = vshll.u32 %v26472_v46, 16  ;;  %v26474_v48 = vshrl.u32 %v26472_v46, 16  ;;  %12161 = vmatpush1.bf16.msra.mxu0 %v17690_v12  ;;  %v17696_v14 = vld [vmem:[%s25092_s1 + $0xe00] ss:$8 sps:$4 sm:$0xff]  }
 0x3da   : > { %v8634_v28 = vrot.slane %v26470_v40, 5  ;;  %v22783_v1 = vsel %vm18622_vm14, %v8507_v62, %v26471_v52  ;;  %10405 = vmatmul.mubr.bf16.gmra.mxu1 %v22700_v11  ;;  %v8616_v62 = vsel %vm19024_vm0, %v8611_v43, %v8615_v51  ;;  %12162 = vmatprep.subr.bf16.mxu0 %v17698_v13  ;;  %v17701_v52 = vld [vmem:[%s25092_s1 + $0xef4] ss:$8 sps:$4 sm:$0xff]   ;;  %v26475_v46 = vshrl.u32 %v22328_v18, 16  ;;  %v17657_v12 = vld [vmem:[%s25092_s1 + $0xd20] ss:$8 sps:$4 sm:$0xff]  }
 0x3db   : > { %v22789_v63 = vrot.slane %v26473_v34, 5  ;;  %v22793_v3 = vrot.slane %v26474_v48, 4  ;;  %v8621_v40 = vrot.slane %v8620_v8, 4  ;;  %v8629_v34 = vor.u32 %v8628_v5, %v8625_v4  ;;  %10414 = vmatprep.mubr.bf16.mxu1 %v22747_v26  ;;  %11964 = vmatpush1.bf16.msra.mxu1 %v17654_v38  ;;  %v17662_v38 = vld [vmem:[%s25092_s1 + $0xd14] ss:$8 sps:$4 sm:$0xff]  }
 0x3dc   : > { %v8638_v48 = vrot.slane %v26475_v46, 4  ;;  %v8644_v51 = vrot.slane %v26476_v59, 4  ;;  %v26477_v13 = vshll.u32 %v22385_v24, 16  ;;  %v26478_v43 = vshll.u32 %v22397_v44, 16  ;;  %11965 = vmatprep.subr.bf16.mxu1 %v17659_v32  ;;  %v26480_v5 = vld [vmem:[#allocation115_spill] sm:$0xff] }
 0x3dd   : > { %v26479_v4 = vshrl.u32 %v22397_v44, 16  ;;  %v8791_v46 = vsel %vm18622_vm14, %v8621_v40, %v26480_v5  ;;  %v8630_v36 = vrot.slane %v8629_v34, 4  ;;  %v26481_v24 = vshrl.u32 %v22491_v45, 16  ;;  %12163 = vmatpush1.bf16.msra.mxu0 %v17696_v14  ;;  %v17699_v44 = vld [vmem:[%s25092_s1 + $0xef0] ss:$8 sps:$4 sm:$0xff]   ;;  %v26485_v14 = vld [vmem:[#allocation152_spill] sm:$0xff] }
 0x3de   : > { %v8647_v8 = vrot.slane %v26477_v13, 5  ;;  %v8653_v23 = vrot.slane %v26478_v43, 5  ;;  %v8639_v59 = vor.u32 %v8638_v48, %v8634_v28  ;;  %v22826_v26 = vcombine.low %v8616_v62, %v8791_v46  ;;  %12164 = vmatprep.subr.bf16.mxu0 %v17701_v52  ;;  %v17707_v48 = vld [vmem:[%s25092_s1 + $0xee4] ss:$8 sps:$4 sm:$0xff]   ;;  %v17705_v30 = vld [vmem:[%s25092_s1 + $0xee0] ss:$8 sps:$4 sm:$0xff]  }
 0x3df   : > { %v8657_v18 = vrot.slane %v26479_v4, 4  ;;  %v8208_v13 = vrot.slane %v26481_v24, 7  ;;  %v22828_v43 = vcombine.high %v8616_v62, %v8791_v46  ;;  %v8635_v40 = vsel %vm19024_vm0, %v8630_v36, %v8634_v28  ;;  %11835 = vmatmul.mubr.bf16.gmra.mxu0 %v26485_v14  ;;  %11966 = vmatpush1.bf16.msra.mxu1 %v17657_v12  ;;  %v17668_v24 = vld [vmem:[%s25092_s1 + $0xd04] ss:$8 sps:$4 sm:$0xff]  }
 0x3e0   : > { %26482 = vst [vmem:[#allocation164_spill] sm:$0xff] %v22826_v26  ;;  %v8648_v32 = vor.u32 %v8647_v8, %v8644_v51  ;;  %v8640_v34 = vrot.slane %v8639_v59, 4  ;;  %v26484_v5 = vshll.u32 %v22491_v45, 16  ;;  %v17660_v51 = vld [vmem:[%s25092_s1 + $0xd10] ss:$8 sps:$4 sm:$0xff]   ;;  %v26486_v36 = vshrl.u32 %v22547_v7, 16  ;;  %11967 = vmatprep.subr.bf16.mxu1 %v17662_v38 }
 0x3e1   : > { %26483 = vst [vmem:[#allocation68_spill] sm:$0xff] %v22828_v43  ;;  %v8658_v4 = vor.u32 %v8657_v18, %v8653_v23  ;;  %v8212_v46 = vrot.slane %v8208_v13, 4  ;;  %v8217_v18 = vshll.u32 %v22547_v7, 16  ;;  %v26487_v59 = vld [vmem:[#allocation155_spill] sm:$0xff]  ;;  %v26491_v14 = vshll.u32 %v22449_v47, 16  ;;  %12165 = vmatpush2.bf16.msra.mxu0 %v17699_v44 }
 0x3e2   : > { %v8211_v62 = vor.u32 %v26484_v5, %v8208_v13  ;;  %v8649_v52 = vrot.slane %v8648_v32, 4  ;;  %v8216_v28 = vrot.slane %v26486_v36, 7  ;;  %11844 = vmatprep.mubr.bf16.mxu0 %v26487_v59  ;;  %v26488_v13 = vld [vmem:[#allocation122_spill] sm:$0xff]  ;;  %v26489_v5 = vld [vmem:[#allocation136_spill] sm:$0xff]  ;;  %10415 = vmatmul.mubr.bf16.gmra.mxu1 %v22709_v16 }
 0x3e3   : > { %v8659_v8 = vrot.slane %v8658_v4, 4  ;;  %v8795_v12 = vsel %vm18622_vm14, %v8640_v34, %v26488_v13  ;;  %v26490_v4 = vshrl.u32 %v22449_v47, 16  ;;  %v8666_v11 = vrot.slane %v26491_v14, 5  ;;  %12166 = vmatprep.subr.bf16.mxu0 %v17707_v48  ;;  %v17710_v47 = vld [vmem:[%s25092_s1 + $0xed4] ss:$8 sps:$4 sm:$0xff]   ;;  %10424 = vmatprep.mubr.bf16.mxu1 %v22760_v39 }
 0x3e4   : > { %v8314_v32 = vsel %vm18253_vm9, %v8211_v62, %v26489_v5  ;;  %v22861_v38 = vcombine.low %v8635_v40, %v8795_v12  ;;  %v22863_v59 = vcombine.high %v8635_v40, %v8795_v12  ;;  %v8654_v34 = vsel %vm19024_vm0, %v8649_v52, %v8653_v23  ;;  %11968 = vmatpush1.bf16.msra.mxu1 %v17660_v51  ;;  %v17666_v23 = vld [vmem:[%s25092_s1 + $0xd00] ss:$8 sps:$4 sm:$0xff]   ;;  %v17677_v51 = vld [vmem:[%s25092_s1 + $0xdf4] ss:$8 sps:$4 sm:$0xff]  }
 0x3e5   : > { %v8663_v36 = vrot.slane %v26490_v4, 4  ;;  %v8799_v62 = vsel %vm18622_vm14, %v8659_v8, %v26494_v20  ;;  %v8219_v14 = vor.u32 %v8217_v18, %v8216_v28  ;;  %v26497_v13 = vshll.u32 %v22451_v54, 16  ;;  %v22893_v20 = vpop.f32.mrf.mxu0  ;;  %11969 = vmatprep.subr.bf16.mxu1 %v17668_v24  ;;  %12167 = vmatpush2.bf16.msra.mxu0 %v17705_v30  ;;  %v17708_v24 = vld [vmem:[%s25092_s1 + $0xed0] ss:$8 sps:$4 sm:$0xff]  }
 0x3e6   : > { %26492 = vst [vmem:[#allocation69_spill] sm:$0xff] %v22861_v38  ;;  %26493 = vst [vmem:[#allocation118_spill] sm:$0xff] %v22863_v59  ;;  %v22877_v44 = vcombine.low %v8654_v34, %v8799_v62  ;;  %v22879_v40 = vcombine.high %v8654_v34, %v8799_v62  ;;  %v26498_v52 = vshrl.u32 %v22451_v54, 16  ;;  %v26499_v5 = vshrl.u32 %v22510_v58, 16  ;;  %12168 = vmatprep.subr.bf16.mxu0 %v17710_v47 }
 0x3e7   : > { %v8672_v12 = vrot.slane %v26497_v13, 5  ;;  %v8667_v48 = vor.u32 %v8666_v11, %v8663_v36  ;;  %v26500_v34 = vshll.u32 %v22510_v58, 16  ;;  %26501 = vst [vmem:[#allocation70_spill] sm:$0xff] %v22893_v20  ;;  %v8220_v62 = vsel %vm18241_vm8, %v8212_v46, %v8219_v14  ;;  %v26508_v20 = vld [vmem:[#allocation39_spill] sm:$0xff] }
 0x3e8   : > { %26495 = vst [vmem:[#allocation16_spill] sm:$0xff] %v22877_v44  ;;  %26496 = vst [vmem:[#allocation165_spill] sm:$0xff] %v22879_v40  ;;  %v8676_v8 = vrot.slane %v26498_v52, 4  ;;  %v8682_v4 = vrot.slane %v26499_v5, 4  ;;  %v26502_v11 = vshll.u32 %v22512_v15, 16  ;;  %v26503_v36 = vshrl.u32 %v22512_v15, 16  ;;  %11845 = vmatmul.mubr.bf16.gmra.mxu0 %v26508_v20  ;;  %11970 = vmatpush1.bf16.msra.mxu1 %v17666_v23  ;;  %v22933_v23 = vpop.f32.mrf.mxu0 }
 0x3e9   : > { %v8685_v28 = vrot.slane %v26500_v34, 5  ;;  %v26504_v52 = vshrl.u32 %v22491_v45, 16  ;;  %v22909_v5 = vcombine.low %v8314_v32, %v8220_v62  ;;  %v22911_v34 = vcombine.high %v8314_v32, %v8220_v62  ;;  %v17716_v15 = vld [vmem:[%s25092_s1 + $0xec4] ss:$8 sps:$4 sm:$0xff]   ;;  %v17675_v32 = vld [vmem:[%s25092_s1 + $0xdf0] ss:$8 sps:$4 sm:$0xff]   ;;  %11971 = vmatprep.subr.bf16.mxu1 %v17677_v51  ;;  %12169 = vmatpush2.bf16.msra.mxu0 %v17708_v24 }
 0x3ea   : > { %v8691_v54 = vrot.slane %v26502_v11, 5  ;;  %v8695_v13 = vrot.slane %v26503_v36, 4  ;;  %v8668_v9 = vrot.slane %v8667_v48, 4  ;;  %v8677_v46 = vor.u32 %v8676_v8, %v8672_v12  ;;  %26514 = vst [vmem:[#allocation166_spill] sm:$0xff] %v22933_v23  ;;  %10425 = vmatmul.mubr.bf16.gmra.mxu1 %v22758_v57  ;;  %12170 = vmatprep.subr.bf16.mxu0 %v17716_v15 }
 0x3eb   : > { %v8701_v58 = vrot.slane %v26504_v52, 4  ;;  %26505 = vst [vmem:[#allocation71_spill] sm:$0xff] %v22909_v5  ;;  %26506 = vst [vmem:[#allocation120_spill] sm:$0xff] %v22911_v34  ;;  %v8686_v14 = vor.u32 %v8685_v28, %v8682_v4  ;;  %v26507_v36 = vshll.u32 %v22491_v45, 16  ;;  %v8710_v52 = vrot.slane %v8217_v18, 5  ;;  %v26513_v18 = vld [vmem:[#allocation156_spill] sm:$0xff] }
 0x3ec   : > { %v8696_v11 = vor.u32 %v8695_v13, %v8691_v54  ;;  %v8673_v47 = vsel %vm19024_vm0, %v8668_v9, %v8672_v12  ;;  %v8678_v48 = vrot.slane %v8677_v46, 4  ;;  %v26509_v8 = vshrl.u32 %v22547_v7, 16  ;;  %11854 = vmatprep.mubr.bf16.mxu0 %v26513_v18  ;;  %v17686_v13 = vld [vmem:[%s25092_s1 + $0xde4] ss:$8 sps:$4 sm:$0xff]   ;;  %11972 = vmatpush2.bf16.msra.mxu1 %v17675_v32  ;;  %v17695_v32 = vld [vmem:[%s25092_s1 + $0xdd4] ss:$8 sps:$4 sm:$0xff]  }
 0x3ed   : > { %v8704_v30 = vrot.slane %v26507_v36, 5  ;;  %v26510_v4 = vmax.f32 %v22462_v22, 0.0  ;;  %v26511_v45 = vmax.f32 %v22517_v41, 0.0  ;;  %v8687_v12 = vrot.slane %v8686_v14, 4  ;;  %v17714_v14 = vld [vmem:[%s25092_s1 + $0xec0] ss:$8 sps:$4 sm:$0xff]   ;;  %11973 = vmatprep.subr.bf16.mxu1 %v17686_v13 }
 0x3ee   : > { %v8714_v62 = vrot.slane %v26509_v8, 4  ;;  %v8697_v9 = vrot.slane %v8696_v11, 4  ;;  %v26515_v7 = vmax.f32 %v22457_v2, 0.0  ;;  %v26516_v22 = vmax.f32 %v22500_v56, 0.0  ;;  %v17719_v11 = vld [vmem:[%s25092_s1 + $0xeb4] ss:$8 sps:$4 sm:$0xff]   ;;  %12171 = vmatpush2.bf16.msra.mxu0 %v17714_v14 }
 0x3ef   : > { %v22930_v28 = vpack.c.bf16 %v26511_v45, %v26510_v4  ;;  %v8705_v46 = vor.u32 %v8704_v30, %v8701_v58  ;;  %v22946_v41 = vcombine.high %v22771_v37, %v22783_v1  ;;  %v26519_v51 = vor.u32 %v22738_v53, %v22732_v42  ;;  %v26520_v58 = vld [vmem:[#allocation131_spill] sm:$0xff]  ;;  %12172 = vmatprep.subr.bf16.mxu0 %v17719_v11 }
 0x3f0   : > { %v22942_v36 = vpack.c.bf16 %v26516_v22, %v26515_v7  ;;  %v8803_v2 = vsel %vm18622_vm14, %v8678_v48, %v26520_v58  ;;  %v8715_v56 = vor.u32 %v8714_v62, %v8710_v52  ;;  %v8692_v24 = vsel %vm19024_vm0, %v8687_v12, %v8691_v54  ;;  %v26523_v45 = vld [vmem:[#allocation35_spill] sm:$0xff]  ;;  %v17684_v22 = vld [vmem:[%s25092_s1 + $0xde0] ss:$8 sps:$4 sm:$0xff]  }
 0x3f1   : > { %26512 = vst [vmem:[#allocation21_spill] sm:$0xff] %v22930_v28  ;;  %26518 = vst [vmem:[#allocation167_spill] sm:$0xff] %v22946_v41  ;;  %v8526_v8 = vrot.slane %v26519_v51, 4  ;;  %v22961_v30 = vcombine.low %v8673_v47, %v8803_v2  ;;  %v22963_v53 = vcombine.high %v8673_v47, %v8803_v2  ;;  %v8706_v4 = vrot.slane %v8705_v46, 4  ;;  %10434 = vmatprep.mubr.bf16.mxu1 %v22946_v41  ;;  %v26526_v51 = vld [vmem:[#allocation135_spill] sm:$0xff]  ;;  %v22981_v46 = vpop.f32.mrf.mxu0  ;;  %v26555_v28 = vld [vmem:[#allocation44_spill] sm:$0xff] }
 0x3f2   : > { %26517 = vst [vmem:[#allocation121_spill] sm:$0xff] %v22942_v36  ;;  %v26524_v48 = vshrl.u32 %v26523_v45, 16  ;;  %v26525_v7 = vshll.u32 %v26523_v45, 16  ;;  %v8807_v47 = vsel %vm18622_vm14, %v8697_v9, %v26526_v51  ;;  %v8716_v58 = vrot.slane %v8715_v56, 4  ;;  %26528 = vst [vmem:[#allocation26_spill] sm:$0xff] %v22981_v46  ;;  %v26532_v9 = vld [vmem:[#allocation97_spill] sm:$0xff]  ;;  %11974 = vmatpush2.bf16.msra.mxu1 %v17684_v22 }
 0x3f3   : > { %26521 = vst [vmem:[#allocation123_spill] sm:$0xff] %v22961_v30  ;;  %26522 = vst [vmem:[#allocation130_spill] sm:$0xff] %v22963_v53  ;;  %v26527_v54 = vor.u32 %v22728_v35, %v22716_v21  ;;  %v22986_v2 = vcombine.low %v8692_v24, %v8807_v47  ;;  %v22988_v45 = vcombine.high %v8692_v24, %v8807_v47  ;;  %v17717_v35 = vld [vmem:[%s25092_s1 + $0xeb0] ss:$8 sps:$4 sm:$0xff]   ;;  %v26531_v21 = vld [vmem:[#allocation132_spill] sm:$0xff]  ;;  %11975 = vmatprep.subr.bf16.mxu1 %v17695_v32 }
 0x3f4   : > { %v8530_v62 = vrot.slane %v26524_v48, 4  ;;  %v8533_v15 = vrot.slane %v26525_v7, 5  ;;  %v8711_v48 = vsel %vm19024_vm0, %v8706_v4, %v8710_v52  ;;  %v8811_v13 = vsel %vm18622_vm14, %v8716_v58, %v26531_v21  ;;  %v17725_v52 = vld [vmem:[%s25092_s1 + $0xea4] ss:$8 sps:$4 sm:$0xff]   ;;  %v17693_v51 = vld [vmem:[%s25092_s1 + $0xdd0] ss:$8 sps:$4 sm:$0xff]   ;;  %v23022_v58 = vpop.f32.mrf.mxu1  ;;  %12173 = vmatpush2.bf16.msra.mxu0 %v17717_v35 }
 0x3f5   : > { %v8516_v12 = vrot.slane %v26527_v54, 4  ;;  %26529 = vst [vmem:[#allocation133_spill] sm:$0xff] %v22986_v2  ;;  %26530 = vst [vmem:[#allocation73_spill] sm:$0xff] %v22988_v45  ;;  %v8771_v56 = vsel %vm18622_vm14, %v8526_v8, %v26532_v9  ;;  %v8544_v24 = vor.u32 %v22793_v3, %v22789_v63  ;;  %v23006_v14 = vcombine.low %v8711_v48, %v8811_v13  ;;  %v26535_v7 = vld [vmem:[#allocation108_spill] sm:$0xff]  ;;  %v23024_v54 = vpop.f32.mrf.mxu0  ;;  %v17728_v21 = vld [vmem:[%s25092_s1 + $0xe94] ss:$8 sps:$4 sm:$0xff]  }
 0x3f6   : > { %v23008_v4 = vcombine.high %v8711_v48, %v8811_v13  ;;  %11855 = vmatmul.mubr.bf16.gmra.mxu0 %v26535_v7  ;;  %v23016_v8 = vcombine.low %v22771_v37, %v22783_v1  ;;  %v26537_v3 = vld [vmem:[#allocation60_spill] sm:$0xff]  ;;  %v8534_v47 = vor.u32 %v8533_v15, %v8530_v62  ;;  %26538 = vst [vmem:[#allocation171_spill] sm:$0xff] %v23024_v54  ;;  %v26540_v1 = vld [vmem:[#allocation107_spill] sm:$0xff]  ;;  %v26559_v46 = vld [vmem:[#allocation158_spill] sm:$0xff] }
 0x3f7   : > { %26533 = vst [vmem:[#allocation134_spill] sm:$0xff] %v23006_v14  ;;  %11864 = vmatprep.mubr.bf16.mxu0 %v26537_v3  ;;  %v8521_v11 = vsel %vm19024_vm0, %v8516_v12, %v22732_v42  ;;  %v17704_v22 = vld [vmem:[%s25092_s1 + $0xdc4] ss:$8 sps:$4 sm:$0xff]   ;;  %v17723_v37 = vld [vmem:[%s25092_s1 + $0xea0] ss:$8 sps:$4 sm:$0xff]   ;;  %v8545_v42 = vrot.slane %v8544_v24, 4  ;;  %12174 = vmatprep.subr.bf16.mxu0 %v17725_v52  ;;  %v10203_v52 = vpop.f32.mrf.mxu0 }
 0x3f8   : > { %26534 = vst [vmem:[#allocation169_spill] sm:$0xff] %v23008_v4  ;;  %26536 = vst [vmem:[#allocation168_spill] sm:$0xff] %v23016_v8  ;;  %v23029_v48 = vcombine.high %v8521_v11, %v8771_v56  ;;  %10435 = vmatmul.mubr.bf16.gmra.mxu1 %v23016_v8  ;;  %v26541_v62 = vshll.u32 %v26540_v1, 16  ;;  %v26542_v12 = vshrl.u32 %v26540_v1, 16  ;;  %v17702_v35 = vld [vmem:[%s25092_s1 + $0xdc0] ss:$8 sps:$4 sm:$0xff]   ;;  %12175 = vmatpush2.bf16.msra.mxu0 %v17723_v37 }
 0x3f9   : > { %11976 = vmatpush2.bf16.msra.mxu1 %v17693_v51  ;;  %v8535_v13 = vrot.slane %v8534_v47, 4  ;;  %v26543_v9 = vld [vmem:[#allocation159_spill] sm:$0xff]  ;;  %v26546_v47 = vld [vmem:[#allocation100_spill] sm:$0xff]  ;;  %12176 = vmatprep.subr.bf16.mxu0 %v17728_v21  ;;  %v23068_v18 = vcombine.low %v8521_v11, %v8771_v56 }
 0x3fa   : > { %26539 = vst [vmem:[#allocation137_spill] sm:$0xff] %v23029_v48  ;;  %v8558_v15 = vrot.slane %v26541_v62, 5  ;;  %v8562_v32 = vrot.slane %v26542_v12, 4  ;;  %10444 = vmatprep.mubr.bf16.mxu1 %v23029_v48  ;;  %v26544_v24 = vshrl.u32 %v26543_v9, 16  ;;  %v26545_v62 = vshll.u32 %v26543_v9, 16  ;;  %v23050_v12 = vpop.f32.mrf.mxu1  ;;  %11977 = vmatprep.subr.bf16.mxu1 %v17704_v22  ;;  %v10205_v9 = vpop.f32.mrf.mxu0 }
 0x3fb   : > { %v17713_v3 = vld [vmem:[%s25092_s1 + $0xdb4] ss:$8 sps:$4 sm:$0xff]   ;;  %v17726_v51 = vld [vmem:[%s25092_s1 + $0xe90] ss:$8 sps:$4 sm:$0xff]   ;;  %v17734_v22 = vld [vmem:[%s25092_s1 + $0xe84] ss:$8 sps:$4 sm:$0xff]  }
 0x3fc   : > { %v8549_v54 = vrot.slane %v26544_v24, 4  ;;  %v8552_v1 = vrot.slane %v26545_v62, 5  ;;  %v8775_v24 = vsel %vm18622_vm14, %v8545_v42, %v26546_v47  ;;  %v8563_v7 = vor.u32 %v8562_v32, %v8558_v15  ;;  %v26547_v62 = vld [vmem:[#allocation182_spill] sm:$0xff]  ;;  %26548 = vst [vmem:[#allocation138_spill] sm:$0xff] %v23068_v18  ;;  %v23074_v21 = vpop.f32.mrf.mxu1  ;;  %v10207_v47 = vpop.f32.mrf.mxu0  ;;  %12177 = vmatpush2.bf16.msra.mxu0 %v17726_v51  ;;  %v17732_v56 = vld [vmem:[%s25092_s1 + $0xe80] ss:$8 sps:$4 sm:$0xff]  }
 0x3fd   : > { %11978 = vmatpush2.bf16.msra.mxu1 %v17702_v35  ;;  %v17711_v37 = vld [vmem:[%s25092_s1 + $0xdb0] ss:$8 sps:$4 sm:$0xff]   ;;  %v8540_v42 = vsel %vm19024_vm0, %v8535_v13, %v22789_v63  ;;  %26549 = vst [vmem:[#allocation140_spill] sm:$0xff] %v23074_v21  ;;  %v17722_v35 = vld [vmem:[%s25092_s1 + $0xda4] ss:$8 sps:$4 sm:$0xff]   ;;  %12178 = vmatprep.subr.bf16.mxu0 %v17734_v22 }
 0x3fe   : > { %11865 = vmatmul.mubr.bf16.gmra.mxu0 %v26547_v62  ;;  %v8553_v32 = vor.u32 %v8552_v1, %v8549_v54  ;;  %11979 = vmatprep.subr.bf16.mxu1 %v17713_v3  ;;  %v23079_v62 = vcombine.high %v8540_v42, %v8775_v24  ;;  %v8564_v11 = vrot.slane %v8563_v7, 4  ;;  %v26551_v63 = vld [vmem:[#allocation48_spill] sm:$0xff]  ;;  %v23093_v36 = vpop.f32.mrf.mxu1  ;;  %v26556_v7 = vshrl.u32 %v26555_v28, 16  ;;  %v17731_v22 = vld [vmem:[%s25092_s1 + $0xd94] ss:$8 sps:$4 sm:$0xff]  }
 0x3ff   : > { %11874 = vmatprep.mubr.bf16.mxu0 %v22241_v0  ;;  %v26552_v54 = vshll.u32 %v26551_v63, 16  ;;  %v26553_v1 = vshrl.u32 %v26551_v63, 16  ;;  %v10209_v0 = vpop.f32.mrf.mxu0  ;;  %v17720_v51 = vld [vmem:[%s25092_s1 + $0xda0] ss:$8 sps:$4 sm:$0xff]   ;;  %26554 = vst [vmem:[#allocation75_spill] sm:$0xff] %v23093_v36 }
 0x400   : > { %26550 = vst [vmem:[#allocation31_spill] sm:$0xff] %v23079_v62  ;;  %10445 = vmatmul.mubr.bf16.gmra.mxu1 %v23068_v18  ;;  %v8554_v20 = vrot.slane %v8553_v32, 4  ;;  %v8568_v14 = vrot.slane %v26556_v7, 4  ;;  %12179 = vmatpush2.bf16.msra.mxu0 %v17732_v56  ;;  %v10010_v32 = vpop.f32.mrf.mxu1  ;;  %v26562_v7 = vld [vmem:[#allocation55_spill] sm:$0xff] }
 0x401   : > { %v8577_v13 = vrot.slane %v26552_v54, 5  ;;  %v8581_v3 = vrot.slane %v26553_v1, 4  ;;  %10454 = vmatprep.mubr.bf16.mxu1 %v23079_v62  ;;  %11980 = vmatpush2.bf16.msra.mxu1 %v17711_v37  ;;  %v26557_v54 = vshll.u32 %v26555_v28, 16  ;;  %v26558_v37 = vld [vmem:[#allocation103_spill] sm:$0xff]  ;;  %v10213_v36 = vpop.f32.mrf.mxu0  ;;  %v23106_v21 = vadd.f32 %v10203_v52, %v10010_v32  ;;  %v17737_v52 = vld [vmem:[%s25092_s1 + $0xd84] ss:$8 sps:$4 sm:$0xff]  }
 0x402   : > { %11981 = vmatprep.subr.bf16.mxu1 %v17722_v35  ;;  %v8779_v63 = vsel %vm18622_vm14, %v8564_v11, %v26558_v37  ;;  %v17729_v28 = vld [vmem:[%s25092_s1 + $0xd90] ss:$8 sps:$4 sm:$0xff]   ;;  %v23111_v35 = vcombine.low %v8540_v42, %v8775_v24  ;;  %v8559_v56 = vsel %vm19024_vm0, %v8554_v20, %v8558_v15  ;;  %v17761_v24 = vld [vmem:[%s25092_s1 + $0x1074] ss:$8 sps:$4 sm:$0xff]   ;;  %v26565_v20 = vld [vmem:[#allocation157_spill] sm:$0xff] }
 0x403   : > { %v8571_v4 = vrot.slane %v26557_v54, 5  ;;  %v8582_v1 = vor.u32 %v8581_v3, %v8577_v13  ;;  %26560 = vst [vmem:[#allocation170_spill] sm:$0xff] %v23106_v21  ;;  %v10012_v3 = vpop.f32.mrf.mxu1  ;;  %v23119_v54 = vcombine.high %v8559_v56, %v8779_v63  ;;  %v26567_v15 = vshrl.u32 %v26565_v20, 16  ;;  %13879 = vmatprep.subr.bf16.mxu0 %v17761_v24 }
 0x404   : > { %26561 = vst [vmem:[#allocation172_spill] sm:$0xff] %v23111_v35  ;;  %v23121_v37 = vadd.f32 %v10205_v9, %v10012_v3  ;;  %v17735_v9 = vld [vmem:[%s25092_s1 + $0xd80] ss:$8 sps:$4 sm:$0xff]  }
 0x405   : > { %11982 = vmatpush2.bf16.msra.mxu1 %v17720_v51  ;;  %v8572_v11 = vor.u32 %v8571_v4, %v8568_v14  ;;  %26563 = vst [vmem:[#allocation76_spill] sm:$0xff] %v23119_v54  ;;  %v10215_v51 = vpop.f32.mrf.mxu0  ;;  %v8583_v42 = vrot.slane %v8582_v1, 4  ;;  %v26566_v14 = vshll.u32 %v26565_v20, 16  ;;  %v10014_v32 = vpop.f32.mrf.mxu1 }
 0x406   : > { %11875 = vmatmul.mubr.bf16.gmra.mxu0 %v26559_v46  ;;  %11983 = vmatprep.subr.bf16.mxu1 %v17731_v22  ;;  %26564 = vst [vmem:[#allocation127_spill] sm:$0xff] %v23121_v37  ;;  %v8600_v22 = vrot.slane %v26567_v15, 4  ;;  %v23132_v46 = vadd.f32 %v10207_v47, %v10014_v32  ;;  %v26569_v37 = vld [vmem:[#allocation110_spill] sm:$0xff] }
 0x407   : > { %11884 = vmatprep.mubr.bf16.mxu0 %v26562_v7  ;;  %v8596_v4 = vrot.slane %v26566_v14, 5  ;;  %v10217_v7 = vpop.f32.mrf.mxu0  ;;  %v8573_v3 = vrot.slane %v8572_v11, 4  ;;  %v26570_v1 = vshrl.u32 %v26569_v37, 16  ;;  %v26571_v14 = vshll.u32 %v26569_v37, 16  ;;  %v10016_v20 = vpop.f32.mrf.mxu1  ;;  %v17740_v15 = vld [vmem:[%s25092_s1 + $0xf74] ss:$8 sps:$4 sm:$0xff]  }
 0x408   : > { %10455 = vmatmul.mubr.bf16.gmra.mxu1 %v23111_v35  ;;  %26568 = vst [vmem:[#allocation37_spill] sm:$0xff] %v23132_v46  ;;  %v26572_v32 = vld [vmem:[#allocation106_spill] sm:$0xff]  ;;  %v23150_v37 = vcombine.low %v8559_v56, %v8779_v63 }
 0x409   : > { %10464 = vmatprep.mubr.bf16.mxu1 %v23119_v54  ;;  %11984 = vmatpush2.bf16.msra.mxu1 %v17729_v28  ;;  %v8587_v21 = vrot.slane %v26570_v1, 4  ;;  %v8590_v23 = vrot.slane %v26571_v14, 5  ;;  %v10219_v47 = vpop.f32.mrf.mxu0  ;;  %v23144_v28 = vadd.f32 %v10209_v0, %v10016_v20  ;;  %v8783_v11 = vsel %vm18622_vm14, %v8583_v42, %v26572_v32 }
 0x40a   : > { %11985 = vmatprep.subr.bf16.mxu1 %v17737_v52  ;;  %v8601_v46 = vor.u32 %v8600_v22, %v8596_v4  ;;  %26573 = vst [vmem:[#allocation174_spill] sm:$0xff] %v23150_v37  ;;  %v8578_v52 = vsel %vm19024_vm0, %v8573_v3, %v8577_v13  ;;  %v10020_v22 = vpop.f32.mrf.mxu1 }
 0x40b   : > { %v10223_v1 = vpop.f32.mrf.mxu0  ;;  %v8591_v24 = vor.u32 %v8590_v23, %v8587_v21  ;;  %v23155_v0 = vcombine.high %v8578_v52, %v8783_v11  ;;  %v23159_v63 = vadd.f32 %v10213_v36, %v10020_v22  ;;  %v23167_v3 = vcombine.low %v8578_v52, %v8783_v11 }
 0x40c   : > { %v8602_v42 = vrot.slane %v8601_v46, 4  ;;  %v10022_v56 = vpop.f32.mrf.mxu1 }
 0x40d   : > { %11986 = vmatpush2.bf16.msra.mxu1 %v17735_v9  ;;  %26574 = vst [vmem:[#allocation93_spill] sm:$0xff] %v23155_v0  ;;  %v10225_v14 = vpop.f32.mrf.mxu0  ;;  %v8592_v9 = vrot.slane %v8591_v24, 4  ;;  %v23164_v21 = vadd.f32 %v10215_v51, %v10022_v56  ;;  %26576 = vst [vmem:[#allocation142_spill] sm:$0xff] %v23167_v3 }
 0x40e   : > { %11885 = vmatmul.mubr.bf16.gmra.mxu0 %v22284_v31  ;;  %13686 = vmatprep.subr.bf16.mxu1 %v17740_v15  ;;  %v10024_v13 = vpop.f32.mrf.mxu1 }
 0x40f   : > { %11894 = vmatprep.mubr.bf16.mxu0 %v22366_v19  ;;  %v10227_v20 = vpop.f32.mrf.mxu0  ;;  %v26575_v19 = vld [vmem:[#allocation109_spill] sm:$0xff]  ;;  %v8597_v46 = vsel %vm19024_vm0, %v8592_v9, %v8596_v4  ;;  %v23172_v36 = vadd.f32 %v10217_v7, %v10024_v13 }
 0x410   : > { %10465 = vmatmul.mubr.bf16.gmra.mxu1 %v23150_v37  ;;  %v8787_v23 = vsel %vm18622_vm14, %v8602_v42, %v26575_v19  ;;  %v10026_v22 = vpop.f32.mrf.mxu1 }
 0x411   : > { %10474 = vmatprep.mubr.bf16.mxu1 %v23155_v0  ;;  %v10229_v32 = vpop.f32.mrf.mxu0  ;;  %v23174_v24 = vcombine.high %v8597_v46, %v8787_v23  ;;  %v23177_v19 = vadd.f32 %v10219_v47, %v10026_v22  ;;  %v23183_v7 = vcombine.low %v8597_v46, %v8787_v23 }
 0x412   : > { %v10030_v11 = vpop.f32.mrf.mxu1 }
 0x413   : > { %v10233_v15 = vpop.f32.mrf.mxu0  ;;  %26577 = vst [vmem:[#allocation78_spill] sm:$0xff] %v23174_v24  ;;  %v23181_v29 = vadd.f32 %v10223_v1, %v10030_v11  ;;  %26578 = vst [vmem:[#allocation173_spill] sm:$0xff] %v23183_v7 }
 0x414   : > { %v10032_v4 = vpop.f32.mrf.mxu1 }
 0x415   : > { %v10235_v17 = vpop.f32.mrf.mxu0  ;;  %v23186_v42 = vadd.f32 %v10225_v14, %v10032_v4 }
 0x416   : > { %11895 = vmatmul.mubr.bf16.gmra.mxu0 %v22364_v33  ;;  %v10034_v47 = vpop.f32.mrf.mxu1 }
 0x417   : > { %11904 = vmatprep.mubr.bf16.mxu0 %v22415_v61  ;;  %v10237_v51 = vpop.f32.mrf.mxu0  ;;  %v23190_v56 = vadd.f32 %v10227_v20, %v10034_v47 }
 0x418   : > { %10475 = vmatmul.mubr.bf16.gmra.mxu1 %v23167_v3  ;;  %v10036_v13 = vpop.f32.mrf.mxu1 }
 0x419   : > { %10484 = vmatprep.mubr.bf16.mxu1 %v23174_v24  ;;  %v10239_v52 = vpop.f32.mrf.mxu0 }
 0x41b   : > { %v10243_v9 = vpop.f32.mrf.mxu0 }
 0x41c   : > { %v10040_v23 = vpop.f32.mrf.mxu1 }
 0x41d   : > { %v10245_v22 = vpop.f32.mrf.mxu0  ;;  %v23196_v46 = vadd.f32 %v10233_v15, %v10040_v23 }
 0x41e   : > { %11905 = vmatmul.mubr.bf16.gmra.mxu0 %v22413_v55  ;;  %v23192_v55 = vadd.f32 %v10229_v32, %v10036_v13  ;;  %v10042_v11 = vpop.f32.mrf.mxu1 }
 0x41f   : > { %11914 = vmatprep.mubr.bf16.mxu0 %v22495_v27  ;;  %v10247_v1 = vpop.f32.mrf.mxu0  ;;  %v23200_v20 = vadd.f32 %v10235_v17, %v10042_v11 }
 0x420   : > { %10485 = vmatmul.mubr.bf16.gmra.mxu1 %v23183_v7  ;;  %v10044_v4 = vpop.f32.mrf.mxu1 }
 0x421   : > { %10494 = vmatprep.mubr.bf16.mxu1 %v22828_v43  ;;  %v10249_v14 = vpop.f32.mrf.mxu0  ;;  %v23202_v32 = vadd.f32 %v10237_v51, %v10044_v4 }
 0x422   : > { %v10046_v13 = vpop.f32.mrf.mxu1 }
 0x423   : > { %v10253_v47 = vpop.f32.mrf.mxu0 }
 0x425   : > { %v10255_v27 = vpop.f32.mrf.mxu0  ;;  %v10050_v23 = vpop.f32.mrf.mxu1 }
 0x426   : > { %11915 = vmatmul.mubr.bf16.gmra.mxu0 %v22493_v60  ;;  %v23209_v60 = vadd.f32 %v10243_v9, %v10050_v23 }
 0x427   : > { %11924 = vmatprep.mubr.bf16.mxu0 %v22537_v50  ;;  %v23205_v50 = vadd.f32 %v10239_v52, %v10046_v13  ;;  %v10257_v15 = vpop.f32.mrf.mxu0  ;;  %v10052_v11 = vpop.f32.mrf.mxu1 }
 0x428   : > { %10495 = vmatmul.mubr.bf16.gmra.mxu1 %v22826_v26  ;;  %v23212_v51 = vadd.f32 %v10245_v22, %v10052_v11 }
 0x429   : > { %10504 = vmatprep.mubr.bf16.mxu1 %v22863_v59  ;;  %v10259_v17 = vpop.f32.mrf.mxu0  ;;  %v10054_v61 = vpop.f32.mrf.mxu1 }
 0x42a   : > { %v23214_v33 = vadd.f32 %v10247_v1, %v10054_v61 }
 0x42b   : > { %v10263_v4 = vpop.f32.mrf.mxu0  ;;  %v10056_v13 = vpop.f32.mrf.mxu1 }
 0x42d   : > { %v10265_v52 = vpop.f32.mrf.mxu0  ;;  %v10060_v23 = vpop.f32.mrf.mxu1 }
 0x42e   : > { %11925 = vmatmul.mubr.bf16.gmra.mxu0 %v22535_v6  ;;  %v23221_v6 = vadd.f32 %v10253_v47, %v10060_v23 }
 0x42f   : > { %11934 = vmatprep.mubr.bf16.mxu0 %v22568_v25  ;;  %v23218_v25 = vadd.f32 %v10249_v14, %v10056_v13  ;;  %v10267_v9 = vpop.f32.mrf.mxu0  ;;  %v10062_v22 = vpop.f32.mrf.mxu1 }
 0x430   : > { %10505 = vmatmul.mubr.bf16.gmra.mxu1 %v22861_v38  ;;  %26579 = vst [vmem:[#allocation80_spill] sm:$0xff] %v23221_v6  ;;  %v23224_v61 = vadd.f32 %v10255_v27, %v10062_v22 }
 0x431   : > { %10514 = vmatprep.mubr.bf16.mxu1 %v22879_v40  ;;  %v10269_v11 = vpop.f32.mrf.mxu0  ;;  %v10064_v1 = vpop.f32.mrf.mxu1 }
 0x432   : > { %26580 = vst [vmem:[#allocation18_spill] sm:$0xff] %v23224_v61  ;;  %v23226_v31 = vadd.f32 %v10257_v15, %v10064_v1  ;;  %v17759_v15 = vld [vmem:[%s25092_s1 + $0x1070] ss:$8 sps:$4 sm:$0xff]   ;;  %v26594_v61 = vld [vmem:[#allocation28_spill] sm:$0xff] }
 0x433   : > { %v10273_v14 = vpop.f32.mrf.mxu0 }
 0x434   : > { %26581 = vst [vmem:[#allocation128_spill] sm:$0xff] %v23226_v31 }
 0x436   : > { %11935 = vmatmul.mubr.bf16.gmra.mxu0 %v22566_v10  ;;  %v10275_v10 = vpop.f32.mrf.mxu0 }
 0x437   : > { %11944 = vmatprep.mubr.bf16.mxu0 %v22911_v34  ;;  %v10066_v34 = vpop.f32.mrf.mxu1 }
 0x438   : > { %10515 = vmatmul.mubr.bf16.gmra.mxu1 %v22877_v44  ;;  %v23230_v13 = vadd.f32 %v10259_v17, %v10066_v34  ;;  %v10277_v27 = vpop.f32.mrf.mxu0  ;;  %v26585_v17 = vld [vmem:[#allocation66_spill] sm:$0xff] }
 0x439   : > { %10524 = vmatprep.mubr.bf16.mxu1 %v22963_v53  ;;  %v10070_v47 = vpop.f32.mrf.mxu1 }
 0x43a   : > { %26582 = vst [vmem:[#allocation22_spill] sm:$0xff] %v23230_v13  ;;  %v23234_v23 = vadd.f32 %v10263_v4, %v10070_v47  ;;  %v26587_v4 = vld [vmem:[#allocation113_spill] sm:$0xff] }
 0x43b   : > { %v10072_v22 = vpop.f32.mrf.mxu1 }
 0x43c   : > { %26583 = vst [vmem:[#allocation144_spill] sm:$0xff] %v23234_v23  ;;  %v23239_v1 = vadd.f32 %v10265_v52, %v10072_v22  ;;  %v17765_v52 = vld [vmem:[%s25092_s1 + $0x1060] ss:$8 sps:$4 sm:$0xff]  }
 0x43d   : > { %v10074_v34 = vpop.f32.mrf.mxu1 }
 0x43e   : > { %11945 = vmatmul.mubr.bf16.gmra.mxu0 %v22909_v5  ;;  %26584 = vst [vmem:[#allocation24_spill] sm:$0xff] %v23239_v1  ;;  %v10279_v5 = vpop.f32.mrf.mxu0  ;;  %v23245_v13 = vadd.f32 %v10267_v9, %v10074_v34  ;;  %v17770_v1 = vld [vmem:[%s25092_s1 + $0x1054] ss:$8 sps:$4 sm:$0xff]  }
 0x43f   : > { %12180 = vmatprep.mubr.bf16.mxu0 %v22638_v49  ;;  %v17767_v49 = vld [vmem:[%s25092_s1 + $0x1064] ss:$8 sps:$4 sm:$0xff]   ;;  %v10076_v47 = vpop.f32.mrf.mxu1  ;;  %v26589_v34 = vld [vmem:[#allocation98_spill] sm:$0xff] }
 0x440   : > { %10525 = vmatmul.mubr.bf16.gmra.mxu1 %v22961_v30  ;;  %26586 = vst [vmem:[#allocation42_spill] sm:$0xff] %v23245_v13  ;;  %v10283_v23 = vpop.f32.mrf.mxu0  ;;  %v23251_v22 = vadd.f32 %v10269_v11, %v10076_v47  ;;  %v17776_v11 = vld [vmem:[%s25092_s1 + $0x1044] ss:$8 sps:$4 sm:$0xff]  }
 0x441   : > { %10534 = vmatprep.mubr.bf16.mxu1 %v22988_v45  ;;  %v26592_v13 = vld [vmem:[#allocation116_spill] sm:$0xff] }
 0x442   : > { %26588 = vst [vmem:[#allocation83_spill] sm:$0xff] %v23251_v22  ;;  %v10285_v9 = vpop.f32.mrf.mxu0  ;;  %v26591_v22 = vld [vmem:[#allocation114_spill] sm:$0xff] }
 0x446   : > { %12181 = vmatmul.mubr.bf16.vlgmr.msra.gmra.mxu0 %v26585_v17  ;;  %v10287_v17 = vpop.f32.mrf.mxu0 }
 0x447   : > { %12190 = vmatprep.mubr.bf16.mxu0 %v26587_v4  ;;  %13880 = vmatpush1.bf16.msra.mxu0 %v17759_v15  ;;  %v17768_v15 = vld [vmem:[%s25092_s1 + $0x1050] ss:$8 sps:$4 sm:$0xff]   ;;  %v10080_v4 = vpop.f32.mrf.mxu1 }
 0x448   : > { %13881 = vmatprep.subr.bf16.mxu0 %v17767_v49  ;;  %10535 = vmatmul.mubr.bf16.gmra.mxu1 %v22986_v2  ;;  %v23264_v49 = vadd.f32 %v10273_v14, %v10080_v4  ;;  %v10289_v47 = vpop.f32.mrf.mxu0  ;;  %v17774_v14 = vld [vmem:[%s25092_s1 + $0x1040] ss:$8 sps:$4 sm:$0xff]  }
 0x449   : > { %11987 = vmatprep.mubr.bf16.mxu1 %v26589_v34  ;;  %v17738_v34 = vld [vmem:[%s25092_s1 + $0xf70] ss:$8 sps:$4 sm:$0xff]  }
 0x44a   : > { %26590 = vst [vmem:[#allocation139_spill] sm:$0xff] %v23264_v49  ;;  %v17779_v49 = vld [vmem:[%s25092_s1 + $0x1034] ss:$8 sps:$4 sm:$0xff]  }
 0x44b   : > { %13882 = vmatpush1.bf16.msra.mxu0 %v17765_v52  ;;  %v10082_v52 = vpop.f32.mrf.mxu1 }
 0x44c   : > { %13883 = vmatprep.subr.bf16.mxu0 %v17770_v1  ;;  %v23271_v31 = vadd.f32 %v10275_v10, %v10082_v52  ;;  %v17743_v1 = vld [vmem:[%s25092_s1 + $0xf64] ss:$8 sps:$4 sm:$0xff]  }
 0x44d   : > { %v10084_v4 = vpop.f32.mrf.mxu1  ;;  %v26595_v52 = vld [vmem:[#allocation29_spill] sm:$0xff] }
 0x44e   : > { %12191 = vmatmul.mubr.bf16.gmra.mxu0 %v26591_v22  ;;  %26593 = vst [vmem:[#allocation179_spill] sm:$0xff] %v23271_v31  ;;  %v10293_v22 = vpop.f32.mrf.mxu0  ;;  %v23283_v10 = vadd.f32 %v10277_v27, %v10084_v4 }
 0x44f   : > { %12200 = vmatprep.mubr.bf16.mxu0 %v26592_v13  ;;  %13884 = vmatpush1.bf16.msra.mxu0 %v17768_v15  ;;  %v10086_v13 = vpop.f32.mrf.mxu1  ;;  %v17741_v15 = vld [vmem:[%s25092_s1 + $0xf60] ss:$8 sps:$4 sm:$0xff]  }
 0x450   : > { %13885 = vmatprep.subr.bf16.mxu0 %v17776_v11  ;;  %11988 = vmatmul.mubr.bf16.vlgmr.msra.gmra.mxu1 %v26594_v61  ;;  %v10295_v31 = vpop.f32.mrf.mxu0  ;;  %v23289_v6 = vadd.f32 %v10279_v5, %v10086_v13  ;;  %v17746_v11 = vld [vmem:[%s25092_s1 + $0xf54] ss:$8 sps:$4 sm:$0xff]   ;;  %v17785_v5 = vld [vmem:[%s25092_s1 + $0x1024] ss:$8 sps:$4 sm:$0xff]  }
 0x451   : > { %11997 = vmatprep.mubr.bf16.mxu1 %v26595_v52  ;;  %13687 = vmatpush1.bf16.msra.mxu1 %v17738_v34  ;;  %v10090_v61 = vpop.f32.mrf.mxu1  ;;  %v17777_v34 = vld [vmem:[%s25092_s1 + $0x1030] ss:$8 sps:$4 sm:$0xff]  }
 0x452   : > { %26596 = vst [vmem:[#allocation74_spill] sm:$0xff] %v23289_v6  ;;  %13688 = vmatprep.subr.bf16.mxu1 %v17743_v1  ;;  %v10297_v27 = vpop.f32.mrf.mxu0  ;;  %v23297_v4 = vadd.f32 %v10283_v23, %v10090_v61  ;;  %v17749_v23 = vld [vmem:[%s25092_s1 + $0xf44] ss:$8 sps:$4 sm:$0xff]  }
 0x453   : > { %13886 = vmatpush1.bf16.msra.mxu0 %v17774_v14  ;;  %v10092_v13 = vpop.f32.mrf.mxu1  ;;  %v17744_v14 = vld [vmem:[%s25092_s1 + $0xf50] ss:$8 sps:$4 sm:$0xff]   ;;  %v26599_v61 = vld [vmem:[#allocation25_spill] sm:$0xff] }
 0x454   : > { %13887 = vmatprep.subr.bf16.mxu0 %v17779_v49  ;;  %26597 = vst [vmem:[#allocation141_spill] sm:$0xff] %v23297_v4  ;;  %v10299_v1 = vpop.f32.mrf.mxu0  ;;  %v23307_v6 = vadd.f32 %v10285_v9, %v10092_v13  ;;  %v17788_v9 = vld [vmem:[%s25092_s1 + $0x1014] ss:$8 sps:$4 sm:$0xff]  }
 0x455   : > { %13689 = vmatpush1.bf16.msra.mxu1 %v17741_v15  ;;  %v10094_v49 = vpop.f32.mrf.mxu1  ;;  %v17783_v15 = vld [vmem:[%s25092_s1 + $0x1020] ss:$8 sps:$4 sm:$0xff]  }
 0x456   : > { %12201 = vmatmul.mubr.bf16.gmra.mxu0 %v22709_v16  ;;  %26598 = vst [vmem:[#allocation95_spill] sm:$0xff] %v23307_v6  ;;  %13690 = vmatprep.subr.bf16.mxu1 %v17746_v11  ;;  %v23316_v16 = vadd.f32 %v10287_v17, %v10094_v49  ;;  %v26601_v11 = vld [vmem:[#allocation99_spill] sm:$0xff] }
 0x457   : > { %12210 = vmatprep.mubr.bf16.mxu0 %v22760_v39  ;;  %13888 = vmatpush1.bf16.msra.mxu0 %v17777_v34  ;;  %v10096_v13 = vpop.f32.mrf.mxu1  ;;  %v10303_v39 = vpop.f32.mrf.mxu0  ;;  %v17747_v34 = vld [vmem:[%s25092_s1 + $0xf40] ss:$8 sps:$4 sm:$0xff]   ;;  %v17752_v17 = vld [vmem:[%s25092_s1 + $0xf34] ss:$8 sps:$4 sm:$0xff]  }
 0x458   : > { %11998 = vmatmul.mubr.bf16.gmra.mxu1 %v26599_v61  ;;  %26600 = vst [vmem:[#allocation145_spill] sm:$0xff] %v23316_v16  ;;  %13889 = vmatprep.subr.bf16.mxu0 %v17785_v5  ;;  %v23325_v6 = vadd.f32 %v10289_v47, %v10096_v13  ;;  %v17786_v16 = vld [vmem:[%s25092_s1 + $0x1010] ss:$8 sps:$4 sm:$0xff]   ;;  %v17794_v47 = vld [vmem:[%s25092_s1 + $0x1004] ss:$8 sps:$4 sm:$0xff]  }
 0x459   : > { %12007 = vmatprep.mubr.bf16.mxu1 %v26601_v11  ;;  %13691 = vmatpush1.bf16.msra.mxu1 %v17744_v14  ;;  %v10100_v5 = vpop.f32.mrf.mxu1  ;;  %v10305_v49 = vpop.f32.mrf.mxu0 }
 0x45a   : > { %13692 = vmatprep.subr.bf16.mxu1 %v17749_v23  ;;  %v23333_v4 = vadd.f32 %v10293_v22, %v10100_v5  ;;  %v17755_v22 = vld [vmem:[%s25092_s1 + $0xf24] ss:$8 sps:$4 sm:$0xff]  }
 0x45b   : > { %13890 = vmatpush1.bf16.msra.mxu0 %v17783_v15  ;;  %v10102_v14 = vpop.f32.mrf.mxu1  ;;  %v10307_v23 = vpop.f32.mrf.mxu0  ;;  %v17750_v15 = vld [vmem:[%s25092_s1 + $0xf30] ss:$8 sps:$4 sm:$0xff]  }
 0x45c   : > { %26602 = vst [vmem:[#allocation180_spill] sm:$0xff] %v23333_v4  ;;  %13891 = vmatprep.subr.bf16.mxu0 %v17788_v9  ;;  %v23343_v13 = vadd.f32 %v10295_v31, %v10102_v14  ;;  %v17797_v31 = vld [vmem:[%s25092_s1 + $0x10f4] ss:$8 sps:$4 sm:$0xff]  }
 0x45d   : > { %13693 = vmatpush1.bf16.msra.mxu1 %v17747_v34  ;;  %v10104_v9 = vpop.f32.mrf.mxu1  ;;  %v10309_v5 = vpop.f32.mrf.mxu0  ;;  %v17792_v34 = vld [vmem:[%s25092_s1 + $0x1000] ss:$8 sps:$4 sm:$0xff]  }
 0x45e   : > { %12211 = vmatmul.mubr.bf16.gmra.mxu0 %v22758_v57  ;;  %26603 = vst [vmem:[#allocation47_spill] sm:$0xff] %v23343_v13  ;;  %13694 = vmatprep.subr.bf16.mxu1 %v17752_v17  ;;  %v26604_v57 = vld [vmem:[#allocation30_spill] sm:$0xff]  ;;  %v23352_v4 = vadd.f32 %v10297_v27, %v10104_v9  ;;  %v26606_v17 = vld [vmem:[#allocation149_spill] sm:$0xff] }
 0x45f   : > { %12220 = vmatprep.mubr.bf16.mxu0 %v22946_v41  ;;  %13892 = vmatpush1.bf16.msra.mxu0 %v17786_v16  ;;  %v10106_v14 = vpop.f32.mrf.mxu1  ;;  %v17753_v16 = vld [vmem:[%s25092_s1 + $0xf20] ss:$8 sps:$4 sm:$0xff]   ;;  %v10313_v13 = vpop.f32.mrf.mxu0  ;;  %v17758_v27 = vld [vmem:[%s25092_s1 + $0xf14] ss:$8 sps:$4 sm:$0xff]  }
 0x460   : > { %12008 = vmatmul.mubr.bf16.gmra.mxu1 %v26604_v57  ;;  %26605 = vst [vmem:[#allocation82_spill] sm:$0xff] %v23352_v4  ;;  %13893 = vmatprep.subr.bf16.mxu0 %v17794_v47  ;;  %v23361_v41 = vadd.f32 %v10299_v1, %v10106_v14  ;;  %v17795_v47 = vld [vmem:[%s25092_s1 + $0x10f0] ss:$8 sps:$4 sm:$0xff]  }
 0x461   : > { %12017 = vmatprep.mubr.bf16.mxu1 %v26606_v17  ;;  %13695 = vmatpush1.bf16.msra.mxu1 %v17750_v15  ;;  %v10315_v9 = vpop.f32.mrf.mxu0  ;;  %v17803_v15 = vld [vmem:[%s25092_s1 + $0x10e4] ss:$8 sps:$4 sm:$0xff]   ;;  %v10110_v1 = vpop.f32.mrf.mxu1 }
 0x462   : > { %26607 = vst [vmem:[#allocation81_spill] sm:$0xff] %v23361_v41  ;;  %13696 = vmatprep.subr.bf16.mxu1 %v17755_v22  ;;  %v17756_v22 = vld [vmem:[%s25092_s1 + $0xf10] ss:$8 sps:$4 sm:$0xff]   ;;  %v23376_v14 = vadd.f32 %v10303_v39, %v10110_v1 }
 0x463   : > { %13894 = vmatpush1.bf16.msra.mxu0 %v17792_v34  ;;  %v10317_v34 = vpop.f32.mrf.mxu0  ;;  %v10112_v41 = vpop.f32.mrf.mxu1  ;;  %v26611_v1 = vld [vmem:[#allocation34_spill] sm:$0xff] }
 0x464   : > { %13895 = vmatprep.subr.bf16.mxu0 %v17797_v31  ;;  %26608 = vst [vmem:[#allocation79_spill] sm:$0xff] %v23376_v14  ;;  %v17764_v31 = vld [vmem:[%s25092_s1 + $0xf04] ss:$8 sps:$4 sm:$0xff]   ;;  %v23386_v4 = vadd.f32 %v10305_v49, %v10112_v41  ;;  %v17773_v41 = vld [vmem:[%s25092_s1 + $0xff4] ss:$8 sps:$4 sm:$0xff]  }
 0x465   : > { %13697 = vmatpush1.bf16.msra.mxu1 %v17753_v16  ;;  %v17801_v16 = vld [vmem:[%s25092_s1 + $0x10e0] ss:$8 sps:$4 sm:$0xff]   ;;  %v10319_v39 = vpop.f32.mrf.mxu0 }
 0x466   : > { %12221 = vmatmul.mubr.bf16.gmra.mxu0 %v23016_v8  ;;  %13698 = vmatprep.subr.bf16.mxu1 %v17758_v27  ;;  %v26609_v8 = vld [vmem:[#allocation101_spill] sm:$0xff]  ;;  %26610 = vst [vmem:[#allocation96_spill] sm:$0xff] %v23386_v4  ;;  %v17806_v27 = vld [vmem:[%s25092_s1 + $0x10d4] ss:$8 sps:$4 sm:$0xff]  }
 0x467   : > { %12230 = vmatprep.mubr.bf16.mxu0 %v23029_v48  ;;  %13896 = vmatpush2.bf16.msra.mxu0 %v17795_v47  ;;  %v10114_v48 = vpop.f32.mrf.mxu1  ;;  %v17762_v47 = vld [vmem:[%s25092_s1 + $0xf00] ss:$8 sps:$4 sm:$0xff]  }
 0x468   : > { %12018 = vmatmul.mubr.bf16.gmra.mxu1 %v26609_v8  ;;  %13897 = vmatprep.subr.bf16.mxu0 %v17803_v15  ;;  %v23395_v14 = vadd.f32 %v10307_v23, %v10114_v48  ;;  %v17804_v15 = vld [vmem:[%s25092_s1 + $0x10d0] ss:$8 sps:$4 sm:$0xff]   ;;  %v17812_v48 = vld [vmem:[%s25092_s1 + $0x10c4] ss:$8 sps:$4 sm:$0xff]  }
 0x469   : > { %12027 = vmatprep.mubr.bf16.mxu1 %v26611_v1  ;;  %13699 = vmatpush1.bf16.msra.mxu1 %v17756_v22  ;;  %v10116_v49 = vpop.f32.mrf.mxu1  ;;  %v10323_v22 = vpop.f32.mrf.mxu0 }
 0x46a   : > { %26612 = vst [vmem:[#allocation87_spill] sm:$0xff] %v23395_v14  ;;  %13700 = vmatprep.subr.bf16.mxu1 %v17764_v31  ;;  %v23403_v4 = vadd.f32 %v10309_v5, %v10116_v49  ;;  %v17771_v31 = vld [vmem:[%s25092_s1 + $0xff0] ss:$8 sps:$4 sm:$0xff]  }
 0x46b   : > { %13898 = vmatpush2.bf16.msra.mxu0 %v17801_v16  ;;  %v10120_v23 = vpop.f32.mrf.mxu1  ;;  %v10325_v5 = vpop.f32.mrf.mxu0 }
 0x46c   : > { %26613 = vst [vmem:[#allocation52_spill] sm:$0xff] %v23403_v4  ;;  %13899 = vmatprep.subr.bf16.mxu0 %v17806_v27  ;;  %v23412_v16 = vadd.f32 %v10313_v13, %v10120_v23  ;;  %v17782_v27 = vld [vmem:[%s25092_s1 + $0xfe4] ss:$8 sps:$4 sm:$0xff]  }
 0x46d   : > { %13701 = vmatpush1.bf16.msra.mxu1 %v17762_v47  ;;  %v10122_v49 = vpop.f32.mrf.mxu1  ;;  %v17810_v47 = vld [vmem:[%s25092_s1 + $0x10c0] ss:$8 sps:$4 sm:$0xff]   ;;  %v10327_v13 = vpop.f32.mrf.mxu0 }
 0x46e   : > { %12231 = vmatmul.mubr.bf16.gmra.mxu0 %v23068_v18  ;;  %26614 = vst [vmem:[#allocation146_spill] sm:$0xff] %v23412_v16  ;;  %13702 = vmatprep.subr.bf16.mxu1 %v17773_v41  ;;  %v26615_v18 = vld [vmem:[#allocation151_spill] sm:$0xff]  ;;  %v23422_v4 = vadd.f32 %v10315_v9, %v10122_v49  ;;  %v26617_v23 = vld [vmem:[#allocation104_spill] sm:$0xff] }
 0x46f   : > { %12240 = vmatprep.mubr.bf16.mxu0 %v23079_v62  ;;  %13900 = vmatpush2.bf16.msra.mxu0 %v17804_v15  ;;  %v17815_v41 = vld [vmem:[%s25092_s1 + $0x10b4] ss:$8 sps:$4 sm:$0xff]   ;;  %v10124_v62 = vpop.f32.mrf.mxu1  ;;  %v17780_v15 = vld [vmem:[%s25092_s1 + $0xfe0] ss:$8 sps:$4 sm:$0xff]   ;;  %v10329_v14 = vpop.f32.mrf.mxu0  ;;  %v17813_v49 = vld [vmem:[%s25092_s1 + $0x10b0] ss:$8 sps:$4 sm:$0xff]  }
 0x470   : > { %12028 = vmatmul.mubr.bf16.gmra.mxu1 %v26615_v18  ;;  %26616 = vst [vmem:[#allocation27_spill] sm:$0xff] %v23422_v4  ;;  %13901 = vmatprep.subr.bf16.mxu0 %v17812_v48  ;;  %v23431_v16 = vadd.f32 %v10317_v34, %v10124_v62  ;;  %v17791_v9 = vld [vmem:[%s25092_s1 + $0xfd4] ss:$8 sps:$4 sm:$0xff]   ;;  %v17821_v62 = vld [vmem:[%s25092_s1 + $0x10a4] ss:$8 sps:$4 sm:$0xff]  }
 0x471   : > { %12037 = vmatprep.mubr.bf16.mxu1 %v26617_v23  ;;  %13703 = vmatpush2.bf16.msra.mxu1 %v17771_v31  ;;  %v10126_v48 = vpop.f32.mrf.mxu1  ;;  %v10333_v34 = vpop.f32.mrf.mxu0  ;;  %v17789_v31 = vld [vmem:[%s25092_s1 + $0xfd0] ss:$8 sps:$4 sm:$0xff]  }
 0x472   : > { %26618 = vst [vmem:[#allocation23_spill] sm:$0xff] %v23431_v16  ;;  %13704 = vmatprep.subr.bf16.mxu1 %v17782_v27  ;;  %v23439_v4 = vadd.f32 %v10319_v39, %v10126_v48  ;;  %v17800_v39 = vld [vmem:[%s25092_s1 + $0xfc4] ss:$8 sps:$4 sm:$0xff]  }
 0x473   : > { %13902 = vmatpush2.bf16.msra.mxu0 %v17810_v47  ;;  %v10335_v27 = vpop.f32.mrf.mxu0  ;;  %v17819_v47 = vld [vmem:[%s25092_s1 + $0x10a0] ss:$8 sps:$4 sm:$0xff]  }
 0x474   : > { %26619 = vst [vmem:[#allocation15_spill] sm:$0xff] %v23439_v4  ;;  %13903 = vmatprep.subr.bf16.mxu0 %v17815_v41  ;;  %v10130_v41 = vpop.f32.mrf.mxu1  ;;  %v26620_v48 = vld [vmem:[#allocation41_spill] sm:$0xff] }
 0x475   : > { %13705 = vmatpush2.bf16.msra.mxu1 %v17780_v15  ;;  %v17824_v15 = vld [vmem:[%s25092_s1 + $0x1094] ss:$8 sps:$4 sm:$0xff]  }
 0x476   : > { %12241 = vmatmul.mubr.bf16.gmra.mxu0 %v23111_v35  ;;  %13706 = vmatprep.subr.bf16.mxu1 %v17791_v9  ;;  %v26622_v9 = vld [vmem:[#allocation45_spill] sm:$0xff]  ;;  %v10337_v35 = vpop.f32.mrf.mxu0  ;;  %v10132_v4 = vpop.f32.mrf.mxu1 }
 0x477   : > { %12250 = vmatprep.mubr.bf16.mxu0 %v23119_v54  ;;  %13904 = vmatpush2.bf16.msra.mxu0 %v17813_v49  ;;  %v23459_v54 = vadd.f32 %v10323_v22, %v10130_v41  ;;  %v17798_v49 = vld [vmem:[%s25092_s1 + $0xfc0] ss:$8 sps:$4 sm:$0xff]   ;;  %v23468_v16 = vadd.f32 %v10325_v5, %v10132_v4  ;;  %v17822_v22 = vld [vmem:[%s25092_s1 + $0x1090] ss:$8 sps:$4 sm:$0xff]  }
 0x478   : > { %12038 = vmatmul.mubr.bf16.gmra.mxu1 %v26620_v48  ;;  %13905 = vmatprep.subr.bf16.mxu0 %v17821_v62  ;;  %v17809_v62 = vld [vmem:[%s25092_s1 + $0xfb4] ss:$8 sps:$4 sm:$0xff]   ;;  %v10339_v48 = vpop.f32.mrf.mxu0  ;;  %v10134_v41 = vpop.f32.mrf.mxu1  ;;  %v17807_v4 = vld [vmem:[%s25092_s1 + $0xfb0] ss:$8 sps:$4 sm:$0xff]  }
 0x479   : > { %26621 = vst [vmem:[#allocation176_spill] sm:$0xff] %v23459_v54  ;;  %12047 = vmatprep.mubr.bf16.mxu1 %v26622_v9  ;;  %13707 = vmatpush2.bf16.msra.mxu1 %v17789_v31  ;;  %26623 = vst [vmem:[#allocation89_spill] sm:$0xff] %v23468_v16  ;;  %v17830_v31 = vld [vmem:[%s25092_s1 + $0x1084] ss:$8 sps:$4 sm:$0xff]   ;;  %v23476_v54 = vadd.f32 %v10327_v13, %v10134_v41 }
 0x47a   : > { %13708 = vmatprep.subr.bf16.mxu1 %v17800_v39  ;;  %v10343_v39 = vpop.f32.mrf.mxu0  ;;  %v10136_v5 = vpop.f32.mrf.mxu1 }
 0x47b   : > { %13906 = vmatpush2.bf16.msra.mxu0 %v17819_v47  ;;  %26624 = vst [vmem:[#allocation175_spill] sm:$0xff] %v23476_v54  ;;  %v17818_v47 = vld [vmem:[%s25092_s1 + $0xfa4] ss:$8 sps:$4 sm:$0xff]  }
 0x47c   : > { %13907 = vmatprep.subr.bf16.mxu0 %v17824_v15  ;;  %v23486_v15 = vadd.f32 %v10329_v14, %v10136_v5  ;;  %v10345_v13 = vpop.f32.mrf.mxu0  ;;  %v10140_v41 = vpop.f32.mrf.mxu1  ;;  %v17816_v14 = vld [vmem:[%s25092_s1 + $0xfa0] ss:$8 sps:$4 sm:$0xff]  }
 0x47d   : > { %13709 = vmatpush2.bf16.msra.mxu1 %v17798_v49  ;;  %v17828_v49 = vld [vmem:[%s25092_s1 + $0x1080] ss:$8 sps:$4 sm:$0xff]   ;;  %v23492_v54 = vadd.f32 %v10333_v34, %v10140_v41 }
 0x47e   : > { %12251 = vmatmul.mubr.bf16.gmra.mxu0 %v23150_v37  ;;  %13710 = vmatprep.subr.bf16.mxu1 %v17809_v62  ;;  %26625 = vst [vmem:[#allocation57_spill] sm:$0xff] %v23486_v15  ;;  %v26626_v37 = vld [vmem:[#allocation43_spill] sm:$0xff]  ;;  %v10347_v62 = vpop.f32.mrf.mxu0  ;;  %v10142_v5 = vpop.f32.mrf.mxu1 }
 0x47f   : > { %12260 = vmatprep.mubr.bf16.mxu0 %v23155_v0  ;;  %13908 = vmatpush2.bf16.msra.mxu0 %v17822_v22  ;;  %v26627_v0 = vld [vmem:[#allocation154_spill] sm:$0xff]  ;;  %v23501_v15 = vadd.f32 %v10335_v27, %v10142_v5  ;;  %v17833_v27 = vld [vmem:[%s25092_s1 + $0xf84] ss:$8 sps:$4 sm:$0xff]  }
 0x480   : > { %12048 = vmatmul.mubr.bf16.gmra.mxu1 %v26626_v37  ;;  %13909 = vmatprep.subr.bf16.mxu0 %v17830_v31  ;;  %v17827_v22 = vld [vmem:[%s25092_s1 + $0xf94] ss:$8 sps:$4 sm:$0xff]   ;;  %v10349_v16 = vpop.f32.mrf.mxu0  ;;  %v10144_v34 = vpop.f32.mrf.mxu1 }
 0x481   : > { %12057 = vmatprep.mubr.bf16.mxu1 %v26627_v0  ;;  %13711 = vmatpush2.bf16.msra.mxu1 %v17807_v4  ;;  %v23503_v31 = vadd.f32 %v10337_v35, %v10144_v34  ;;  %v17825_v4 = vld [vmem:[%s25092_s1 + $0xf90] ss:$8 sps:$4 sm:$0xff]   ;;  %v26631_v34 = vld [vmem:[#allocation181_spill] sm:$0xff] }
 0x482   : > { %13712 = vmatprep.subr.bf16.mxu1 %v17818_v47  ;;  %v23505_v41 = vpop.f32.mrf.mxu0  ;;  %v10146_v47 = vpop.f32.mrf.mxu1 }
 0x483   : > { %13910 = vmatpush2.bf16.msra.mxu0 %v17828_v49  ;;  %26628 = vst [vmem:[#allocation178_spill] sm:$0xff] %v23505_v41  ;;  %v23515_v49 = vadd.f32 %v10339_v48, %v10146_v47  ;;  %v17836_v48 = vld [vmem:[%s25092_s1 + $0x1174] ss:$8 sps:$4 sm:$0xff]  }
 0x484   : > { %v23517_v35 = vpop.f32.mrf.mxu0  ;;  %v10150_v5 = vpop.f32.mrf.mxu1 }
 0x485   : > { %13713 = vmatpush2.bf16.msra.mxu1 %v17816_v14  ;;  %26629 = vst [vmem:[#allocation90_spill] sm:$0xff] %v23515_v49  ;;  %26630 = vst [vmem:[#allocation177_spill] sm:$0xff] %v23517_v35  ;;  %v23520_v14 = vadd.f32 %v10343_v39, %v10150_v5 }
 0x486   : > { %12261 = vmatmul.mubr.bf16.gmra.mxu0 %v23167_v3  ;;  %13714 = vmatprep.subr.bf16.mxu1 %v17827_v22  ;;  %v26633_v3 = vld [vmem:[#allocation46_spill] sm:$0xff]  ;;  %v23523_v41 = vpop.f32.mrf.mxu0  ;;  %v17831_v22 = vld [vmem:[%s25092_s1 + $0xf80] ss:$8 sps:$4 sm:$0xff]  }
 0x487   : > { %12270 = vmatprep.mubr.bf16.mxu0 %v23174_v24  ;;  %26632 = vst [vmem:[#allocation19_spill] sm:$0xff] %v23520_v14  ;;  %26634 = vst [vmem:[#allocation62_spill] sm:$0xff] %v23523_v41  ;;  %v10152_v24 = vpop.f32.mrf.mxu1 }
 0x488   : > { %12058 = vmatmul.mubr.bf16.gmra.mxu1 %v26631_v34  ;;  %v23531_v47 = vadd.f32 %v10345_v13, %v10152_v24  ;;  %v23533_v35 = vpop.f32.mrf.mxu0 }
 0x489   : > { %12067 = vmatprep.mubr.bf16.mxu1 %v26633_v3  ;;  %13715 = vmatpush2.bf16.msra.mxu1 %v17825_v4  ;;  %26635 = vst [vmem:[#allocation17_spill] sm:$0xff] %v23533_v35  ;;  %v10154_v39 = vpop.f32.mrf.mxu1  ;;  %v26641_v35 = vld [vmem:[#allocation51_spill] sm:$0xff] }
 0x48a   : > { %13716 = vmatprep.subr.bf16.mxu1 %v17833_v27  ;;  %v23535_v5 = vadd.f32 %v10347_v62, %v10154_v39  ;;  %v23537_v14 = vpop.f32.mrf.mxu0  ;;  %v26638_v27 = vld [vmem:[#allocation70_spill] sm:$0xff] }
 0x48b   : > { %26637 = vst [vmem:[#allocation92_spill] sm:$0xff] %v23537_v14  ;;  %v10156_v4 = vpop.f32.mrf.mxu1  ;;  %v10194_v41 = vadd.f32 %v26638_v27, %v23022_v58  ;;  %v26642_v62 = vld [vmem:[#allocation166_spill] sm:$0xff] }
 0x48c   : > { %26636 = vst [vmem:[#allocation20_spill] sm:$0xff] %v23535_v5  ;;  %v23543_v49 = vadd.f32 %v10349_v16, %v10156_v4  ;;  %v23545_v24 = vpop.f32.mrf.mxu0  ;;  %v10196_v39 = vadd.f32 %v26642_v62, %v23050_v12  ;;  %v26646_v5 = vld [vmem:[#allocation26_spill] sm:$0xff]  ;;  %v26650_v62 = vld [vmem:[#allocation111_spill] sm:$0xff] }
 0x48d   : > { %13717 = vmatpush2.bf16.msra.mxu1 %v17831_v22  ;;  %26640 = vst [vmem:[#allocation67_spill] sm:$0xff] %v23545_v24  ;;  %v10386_v13 = vpop.f32.mrf.mxu1  ;;  %v26643_v22 = vld [vmem:[#allocation183_spill] sm:$0xff] }
 0x48e   : > { %12271 = vmatmul.mubr.bf16.gmra.mxu0 %v23183_v7  ;;  %14072 = vmatprep.subr.bf16.mxu1 %v17836_v48  ;;  %26639 = vst [vmem:[#allocation14_spill] sm:$0xff] %v23543_v49  ;;  %v23550_v14 = vadd.f32 %v10386_v13, %v10194_v41  ;;  %v23553_v7 = vpop.f32.mrf.mxu0 }
 0x48f   : > { %12280 = vmatprep.mubr.bf16.mxu0 %v22828_v43  ;;  %26644 = vst [vmem:[#allocation143_spill] sm:$0xff] %v23553_v7  ;;  %v10388_v48 = vpop.f32.mrf.mxu1  ;;  %v26645_v43 = vld [vmem:[#allocation140_spill] sm:$0xff] }
 0x490   : > { %12068 = vmatmul.mubr.bf16.gmra.mxu1 %v26641_v35  ;;  %v10198_v58 = vadd.f32 %v26646_v5, %v26645_v43  ;;  %v23557_v16 = vadd.f32 %v10388_v48, %v10196_v39  ;;  %v23559_v4 = vpop.f32.mrf.mxu0  ;;  %v26651_v43 = vld [vmem:[#allocation170_spill] sm:$0xff]  ;;  %v26652_v39 = vld [vmem:[#allocation53_spill] sm:$0xff] }
 0x491   : > { %12077 = vmatprep.mubr.bf16.mxu1 %v26643_v22  ;;  %26647 = vst [vmem:[#allocation72_spill] sm:$0xff] %v23559_v4  ;;  %v10390_v27 = vpop.f32.mrf.mxu1 }
 0x492   : > { %v23561_v24 = vadd.f32 %v10390_v27, %v10198_v58  ;;  %v23563_v49 = vpop.f32.mrf.mxu0  ;;  %v26654_v27 = vld [vmem:[#allocation127_spill] sm:$0xff] }
 0x493   : > { %26648 = vst [vmem:[#allocation77_spill] sm:$0xff] %v23563_v49  ;;  %v23566_v12 = vpop.f32.mrf.mxu1 }
 0x494   : > { %v23569_v41 = vpop.f32.mrf.mxu0 }
 0x495   : > { %26649 = vst [vmem:[#allocation85_spill] sm:$0xff] %v23569_v41  ;;  %v10396_v13 = vpop.f32.mrf.mxu1 }
 0x496   : > { %12281 = vmatmul.mubr.bf16.gmra.mxu0 %v22826_v26  ;;  %v23573_v5 = vadd.f32 %v10396_v13, %v26651_v43  ;;  %v23576_v48 = vpop.f32.mrf.mxu0 }
 0x497   : > { %12290 = vmatprep.mubr.bf16.mxu0 %v22863_v59  ;;  %26653 = vst [vmem:[#allocation36_spill] sm:$0xff] %v23576_v48  ;;  %v10398_v58 = vpop.f32.mrf.mxu1  ;;  %v26656_v59 = vld [vmem:[#allocation37_spill] sm:$0xff] }
 0x498   : > { %12078 = vmatmul.mubr.bf16.gmra.mxu1 %v26650_v62  ;;  %v23579_v49 = vadd.f32 %v10398_v58, %v26654_v27  ;;  %v23581_v26 = vpop.f32.mrf.mxu0  ;;  %v26659_v27 = vld [vmem:[#allocation56_spill] sm:$0xff] }
 0x499   : > { %12087 = vmatprep.mubr.bf16.mxu1 %v26652_v39  ;;  %26655 = vst [vmem:[#allocation84_spill] sm:$0xff] %v23581_v26  ;;  %v10400_v4 = vpop.f32.mrf.mxu1 }
 0x49a   : > { %v23584_v7 = vadd.f32 %v10400_v4, %v26656_v59  ;;  %v23586_v41 = vpop.f32.mrf.mxu0  ;;  %v26660_v59 = vld [vmem:[#allocation117_spill] sm:$0xff] }
 0x49b   : > { %26657 = vst [vmem:[#allocation102_spill] sm:$0xff] %v23586_v41  ;;  %v10402_v13 = vpop.f32.mrf.mxu1 }
 0x49c   : > { %v23591_v43 = vadd.f32 %v10402_v13, %v23144_v28  ;;  %v23593_v48 = vpop.f32.mrf.mxu0 }
 0x49d   : > { %26658 = vst [vmem:[#allocation86_spill] sm:$0xff] %v23593_v48  ;;  %v10406_v58 = vpop.f32.mrf.mxu1 }
 0x49e   : > { %12291 = vmatmul.mubr.bf16.gmra.mxu0 %v22861_v38  ;;  %v23597_v26 = vadd.f32 %v10406_v58, %v23159_v63  ;;  %v23600_v4 = vpop.f32.mrf.mxu0 }
 0x49f   : > { %12300 = vmatprep.mubr.bf16.mxu0 %v22879_v40  ;;  %26661 = vst [vmem:[#allocation88_spill] sm:$0xff] %v23600_v4  ;;  %v10408_v41 = vpop.f32.mrf.mxu1 }
 0x4a0   : > { %12088 = vmatmul.mubr.bf16.gmra.mxu1 %v26659_v27  ;;  %v23603_v38 = vadd.f32 %v10408_v41, %v23164_v21  ;;  %v23605_v40 = vpop.f32.mrf.mxu0  ;;  %v26665_v41 = vld [vmem:[#allocation186_spill] sm:$0xff] }
 0x4a1   : > { %12097 = vmatprep.mubr.bf16.mxu1 %v26660_v59  ;;  %26662 = vst [vmem:[#allocation40_spill] sm:$0xff] %v23605_v40  ;;  %v10410_v28 = vpop.f32.mrf.mxu1 }
 0x4a2   : > { %v23608_v13 = vadd.f32 %v10410_v28, %v23172_v36  ;;  %v23610_v48 = vpop.f32.mrf.mxu0  ;;  %v26666_v36 = vld [vmem:[#allocation185_spill] sm:$0xff] }
 0x4a3   : > { %26663 = vst [vmem:[#allocation91_spill] sm:$0xff] %v23610_v48  ;;  %v10412_v63 = vpop.f32.mrf.mxu1 }
 0x4a4   : > { %v23615_v58 = vadd.f32 %v10412_v63, %v23177_v19  ;;  %v23617_v4 = vpop.f32.mrf.mxu0 }
 0x4a5   : > { %26664 = vst [vmem:[#allocation58_spill] sm:$0xff] %v23617_v4  ;;  %v10416_v21 = vpop.f32.mrf.mxu1 }
 0x4a6   : > { %12301 = vmatmul.mubr.bf16.gmra.mxu0 %v22877_v44  ;;  %v23621_v40 = vadd.f32 %v10416_v21, %v23181_v29  ;;  %v23624_v28 = vpop.f32.mrf.mxu0 }
 0x4a7   : > { %12310 = vmatprep.mubr.bf16.mxu0 %v22963_v53  ;;  %26667 = vst [vmem:[#allocation94_spill] sm:$0xff] %v23624_v28  ;;  %v10418_v48 = vpop.f32.mrf.mxu1 }
 0x4a8   : > { %12098 = vmatmul.mubr.bf16.gmra.mxu1 %v26665_v41  ;;  %v23627_v44 = vadd.f32 %v10418_v48, %v23186_v42  ;;  %v23629_v53 = vpop.f32.mrf.mxu0  ;;  %v26671_v48 = vld [vmem:[#allocation129_spill] sm:$0xff] }
 0x4a9   : > { %12107 = vmatprep.mubr.bf16.mxu1 %v26666_v36  ;;  %26668 = vst [vmem:[#allocation153_spill] sm:$0xff] %v23629_v53  ;;  %v10420_v19 = vpop.f32.mrf.mxu1 }
 0x4aa   : > { %v23632_v63 = vadd.f32 %v10420_v19, %v23190_v56  ;;  %v23634_v4 = vpop.f32.mrf.mxu0  ;;  %v26673_v56 = vld [vmem:[#allocation160_spill] sm:$0xff] }
 0x4ab   : > { %26669 = vst [vmem:[#allocation115_spill] sm:$0xff] %v23634_v4  ;;  %v10422_v29 = vpop.f32.mrf.mxu1 }
 0x4ac   : > { %v23639_v21 = vadd.f32 %v10422_v29, %v23192_v55  ;;  %v23641_v28 = vpop.f32.mrf.mxu0 }
 0x4ad   : > { %26670 = vst [vmem:[#allocation122_spill] sm:$0xff] %v23641_v28  ;;  %v10426_v42 = vpop.f32.mrf.mxu1 }
 0x4ae   : > { %12311 = vmatmul.mubr.bf16.gmra.mxu0 %v22961_v30  ;;  %v23645_v53 = vadd.f32 %v10426_v42, %v23196_v46  ;;  %v23648_v19 = vpop.f32.mrf.mxu0  ;;  %v26677_v42 = vld [vmem:[#allocation169_spill] sm:$0xff] }
 0x4af   : > { %12320 = vmatprep.mubr.bf16.mxu0 %v22988_v45  ;;  %26674 = vst [vmem:[#allocation126_spill] sm:$0xff] %v23648_v19  ;;  %v10428_v4 = vpop.f32.mrf.mxu1 }
 0x4b0   : > { %12108 = vmatmul.mubr.bf16.gmra.mxu1 %v26671_v48  ;;  %26672 = vst [vmem:[#allocation136_spill] sm:$0xff] %v23645_v53  ;;  %v23651_v30 = vadd.f32 %v10428_v4, %v23200_v20  ;;  %v23653_v45 = vpop.f32.mrf.mxu0  ;;  %v26680_v4 = vld [vmem:[#allocation162_spill] sm:$0xff] }
 0x4b1   : > { %12117 = vmatprep.mubr.bf16.mxu1 %v26673_v56  ;;  %26675 = vst [vmem:[#allocation131_spill] sm:$0xff] %v23653_v45  ;;  %v10430_v55 = vpop.f32.mrf.mxu1 }
 0x4b2   : > { %v23656_v29 = vadd.f32 %v10430_v55, %v23202_v32  ;;  %v26681_v32 = vld [vmem:[#allocation112_spill] sm:$0xff] }
 0x4b3   : > { %v10432_v46 = vpop.f32.mrf.mxu1 }
 0x4b4   : > { %v23663_v53 = vadd.f32 %v10432_v46, %v23205_v50 }
 0x4b6   : > { %v23658_v28 = vpop.f32.mrf.mxu0  ;;  %12321 = vmatmul.mubr.bf16.gmra.mxu0 %v22986_v2  ;;  %26678 = vst [vmem:[#allocation135_spill] sm:$0xff] %v23663_v53  ;;  %v26687_v53 = vld [vmem:[#allocation134_spill] sm:$0xff] }
 0x4b7   : > { %26676 = vst [vmem:[#allocation35_spill] sm:$0xff] %v23658_v28  ;;  %12330 = vmatprep.mubr.bf16.mxu0 %v26677_v42 }
 0x4b8   : > { %v23665_v19 = vpop.f32.mrf.mxu0  ;;  %v10436_v20 = vpop.f32.mrf.mxu1  ;;  %12118 = vmatmul.mubr.bf16.gmra.mxu1 %v26680_v4 }
 0x4b9   : > { %26679 = vst [vmem:[#allocation132_spill] sm:$0xff] %v23665_v19  ;;  %v23669_v45 = vadd.f32 %v10436_v20, %v23209_v60  ;;  %12127 = vmatprep.mubr.bf16.mxu1 %v26681_v32 }
 0x4ba   : > { %v23672_v55 = vpop.f32.mrf.mxu0  ;;  %v10438_v28 = vpop.f32.mrf.mxu1 }
 0x4bb   : > { %26682 = vst [vmem:[#allocation97_spill] sm:$0xff] %v23672_v55  ;;  %v23675_v2 = vadd.f32 %v10438_v28, %v23212_v51  ;;  %v26690_v28 = vld [vmem:[#allocation163_spill] sm:$0xff] }
 0x4bc   : > { %v23677_v42 = vpop.f32.mrf.mxu0  ;;  %v10440_v50 = vpop.f32.mrf.mxu1 }
 0x4bd   : > { %26683 = vst [vmem:[#allocation107_spill] sm:$0xff] %v23675_v2  ;;  %26684 = vst [vmem:[#allocation159_spill] sm:$0xff] %v23677_v42  ;;  %v23680_v46 = vadd.f32 %v10440_v50, %v23214_v33  ;;  %v26691_v42 = vld [vmem:[#allocation80_spill] sm:$0xff]  ;;  %v26693_v33 = vld [vmem:[#allocation21_spill] sm:$0xff] }
 0x4be   : > { %v23682_v19 = vpop.f32.mrf.mxu0  ;;  %12331 = vmatmul.mubr.bf16.gmra.mxu0 %v26687_v53  ;;  %v10442_v60 = vpop.f32.mrf.mxu1  ;;  %v26695_v53 = vld [vmem:[#allocation18_spill] sm:$0xff] }
 0x4bf   : > { %26685 = vst [vmem:[#allocation100_spill] sm:$0xff] %v23680_v46  ;;  %26686 = vst [vmem:[#allocation48_spill] sm:$0xff] %v23682_v19  ;;  %13911 = vmatprep.mubr.bf16.mxu0 %v26595_v52  ;;  %v23687_v20 = vadd.f32 %v10442_v60, %v23218_v25  ;;  %v26698_v60 = vld [vmem:[#allocation128_spill] sm:$0xff] }
 0x4c0   : > { %v23689_v55 = vpop.f32.mrf.mxu0  ;;  %v10446_v51 = vpop.f32.mrf.mxu1  ;;  %12128 = vmatmul.mubr.bf16.gmra.mxu1 %v26690_v28 }
 0x4c1   : > { %26688 = vst [vmem:[#allocation44_spill] sm:$0xff] %v23687_v20  ;;  %26689 = vst [vmem:[#allocation103_spill] sm:$0xff] %v23689_v55  ;;  %v23693_v2 = vadd.f32 %v10446_v51, %v26691_v42  ;;  %12137 = vmatprep.mubr.bf16.mxu1 %v26693_v33  ;;  %v26701_v51 = vld [vmem:[#allocation22_spill] sm:$0xff] }
 0x4c2   : > { %v23696_v50 = vpop.f32.mrf.mxu0  ;;  %v10448_v19 = vpop.f32.mrf.mxu1 }
 0x4c3   : > { %26692 = vst [vmem:[#allocation157_spill] sm:$0xff] %v23693_v2  ;;  %26694 = vst [vmem:[#allocation110_spill] sm:$0xff] %v23696_v50  ;;  %v23699_v46 = vadd.f32 %v10448_v19, %v26695_v53  ;;  %v26704_v19 = vld [vmem:[#allocation121_spill] sm:$0xff] }
 0x4c4   : > { %v23701_v52 = vpop.f32.mrf.mxu0  ;;  %v10450_v25 = vpop.f32.mrf.mxu1 }
 0x4c5   : > { %26696 = vst [vmem:[#allocation106_spill] sm:$0xff] %v23699_v46  ;;  %26697 = vst [vmem:[#allocation109_spill] sm:$0xff] %v23701_v52  ;;  %v23704_v20 = vadd.f32 %v10450_v25, %v26698_v60  ;;  %v26705_v52 = vld [vmem:[#allocation144_spill] sm:$0xff]  ;;  %v26706_v25 = vld [vmem:[#allocation147_spill] sm:$0xff] }
 0x4c6   : > { %v23706_v55 = vpop.f32.mrf.mxu0  ;;  %13912 = vmatmul.mubr.bf16.vlgmr.msra.gmra.mxu0 %v26599_v61  ;;  %v10452_v42 = vpop.f32.mrf.mxu1  ;;  %v26708_v61 = vld [vmem:[#allocation24_spill] sm:$0xff] }
 0x4c7   : > { %26699 = vst [vmem:[#allocation66_spill] sm:$0xff] %v23704_v20  ;;  %26700 = vst [vmem:[#allocation98_spill] sm:$0xff] %v23706_v55  ;;  %13921 = vmatprep.mubr.bf16.mxu0 %v26601_v11  ;;  %v23711_v2 = vadd.f32 %v10452_v42, %v26701_v51  ;;  %v26711_v51 = vld [vmem:[#allocation42_spill] sm:$0xff] }
 0x4c8   : > { %v23713_v50 = vpop.f32.mrf.mxu0  ;;  %v10456_v53 = vpop.f32.mrf.mxu1  ;;  %12138 = vmatmul.mubr.bf16.gmra.mxu1 %v26704_v19 }
 0x4c9   : > { %26702 = vst [vmem:[#allocation28_spill] sm:$0xff] %v23711_v2  ;;  %26703 = vst [vmem:[#allocation29_spill] sm:$0xff] %v23713_v50  ;;  %v23717_v46 = vadd.f32 %v10456_v53, %v26705_v52  ;;  %13718 = vmatprep.mubr.bf16.mxu1 %v26706_v25  ;;  %v17834_v52 = vld [vmem:[%s25092_s1 + $0x1170] ss:$8 sps:$4 sm:$0xff]  }
 0x4ca   : > { %v23720_v60 = vpop.f32.mrf.mxu0  ;;  %v10458_v55 = vpop.f32.mrf.mxu1  ;;  %v26714_v25 = vld [vmem:[#allocation83_spill] sm:$0xff] }
 0x4cb   : > { %26707 = vst [vmem:[#allocation25_spill] sm:$0xff] %v23720_v60  ;;  %v23723_v20 = vadd.f32 %v10458_v55, %v26708_v61  ;;  %v17839_v55 = vld [vmem:[%s25092_s1 + $0x1164] ss:$8 sps:$4 sm:$0xff]   ;;  %v26718_v60 = vld [vmem:[#allocation150_spill] sm:$0xff] }
 0x4cc   : > { %v23725_v11 = vpop.f32.mrf.mxu0  ;;  %v10460_v42 = vpop.f32.mrf.mxu1 }
 0x4cd   : > { %26709 = vst [vmem:[#allocation99_spill] sm:$0xff] %v23723_v20  ;;  %26710 = vst [vmem:[#allocation30_spill] sm:$0xff] %v23725_v11  ;;  %v23728_v2 = vadd.f32 %v10460_v42, %v26711_v51 }
 0x4ce   : > { %v23730_v50 = vpop.f32.mrf.mxu0  ;;  %13922 = vmatmul.mubr.bf16.gmra.mxu0 %v26604_v57  ;;  %v10462_v53 = vpop.f32.mrf.mxu1  ;;  %v26717_v57 = vld [vmem:[#allocation139_spill] sm:$0xff] }
 0x4cf   : > { %26712 = vst [vmem:[#allocation149_spill] sm:$0xff] %v23728_v2  ;;  %26713 = vst [vmem:[#allocation101_spill] sm:$0xff] %v23730_v50  ;;  %13931 = vmatprep.mubr.bf16.mxu0 %v26606_v17  ;;  %v23741_v61 = vadd.f32 %v10462_v53, %v26714_v25  ;;  %v26716_v50 = vld [vmem:[#allocation148_spill] sm:$0xff]  ;;  %v17842_v53 = vld [vmem:[%s25092_s1 + $0x1154] ss:$8 sps:$4 sm:$0xff]  }
 0x4d0   : > { %v23743_v42 = vpop.f32.mrf.mxu0  ;;  %v10466_v51 = vpop.f32.mrf.mxu1  ;;  %13719 = vmatmul.mubr.bf16.vlgmr.msra.gmra.mxu1 %v26716_v50  ;;  %v17837_v17 = vld [vmem:[%s25092_s1 + $0x1160] ss:$8 sps:$4 sm:$0xff]   ;;  %v26720_v25 = vld [vmem:[#allocation179_spill] sm:$0xff] }
 0x4d1   : > { %26715 = vst [vmem:[#allocation34_spill] sm:$0xff] %v23743_v42  ;;  %v23747_v11 = vadd.f32 %v10466_v51, %v26717_v57  ;;  %13728 = vmatprep.mubr.bf16.mxu1 %v26718_v60  ;;  %14073 = vmatpush1.bf16.msra.mxu1 %v17834_v52  ;;  %v26728_v42 = vld [vmem:[#allocation38_spill] sm:$0xff] }
 0x4d2   : > { %v23750_v2 = vpop.f32.mrf.mxu0  ;;  %v10468_v20 = vpop.f32.mrf.mxu1  ;;  %14074 = vmatprep.subr.bf16.mxu1 %v17839_v55  ;;  %v17840_v55 = vld [vmem:[%s25092_s1 + $0x1150] ss:$8 sps:$4 sm:$0xff]  }
 0x4d3   : > { %26719 = vst [vmem:[#allocation151_spill] sm:$0xff] %v23750_v2  ;;  %v23759_v50 = vadd.f32 %v10468_v20, %v26720_v25  ;;  %v17845_v20 = vld [vmem:[%s25092_s1 + $0x1144] ss:$8 sps:$4 sm:$0xff]   ;;  %v26724_v25 = vld [vmem:[#allocation74_spill] sm:$0xff] }
 0x4d4   : > { %v23761_v51 = vpop.f32.mrf.mxu0  ;;  %v10470_v57 = vpop.f32.mrf.mxu1 }
 0x4d5   : > { %26721 = vst [vmem:[#allocation104_spill] sm:$0xff] %v23761_v51  ;;  %v23764_v60 = vadd.f32 %v10470_v57, %v23283_v10  ;;  %14075 = vmatpush1.bf16.msra.mxu1 %v17837_v17  ;;  %v26727_v17 = vld [vmem:[#allocation141_spill] sm:$0xff] }
 0x4d6   : > { %v23766_v52 = vpop.f32.mrf.mxu0  ;;  %13932 = vmatmul.mubr.bf16.gmra.mxu0 %v26609_v8  ;;  %v10472_v2 = vpop.f32.mrf.mxu1  ;;  %14076 = vmatprep.subr.bf16.mxu1 %v17842_v53  ;;  %v26726_v8 = vld [vmem:[#allocation32_spill] sm:$0xff] }
 0x4d7   : > { %26722 = vst [vmem:[#allocation45_spill] sm:$0xff] %v23764_v60  ;;  %26723 = vst [vmem:[#allocation43_spill] sm:$0xff] %v23766_v52  ;;  %13941 = vmatprep.mubr.bf16.mxu0 %v26611_v1  ;;  %v23777_v10 = vadd.f32 %v10472_v2, %v26724_v25  ;;  %v17843_v1 = vld [vmem:[%s25092_s1 + $0x1140] ss:$8 sps:$4 sm:$0xff]   ;;  %v17848_v2 = vld [vmem:[%s25092_s1 + $0x1134] ss:$8 sps:$4 sm:$0xff]  }
 0x4d8   : > { %v23779_v57 = vpop.f32.mrf.mxu0  ;;  %v10476_v52 = vpop.f32.mrf.mxu1  ;;  %13729 = vmatmul.mubr.bf16.gmra.mxu1 %v26726_v8  ;;  %v26730_v25 = vld [vmem:[#allocation95_spill] sm:$0xff] }
 0x4d9   : > { %26725 = vst [vmem:[#allocation154_spill] sm:$0xff] %v23779_v57  ;;  %v23783_v51 = vadd.f32 %v10476_v52, %v26727_v17  ;;  %13738 = vmatprep.mubr.bf16.mxu1 %v26728_v42  ;;  %14077 = vmatpush1.bf16.msra.mxu1 %v17840_v55  ;;  %v26732_v42 = vld [vmem:[#allocation145_spill] sm:$0xff] }
 0x4da   : > { %v23786_v60 = vpop.f32.mrf.mxu0  ;;  %v10478_v53 = vpop.f32.mrf.mxu1  ;;  %14078 = vmatprep.subr.bf16.mxu1 %v17845_v20  ;;  %v17846_v20 = vld [vmem:[%s25092_s1 + $0x1130] ss:$8 sps:$4 sm:$0xff]  }
 0x4db   : > { %26729 = vst [vmem:[#allocation181_spill] sm:$0xff] %v23786_v60  ;;  %v23795_v8 = vadd.f32 %v10478_v53, %v26730_v25  ;;  %v17851_v53 = vld [vmem:[%s25092_s1 + $0x1124] ss:$8 sps:$4 sm:$0xff]  }
 0x4dc   : > { %v23797_v52 = vpop.f32.mrf.mxu0  ;;  %v10480_v17 = vpop.f32.mrf.mxu1 }
 0x4dd   : > { %26731 = vst [vmem:[#allocation46_spill] sm:$0xff] %v23797_v52  ;;  %v23800_v57 = vadd.f32 %v10480_v17, %v26732_v42  ;;  %14079 = vmatpush1.bf16.msra.mxu1 %v17843_v1  ;;  %v26737_v1 = vld [vmem:[#allocation180_spill] sm:$0xff]  ;;  %v26739_v52 = vld [vmem:[#allocation105_spill] sm:$0xff] }
 0x4de   : > { %v23802_v55 = vpop.f32.mrf.mxu0  ;;  %13942 = vmatmul.mubr.bf16.gmra.mxu0 %v26615_v18  ;;  %v10482_v60 = vpop.f32.mrf.mxu1  ;;  %14080 = vmatprep.subr.bf16.mxu1 %v17848_v2  ;;  %v26736_v18 = vld [vmem:[#allocation33_spill] sm:$0xff] }
 0x4df   : > { %26733 = vst [vmem:[#allocation70_spill] sm:$0xff] %v23800_v57  ;;  %26734 = vst [vmem:[#allocation51_spill] sm:$0xff] %v23802_v55  ;;  %13951 = vmatprep.mubr.bf16.mxu0 %v26617_v23  ;;  %v23813_v25 = vadd.f32 %v10482_v60, %v23325_v6  ;;  %v17849_v23 = vld [vmem:[%s25092_s1 + $0x1120] ss:$8 sps:$4 sm:$0xff]   ;;  %v17854_v6 = vld [vmem:[%s25092_s1 + $0x1114] ss:$8 sps:$4 sm:$0xff]  }
 0x4e0   : > { %v23815_v17 = vpop.f32.mrf.mxu0  ;;  %v10486_v42 = vpop.f32.mrf.mxu1  ;;  %13739 = vmatmul.mubr.bf16.gmra.mxu1 %v26736_v18  ;;  %v26741_v60 = vld [vmem:[#allocation47_spill] sm:$0xff] }
 0x4e1   : > { %26735 = vst [vmem:[#allocation166_spill] sm:$0xff] %v23815_v17  ;;  %v23819_v55 = vadd.f32 %v10486_v42, %v26737_v1  ;;  %13748 = vmatprep.mubr.bf16.mxu1 %v26739_v52  ;;  %14081 = vmatpush1.bf16.msra.mxu1 %v17846_v20  ;;  %v26744_v52 = vld [vmem:[#allocation82_spill] sm:$0xff] }
 0x4e2   : > { %v23822_v57 = vpop.f32.mrf.mxu0  ;;  %v10488_v2 = vpop.f32.mrf.mxu1  ;;  %14082 = vmatprep.subr.bf16.mxu1 %v17851_v53  ;;  %v17852_v53 = vld [vmem:[%s25092_s1 + $0x1110] ss:$8 sps:$4 sm:$0xff]  }
 0x4e3   : > { %26738 = vst [vmem:[#allocation183_spill] sm:$0xff] %v23819_v55  ;;  %26740 = vst [vmem:[#allocation140_spill] sm:$0xff] %v23822_v57  ;;  %v23831_v18 = vadd.f32 %v10488_v2, %v26741_v60  ;;  %v26747_v57 = vld [vmem:[#allocation41_spill] sm:$0xff] }
 0x4e4   : > { %v23833_v42 = vpop.f32.mrf.mxu0  ;;  %v10490_v1 = vpop.f32.mrf.mxu1  ;;  %v17857_v2 = vld [vmem:[%s25092_s1 + $0x1104] ss:$8 sps:$4 sm:$0xff]  }
 0x4e5   : > { %26742 = vst [vmem:[#allocation26_spill] sm:$0xff] %v23831_v18  ;;  %26743 = vst [vmem:[#allocation111_spill] sm:$0xff] %v23833_v42  ;;  %v23836_v17 = vadd.f32 %v10490_v1, %v26744_v52  ;;  %14083 = vmatpush1.bf16.msra.mxu1 %v17849_v23  ;;  %v26748_v60 = vld [vmem:[#allocation81_spill] sm:$0xff]  ;;  %v26751_v23 = vld [vmem:[#allocation79_spill] sm:$0xff] }
 0x4e6   : > { %v23838_v20 = vpop.f32.mrf.mxu0  ;;  %13952 = vmatmul.mubr.bf16.gmra.mxu0 %v26747_v57  ;;  %v10492_v55 = vpop.f32.mrf.mxu1  ;;  %14084 = vmatprep.subr.bf16.mxu1 %v17854_v6  ;;  %v26750_v57 = vld [vmem:[#allocation152_spill] sm:$0xff] }
 0x4e7   : > { %26745 = vst [vmem:[#allocation170_spill] sm:$0xff] %v23836_v17  ;;  %26746 = vst [vmem:[#allocation53_spill] sm:$0xff] %v23838_v20  ;;  %13961 = vmatprep.mubr.bf16.mxu0 %v26622_v9  ;;  %v23849_v1 = vadd.f32 %v10492_v55, %v26748_v60  ;;  %v26752_v17 = vld [vmem:[#allocation155_spill] sm:$0xff]  ;;  %v17855_v9 = vld [vmem:[%s25092_s1 + $0x1100] ss:$8 sps:$4 sm:$0xff]  }
 0x4e8   : > { %v23851_v52 = vpop.f32.mrf.mxu0  ;;  %v10496_v20 = vpop.f32.mrf.mxu1  ;;  %13749 = vmatmul.mubr.bf16.gmra.mxu1 %v26750_v57  ;;  %v17860_v55 = vld [vmem:[%s25092_s1 + $0x11f4] ss:$8 sps:$4 sm:$0xff]   ;;  %v26754_v60 = vld [vmem:[#allocation96_spill] sm:$0xff] }
 0x4e9   : > { %26749 = vst [vmem:[#allocation127_spill] sm:$0xff] %v23851_v52  ;;  %v23855_v42 = vadd.f32 %v10496_v20, %v26751_v23  ;;  %13758 = vmatprep.mubr.bf16.mxu1 %v26752_v17  ;;  %14085 = vmatpush1.bf16.msra.mxu1 %v17852_v53  ;;  %v26757_v17 = vld [vmem:[#allocation87_spill] sm:$0xff] }
 0x4ea   : > { %v23858_v18 = vpop.f32.mrf.mxu0  ;;  %v10498_v6 = vpop.f32.mrf.mxu1  ;;  %14086 = vmatprep.subr.bf16.mxu1 %v17857_v2  ;;  %v17858_v2 = vld [vmem:[%s25092_s1 + $0x11f0] ss:$8 sps:$4 sm:$0xff]  }
 0x4eb   : > { %26753 = vst [vmem:[#allocation37_spill] sm:$0xff] %v23858_v18  ;;  %v23867_v57 = vadd.f32 %v10498_v6, %v26754_v60  ;;  %v17863_v6 = vld [vmem:[%s25092_s1 + $0x11e4] ss:$8 sps:$4 sm:$0xff]  }
 0x4ec   : > { %v23869_v20 = vpop.f32.mrf.mxu0  ;;  %v10500_v23 = vpop.f32.mrf.mxu1  ;;  %v26760_v60 = vld [vmem:[#allocation52_spill] sm:$0xff] }
 0x4ed   : > { %26755 = vst [vmem:[#allocation56_spill] sm:$0xff] %v23867_v57  ;;  %26756 = vst [vmem:[#allocation117_spill] sm:$0xff] %v23869_v20  ;;  %v23872_v52 = vadd.f32 %v10500_v23, %v26757_v17  ;;  %14087 = vmatpush1.bf16.msra.mxu1 %v17855_v9  ;;  %v26763_v9 = vld [vmem:[#allocation146_spill] sm:$0xff] }
 0x4ee   : > { %v23874_v53 = vpop.f32.mrf.mxu0  ;;  %13962 = vmatmul.mubr.bf16.gmra.mxu0 %v26626_v37  ;;  %v10502_v18 = vpop.f32.mrf.mxu1  ;;  %14088 = vmatprep.subr.bf16.mxu1 %v17860_v55  ;;  %v26762_v37 = vld [vmem:[#allocation39_spill] sm:$0xff] }
 0x4ef   : > { %26758 = vst [vmem:[#allocation186_spill] sm:$0xff] %v23872_v52  ;;  %26759 = vst [vmem:[#allocation185_spill] sm:$0xff] %v23874_v53  ;;  %13971 = vmatprep.mubr.bf16.mxu0 %v26627_v0  ;;  %v23885_v23 = vadd.f32 %v10502_v18, %v26760_v60  ;;  %v26764_v52 = vld [vmem:[#allocation156_spill] sm:$0xff]  ;;  %v17866_v18 = vld [vmem:[%s25092_s1 + $0x11d4] ss:$8 sps:$4 sm:$0xff]  }
 0x4f0   : > { %v23887_v17 = vpop.f32.mrf.mxu0  ;;  %v10506_v53 = vpop.f32.mrf.mxu1  ;;  %13759 = vmatmul.mubr.bf16.gmra.mxu1 %v26762_v37  ;;  %v17861_v0 = vld [vmem:[%s25092_s1 + $0x11e0] ss:$8 sps:$4 sm:$0xff]   ;;  %v26766_v60 = vld [vmem:[#allocation27_spill] sm:$0xff] }
 0x4f1   : > { %26761 = vst [vmem:[#allocation129_spill] sm:$0xff] %v23887_v17  ;;  %v23891_v20 = vadd.f32 %v10506_v53, %v26763_v9  ;;  %13768 = vmatprep.mubr.bf16.mxu1 %v26764_v52  ;;  %14089 = vmatpush2.bf16.msra.mxu1 %v17858_v2  ;;  %v26769_v52 = vld [vmem:[#allocation23_spill] sm:$0xff] }
 0x4f2   : > { %v23894_v57 = vpop.f32.mrf.mxu0  ;;  %v10508_v55 = vpop.f32.mrf.mxu1  ;;  %14090 = vmatprep.subr.bf16.mxu1 %v17863_v6  ;;  %v17864_v6 = vld [vmem:[%s25092_s1 + $0x11d0] ss:$8 sps:$4 sm:$0xff]  }
 0x4f3   : > { %26765 = vst [vmem:[#allocation160_spill] sm:$0xff] %v23894_v57  ;;  %v23903_v37 = vadd.f32 %v10508_v55, %v26766_v60  ;;  %v17869_v55 = vld [vmem:[%s25092_s1 + $0x11c4] ss:$8 sps:$4 sm:$0xff]   ;;  %v26772_v60 = vld [vmem:[#allocation15_spill] sm:$0xff] }
 0x4f4   : > { %v23905_v53 = vpop.f32.mrf.mxu0  ;;  %v10510_v9 = vpop.f32.mrf.mxu1 }
 0x4f5   : > { %26767 = vst [vmem:[#allocation162_spill] sm:$0xff] %v23903_v37  ;;  %26768 = vst [vmem:[#allocation112_spill] sm:$0xff] %v23905_v53  ;;  %v23908_v17 = vadd.f32 %v10510_v9, %v26769_v52  ;;  %14091 = vmatpush2.bf16.msra.mxu1 %v17861_v0  ;;  %v26776_v0 = vld [vmem:[#allocation176_spill] sm:$0xff] }
 0x4f6   : > { %v23910_v2 = vpop.f32.mrf.mxu0  ;;  %13972 = vmatmul.mubr.bf16.gmra.mxu0 %v26631_v34  ;;  %v10512_v57 = vpop.f32.mrf.mxu1  ;;  %14092 = vmatprep.subr.bf16.mxu1 %v17866_v18  ;;  %v26775_v34 = vld [vmem:[#allocation108_spill] sm:$0xff] }
 0x4f7   : > { %26770 = vst [vmem:[#allocation163_spill] sm:$0xff] %v23908_v17  ;;  %26771 = vst [vmem:[#allocation80_spill] sm:$0xff] %v23910_v2  ;;  %13981 = vmatprep.mubr.bf16.mxu0 %v26633_v3  ;;  %v23921_v9 = vadd.f32 %v10512_v57, %v26772_v60  ;;  %v26778_v17 = vld [vmem:[#allocation60_spill] sm:$0xff]  ;;  %v17872_v57 = vld [vmem:[%s25092_s1 + $0x11b4] ss:$8 sps:$4 sm:$0xff]  }
 0x4f8   : > { %v23923_v52 = vpop.f32.mrf.mxu0  ;;  %v10516_v2 = vpop.f32.mrf.mxu1  ;;  %13769 = vmatmul.mubr.bf16.gmra.mxu1 %v26775_v34  ;;  %v17867_v3 = vld [vmem:[%s25092_s1 + $0x11c0] ss:$8 sps:$4 sm:$0xff]  }
 0x4f9   : > { %26773 = vst [vmem:[#allocation21_spill] sm:$0xff] %v23921_v9  ;;  %26774 = vst [vmem:[#allocation18_spill] sm:$0xff] %v23923_v52  ;;  %v23927_v53 = vadd.f32 %v10516_v2, %v26776_v0  ;;  %13778 = vmatprep.mubr.bf16.mxu1 %v26778_v17  ;;  %14093 = vmatpush2.bf16.msra.mxu1 %v17864_v6  ;;  %v26780_v60 = vld [vmem:[#allocation89_spill] sm:$0xff]  ;;  %v26783_v17 = vld [vmem:[#allocation175_spill] sm:$0xff] }
 0x4fa   : > { %v23930_v37 = vpop.f32.mrf.mxu0  ;;  %v10518_v18 = vpop.f32.mrf.mxu1  ;;  %14094 = vmatprep.subr.bf16.mxu1 %v17869_v55  ;;  %v17870_v55 = vld [vmem:[%s25092_s1 + $0x11b0] ss:$8 sps:$4 sm:$0xff]  }
 0x4fb   : > { %26777 = vst [vmem:[#allocation128_spill] sm:$0xff] %v23927_v53  ;;  %26779 = vst [vmem:[#allocation22_spill] sm:$0xff] %v23930_v37  ;;  %v23939_v34 = vadd.f32 %v10518_v18, %v26780_v60  ;;  %v17875_v18 = vld [vmem:[%s25092_s1 + $0x11a4] ss:$8 sps:$4 sm:$0xff]  }
 0x4fc   : > { %v23941_v2 = vpop.f32.mrf.mxu0  ;;  %v10520_v0 = vpop.f32.mrf.mxu1  ;;  %v26786_v60 = vld [vmem:[#allocation57_spill] sm:$0xff] }
 0x4fd   : > { %26781 = vst [vmem:[#allocation121_spill] sm:$0xff] %v23939_v34  ;;  %26782 = vst [vmem:[#allocation144_spill] sm:$0xff] %v23941_v2  ;;  %v23944_v52 = vadd.f32 %v10520_v0, %v26783_v17  ;;  %14095 = vmatpush2.bf16.msra.mxu1 %v17867_v3  ;;  %v26791_v2 = vld [vmem:[#allocation49_spill] sm:$0xff] }
 0x4fe   : > { %v23946_v6 = vpop.f32.mrf.mxu0  ;;  %13982 = vmatmul.mubr.bf16.gmra.mxu0 %v26641_v35  ;;  %v10522_v37 = vpop.f32.mrf.mxu1  ;;  %14096 = vmatprep.subr.bf16.mxu1 %v17872_v57  ;;  %v26789_v35 = vld [vmem:[#allocation182_spill] sm:$0xff] }
 0x4ff   : > { %26784 = vst [vmem:[#allocation147_spill] sm:$0xff] %v23944_v52  ;;  %26785 = vst [vmem:[#allocation24_spill] sm:$0xff] %v23946_v6  ;;  %13991 = vmatprep.mubr.bf16.mxu0 %v26643_v22  ;;  %v23957_v0 = vadd.f32 %v10522_v37, %v26786_v60  ;;  %v17873_v22 = vld [vmem:[%s25092_s1 + $0x11a0] ss:$8 sps:$4 sm:$0xff]   ;;  %v17878_v37 = vld [vmem:[%s25092_s1 + $0x1194] ss:$8 sps:$4 sm:$0xff]  }
 0x500   : > { %v23959_v17 = vpop.f32.mrf.mxu0  ;;  %v10526_v6 = vpop.f32.mrf.mxu1  ;;  %13779 = vmatmul.mubr.bf16.gmra.mxu1 %v26789_v35 }
 0x501   : > { %26787 = vst [vmem:[#allocation42_spill] sm:$0xff] %v23957_v0  ;;  %26788 = vst [vmem:[#allocation83_spill] sm:$0xff] %v23959_v17  ;;  %v23963_v3 = vadd.f32 %v10526_v6, %v23492_v54  ;;  %13788 = vmatprep.mubr.bf16.mxu1 %v26791_v2  ;;  %14097 = vmatpush2.bf16.msra.mxu1 %v17870_v55  ;;  %v26801_v17 = vld [vmem:[#allocation55_spill] sm:$0xff]  ;;  %v26809_v0 = vld [vmem:[#allocation177_spill] sm:$0xff] }
 0x502   : > { %v23966_v52 = vpop.f32.mrf.mxu0  ;;  %v10528_v57 = vpop.f32.mrf.mxu1  ;;  %14098 = vmatprep.subr.bf16.mxu1 %v17875_v18  ;;  %v17876_v18 = vld [vmem:[%s25092_s1 + $0x1190] ss:$8 sps:$4 sm:$0xff]  }
 0x503   : > { %26790 = vst [vmem:[#allocation148_spill] sm:$0xff] %v23963_v3  ;;  %26792 = vst [vmem:[#allocation139_spill] sm:$0xff] %v23966_v52  ;;  %v23975_v60 = vadd.f32 %v10528_v57, %v23501_v15  ;;  %v17881_v15 = vld [vmem:[%s25092_s1 + $0x1184] ss:$8 sps:$4 sm:$0xff]   ;;  %v26796_v57 = vld [vmem:[#allocation90_spill] sm:$0xff] }
 0x504   : > { %v23977_v54 = vpop.f32.mrf.mxu0  ;;  %v10530_v6 = vpop.f32.mrf.mxu1  ;;  %v26798_v52 = vld [vmem:[#allocation158_spill] sm:$0xff]  ;;  %v26806_v3 = vld [vmem:[#allocation184_spill] sm:$0xff] }
 0x505   : > { %26793 = vst [vmem:[#allocation150_spill] sm:$0xff] %v23975_v60  ;;  %26794 = vst [vmem:[#allocation179_spill] sm:$0xff] %v23977_v54  ;;  %v23980_v2 = vadd.f32 %v10530_v6, %v23503_v31  ;;  %14099 = vmatpush2.bf16.msra.mxu1 %v17873_v22  ;;  %v26803_v60 = vld [vmem:[#allocation20_spill] sm:$0xff] }
 0x506   : > { %v12182_v55 = vpop.f32.mrf.mxu0  ;;  %13992 = vmatmul.mubr.bf16.gmra.mxu0 %v26650_v62  ;;  %v10532_v35 = vpop.f32.mrf.mxu1  ;;  %14100 = vmatprep.subr.bf16.mxu1 %v17878_v37  ;;  %v26799_v62 = vld [vmem:[#allocation19_spill] sm:$0xff] }
 0x507   : > { %26795 = vst [vmem:[#allocation74_spill] sm:$0xff] %v23980_v2  ;;  %14001 = vmatprep.mubr.bf16.mxu0 %v26652_v39  ;;  %v23991_v54 = vadd.f32 %v10532_v35, %v26796_v57  ;;  %v17879_v39 = vld [vmem:[%s25092_s1 + $0x1180] ss:$8 sps:$4 sm:$0xff]  }
 0x508   : > { %v12184_v31 = vpop.f32.mrf.mxu0  ;;  %v10536_v6 = vpop.f32.mrf.mxu1  ;;  %13789 = vmatmul.mubr.bf16.gmra.mxu1 %v26798_v52 }
 0x509   : > { %26797 = vst [vmem:[#allocation32_spill] sm:$0xff] %v23991_v54  ;;  %v23995_v22 = vadd.f32 %v10536_v6, %v26799_v62  ;;  %13798 = vmatprep.mubr.bf16.mxu1 %v26801_v17  ;;  %14101 = vmatpush2.bf16.msra.mxu1 %v17876_v18  ;;  %v26805_v18 = vld [vmem:[#allocation14_spill] sm:$0xff] }
 0x50a   : > { %v12186_v2 = vpop.f32.mrf.mxu0  ;;  %v10538_v37 = vpop.f32.mrf.mxu1  ;;  %14102 = vmatprep.subr.bf16.mxu1 %v17881_v15 }
 0x50b   : > { %26800 = vst [vmem:[#allocation141_spill] sm:$0xff] %v23995_v22  ;;  %v24002_v35 = vadd.f32 %v10538_v37, %v23531_v47  ;;  %v26807_v47 = vld [vmem:[#allocation178_spill] sm:$0xff] }
 0x50c   : > { %v12188_v57 = vpop.f32.mrf.mxu0  ;;  %v10540_v54 = vpop.f32.mrf.mxu1 }
 0x50d   : > { %26802 = vst [vmem:[#allocation38_spill] sm:$0xff] %v24002_v35  ;;  %v24005_v52 = vadd.f32 %v10540_v54, %v26803_v60  ;;  %14103 = vmatpush2.bf16.msra.mxu1 %v17879_v39  ;;  %v26808_v35 = vld [vmem:[#allocation54_spill] sm:$0xff] }
 0x50e   : > { %v12192_v6 = vpop.f32.mrf.mxu0  ;;  %14002 = vmatmul.mubr.bf16.gmra.mxu0 %v26659_v27  ;;  %v10542_v17 = vpop.f32.mrf.mxu1 }
 0x50f   : > { %26804 = vst [vmem:[#allocation95_spill] sm:$0xff] %v24005_v52  ;;  %14011 = vmatprep.mubr.bf16.mxu0 %v26660_v59  ;;  %v24010_v62 = vadd.f32 %v10542_v17, %v26805_v18  ;;  %v26810_v59 = vld [vmem:[#allocation62_spill] sm:$0xff] }
 0x510   : > { %v12194_v22 = vpop.f32.mrf.mxu0  ;;  %v11989_v15 = vpop.f32.mrf.mxu1  ;;  %13799 = vmatmul.mubr.bf16.gmra.mxu1 %v26806_v3 }
 0x511   : > { %v11990_v37 = vadd.f32 %v11989_v15, %v26807_v47  ;;  %13808 = vmatprep.mubr.bf16.mxu1 %v26808_v35  ;;  %v26812_v35 = vld [vmem:[#allocation75_spill] sm:$0xff] }
 0x512   : > { %v12196_v60 = vpop.f32.mrf.mxu0  ;;  %v11991_v54 = vpop.f32.mrf.mxu1  ;;  %v26813_v15 = vld [vmem:[#allocation171_spill] sm:$0xff] }
 0x513   : > { %v12183_v52 = vadd.f32 %v12182_v55, %v11990_v37  ;;  %v11992_v27 = vadd.f32 %v11991_v54, %v26809_v0  ;;  %v10200_v47 = vadd.f32 %v26813_v15, %v26812_v35  ;;  %v26814_v37 = vld [vmem:[#allocation17_spill] sm:$0xff] }
 0x514   : > { %v12198_v39 = vpop.f32.mrf.mxu0  ;;  %v11993_v34 = vpop.f32.mrf.mxu1 }
 0x515   : > { %v12185_v53 = vadd.f32 %v12184_v31, %v11992_v27  ;;  %v11994_v9 = vadd.f32 %v11993_v34, %v26810_v59  ;;  %v24019_v18 = vadd.f32 %v12183_v52, %v23550_v14  ;;  %v26816_v27 = vld [vmem:[#allocation124_spill] sm:$0xff] }
 0x516   : > { %v12202_v17 = vpop.f32.mrf.mxu0  ;;  %14012 = vmatmul.mubr.bf16.gmra.mxu0 %v26665_v41  ;;  %v11995_v3 = vpop.f32.mrf.mxu1  ;;  %v10393_v41 = vadd.f32 %v23566_v12, %v10200_v47  ;;  %v26817_v52 = vld [vmem:[#allocation92_spill] sm:$0xff] }
 0x517   : > { %26811 = vst [vmem:[#allocation145_spill] sm:$0xff] %v24019_v18  ;;  %14021 = vmatprep.mubr.bf16.mxu0 %v26666_v36  ;;  %v12187_v55 = vadd.f32 %v12186_v2, %v11994_v9  ;;  %v11996_v0 = vadd.f32 %v11995_v3, %v26814_v37  ;;  %v24026_v31 = vadd.f32 %v12185_v53, %v23557_v16  ;;  %v26818_v18 = vld [vmem:[#allocation161_spill] sm:$0xff]  ;;  %v26819_v3 = vld [vmem:[#allocation67_spill] sm:$0xff] }
 0x518   : > { %v12204_v54 = vpop.f32.mrf.mxu0  ;;  %v11999_v34 = vpop.f32.mrf.mxu1  ;;  %13809 = vmatmul.mubr.bf16.gmra.mxu1 %v26816_v27 }
 0x519   : > { %26815 = vst [vmem:[#allocation33_spill] sm:$0xff] %v24026_v31  ;;  %v12189_v14 = vadd.f32 %v12188_v57, %v11996_v0  ;;  %v12000_v59 = vadd.f32 %v11999_v34, %v26817_v52  ;;  %13818 = vmatprep.mubr.bf16.mxu1 %v26818_v18  ;;  %v24033_v35 = vadd.f32 %v12187_v55, %v23561_v24  ;;  %v26820_v31 = vld [vmem:[#allocation143_spill] sm:$0xff] }
 0x51a   : > { %v12206_v36 = vpop.f32.mrf.mxu0  ;;  %v12001_v9 = vpop.f32.mrf.mxu1 }
 0x51b   : > { %v12193_v2 = vadd.f32 %v12192_v6, %v12000_v59  ;;  %v12002_v15 = vadd.f32 %v12001_v9, %v26819_v3  ;;  %v24036_v53 = vadd.f32 %v12189_v14, %v10393_v41  ;;  %v26821_v6 = vld [vmem:[#allocation72_spill] sm:$0xff]  ;;  %v26823_v14 = vld [vmem:[#allocation77_spill] sm:$0xff] }
 0x51c   : > { %v12208_v16 = vpop.f32.mrf.mxu0  ;;  %v12003_v37 = vpop.f32.mrf.mxu1  ;;  %v26825_v9 = vld [vmem:[#allocation85_spill] sm:$0xff] }
 0x51d   : > { %v12195_v27 = vadd.f32 %v12194_v22, %v12002_v15  ;;  %v12004_v12 = vadd.f32 %v12003_v37, %v26820_v31  ;;  %v24041_v18 = vadd.f32 %v12193_v2, %v23573_v5  ;;  %v26822_v22 = vld [vmem:[#allocation50_spill] sm:$0xff] }
 0x51e   : > { %v12212_v57 = vpop.f32.mrf.mxu0  ;;  %14022 = vmatmul.mubr.bf16.gmra.mxu0 %v26671_v48  ;;  %v12005_v47 = vpop.f32.mrf.mxu1  ;;  %v26824_v48 = vld [vmem:[#allocation64_spill] sm:$0xff] }
 0x51f   : > { %14031 = vmatprep.mubr.bf16.mxu0 %v26673_v56  ;;  %v12197_v24 = vadd.f32 %v12196_v60, %v12004_v12  ;;  %v12006_v55 = vadd.f32 %v12005_v47, %v26821_v6  ;;  %v24046_v34 = vadd.f32 %v12195_v27, %v23579_v49  ;;  %v26826_v27 = vld [vmem:[#allocation36_spill] sm:$0xff] }
 0x520   : > { %v12214_v0 = vpop.f32.mrf.mxu0  ;;  %v12009_v41 = vpop.f32.mrf.mxu1  ;;  %13819 = vmatmul.mubr.bf16.gmra.mxu1 %v26822_v22 }
 0x521   : > { %v12199_v31 = vadd.f32 %v12198_v39, %v12006_v55  ;;  %v12010_v52 = vadd.f32 %v12009_v41, %v26823_v14  ;;  %13828 = vmatprep.mubr.bf16.mxu1 %v26824_v48  ;;  %v24052_v59 = vadd.f32 %v12197_v24, %v23584_v7  ;;  %v26827_v24 = vld [vmem:[#allocation84_spill] sm:$0xff]  ;;  %v26831_v48 = vld [vmem:[#allocation86_spill] sm:$0xff] }
 0x522   : > { %v12216_v5 = vpop.f32.mrf.mxu0  ;;  %v12011_v56 = vpop.f32.mrf.mxu1 }
 0x523   : > { %v12203_v60 = vadd.f32 %v12202_v17, %v12010_v52  ;;  %v12012_v2 = vadd.f32 %v12011_v56, %v26825_v9  ;;  %v24056_v49 = vadd.f32 %v12199_v31, %v23591_v43  ;;  %v26829_v31 = vld [vmem:[#allocation102_spill] sm:$0xff] }
 0x524   : > { %v12218_v3 = vpop.f32.mrf.mxu0  ;;  %v12013_v15 = vpop.f32.mrf.mxu1 }
 0x525   : > { %v12205_v37 = vadd.f32 %v12204_v54, %v12012_v2  ;;  %v12014_v39 = vadd.f32 %v12013_v15, %v26826_v27  ;;  %v24061_v47 = vadd.f32 %v12203_v60, %v23597_v26  ;;  %v26828_v54 = vld [vmem:[#allocation63_spill] sm:$0xff]  ;;  %v26832_v15 = vld [vmem:[#allocation88_spill] sm:$0xff] }
 0x526   : > { %v12222_v12 = vpop.f32.mrf.mxu0  ;;  %14032 = vmatmul.mubr.bf16.gmra.mxu0 %v26680_v4  ;;  %v12015_v7 = vpop.f32.mrf.mxu1  ;;  %v26830_v4 = vld [vmem:[#allocation65_spill] sm:$0xff] }
 0x527   : > { %14041 = vmatprep.mubr.bf16.mxu0 %v26681_v32  ;;  %v12207_v17 = vadd.f32 %v12206_v36, %v12014_v39  ;;  %v12016_v6 = vadd.f32 %v12015_v7, %v26827_v24  ;;  %v24066_v43 = vadd.f32 %v12205_v37, %v23603_v38  ;;  %v26833_v39 = vld [vmem:[#allocation40_spill] sm:$0xff] }
 0x528   : > { %v12224_v55 = vpop.f32.mrf.mxu0  ;;  %v12019_v41 = vpop.f32.mrf.mxu1  ;;  %13829 = vmatmul.mubr.bf16.gmra.mxu1 %v26828_v54 }
 0x529   : > { %v12209_v22 = vadd.f32 %v12208_v16, %v12016_v6  ;;  %v12020_v14 = vadd.f32 %v12019_v41, %v26829_v31  ;;  %13838 = vmatprep.mubr.bf16.mxu1 %v26830_v4  ;;  %v24072_v52 = vadd.f32 %v12207_v17, %v23608_v13  ;;  %v26835_v41 = vld [vmem:[#allocation91_spill] sm:$0xff]  ;;  %v26837_v31 = vld [vmem:[#allocation58_spill] sm:$0xff] }
 0x52a   : > { %v12226_v26 = vpop.f32.mrf.mxu0  ;;  %v12021_v32 = vpop.f32.mrf.mxu1 }
 0x52b   : > { %v12213_v36 = vadd.f32 %v12212_v57, %v12020_v14  ;;  %v12022_v56 = vadd.f32 %v12021_v32, %v26831_v48  ;;  %v24076_v38 = vadd.f32 %v12209_v22, %v23615_v58  ;;  %v26838_v48 = vld [vmem:[#allocation94_spill] sm:$0xff] }
 0x52c   : > { %v12228_v60 = vpop.f32.mrf.mxu0  ;;  %v12023_v9 = vpop.f32.mrf.mxu1 }
 0x52d   : > { %v12215_v2 = vadd.f32 %v12214_v0, %v12022_v56  ;;  %v12024_v16 = vadd.f32 %v12023_v9, %v26832_v15  ;;  %v24081_v27 = vadd.f32 %v12213_v36, %v23621_v40  ;;  %v26834_v0 = vld [vmem:[#allocation9_spill] sm:$0xff]  ;;  %v26839_v9 = vld [vmem:[#allocation136_spill] sm:$0xff] }
 0x52e   : > { %v12232_v37 = vpop.f32.mrf.mxu0  ;;  %14042 = vmatmul.mubr.bf16.gmra.mxu0 %v26690_v28  ;;  %v12025_v13 = vpop.f32.mrf.mxu1  ;;  %v26836_v28 = vld [vmem:[#allocation10_spill] sm:$0xff]  ;;  %v26841_v15 = vld [vmem:[#allocation8_spill] sm:$0xff] }
 0x52f   : > { %14051 = vmatprep.mubr.bf16.mxu0 %v26693_v33  ;;  %v12217_v57 = vadd.f32 %v12216_v5, %v12024_v16  ;;  %v12026_v7 = vadd.f32 %v12025_v13, %v26833_v39  ;;  %v24086_v58 = vadd.f32 %v12215_v2, %v23627_v44  ;;  %v26842_v16 = vld [vmem:[#allocation153_spill] sm:$0xff] }
 0x530   : > { %v12234_v17 = vpop.f32.mrf.mxu0  ;;  %v12029_v24 = vpop.f32.mrf.mxu1  ;;  %13839 = vmatmul.mubr.bf16.gmra.mxu1 %v26834_v0 }
 0x531   : > { %v12219_v6 = vadd.f32 %v12218_v3, %v12026_v7  ;;  %v12030_v54 = vadd.f32 %v12029_v24, %v26835_v41  ;;  %13848 = vmatprep.mubr.bf16.mxu1 %v26836_v28  ;;  %v24092_v22 = vadd.f32 %v12217_v57, %v23632_v63  ;;  %v26845_v24 = vld [vmem:[#allocation115_spill] sm:$0xff]  ;;  %v26848_v28 = vld [vmem:[#allocation122_spill] sm:$0xff] }
 0x532   : > { %v12236_v40 = vpop.f32.mrf.mxu0  ;;  %v12031_v33 = vpop.f32.mrf.mxu1 }
 0x533   : > { %v12223_v5 = vadd.f32 %v12222_v12, %v12030_v54  ;;  %v12032_v14 = vadd.f32 %v12031_v33, %v26837_v31  ;;  %v24096_v44 = vadd.f32 %v12219_v6, %v23639_v21  ;;  %v26849_v31 = vld [vmem:[#allocation135_spill] sm:$0xff] }
 0x534   : > { %v12238_v4 = vpop.f32.mrf.mxu0  ;;  %v12033_v32 = vpop.f32.mrf.mxu1 }
 0x535   : > { %v12225_v36 = vadd.f32 %v12224_v55, %v12032_v14  ;;  %v12034_v3 = vadd.f32 %v12033_v32, %v26838_v48  ;;  %v24101_v2 = vadd.f32 %v12223_v5, %v26839_v9  ;;  %v26844_v55 = vld [vmem:[#allocation11_spill] sm:$0xff] }
 0x536   : > { %v12242_v56 = vpop.f32.mrf.mxu0  ;;  %14052 = vmatmul.mubr.bf16.gmra.mxu0 %v26704_v19  ;;  %v12035_v63 = vpop.f32.mrf.mxu1  ;;  %v26846_v19 = vld [vmem:[#allocation120_spill] sm:$0xff] }
 0x537   : > { %26840 = vst [vmem:[#allocation180_spill] sm:$0xff] %v24101_v2  ;;  %14061 = vmatprep.mubr.bf16.mxu0 %v26841_v15  ;;  %v12227_v12 = vadd.f32 %v12226_v26, %v12034_v3  ;;  %v12036_v13 = vadd.f32 %v12035_v63, %v26842_v16  ;;  %v24106_v21 = vadd.f32 %v12225_v36, %v23651_v30  ;;  %v26851_v36 = vld [vmem:[#allocation126_spill] sm:$0xff]  ;;  %v26852_v3 = vld [vmem:[#allocation12_spill] sm:$0xff] }
 0x538   : > { %v12244_v57 = vpop.f32.mrf.mxu0  ;;  %v12039_v39 = vpop.f32.mrf.mxu1  ;;  %13849 = vmatmul.mubr.bf16.gmra.mxu1 %v26844_v55 }
 0x539   : > { %26843 = vst [vmem:[#allocation105_spill] sm:$0xff] %v24106_v21  ;;  %v12229_v7 = vadd.f32 %v12228_v60, %v12036_v13  ;;  %v12040_v0 = vadd.f32 %v12039_v39, %v26845_v24  ;;  %13858 = vmatprep.mubr.bf16.mxu1 %v26846_v19  ;;  %v24112_v41 = vadd.f32 %v12227_v12, %v23656_v29  ;;  %v26854_v12 = vld [vmem:[#allocation131_spill] sm:$0xff] }
 0x53a   : > { %v12246_v6 = vpop.f32.mrf.mxu0  ;;  %v12041_v54 = vpop.f32.mrf.mxu1  ;;  %v26855_v13 = vld [vmem:[#allocation107_spill] sm:$0xff] }
 0x53b   : > { %26847 = vst [vmem:[#allocation47_spill] sm:$0xff] %v24112_v41  ;;  %v12233_v26 = vadd.f32 %v12232_v37, %v12040_v0  ;;  %v12042_v33 = vadd.f32 %v12041_v54, %v26848_v28  ;;  %v24116_v30 = vadd.f32 %v12229_v7, %v26849_v31  ;;  %v26857_v7 = vld [vmem:[#allocation71_spill] sm:$0xff]  ;;  %v26859_v54 = vld [vmem:[#allocation100_spill] sm:$0xff] }
 0x53c   : > { %v12248_v5 = vpop.f32.mrf.mxu0  ;;  %v12043_v14 = vpop.f32.mrf.mxu1  ;;  %v26858_v24 = vld [vmem:[#allocation35_spill] sm:$0xff]  ;;  %v26861_v28 = vld [vmem:[#allocation132_spill] sm:$0xff] }
 0x53d   : > { %26850 = vst [vmem:[#allocation82_spill] sm:$0xff] %v24116_v30  ;;  %v12235_v32 = vadd.f32 %v12234_v17, %v12042_v33  ;;  %v12044_v60 = vadd.f32 %v12043_v14, %v26851_v36  ;;  %v24121_v9 = vadd.f32 %v12233_v26, %v23669_v45  ;;  %v26862_v14 = vld [vmem:[#allocation44_spill] sm:$0xff] }
 0x53e   : > { %v12252_v48 = vpop.f32.mrf.mxu0  ;;  %14062 = vmatmul.mubr.bf16.gmra.mxu0 %v26852_v3  ;;  %v12045_v29 = vpop.f32.mrf.mxu1 }
 0x53f   : > { %26853 = vst [vmem:[#allocation41_spill] sm:$0xff] %v24121_v9  ;;  %v12237_v63 = vadd.f32 %v12236_v40, %v12044_v60  ;;  %v12046_v37 = vadd.f32 %v12045_v29, %v26854_v12  ;;  %v24125_v39 = vadd.f32 %v12235_v32, %v26855_v13  ;;  %v26864_v29 = vld [vmem:[#allocation97_spill] sm:$0xff] }
 0x540   : > { %v12254_v16 = vpop.f32.mrf.mxu0  ;;  %v12049_v55 = vpop.f32.mrf.mxu1  ;;  %13859 = vmatmul.mubr.bf16.gmra.mxu1 %v26857_v7 }
 0x541   : > { %26856 = vst [vmem:[#allocation81_spill] sm:$0xff] %v24125_v39  ;;  %v12239_v17 = vadd.f32 %v12238_v4, %v12046_v37  ;;  %v12050_v0 = vadd.f32 %v12049_v55, %v26858_v24  ;;  %13868 = vmatprep.mubr.bf16.mxu1 %v26841_v15  ;;  %v24131_v45 = vadd.f32 %v12237_v63, %v26859_v54  ;;  %v26865_v37 = vld [vmem:[#allocation157_spill] sm:$0xff]  ;;  %v26867_v63 = vld [vmem:[#allocation159_spill] sm:$0xff] }
 0x542   : > { %v12256_v19 = vpop.f32.mrf.mxu0  ;;  %v12051_v26 = vpop.f32.mrf.mxu1 }
 0x543   : > { %26860 = vst [vmem:[#allocation152_spill] sm:$0xff] %v24131_v45  ;;  %v12243_v40 = vadd.f32 %v12242_v56, %v12050_v0  ;;  %v12052_v33 = vadd.f32 %v12051_v26, %v26861_v28  ;;  %v24135_v32 = vadd.f32 %v12239_v17, %v26862_v14  ;;  %v26868_v56 = vld [vmem:[#allocation106_spill] sm:$0xff]  ;;  %v26870_v28 = vld [vmem:[#allocation48_spill] sm:$0xff] }
 0x544   : > { %v12258_v31 = vpop.f32.mrf.mxu0  ;;  %v12053_v36 = vpop.f32.mrf.mxu1 }
 0x545   : > { %26863 = vst [vmem:[#allocation79_spill] sm:$0xff] %v24135_v32  ;;  %v12245_v60 = vadd.f32 %v12244_v57, %v12052_v33  ;;  %v12054_v4 = vadd.f32 %v12053_v36, %v26864_v29  ;;  %v24139_v13 = vadd.f32 %v12243_v40, %v26865_v37  ;;  %v26871_v33 = vld [vmem:[#allocation113_spill] sm:$0xff]  ;;  %v26872_v36 = vld [vmem:[#allocation66_spill] sm:$0xff] }
 0x546   : > { %v12262_v12 = vpop.f32.mrf.mxu0  ;;  %v12055_v55 = vpop.f32.mrf.mxu1  ;;  %v27005_v32 = vld [vmem:[#allocation134_spill] sm:$0xff] }
 0x547   : > { %26866 = vst [vmem:[#allocation155_spill] sm:$0xff] %v24139_v13  ;;  %v12247_v7 = vadd.f32 %v12246_v6, %v12054_v4  ;;  %v12056_v24 = vadd.f32 %v12055_v55, %v26867_v63  ;;  %v24143_v0 = vadd.f32 %v12245_v60, %v26868_v56  ;;  %v26874_v4 = vld [vmem:[#allocation103_spill] sm:$0xff]  ;;  %v26875_v63 = vld [vmem:[#allocation28_spill] sm:$0xff]  ;;  %v26877_v13 = vld [vmem:[#allocation110_spill] sm:$0xff] }
 0x548   : > { %v12264_v54 = vpop.f32.mrf.mxu0  ;;  %v12059_v26 = vpop.f32.mrf.mxu1  ;;  %13869 = vmatmul.mubr.bf16.gmra.mxu1 %v26852_v3 }
 0x549   : > { %26869 = vst [vmem:[#allocation96_spill] sm:$0xff] %v24143_v0  ;;  %v12249_v17 = vadd.f32 %v12248_v5, %v12056_v24  ;;  %v12060_v57 = vadd.f32 %v12059_v26, %v26870_v28  ;;  %14104 = vmatprep.mubr.bf16.mxu1 %v26871_v33  ;;  %v24149_v40 = vadd.f32 %v12247_v7, %v26872_v36  ;;  %v26879_v7 = vld [vmem:[#allocation109_spill] sm:$0xff] }
 0x54a   : > { %v12266_v14 = vpop.f32.mrf.mxu0  ;;  %v12061_v29 = vpop.f32.mrf.mxu1 }
 0x54b   : > { %26873 = vst [vmem:[#allocation87_spill] sm:$0xff] %v24149_v40  ;;  %v12253_v6 = vadd.f32 %v12252_v48, %v12060_v57  ;;  %v12062_v37 = vadd.f32 %v12061_v29, %v26874_v4  ;;  %v24153_v60 = vadd.f32 %v12249_v17, %v26875_v63  ;;  %v26880_v48 = vld [vmem:[#allocation99_spill] sm:$0xff]  ;;  %v26882_v4 = vld [vmem:[#allocation114_spill] sm:$0xff] }
 0x54c   : > { %v12268_v55 = vpop.f32.mrf.mxu0  ;;  %v12063_v56 = vpop.f32.mrf.mxu1  ;;  %v26883_v63 = vld [vmem:[#allocation98_spill] sm:$0xff] }
 0x54d   : > { %26876 = vst [vmem:[#allocation52_spill] sm:$0xff] %v24153_v60  ;;  %v12255_v0 = vadd.f32 %v12254_v16, %v12062_v37  ;;  %v12064_v5 = vadd.f32 %v12063_v56, %v26877_v13  ;;  %v24157_v26 = vadd.f32 %v12253_v6, %v23717_v46  ;;  %v26884_v37 = vld [vmem:[#allocation116_spill] sm:$0xff]  ;;  %v26885_v56 = vld [vmem:[#allocation149_spill] sm:$0xff] }
 0x54e   : > { %v12272_v24 = vpop.f32.mrf.mxu0  ;;  %v12065_v28 = vpop.f32.mrf.mxu1 }
 0x54f   : > { %26878 = vst [vmem:[#allocation39_spill] sm:$0xff] %v24157_v26  ;;  %v12257_v33 = vadd.f32 %v12256_v19, %v12064_v5  ;;  %v12066_v36 = vadd.f32 %v12065_v28, %v26879_v7  ;;  %v24161_v57 = vadd.f32 %v12255_v0, %v26880_v48  ;;  %v26887_v5 = vld [vmem:[#allocation29_spill] sm:$0xff] }
 0x550   : > { %v12274_v40 = vpop.f32.mrf.mxu0  ;;  %v12069_v29 = vpop.f32.mrf.mxu1  ;;  %14105 = vmatmul.mubr.bf16.vlgmr.msra.gmra.mxu1 %v26882_v4  ;;  %v26889_v4 = vld [vmem:[#allocation25_spill] sm:$0xff] }
 0x551   : > { %26881 = vst [vmem:[#allocation146_spill] sm:$0xff] %v24161_v57  ;;  %v12259_v17 = vadd.f32 %v12258_v31, %v12066_v36  ;;  %v12070_v16 = vadd.f32 %v12069_v29, %v26883_v63  ;;  %14114 = vmatprep.mubr.bf16.mxu1 %v26884_v37  ;;  %v24167_v46 = vadd.f32 %v12257_v33, %v26885_v56  ;;  %v26891_v33 = vld [vmem:[#allocation30_spill] sm:$0xff] }
 0x552   : > { %v12276_v13 = vpop.f32.mrf.mxu0  ;;  %v12071_v6 = vpop.f32.mrf.mxu1 }
 0x553   : > { %26886 = vst [vmem:[#allocation156_spill] sm:$0xff] %v24167_v46  ;;  %v12263_v19 = vadd.f32 %v12262_v12, %v12070_v16  ;;  %v12072_v28 = vadd.f32 %v12071_v6, %v26887_v5  ;;  %v24171_v0 = vadd.f32 %v12259_v17, %v23741_v61  ;;  %v26893_v6 = vld [vmem:[#allocation59_spill] sm:$0xff]  ;;  %v26894_v17 = vld [vmem:[#allocation101_spill] sm:$0xff] }
 0x554   : > { %v12278_v7 = vpop.f32.mrf.mxu0  ;;  %v12073_v48 = vpop.f32.mrf.mxu1  ;;  %v26895_v5 = vld [vmem:[#allocation13_spill] sm:$0xff] }
 0x555   : > { %26888 = vst [vmem:[#allocation27_spill] sm:$0xff] %v24171_v0  ;;  %v12265_v57 = vadd.f32 %v12264_v54, %v12072_v28  ;;  %v12074_v31 = vadd.f32 %v12073_v48, %v26889_v4  ;;  %v24175_v29 = vadd.f32 %v12263_v19, %v23747_v11  ;;  %v26896_v48 = vld [vmem:[#allocation45_spill] sm:$0xff]  ;;  %v26898_v4 = vld [vmem:[#allocation34_spill] sm:$0xff] }
 0x556   : > { %v12282_v36 = vpop.f32.mrf.mxu0  ;;  %v12075_v63 = vpop.f32.mrf.mxu1 }
 0x557   : > { %26890 = vst [vmem:[#allocation23_spill] sm:$0xff] %v24175_v29  ;;  %v12267_v37 = vadd.f32 %v12266_v14, %v12074_v31  ;;  %v12076_v56 = vadd.f32 %v12075_v63, %v26891_v33  ;;  %v24179_v12 = vadd.f32 %v12265_v57, %v23759_v50 }
 0x558   : > { %v12284_v46 = vpop.f32.mrf.mxu0  ;;  %v12079_v16 = vpop.f32.mrf.mxu1  ;;  %14115 = vmatmul.mubr.bf16.gmra.mxu1 %v26893_v6  ;;  %v26900_v6 = vld [vmem:[#allocation151_spill] sm:$0xff] }
 0x559   : > { %26892 = vst [vmem:[#allocation15_spill] sm:$0xff] %v24179_v12  ;;  %v12269_v61 = vadd.f32 %v12268_v55, %v12076_v56  ;;  %v12080_v54 = vadd.f32 %v12079_v16, %v26894_v17  ;;  %14124 = vmatprep.mubr.bf16.mxu1 %v26895_v5  ;;  %v24185_v11 = vadd.f32 %v12267_v37, %v26896_v48  ;;  %v26902_v37 = vld [vmem:[#allocation104_spill] sm:$0xff]  ;;  %v27000_v12 = vld [vmem:[#allocation169_spill] sm:$0xff] }
 0x55a   : > { %v12286_v28 = vpop.f32.mrf.mxu0  ;;  %v12081_v19 = vpop.f32.mrf.mxu1 }
 0x55b   : > { %26897 = vst [vmem:[#allocation108_spill] sm:$0xff] %v24185_v11  ;;  %v12273_v14 = vadd.f32 %v12272_v24, %v12080_v54  ;;  %v12082_v31 = vadd.f32 %v12081_v19, %v26898_v4  ;;  %v24189_v50 = vadd.f32 %v12269_v61, %v23777_v10  ;;  %v26904_v19 = vld [vmem:[#allocation61_spill] sm:$0xff]  ;;  %v26905_v61 = vld [vmem:[#allocation43_spill] sm:$0xff] }
 0x55c   : > { %v12288_v63 = vpop.f32.mrf.mxu0  ;;  %v12083_v57 = vpop.f32.mrf.mxu1  ;;  %v26906_v4 = vld [vmem:[#allocation167_spill] sm:$0xff] }
 0x55d   : > { %26899 = vst [vmem:[#allocation176_spill] sm:$0xff] %v24189_v50  ;;  %v12275_v33 = vadd.f32 %v12274_v40, %v12082_v31  ;;  %v12084_v55 = vadd.f32 %v12083_v57, %v26900_v6  ;;  %v24193_v16 = vadd.f32 %v12273_v14, %v23783_v51  ;;  %v26907_v57 = vld [vmem:[#allocation70_spill] sm:$0xff]  ;;  %v26999_v50 = vld [vmem:[#allocation133_spill] sm:$0xff] }
 0x55e   : > { %v12292_v56 = vpop.f32.mrf.mxu0  ;;  %v12085_v17 = vpop.f32.mrf.mxu1  ;;  %v26909_v6 = vld [vmem:[#allocation154_spill] sm:$0xff] }
 0x55f   : > { %26901 = vst [vmem:[#allocation60_spill] sm:$0xff] %v24193_v16  ;;  %v12277_v5 = vadd.f32 %v12276_v13, %v12084_v55  ;;  %v12086_v48 = vadd.f32 %v12085_v17, %v26902_v37  ;;  %v24197_v24 = vadd.f32 %v12275_v33, %v23795_v8 }
 0x560   : > { %v12294_v11 = vpop.f32.mrf.mxu0  ;;  %v12089_v54 = vpop.f32.mrf.mxu1  ;;  %14125 = vmatmul.mubr.bf16.gmra.mxu1 %v26904_v19  ;;  %v26911_v19 = vld [vmem:[#allocation181_spill] sm:$0xff] }
 0x561   : > { %26903 = vst [vmem:[#allocation89_spill] sm:$0xff] %v24197_v24  ;;  %v12279_v10 = vadd.f32 %v12278_v7, %v12086_v48  ;;  %v12090_v40 = vadd.f32 %v12089_v54, %v26905_v61  ;;  %14134 = vmatprep.mubr.bf16.mxu1 %v26906_v4  ;;  %v24203_v51 = vadd.f32 %v12277_v5, %v26907_v57  ;;  %v26912_v54 = vld [vmem:[#allocation183_spill] sm:$0xff]  ;;  %v26914_v5 = vld [vmem:[#allocation46_spill] sm:$0xff] }
 0x562   : > { %v12296_v31 = vpop.f32.mrf.mxu0  ;;  %v12091_v14 = vpop.f32.mrf.mxu1 }
 0x563   : > { %26908 = vst [vmem:[#allocation175_spill] sm:$0xff] %v24203_v51  ;;  %v12283_v13 = vadd.f32 %v12282_v36, %v12090_v40  ;;  %v12092_v55 = vadd.f32 %v12091_v14, %v26909_v6  ;;  %v24207_v8 = vadd.f32 %v12279_v10, %v23813_v25  ;;  %v26915_v36 = vld [vmem:[#allocation26_spill] sm:$0xff]  ;;  %v26917_v6 = vld [vmem:[#allocation168_spill] sm:$0xff]  ;;  %v26918_v10 = vld [vmem:[#allocation51_spill] sm:$0xff] }
 0x564   : > { %v12298_v17 = vpop.f32.mrf.mxu0  ;;  %v12093_v33 = vpop.f32.mrf.mxu1 }
 0x565   : > { %26910 = vst [vmem:[#allocation57_spill] sm:$0xff] %v24207_v8  ;;  %v12285_v37 = vadd.f32 %v12284_v46, %v12092_v55  ;;  %v12094_v7 = vadd.f32 %v12093_v33, %v26911_v19  ;;  %v24211_v61 = vadd.f32 %v12283_v13, %v26912_v54  ;;  %v26919_v55 = vld [vmem:[#allocation137_spill] sm:$0xff]  ;;  %v26920_v19 = vld [vmem:[#allocation170_spill] sm:$0xff] }
 0x566   : > { %v12302_v48 = vpop.f32.mrf.mxu0  ;;  %v12095_v4 = vpop.f32.mrf.mxu1 }
 0x567   : > { %26913 = vst [vmem:[#allocation182_spill] sm:$0xff] %v24211_v61  ;;  %v12287_v24 = vadd.f32 %v12286_v28, %v12094_v7  ;;  %v12096_v57 = vadd.f32 %v12095_v4, %v26914_v5  ;;  %v24215_v40 = vadd.f32 %v12285_v37, %v26915_v36  ;;  %v26922_v7 = vld [vmem:[#allocation166_spill] sm:$0xff] }
 0x568   : > { %v12304_v51 = vpop.f32.mrf.mxu0  ;;  %v12099_v14 = vpop.f32.mrf.mxu1  ;;  %14135 = vmatmul.mubr.bf16.gmra.mxu1 %v26917_v6  ;;  %v26924_v6 = vld [vmem:[#allocation140_spill] sm:$0xff] }
 0x569   : > { %26916 = vst [vmem:[#allocation49_spill] sm:$0xff] %v24215_v40  ;;  %v12289_v25 = vadd.f32 %v12288_v63, %v12096_v57  ;;  %v12100_v46 = vadd.f32 %v12099_v14, %v26918_v10  ;;  %14144 = vmatprep.mubr.bf16.mxu1 %v26919_v55  ;;  %v24221_v13 = vadd.f32 %v12287_v24, %v26920_v19  ;;  %v26926_v24 = vld [vmem:[#allocation111_spill] sm:$0xff] }
 0x56a   : > { %v12306_v33 = vpop.f32.mrf.mxu0  ;;  %v12101_v54 = vpop.f32.mrf.mxu1 }
 0x56b   : > { %26921 = vst [vmem:[#allocation90_spill] sm:$0xff] %v24221_v13  ;;  %v12293_v28 = vadd.f32 %v12292_v56, %v12100_v46  ;;  %v12102_v4 = vadd.f32 %v12101_v54, %v26922_v7  ;;  %v24225_v37 = vadd.f32 %v12289_v25, %v23849_v1  ;;  %v26927_v56 = vld [vmem:[#allocation56_spill] sm:$0xff]  ;;  %v26929_v7 = vld [vmem:[#allocation138_spill] sm:$0xff]  ;;  %v26930_v25 = vld [vmem:[#allocation53_spill] sm:$0xff] }
 0x56c   : > { %v12308_v5 = vpop.f32.mrf.mxu0  ;;  %v12103_v36 = vpop.f32.mrf.mxu1 }
 0x56d   : > { %26923 = vst [vmem:[#allocation158_spill] sm:$0xff] %v24225_v37  ;;  %v12295_v40 = vadd.f32 %v12294_v11, %v12102_v4  ;;  %v12104_v63 = vadd.f32 %v12103_v36, %v26924_v6  ;;  %v24229_v14 = vadd.f32 %v12293_v28, %v23855_v42  ;;  %v26931_v4 = vld [vmem:[#allocation31_spill] sm:$0xff]  ;;  %v26932_v6 = vld [vmem:[#allocation186_spill] sm:$0xff] }
 0x56e   : > { %v12312_v57 = vpop.f32.mrf.mxu0  ;;  %v12105_v10 = vpop.f32.mrf.mxu1 }
 0x56f   : > { %26925 = vst [vmem:[#allocation19_spill] sm:$0xff] %v24229_v14  ;;  %v12297_v55 = vadd.f32 %v12296_v31, %v12104_v63  ;;  %v12106_v19 = vadd.f32 %v12105_v10, %v26926_v24  ;;  %v24233_v46 = vadd.f32 %v12295_v40, %v26927_v56  ;;  %v26934_v63 = vld [vmem:[#allocation127_spill] sm:$0xff]  ;;  %v26995_v14 = vld [vmem:[#allocation73_spill] sm:$0xff] }
 0x570   : > { %v12314_v13 = vpop.f32.mrf.mxu0  ;;  %v12109_v54 = vpop.f32.mrf.mxu1  ;;  %14145 = vmatmul.mubr.bf16.gmra.mxu1 %v26929_v7  ;;  %v26936_v7 = vld [vmem:[#allocation37_spill] sm:$0xff] }
 0x571   : > { %26928 = vst [vmem:[#allocation55_spill] sm:$0xff] %v24233_v46  ;;  %v12299_v1 = vadd.f32 %v12298_v17, %v12106_v19  ;;  %v12110_v11 = vadd.f32 %v12109_v54, %v26930_v25  ;;  %14154 = vmatprep.mubr.bf16.mxu1 %v26931_v4  ;;  %v24239_v42 = vadd.f32 %v12297_v55, %v26932_v6  ;;  %v26938_v55 = vld [vmem:[#allocation117_spill] sm:$0xff] }
 0x572   : > { %v12316_v36 = vpop.f32.mrf.mxu0  ;;  %v12111_v28 = vpop.f32.mrf.mxu1 }
 0x573   : > { %26933 = vst [vmem:[#allocation20_spill] sm:$0xff] %v24239_v42  ;;  %v12303_v31 = vadd.f32 %v12302_v48, %v12110_v11  ;;  %v12112_v10 = vadd.f32 %v12111_v28, %v26934_v63  ;;  %v24243_v40 = vadd.f32 %v12299_v1, %v23885_v23  ;;  %v26939_v48 = vld [vmem:[#allocation162_spill] sm:$0xff]  ;;  %v26941_v63 = vld [vmem:[#allocation172_spill] sm:$0xff]  ;;  %v26942_v1 = vld [vmem:[#allocation185_spill] sm:$0xff] }
 0x574   : > { %v12318_v24 = vpop.f32.mrf.mxu0  ;;  %v12113_v56 = vpop.f32.mrf.mxu1 }
 0x575   : > { %26935 = vst [vmem:[#allocation14_spill] sm:$0xff] %v24243_v40  ;;  %v12305_v46 = vadd.f32 %v12304_v51, %v12112_v10  ;;  %v12114_v17 = vadd.f32 %v12113_v56, %v26936_v7  ;;  %v24247_v54 = vadd.f32 %v12303_v31, %v23891_v20  ;;  %v26943_v10 = vld [vmem:[#allocation76_spill] sm:$0xff]  ;;  %v26944_v7 = vld [vmem:[#allocation163_spill] sm:$0xff] }
 0x576   : > { %v12322_v19 = vpop.f32.mrf.mxu0  ;;  %v12115_v25 = vpop.f32.mrf.mxu1  ;;  %v26952_v40 = vld [vmem:[#allocation112_spill] sm:$0xff] }
 0x577   : > { %26937 = vst [vmem:[#allocation184_spill] sm:$0xff] %v24247_v54  ;;  %v12307_v4 = vadd.f32 %v12306_v33, %v12114_v17  ;;  %v12116_v6 = vadd.f32 %v12115_v25, %v26938_v55  ;;  %v24251_v11 = vadd.f32 %v12305_v46, %v26939_v48  ;;  %v26946_v17 = vld [vmem:[#allocation129_spill] sm:$0xff] }
 0x578   : > { %v12324_v42 = vpop.f32.mrf.mxu0  ;;  %v12119_v28 = vpop.f32.mrf.mxu1  ;;  %14155 = vmatmul.mubr.bf16.gmra.mxu1 %v26941_v63  ;;  %v26947_v54 = vld [vmem:[#allocation21_spill] sm:$0xff]  ;;  %v26949_v63 = vld [vmem:[#allocation160_spill] sm:$0xff] }
 0x579   : > { %26940 = vst [vmem:[#allocation178_spill] sm:$0xff] %v24251_v11  ;;  %v12309_v23 = vadd.f32 %v12308_v5, %v12116_v6  ;;  %v12120_v51 = vadd.f32 %v12119_v28, %v26942_v1  ;;  %14164 = vmatprep.mubr.bf16.mxu1 %v26943_v10  ;;  %v24257_v20 = vadd.f32 %v12307_v4, %v26944_v7  ;;  %v26950_v6 = vld [vmem:[#allocation128_spill] sm:$0xff] }
 0x57a   : > { %v12326_v56 = vpop.f32.mrf.mxu0  ;;  %v12121_v31 = vpop.f32.mrf.mxu1 }
 0x57b   : > { %26945 = vst [vmem:[#allocation54_spill] sm:$0xff] %v24257_v20  ;;  %v12313_v33 = vadd.f32 %v12312_v57, %v12120_v51  ;;  %v12122_v25 = vadd.f32 %v12121_v31, %v26946_v17  ;;  %v24261_v46 = vadd.f32 %v12309_v23, %v26947_v54  ;;  %v26953_v20 = vld [vmem:[#allocation121_spill] sm:$0xff]  ;;  %v26955_v31 = vld [vmem:[#allocation174_spill] sm:$0xff]  ;;  %v26956_v23 = vld [vmem:[#allocation80_spill] sm:$0xff] }
 0x57c   : > { %v12328_v55 = vpop.f32.mrf.mxu0  ;;  %v12123_v48 = vpop.f32.mrf.mxu1 }
 0x57d   : > { %26948 = vst [vmem:[#allocation177_spill] sm:$0xff] %v24261_v46  ;;  %v12315_v11 = vadd.f32 %v12314_v13, %v12122_v25  ;;  %v12124_v5 = vadd.f32 %v12123_v48, %v26949_v63  ;;  %v24265_v28 = vadd.f32 %v12313_v33, %v26950_v6  ;;  %v26957_v13 = vld [vmem:[#allocation93_spill] sm:$0xff]  ;;  %v26958_v25 = vld [vmem:[#allocation147_spill] sm:$0xff]  ;;  %v26961_v6 = vld [vmem:[#allocation42_spill] sm:$0xff] }
 0x57e   : > { %v12125_v1 = vpop.f32.mrf.mxu1  ;;  %v12332_v7 = vpop.f32.mrf.mxu0  ;;  %v26994_v46 = vld [vmem:[#allocation123_spill] sm:$0xff] }
 0x57f   : > { %26951 = vst [vmem:[#allocation62_spill] sm:$0xff] %v24265_v28  ;;  %v12317_v10 = vadd.f32 %v12316_v36, %v12124_v5  ;;  %v12126_v4 = vadd.f32 %v12125_v1, %v26952_v40  ;;  %v24269_v57 = vadd.f32 %v12315_v11, %v26953_v20  ;;  %v26960_v5 = vld [vmem:[#allocation18_spill] sm:$0xff] }
 0x580   : > { %v12129_v51 = vpop.f32.mrf.mxu1  ;;  %14165 = vmatmul.mubr.bf16.gmra.mxu1 %v26955_v31  ;;  %v12334_v36 = vpop.f32.mrf.mxu0 }
 0x581   : > { %26954 = vst [vmem:[#allocation75_spill] sm:$0xff] %v24269_v57  ;;  %v12319_v54 = vadd.f32 %v12318_v24, %v12126_v4  ;;  %v12130_v17 = vadd.f32 %v12129_v51, %v26956_v23  ;;  %14174 = vmatprep.mubr.bf16.mxu1 %v26957_v13  ;;  %v24275_v48 = vadd.f32 %v12317_v10, %v26958_v25  ;;  %v26963_v57 = vld [vmem:[#allocation22_spill] sm:$0xff]  ;;  %v26964_v24 = vld [vmem:[#allocation148_spill] sm:$0xff] }
 0x582   : > { %v12131_v33 = vpop.f32.mrf.mxu1  ;;  %v12336_v23 = vpop.f32.mrf.mxu0  ;;  %v26966_v10 = vld [vmem:[#allocation144_spill] sm:$0xff] }
 0x583   : > { %26959 = vst [vmem:[#allocation171_spill] sm:$0xff] %v24275_v48  ;;  %v12323_v63 = vadd.f32 %v12322_v19, %v12130_v17  ;;  %v12132_v40 = vadd.f32 %v12131_v33, %v26960_v5  ;;  %v24279_v1 = vadd.f32 %v12319_v54, %v26961_v6  ;;  %v26967_v48 = vld [vmem:[#allocation150_spill] sm:$0xff]  ;;  %v26970_v5 = vld [vmem:[#allocation24_spill] sm:$0xff] }
 0x584   : > { %v12133_v11 = vpop.f32.mrf.mxu1  ;;  %v26969_v33 = vld [vmem:[#allocation142_spill] sm:$0xff] }
 0x585   : > { %26962 = vst [vmem:[#allocation17_spill] sm:$0xff] %v24279_v1  ;;  %v12325_v20 = vadd.f32 %v12324_v42, %v12132_v40  ;;  %v12134_v31 = vadd.f32 %v12133_v11, %v26963_v57  ;;  %v24283_v4 = vadd.f32 %v12323_v63, %v26964_v24  ;;  %v26971_v42 = vld [vmem:[#allocation78_spill] sm:$0xff]  ;;  %v12338_v11 = vpop.f32.mrf.mxu0 }
 0x586   : > { %v12135_v51 = vpop.f32.mrf.mxu1  ;;  %v26972_v57 = vld [vmem:[#allocation74_spill] sm:$0xff] }
 0x587   : > { %26965 = vst [vmem:[#allocation124_spill] sm:$0xff] %v24283_v4  ;;  %v12327_v13 = vadd.f32 %v12326_v56, %v12134_v31  ;;  %v12136_v25 = vadd.f32 %v12135_v51, %v26966_v10  ;;  %v24287_v19 = vadd.f32 %v12325_v20, %v26967_v48  ;;  %v26974_v56 = vld [vmem:[#allocation83_spill] sm:$0xff]  ;;  %v26975_v51 = vld [vmem:[#allocation32_spill] sm:$0xff] }
 0x588   : > { %v12139_v17 = vpop.f32.mrf.mxu1  ;;  %14175 = vmatmul.mubr.bf16.gmra.mxu1 %v26969_v33 }
 0x589   : > { %26968 = vst [vmem:[#allocation92_spill] sm:$0xff] %v24287_v19  ;;  %v12329_v54 = vadd.f32 %v12328_v55, %v12136_v25  ;;  %v12140_v6 = vadd.f32 %v12139_v17, %v26970_v5  ;;  %14184 = vmatprep.mubr.bf16.mxu1 %v26971_v42  ;;  %v24293_v40 = vadd.f32 %v12327_v13, %v26972_v57  ;;  %v26977_v19 = vld [vmem:[#allocation139_spill] sm:$0xff]  ;;  %v26978_v55 = vld [vmem:[#allocation141_spill] sm:$0xff]  ;;  %v24303_v5 = vpop.f32.mrf.mxu0 }
 0x58a   : > { %v12141_v63 = vpop.f32.mrf.mxu1  ;;  %v26980_v42 = vld [vmem:[#allocation179_spill] sm:$0xff] }
 0x58b   : > { %26973 = vst [vmem:[#allocation161_spill] sm:$0xff] %v24293_v40  ;;  %v12333_v24 = vadd.f32 %v12332_v7, %v12140_v6  ;;  %v12142_v31 = vadd.f32 %v12141_v63, %v26974_v56  ;;  %v24297_v10 = vadd.f32 %v12329_v54, %v26975_v51  ;;  %v26981_v40 = vld [vmem:[#allocation38_spill] sm:$0xff]  ;;  %v26983_v54 = vld [vmem:[#allocation173_spill] sm:$0xff] }
 0x58c   : > { %v12143_v48 = vpop.f32.mrf.mxu1 }
 0x58d   : > { %26976 = vst [vmem:[#allocation67_spill] sm:$0xff] %v24297_v10  ;;  %v12335_v20 = vadd.f32 %v12334_v36, %v12142_v31  ;;  %v12144_v33 = vadd.f32 %v12143_v48, %v26977_v19  ;;  %v24301_v25 = vadd.f32 %v12333_v24, %v26978_v55  ;;  %v26984_v36 = vld [vmem:[#allocation68_spill] sm:$0xff]  ;;  %v26985_v19 = vld [vmem:[#allocation95_spill] sm:$0xff]  ;;  %v24318_v31 = vpop.f32.mrf.mxu0 }
 0x58e   : > { %v12145_v17 = vpop.f32.mrf.mxu1 }
 0x58f   : > { %26979 = vst [vmem:[#allocation143_spill] sm:$0xff] %v24301_v25  ;;  %v12337_v13 = vadd.f32 %v12336_v23, %v12144_v33  ;;  %v12146_v57 = vadd.f32 %v12145_v17, %v26980_v42  ;;  %v24307_v7 = vadd.f32 %v12335_v20, %v26981_v40  ;;  %v24327_v48 = vpop.f32.mrf.mxu0  ;;  %v26989_v33 = vld [vmem:[#allocation118_spill] sm:$0xff] }
 0x590   : > { %v24309_v6 = vpop.f32.mrf.mxu1  ;;  %14185 = vmatmul.mubr.bf16.gmra.mxu1 %v26983_v54  ;;  %v26990_v54 = vld [vmem:[#allocation69_spill] sm:$0xff]  ;;  %v26993_v25 = vld [vmem:[#allocation130_spill] sm:$0xff] }
 0x591   : > { %26982 = vst [vmem:[#allocation72_spill] sm:$0xff] %v24307_v7  ;;  %v12339_v63 = vadd.f32 %v12338_v11, %v12146_v57  ;;  %14194 = vmatprep.mubr.bf16.mxu1 %v26984_v36  ;;  %v24314_v56 = vadd.f32 %v12337_v13, %v26985_v19  ;;  %v26988_v11 = vld [vmem:[#allocation164_spill] sm:$0xff]  ;;  %v24335_v17 = vpop.f32.mrf.mxu0 }
 0x592   : > { %v24316_v24 = vpop.f32.mrf.mxu1  ;;  %v26992_v7 = vld [vmem:[#allocation16_spill] sm:$0xff] }
 0x593   : > { %26986 = vst [vmem:[#allocation50_spill] sm:$0xff] %v24314_v56  ;;  %v24321_v23 = vadd.f32 %v12339_v63, %v24010_v62  ;;  %v24341_v42 = vpop.f32.mrf.mxu0  ;;  %v26991_v63 = vld [vmem:[#allocation165_spill] sm:$0xff] }
 0x594   : > { %v24323_v51 = vpop.f32.mrf.mxu1 }
 0x595   : > { %26987 = vst [vmem:[#allocation77_spill] sm:$0xff] %v24321_v23  ;;  %v24349_v19 = vpop.f32.mrf.mxu0 }
 0x596   : > { %v24325_v40 = vpop.f32.mrf.mxu1 }
 0x597   : > { %v24355_v23 = vpop.f32.mrf.mxu0 }
 0x598   : > { %v24329_v20 = vpop.f32.mrf.mxu1  ;;  %14195 = vmatmul.mubr.bf16.gmra.mxu1 %v26988_v11 }
 0x599   : > { %14204 = vmatprep.mubr.bf16.mxu1 %v26989_v33 }
 0x59a   : > { %v24333_v55 = vpop.f32.mrf.mxu1 }
 0x59c   : > { %v24337_v13 = vpop.f32.mrf.mxu1 }
 0x59e   : > { %v24339_v62 = vpop.f32.mrf.mxu1 }
 0x5a0   : > { %v24343_v57 = vpop.f32.mrf.mxu1  ;;  %14205 = vmatmul.mubr.bf16.gmra.mxu1 %v26990_v54  ;;  %v24363_v54 = vpop.f32.mrf.mxu0 }
 0x5a1   : > { %14214 = vmatprep.mubr.bf16.mxu1 %v26991_v63 }
 0x5a2   : > { %v24347_v36 = vpop.f32.mrf.mxu1  ;;  %v24369_v1 = vpop.f32.mrf.mxu0 }
 0x5a4   : > { %v24351_v11 = vpop.f32.mrf.mxu1 }
 0x5a6   : > { %v24353_v33 = vpop.f32.mrf.mxu1 }
 0x5a8   : > { %v24357_v56 = vpop.f32.mrf.mxu1  ;;  %14215 = vmatmul.mubr.bf16.gmra.mxu1 %v26992_v7  ;;  %v24377_v7 = vpop.f32.mrf.mxu0 }
 0x5a9   : > { %14224 = vmatprep.mubr.bf16.mxu1 %v26993_v25 }
 0x5aa   : > { %v24361_v10 = vpop.f32.mrf.mxu1  ;;  %v24383_v8 = vpop.f32.mrf.mxu0 }
 0x5ac   : > { %v24365_v63 = vpop.f32.mrf.mxu1 }
 0x5ae   : > { %v24367_v4 = vpop.f32.mrf.mxu1 }
 0x5b0   : > { %v24371_v28 = vpop.f32.mrf.mxu1  ;;  %14225 = vmatmul.mubr.bf16.gmra.mxu1 %v26994_v46  ;;  %v24391_v46 = vpop.f32.mrf.mxu0 }
 0x5b1   : > { %14234 = vmatprep.mubr.bf16.mxu1 %v26995_v14 }
 0x5b2   : > { %v24375_v37 = vpop.f32.mrf.mxu1  ;;  %v24397_v26 = vpop.f32.mrf.mxu0 }
 0x5b4   : > { %v24379_v25 = vpop.f32.mrf.mxu1 }
 0x5b5   : > { %26996 = vst [vmem:[#allocation64_spill] sm:$0xff] %v24379_v25  ;;  %v27063_v25 = vld [vmem:[#allocation125_spill] sm:$0xff] }
 0x5b6   : > { %v24381_v61 = vpop.f32.mrf.mxu1 }
 0x5b7   : > { %26997 = vst [vmem:[#allocation85_spill] sm:$0xff] %v24381_v61 }
 0x5b8   : > { %v24385_v16 = vpop.f32.mrf.mxu1  ;;  %14235 = vmatmul.mubr.bf16.gmra.mxu1 %v26999_v50  ;;  %v24405_v50 = vpop.f32.mrf.mxu0 }
 0x5b9   : > { %26998 = vst [vmem:[#allocation36_spill] sm:$0xff] %v24385_v16  ;;  %14244 = vmatprep.mubr.bf16.mxu1 %v27000_v12 }
 0x5ba   : > { %v24389_v29 = vpop.f32.mrf.mxu1  ;;  %v24411_v9 = vpop.f32.mrf.mxu0 }
 0x5bb   : > { %27001 = vst [vmem:[#allocation84_spill] sm:$0xff] %v24389_v29 }
 0x5bc   : > { %v24393_v14 = vpop.f32.mrf.mxu1 }
 0x5bd   : > { %27002 = vst [vmem:[#allocation63_spill] sm:$0xff] %v24393_v14 }
 0x5be   : > { %v24395_v0 = vpop.f32.mrf.mxu1 }
 0x5bf   : > { %27003 = vst [vmem:[#allocation102_spill] sm:$0xff] %v24395_v0 }
 0x5c0   : > { %v24399_v60 = vpop.f32.mrf.mxu1  ;;  %14245 = vmatmul.mubr.bf16.gmra.mxu1 %v27005_v32 }
 0x5c1   : > { %27004 = vst [vmem:[#allocation65_spill] sm:$0xff] %v24399_v60  ;;  %14254 = vmatprep.mubr.bf16.mxu1 %v26841_v15  ;;  %v24418_v60 = vpop.f32.mrf.mxu0 }
 0x5c2   : > { %v24403_v45 = vpop.f32.mrf.mxu1 }
 0x5c3   : > { %27006 = vst [vmem:[#allocation86_spill] sm:$0xff] %v24403_v45  ;;  %v24424_v45 = vpop.f32.mrf.mxu0 }
 0x5c4   : > { %v24407_v12 = vpop.f32.mrf.mxu1 }
 0x5c5   : > { %27007 = vst [vmem:[#allocation88_spill] sm:$0xff] %v24407_v12 }
 0x5c6   : > { %v24409_v39 = vpop.f32.mrf.mxu1 }
 0x5c7   : > { %27008 = vst [vmem:[#allocation40_spill] sm:$0xff] %v24409_v39  ;;  %v24430_v39 = vpop.f32.mrf.mxu0 }
 0x5c8   : > { %v24413_v14 = vpop.f32.mrf.mxu1  ;;  %14255 = vmatmul.mubr.bf16.gmra.mxu1 %v26852_v3 }
 0x5c9   : > { %27009 = vst [vmem:[#allocation9_spill] sm:$0xff] %v24413_v14  ;;  %v24436_v3 = vpop.f32.mrf.mxu0 }
 0x5ca   : > { %v24416_v0 = vpop.f32.mrf.mxu1  ;;  %27017 = vst [vmem:[#allocation11_spill] sm:$0xff] %v24436_v3 }
 0x5cb   : > { %27010 = vst [vmem:[#allocation91_spill] sm:$0xff] %v24416_v0 }
 0x5cc   : > { %v24420_v32 = vpop.f32.mrf.mxu1 }
 0x5cd   : > { %27011 = vst [vmem:[#allocation10_spill] sm:$0xff] %v24420_v32  ;;  %v24442_v32 = vpop.f32.mrf.mxu0 }
 0x5ce   : > { %v24422_v15 = vpop.f32.mrf.mxu1  ;;  %27020 = vst [vmem:[#allocation122_spill] sm:$0xff] %v24442_v32 }
 0x5cf   : > { %27012 = vst [vmem:[#allocation58_spill] sm:$0xff] %v24422_v15 }
 0x5d0   : > { %v24426_v30 = vpop.f32.mrf.mxu1 }
 0x5d1   : > { %27013 = vst [vmem:[#allocation94_spill] sm:$0xff] %v24426_v30  ;;  %v24448_v30 = vpop.f32.mrf.mxu0 }
 0x5d2   : > { %v24428_v12 = vpop.f32.mrf.mxu1  ;;  %27023 = vst [vmem:[#allocation12_spill] sm:$0xff] %v24448_v30 }
 0x5d3   : > { %27014 = vst [vmem:[#allocation136_spill] sm:$0xff] %v24428_v12 }
 0x5d4   : > { %v24432_v29 = vpop.f32.mrf.mxu1 }
 0x5d5   : > { %27015 = vst [vmem:[#allocation8_spill] sm:$0xff] %v24432_v29  ;;  %v24454_v29 = vpop.f32.mrf.mxu0 }
 0x5d6   : > { %v24434_v14 = vpop.f32.mrf.mxu1  ;;  %27026 = vst [vmem:[#allocation71_spill] sm:$0xff] %v24454_v29 }
 0x5d7   : > { %27016 = vst [vmem:[#allocation153_spill] sm:$0xff] %v24434_v14 }
 0x5d8   : > { %v24438_v0 = vpop.f32.mrf.mxu1 }
 0x5d9   : > { %27018 = vst [vmem:[#allocation115_spill] sm:$0xff] %v24438_v0  ;;  %v24460_v0 = vpop.f32.mrf.mxu0 }
 0x5da   : > { %v24440_v41 = vpop.f32.mrf.mxu1  ;;  %27029 = vst [vmem:[#allocation132_spill] sm:$0xff] %v24460_v0 }
 0x5db   : > { %27019 = vst [vmem:[#allocation120_spill] sm:$0xff] %v24440_v41 }
 0x5dc   : > { %v24444_v15 = vpop.f32.mrf.mxu1 }
 0x5dd   : > { %27021 = vst [vmem:[#allocation135_spill] sm:$0xff] %v24444_v15  ;;  %v24466_v15 = vpop.f32.mrf.mxu0 }
 0x5de   : > { %v24446_v21 = vpop.f32.mrf.mxu1  ;;  %27032 = vst [vmem:[#allocation157_spill] sm:$0xff] %v24466_v15 }
 0x5df   : > { %27022 = vst [vmem:[#allocation126_spill] sm:$0xff] %v24446_v21 }
 0x5e0   : > { %v24450_v12 = vpop.f32.mrf.mxu1 }
 0x5e1   : > { %27024 = vst [vmem:[#allocation131_spill] sm:$0xff] %v24450_v12  ;;  %v24472_v12 = vpop.f32.mrf.mxu0 }
 0x5e2   : > { %v24452_v16 = vpop.f32.mrf.mxu1  ;;  %27035 = vst [vmem:[#allocation48_spill] sm:$0xff] %v24472_v12 }
 0x5e3   : > { %27025 = vst [vmem:[#allocation107_spill] sm:$0xff] %v24452_v16 }
 0x5e4   : > { %v24456_v14 = vpop.f32.mrf.mxu1 }
 0x5e5   : > { %27027 = vst [vmem:[#allocation35_spill] sm:$0xff] %v24456_v14  ;;  %v24478_v14 = vpop.f32.mrf.mxu0 }
 0x5e6   : > { %v24458_v2 = vpop.f32.mrf.mxu1  ;;  %27038 = vst [vmem:[#allocation103_spill] sm:$0xff] %v24478_v14 }
 0x5e7   : > { %27028 = vst [vmem:[#allocation100_spill] sm:$0xff] %v24458_v2 }
 0x5e8   : > { %v24462_v41 = vpop.f32.mrf.mxu1 }
 0x5e9   : > { %27030 = vst [vmem:[#allocation44_spill] sm:$0xff] %v24462_v41  ;;  %v24484_v41 = vpop.f32.mrf.mxu0 }
 0x5ea   : > { %v24464_v32 = vpop.f32.mrf.mxu1  ;;  %27041 = vst [vmem:[#allocation109_spill] sm:$0xff] %v24484_v41 }
 0x5eb   : > { %27031 = vst [vmem:[#allocation97_spill] sm:$0xff] %v24464_v32 }
 0x5ec   : > { %v24468_v21 = vpop.f32.mrf.mxu1 }
 0x5ed   : > { %27033 = vst [vmem:[#allocation159_spill] sm:$0xff] %v24468_v21  ;;  %v24490_v21 = vpop.f32.mrf.mxu0 }
 0x5ee   : > { %v24470_v30 = vpop.f32.mrf.mxu1  ;;  %27044 = vst [vmem:[#allocation98_spill] sm:$0xff] %v24490_v21 }
 0x5ef   : > { %27034 = vst [vmem:[#allocation106_spill] sm:$0xff] %v24470_v30 }
 0x5f0   : > { %v24474_v16 = vpop.f32.mrf.mxu1 }
 0x5f1   : > { %27036 = vst [vmem:[#allocation113_spill] sm:$0xff] %v24474_v16  ;;  %v24496_v16 = vpop.f32.mrf.mxu0 }
 0x5f2   : > { %v24476_v29 = vpop.f32.mrf.mxu1  ;;  %27047 = vst [vmem:[#allocation29_spill] sm:$0xff] %v24496_v16 }
 0x5f3   : > { %27037 = vst [vmem:[#allocation66_spill] sm:$0xff] %v24476_v29 }
 0x5f4   : > { %v24480_v2 = vpop.f32.mrf.mxu1 }
 0x5f5   : > { %27039 = vst [vmem:[#allocation28_spill] sm:$0xff] %v24480_v2  ;;  %v24502_v2 = vpop.f32.mrf.mxu0 }
 0x5f6   : > { %v24482_v0 = vpop.f32.mrf.mxu1  ;;  %27050 = vst [vmem:[#allocation59_spill] sm:$0xff] %v24502_v2 }
 0x5f7   : > { %27040 = vst [vmem:[#allocation110_spill] sm:$0xff] %v24482_v0 }
 0x5f8   : > { %v24486_v32 = vpop.f32.mrf.mxu1 }
 0x5f9   : > { %27042 = vst [vmem:[#allocation99_spill] sm:$0xff] %v24486_v32  ;;  %v24508_v32 = vpop.f32.mrf.mxu0 }
 0x5fa   : > { %v24488_v15 = vpop.f32.mrf.mxu1  ;;  %27053 = vst [vmem:[#allocation45_spill] sm:$0xff] %v24508_v32  ;;  %v13918_v32 = vadd.f32 %v24327_v48, %v24323_v51  ;;  %v27064_v51 = vld [vmem:[#allocation33_spill] sm:$0xff] }
 0x5fb   : > { %27043 = vst [vmem:[#allocation114_spill] sm:$0xff] %v24488_v15 }
 0x5fc   : > { %v24492_v30 = vpop.f32.mrf.mxu1 }
 0x5fd   : > { %27045 = vst [vmem:[#allocation116_spill] sm:$0xff] %v24492_v30  ;;  %v24514_v30 = vpop.f32.mrf.mxu0 }
 0x5fe   : > { %v24494_v12 = vpop.f32.mrf.mxu1  ;;  %27056 = vst [vmem:[#allocation104_spill] sm:$0xff] %v24514_v30 }
 0x5ff   : > { %27046 = vst [vmem:[#allocation149_spill] sm:$0xff] %v24494_v12 }
 0x600   : > { %v24498_v29 = vpop.f32.mrf.mxu1 }
 0x601   : > { %27048 = vst [vmem:[#allocation25_spill] sm:$0xff] %v24498_v29 }
 0x602   : > { %v24500_v14 = vpop.f32.mrf.mxu1 }
 0x603   : > { %27049 = vst [vmem:[#allocation30_spill] sm:$0xff] %v24500_v14  ;;  %v16775_v14 = vld [vmem:[%s25093_s2 + $0x2] ss:$4 sm:$0x3] }
 0x604   : > { %v24504_v0 = vpop.f32.mrf.mxu1 }
 0x605   : > { %27051 = vst [vmem:[#allocation101_spill] sm:$0xff] %v24504_v0  ;;  %v24525_v0 = vpop.f32.mrf.mxu0 }
 0x606   : > { %v24506_v41 = vpop.f32.mrf.mxu1  ;;  %27059 = vst [vmem:[#allocation167_spill] sm:$0xff] %v24525_v0 }
 0x607   : > { %27052 = vst [vmem:[#allocation13_spill] sm:$0xff] %v24506_v41  ;;  %v13914_v41 = vadd.f32 %v24303_v5, %v24309_v6  ;;  %v24537_v5 = vpop.f32.mrf.mxu0  ;;  %v27062_v6 = vld [vmem:[#allocation145_spill] sm:$0xff] }
 0x608   : > { %v24510_v15 = vpop.f32.mrf.mxu1  ;;  %27061 = vst [vmem:[#allocation70_spill] sm:$0xff] %v24537_v5 }
 0x609   : > { %27054 = vst [vmem:[#allocation34_spill] sm:$0xff] %v24510_v15 }
 0x60a   : > { %v24512_v21 = vpop.f32.mrf.mxu1 }
 0x60b   : > { %27055 = vst [vmem:[#allocation151_spill] sm:$0xff] %v24512_v21  ;;  %v16776_v21 = vld [vmem:[%s25093_s2 + $0x3] ss:$4 sm:$0x3] }
 0x60c   : > { %v24516_v12 = vpop.f32.mrf.mxu1  ;;  %v24552_v5 = vrot.slane %v16776_v21, %v27063_v25 }
 0x60d   : > { %27057 = vst [vmem:[#allocation61_spill] sm:$0xff] %v24516_v12  ;;  %v13916_v12 = vadd.f32 %v24318_v31, %v24316_v24  ;;  %v24544_v24 = vrot.slane %v16775_v14, %v27063_v25 }
 0x60e   : > { %v24518_v16 = vpop.f32.mrf.mxu1 }
 0x60f   : > { %27058 = vst [vmem:[#allocation43_spill] sm:$0xff] %v24518_v16  ;;  %v27060_v16 = vld [vmem:[#allocation119_spill] sm:$0xff] }
 0x610   : > { %v14106_v29 = vpop.f32.mrf.mxu1  ;;  %v24533_v30 = vrot.slane %v16775_v14, %v27060_v16  ;;  %v24541_v61 = vrot.slane %v16776_v21, %v27060_v16  ;;  %v14457_v16 = vld [vmem:[%s18167_s30] sm:$0xff]  ;;  %v14458_v21 = vld [vmem:[%s18167_s30 + $0x8] sm:$0xff] }
 0x611   : > { %v14107_v15 = vadd.f32 %v14106_v29, %v13914_v41  ;;  %v13920_v41 = vadd.f32 %v24335_v17, %v24325_v40 }
 0x612   : > { %v14108_v2 = vpop.f32.mrf.mxu1 }
 0x613   : > { %v14329_v0 = vadd.f32 %v14107_v15, %v27062_v6  ;;  %v14109_v3 = vadd.f32 %v14108_v2, %v13916_v12  ;;  %v24555_v2 = vpop.f32.mrf.mxu0  ;;  %v13924_v12 = vadd.f32 %v24341_v42, %v24329_v20 }
 0x614   : > { %v14110_v29 = vpop.f32.mrf.mxu1 }
 0x615   : > { %v14598_v31 = vmul.f32 %v24533_v30, %v14329_v0  ;;  %v14330_v48 = vadd.f32 %v14109_v3, %v27064_v51  ;;  %v14111_v15 = vadd.f32 %v14110_v29, %v13918_v32  ;;  %v24573_v20 = vpop.f32.mrf.mxu0 }
 0x616   : > { %v14112_v6 = vpop.f32.mrf.mxu1 }
 0x617   : > { %v14675_v40 = vadd.f32 %v24541_v61, %v14598_v31  ;;  %v14599_v17 = vmul.f32 %v24544_v24, %v14330_v48  ;;  %v14331_v14 = vadd.f32 %v14111_v15, %v24033_v35  ;;  %v14113_v0 = vadd.f32 %v14112_v6, %v13920_v41  ;;  %v14459_v41 = vld [vmem:[%s18167_s30 + $0x10] sm:$0xff] }
 0x618   : > { %v14116_v25 = vpop.f32.mrf.mxu1  ;;  %v13926_v31 = vadd.f32 %v24349_v19, %v24333_v55  ;;  %v13928_v35 = vadd.f32 %v24355_v23, %v24337_v13 }
 0x619   : > { %v14739_v32 = vadd.f32 %v14675_v40, %v14457_v16  ;;  %v14676_v3 = vadd.f32 %v24552_v5, %v14599_v17  ;;  %v14600_v29 = vmul.f32 %v24533_v30, %v14331_v14  ;;  %v14332_v51 = vadd.f32 %v14113_v0, %v24036_v53  ;;  %v14460_v17 = vld [vmem:[%s18167_s30 + $0x18] sm:$0xff] }
 0x61a   : > { %v14117_v48 = vadd.f32 %v14116_v25, %v13924_v12  ;;  %v14118_v15 = vpop.f32.mrf.mxu1  ;;  %v13930_v53 = vadd.f32 %v24363_v54, %v24339_v62  ;;  %v13934_v62 = vadd.f32 %v24369_v1, %v24343_v57  ;;  %v24589_v25 = vpop.f32.mrf.mxu0  ;;  %v13936_v1 = vadd.f32 %v24377_v7, %v24347_v36 }
 0x61b   : > { %v14803_v42 = vmax.f32 %v14739_v32, 0.0  ;;  %v14740_v6 = vadd.f32 %v14676_v3, %v14458_v21  ;;  %v14677_v16 = vadd.f32 %v24541_v61, %v14600_v29  ;;  %v14601_v40 = vmul.f32 %v24544_v24, %v14332_v51  ;;  %v14461_v29 = vld [vmem:[%s18167_s30 + $0x20] sm:$0xff] }
 0x61c   : > { %v14333_v55 = vadd.f32 %v14117_v48, %v24041_v18  ;;  %v14119_v19 = vadd.f32 %v14118_v15, %v13926_v31  ;;  %v14120_v23 = vpop.f32.mrf.mxu1  ;;  %v14462_v48 = vld [vmem:[%s18167_s30 + $0x28] sm:$0xff]  ;;  %v24604_v36 = vpop.f32.mrf.mxu0 }
 0x61d   : > { %14867 = vst [vmem:[%s24581_s29] sm:$0xff] %v14803_v42  ;;  %v14804_v13 = vmax.f32 %v14740_v6, 0.0  ;;  %v14741_v14 = vadd.f32 %v14677_v16, %v14459_v41  ;;  %v14678_v0 = vadd.f32 %v24552_v5, %v14601_v40  ;;  %v14121_v12 = vadd.f32 %v14120_v23, %v13928_v35  ;;  %v14463_v40 = vld [vmem:[%s18167_s30 + $0x30] sm:$0xff] }
 0x61e   : > { %v14602_v54 = vmul.f32 %v24533_v30, %v14333_v55  ;;  %v14334_v18 = vadd.f32 %v14119_v19, %v24046_v34  ;;  %v14122_v21 = vpop.f32.mrf.mxu1 }
 0x61f   : > { %14868 = vst [vmem:[%s24581_s29 + $0x8] sm:$0xff] %v14804_v13  ;;  %v14805_v32 = vmax.f32 %v14741_v14, 0.0  ;;  %v14742_v3 = vadd.f32 %v14678_v0, %v14460_v17  ;;  %v14335_v51 = vadd.f32 %v14121_v12, %v24052_v59  ;;  %v14123_v31 = vadd.f32 %v14122_v21, %v13930_v53  ;;  %v14464_v14 = vld [vmem:[%s18167_s30 + $0x38] sm:$0xff] }
 0x620   : > { %v14679_v57 = vadd.f32 %v24541_v61, %v14602_v54  ;;  %v14603_v35 = vmul.f32 %v24544_v24, %v14334_v18  ;;  %v14126_v34 = vpop.f32.mrf.mxu1  ;;  %v13944_v21 = vadd.f32 %v24397_v26, %v24357_v56  ;;  %v14466_v26 = vld [vmem:[%s18167_s30 + $0x48] sm:$0xff] }
 0x621   : > { %14869 = vst [vmem:[%s24581_s29 + $0x10] sm:$0xff] %v14805_v32  ;;  %v14806_v41 = vmax.f32 %v14742_v3, 0.0  ;;  %v14604_v15 = vmul.f32 %v24533_v30, %v14335_v51  ;;  %v14336_v42 = vadd.f32 %v14123_v31, %v24056_v49  ;;  %v14127_v6 = vadd.f32 %v14126_v34, %v13934_v62 }
 0x622   : > { %v14743_v59 = vadd.f32 %v14679_v57, %v14461_v29  ;;  %v14680_v16 = vadd.f32 %v24552_v5, %v14603_v35  ;;  %v14128_v53 = vpop.f32.mrf.mxu1  ;;  %v13938_v49 = vadd.f32 %v24383_v8, %v24351_v11  ;;  %v14465_v11 = vld [vmem:[%s18167_s30 + $0x40] sm:$0xff]  ;;  %v24622_v29 = vpop.f32.mrf.mxu0 }
 0x623   : > { %14870 = vst [vmem:[%s24581_s29 + $0x18] sm:$0xff] %v14806_v41  ;;  %v14681_v7 = vadd.f32 %v24541_v61, %v14604_v15  ;;  %v14605_v17 = vmul.f32 %v24544_v24, %v14336_v42  ;;  %v14337_v55 = vadd.f32 %v14127_v6, %v24061_v47  ;;  %v14129_v19 = vadd.f32 %v14128_v53, %v13936_v1 }
 0x624   : > { %v14807_v23 = vmax.f32 %v14743_v59, 0.0  ;;  %v14744_v13 = vadd.f32 %v14680_v16, %v14462_v48  ;;  %v14130_v0 = vpop.f32.mrf.mxu1  ;;  %v13940_v47 = vadd.f32 %v24391_v46, %v24353_v33  ;;  %v13946_v33 = vadd.f32 %v24405_v50, %v24361_v10  ;;  %v14467_v16 = vld [vmem:[%s18167_s30 + $0x50] sm:$0xff] }
 0x625   : > { %v14745_v12 = vadd.f32 %v14681_v7, %v14463_v40  ;;  %v14682_v62 = vadd.f32 %v24552_v5, %v14605_v17  ;;  %v14606_v54 = vmul.f32 %v24533_v30, %v14337_v55  ;;  %v14338_v18 = vadd.f32 %v14129_v19, %v24066_v43  ;;  %v14468_v55 = vld [vmem:[%s18167_s30 + $0x58] sm:$0xff] }
 0x626   : > { %14871 = vst [vmem:[%s24581_s29 + $0x20] sm:$0xff] %v14807_v23  ;;  %v14808_v8 = vmax.f32 %v14744_v13, 0.0  ;;  %v14131_v32 = vadd.f32 %v14130_v0, %v13938_v49  ;;  %v14132_v3 = vpop.f32.mrf.mxu1  ;;  %v13948_v15 = vadd.f32 %v24411_v9, %v24365_v63  ;;  %v13950_v9 = vadd.f32 %v24418_v60, %v24367_v4 }
 0x627   : > { %v14809_v51 = vmax.f32 %v14745_v12, 0.0  ;;  %v14746_v31 = vadd.f32 %v14682_v62, %v14464_v14  ;;  %v14683_v1 = vadd.f32 %v24541_v61, %v14606_v54  ;;  %v14607_v43 = vmul.f32 %v24544_v24, %v14338_v18  ;;  %v14469_v14 = vld [vmem:[%s18167_s30 + $0x60] sm:$0xff] }
 0x628   : > { %14872 = vst [vmem:[%s24581_s29 + $0x28] sm:$0xff] %v14808_v8  ;;  %v14339_v56 = vadd.f32 %v14131_v32, %v24072_v52  ;;  %v14133_v46 = vadd.f32 %v14132_v3, %v13940_v47  ;;  %v14136_v57 = vpop.f32.mrf.mxu1  ;;  %v24637_v52 = vpop.f32.mrf.mxu0 }
 0x629   : > { %14873 = vst [vmem:[%s24581_s29 + $0x30] sm:$0xff] %v14809_v51  ;;  %v14810_v35 = vmax.f32 %v14746_v31, 0.0  ;;  %v14747_v34 = vadd.f32 %v14683_v1, %v14465_v11  ;;  %v14684_v41 = vadd.f32 %v24552_v5, %v14607_v43  ;;  %v14137_v48 = vadd.f32 %v14136_v57, %v13944_v21  ;;  %v14470_v21 = vld [vmem:[%s18167_s30 + $0x68] sm:$0xff]  ;;  %v27065_v31 = vld [vmem:[#allocation64_spill] sm:$0xff]  ;;  %v27066_v1 = vld [vmem:[#allocation11_spill] sm:$0xff] }
 0x62a   : > { %v14608_v10 = vmul.f32 %v24533_v30, %v14339_v56  ;;  %v14340_v50 = vadd.f32 %v14133_v46, %v24076_v38  ;;  %v14138_v42 = vpop.f32.mrf.mxu1  ;;  %v24652_v60 = vpop.f32.mrf.mxu0  ;;  %v13958_v43 = vadd.f32 %v27066_v1, %v27065_v31 }
 0x62b   : > { %14874 = vst [vmem:[%s24581_s29 + $0x38] sm:$0xff] %v14810_v35  ;;  %v14811_v6 = vmax.f32 %v14747_v34, 0.0  ;;  %v14748_v59 = vadd.f32 %v14684_v41, %v14466_v26  ;;  %v14341_v40 = vadd.f32 %v14137_v48, %v24081_v27  ;;  %v14139_v53 = vadd.f32 %v14138_v42, %v13946_v33  ;;  %v27067_v34 = vld [vmem:[#allocation85_spill] sm:$0xff]  ;;  %v27068_v41 = vld [vmem:[#allocation122_spill] sm:$0xff]  ;;  %v27069_v48 = vld [vmem:[#allocation180_spill] sm:$0xff] }
 0x62c   : > { %v14685_v63 = vadd.f32 %v24541_v61, %v14608_v10  ;;  %v14609_v7 = vmul.f32 %v24544_v24, %v14340_v50  ;;  %v14140_v38 = vpop.f32.mrf.mxu1  ;;  %v24670_v56 = vpop.f32.mrf.mxu0 }
 0x62d   : > { %14875 = vst [vmem:[%s24581_s29 + $0x40] sm:$0xff] %v14811_v6  ;;  %v14812_v17 = vmax.f32 %v14748_v59, 0.0  ;;  %v14610_v19 = vmul.f32 %v24533_v30, %v14341_v40  ;;  %v14342_v49 = vadd.f32 %v14139_v53, %v24086_v58  ;;  %v14141_v23 = vadd.f32 %v14140_v38, %v13948_v15  ;;  %v27070_v40 = vld [vmem:[#allocation36_spill] sm:$0xff] }
 0x62e   : > { %v14749_v27 = vadd.f32 %v14685_v63, %v14467_v16  ;;  %v14686_v13 = vadd.f32 %v24552_v5, %v14609_v7  ;;  %v14142_v0 = vpop.f32.mrf.mxu1  ;;  %v13954_v58 = vadd.f32 %v24424_v45, %v24371_v28  ;;  %v14471_v28 = vld [vmem:[%s18167_s30 + $0x70] sm:$0xff]  ;;  %v27071_v53 = vld [vmem:[#allocation12_spill] sm:$0xff]  ;;  %v27072_v7 = vld [vmem:[#allocation105_spill] sm:$0xff] }
 0x62f   : > { %14876 = vst [vmem:[%s24581_s29 + $0x48] sm:$0xff] %v14812_v17  ;;  %v14687_v4 = vadd.f32 %v24541_v61, %v14610_v19  ;;  %v14611_v12 = vmul.f32 %v24544_v24, %v14342_v49  ;;  %v14343_v62 = vadd.f32 %v14141_v23, %v24092_v22  ;;  %v14143_v54 = vadd.f32 %v14142_v0, %v13950_v9  ;;  %v14473_v23 = vld [vmem:[%s18167_s30 + $0x80] sm:$0xff] }
 0x630   : > { %v14813_v18 = vmax.f32 %v14749_v27, 0.0  ;;  %v14750_v47 = vadd.f32 %v14686_v13, %v14468_v55  ;;  %v14146_v8 = vpop.f32.mrf.mxu1  ;;  %v13956_v22 = vadd.f32 %v24430_v39, %v24375_v37  ;;  %v13960_v39 = vadd.f32 %v27068_v41, %v27067_v34  ;;  %v14472_v37 = vld [vmem:[%s18167_s30 + $0x78] sm:$0xff]  ;;  %v24685_v55 = vpop.f32.mrf.mxu0  ;;  %v27074_v0 = vld [vmem:[#allocation84_spill] sm:$0xff] }
 0x631   : > { %v14751_v11 = vadd.f32 %v14687_v4, %v14469_v14  ;;  %v14688_v32 = vadd.f32 %v24552_v5, %v14611_v12  ;;  %v14612_v3 = vmul.f32 %v24533_v30, %v14343_v62  ;;  %v14344_v51 = vadd.f32 %v14143_v54, %v24096_v44  ;;  %v27073_v27 = vld [vmem:[#allocation47_spill] sm:$0xff] }
 0x632   : > { %14877 = vst [vmem:[%s24581_s29 + $0x50] sm:$0xff] %v14813_v18  ;;  %v14814_v45 = vmax.f32 %v14750_v47, 0.0  ;;  %v14147_v33 = vadd.f32 %v14146_v8, %v13954_v58  ;;  %v14148_v26 = vpop.f32.mrf.mxu1  ;;  %v13964_v9 = vadd.f32 %v27071_v53, %v27070_v40  ;;  %v27075_v4 = vld [vmem:[#allocation71_spill] sm:$0xff]  ;;  %v14474_v47 = vld [vmem:[%s18167_s30 + $0x88] sm:$0xff]  ;;  %v27076_v8 = vld [vmem:[#allocation82_spill] sm:$0xff]  ;;  %v24700_v1 = vpop.f32.mrf.mxu0 }
 0x633   : > { %v14815_v46 = vmax.f32 %v14751_v11, 0.0  ;;  %v14752_v57 = vadd.f32 %v14688_v32, %v14470_v21  ;;  %v14689_v35 = vadd.f32 %v24541_v61, %v14612_v3  ;;  %v14613_v44 = vmul.f32 %v24544_v24, %v14344_v51  ;;  %v14476_v41 = vld [vmem:[%s18167_s30 + $0x98] sm:$0xff]  ;;  %v27084_v40 = vld [vmem:[#allocation48_spill] sm:$0xff] }
 0x634   : > { %14878 = vst [vmem:[%s24581_s29 + $0x58] sm:$0xff] %v14814_v45  ;;  %v14345_v15 = vadd.f32 %v14147_v33, %v27069_v48  ;;  %v14149_v10 = vadd.f32 %v14148_v26, %v13956_v22  ;;  %v14150_v50 = vpop.f32.mrf.mxu1  ;;  %v13966_v12 = vadd.f32 %v27075_v4, %v27074_v0  ;;  %v14475_v22 = vld [vmem:[%s18167_s30 + $0x90] sm:$0xff]  ;;  %v14478_v4 = vld [vmem:[%s18167_s30 + $0xa8] sm:$0xff] }
 0x635   : > { %14879 = vst [vmem:[%s24581_s29 + $0x60] sm:$0xff] %v14815_v46  ;;  %v14816_v42 = vmax.f32 %v14752_v57, 0.0  ;;  %v14753_v6 = vadd.f32 %v14689_v35, %v14471_v28  ;;  %v14690_v59 = vadd.f32 %v24552_v5, %v14613_v44  ;;  %v14151_v16 = vadd.f32 %v14150_v50, %v13958_v43  ;;  %v27077_v28 = vld [vmem:[#allocation41_spill] sm:$0xff]  ;;  %v27078_v46 = vld [vmem:[#allocation63_spill] sm:$0xff]  ;;  %v27079_v57 = vld [vmem:[#allocation132_spill] sm:$0xff] }
 0x636   : > { %v14614_v63 = vmul.f32 %v24533_v30, %v14345_v15  ;;  %v14346_v38 = vadd.f32 %v14149_v10, %v27072_v7  ;;  %v14152_v17 = vpop.f32.mrf.mxu1  ;;  %v13968_v35 = vadd.f32 %v27079_v57, %v27078_v46  ;;  %v27080_v10 = vld [vmem:[#allocation81_spill] sm:$0xff]  ;;  %v27091_v46 = vld [vmem:[#allocation155_spill] sm:$0xff] }
 0x637   : > { %14880 = vst [vmem:[%s24581_s29 + $0x68] sm:$0xff] %v14816_v42  ;;  %v14817_v19 = vmax.f32 %v14753_v6, 0.0  ;;  %v14754_v49 = vadd.f32 %v14690_v59, %v14472_v37  ;;  %v14347_v13 = vadd.f32 %v14151_v16, %v27073_v27  ;;  %v14153_v14 = vadd.f32 %v14152_v17, %v13960_v39  ;;  %v27081_v42 = vld [vmem:[#allocation102_spill] sm:$0xff]  ;;  %v27082_v6 = vld [vmem:[#allocation157_spill] sm:$0xff]  ;;  %v24718_v17 = vpop.f32.mrf.mxu0 }
 0x638   : > { %v14691_v62 = vadd.f32 %v24541_v61, %v14614_v63  ;;  %v14615_v54 = vmul.f32 %v24544_v24, %v14346_v38  ;;  %v14156_v58 = vpop.f32.mrf.mxu1  ;;  %v13970_v59 = vadd.f32 %v27082_v6, %v27081_v42  ;;  %v27083_v16 = vld [vmem:[#allocation65_spill] sm:$0xff]  ;;  %v14477_v63 = vld [vmem:[%s18167_s30 + $0xa0] sm:$0xff] }
 0x639   : > { %14881 = vst [vmem:[%s24581_s29 + $0x70] sm:$0xff] %v14817_v19  ;;  %v14818_v18 = vmax.f32 %v14754_v49, 0.0  ;;  %v14616_v21 = vmul.f32 %v24533_v30, %v14347_v13  ;;  %v14348_v11 = vadd.f32 %v14153_v14, %v27076_v8  ;;  %v14157_v32 = vadd.f32 %v14156_v58, %v13964_v9  ;;  %v27085_v13 = vld [vmem:[#allocation86_spill] sm:$0xff]  ;;  %v27086_v14 = vld [vmem:[#allocation103_spill] sm:$0xff]  ;;  %v27094_v42 = vld [vmem:[#allocation96_spill] sm:$0xff] }
 0x63a   : > { %v14755_v3 = vadd.f32 %v14691_v62, %v14473_v23  ;;  %v14692_v51 = vadd.f32 %v24552_v5, %v14615_v54  ;;  %v14158_v31 = vpop.f32.mrf.mxu1  ;;  %v13974_v53 = vadd.f32 %v27084_v40, %v27083_v16  ;;  %v13976_v0 = vadd.f32 %v27086_v14, %v27085_v13  ;;  %v27097_v13 = vld [vmem:[#allocation29_spill] sm:$0xff] }
 0x63b   : > { %14882 = vst [vmem:[%s24581_s29 + $0x78] sm:$0xff] %v14818_v18  ;;  %v14693_v43 = vadd.f32 %v24541_v61, %v14616_v21  ;;  %v14617_v45 = vmul.f32 %v24544_v24, %v14348_v11  ;;  %v14349_v33 = vadd.f32 %v14157_v32, %v27077_v28  ;;  %v14159_v26 = vadd.f32 %v14158_v31, %v13966_v12  ;;  %v27087_v12 = vld [vmem:[#allocation152_spill] sm:$0xff]  ;;  %v27089_v32 = vld [vmem:[#allocation109_spill] sm:$0xff] }
 0x63c   : > { %v14819_v44 = vmax.f32 %v14755_v3, 0.0  ;;  %v14756_v34 = vadd.f32 %v14692_v51, %v14474_v47  ;;  %v14160_v39 = vpop.f32.mrf.mxu1  ;;  %v27088_v11 = vld [vmem:[#allocation88_spill] sm:$0xff] }
 0x63d   : > { %v14757_v37 = vadd.f32 %v14693_v43, %v14475_v22  ;;  %v14694_v48 = vadd.f32 %v24552_v5, %v14617_v45  ;;  %v14618_v15 = vmul.f32 %v24533_v30, %v14349_v33  ;;  %v14350_v50 = vadd.f32 %v14159_v26, %v27080_v10  ;;  %v27090_v22 = vld [vmem:[#allocation79_spill] sm:$0xff]  ;;  %v24733_v45 = vpop.f32.mrf.mxu0  ;;  %v14479_v26 = vld [vmem:[%s18167_s30 + $0xb0] sm:$0xff] }
 0x63e   : > { %14883 = vst [vmem:[%s24581_s29 + $0x80] sm:$0xff] %v14819_v44  ;;  %v14820_v9 = vmax.f32 %v14756_v34, 0.0  ;;  %v14161_v7 = vadd.f32 %v14160_v39, %v13968_v35  ;;  %v14162_v38 = vpop.f32.mrf.mxu1  ;;  %v13978_v3 = vadd.f32 %v27089_v32, %v27088_v11  ;;  %v27092_v44 = vld [vmem:[#allocation40_spill] sm:$0xff]  ;;  %v27093_v34 = vld [vmem:[#allocation98_spill] sm:$0xff]  ;;  %v14480_v10 = vld [vmem:[%s18167_s30 + $0xb8] sm:$0xff] }
 0x63f   : > { %v14821_v19 = vmax.f32 %v14757_v37, 0.0  ;;  %v14758_v49 = vadd.f32 %v14694_v48, %v14476_v41  ;;  %v14695_v23 = vadd.f32 %v24541_v61, %v14618_v15  ;;  %v14619_v27 = vmul.f32 %v24544_v24, %v14350_v50  ;;  %v27100_v11 = vld [vmem:[#allocation59_spill] sm:$0xff] }
 0x640   : > { %14884 = vst [vmem:[%s24581_s29 + $0x88] sm:$0xff] %v14820_v9  ;;  %v14351_v62 = vadd.f32 %v14161_v7, %v27087_v12  ;;  %v14163_v54 = vadd.f32 %v14162_v38, %v13970_v59  ;;  %v14166_v58 = vpop.f32.mrf.mxu1  ;;  %v13980_v41 = vadd.f32 %v27093_v34, %v27092_v44  ;;  %v14482_v12 = vld [vmem:[%s18167_s30 + $0xc8] sm:$0xff]  ;;  %v27103_v34 = vld [vmem:[#allocation58_spill] sm:$0xff] }
 0x641   : > { %14885 = vst [vmem:[%s24581_s29 + $0x90] sm:$0xff] %v14821_v19  ;;  %v14822_v18 = vmax.f32 %v14758_v49, 0.0  ;;  %v14759_v47 = vadd.f32 %v14695_v23, %v14477_v63  ;;  %v14696_v21 = vadd.f32 %v24552_v5, %v14619_v27  ;;  %v14167_v8 = vadd.f32 %v14166_v58, %v13974_v53  ;;  %v14481_v53 = vld [vmem:[%s18167_s30 + $0xc0] sm:$0xff]  ;;  %v24748_v63 = vpop.f32.mrf.mxu0  ;;  %v27095_v19 = vld [vmem:[#allocation87_spill] sm:$0xff]  ;;  %v27096_v27 = vld [vmem:[#allocation9_spill] sm:$0xff] }
 0x642   : > { %v14620_v51 = vmul.f32 %v24533_v30, %v14351_v62  ;;  %v14352_v31 = vadd.f32 %v14163_v54, %v27090_v22  ;;  %v14168_v43 = vpop.f32.mrf.mxu1  ;;  %v13984_v14 = vadd.f32 %v27097_v13, %v27096_v27 }
 0x643   : > { %14886 = vst [vmem:[%s24581_s29 + $0x98] sm:$0xff] %v14822_v18  ;;  %v14823_v28 = vmax.f32 %v14759_v47, 0.0  ;;  %v14760_v33 = vadd.f32 %v14696_v21, %v14478_v4  ;;  %v14353_v57 = vadd.f32 %v14167_v8, %v27091_v46  ;;  %v14169_v35 = vadd.f32 %v14168_v43, %v13976_v0  ;;  %v27098_v47 = vld [vmem:[#allocation52_spill] sm:$0xff]  ;;  %v27099_v8 = vld [vmem:[#allocation91_spill] sm:$0xff]  ;;  %v14483_v43 = vld [vmem:[%s18167_s30 + $0xd0] sm:$0xff] }
 0x644   : > { %v14697_v39 = vadd.f32 %v24541_v61, %v14620_v51  ;;  %v14621_v37 = vmul.f32 %v24544_v24, %v14352_v31  ;;  %v14170_v48 = vpop.f32.mrf.mxu1  ;;  %v13986_v32 = vadd.f32 %v27100_v11, %v27099_v8  ;;  %v27102_v51 = vld [vmem:[#allocation45_spill] sm:$0xff] }
 0x645   : > { %14887 = vst [vmem:[%s24581_s29 + $0xa0] sm:$0xff] %v14823_v28  ;;  %v14824_v15 = vmax.f32 %v14760_v33, 0.0  ;;  %v14622_v50 = vmul.f32 %v24533_v30, %v14353_v57  ;;  %v14354_v6 = vadd.f32 %v14169_v35, %v27094_v42  ;;  %v14171_v59 = vadd.f32 %v14170_v48, %v13978_v3  ;;  %v27101_v3 = vld [vmem:[#allocation10_spill] sm:$0xff]  ;;  %v27105_v48 = vld [vmem:[#allocation39_spill] sm:$0xff]  ;;  %v14486_v11 = vld [vmem:[%s18167_s30 + $0xe8] sm:$0xff] }
 0x646   : > { %v14761_v16 = vadd.f32 %v14697_v39, %v14479_v26  ;;  %v14698_v40 = vadd.f32 %v24552_v5, %v14621_v37  ;;  %v14172_v9 = vpop.f32.mrf.mxu1  ;;  %v13988_v22 = vadd.f32 %v27102_v51, %v27101_v3  ;;  %v24766_v26 = vpop.f32.mrf.mxu0  ;;  %v14484_v37 = vld [vmem:[%s18167_s30 + $0xd8] sm:$0xff] }
 0x647   : > { %14888 = vst [vmem:[%s24581_s29 + $0xa8] sm:$0xff] %v14824_v15  ;;  %v14699_v7 = vadd.f32 %v24541_v61, %v14622_v50  ;;  %v14623_v38 = vmul.f32 %v24544_v24, %v14354_v6  ;;  %v14355_v49 = vadd.f32 %v14171_v59, %v27095_v19  ;;  %v14173_v23 = vadd.f32 %v14172_v9, %v13980_v41  ;;  %v27104_v41 = vld [vmem:[#allocation104_spill] sm:$0xff]  ;;  %v27112_v3 = vld [vmem:[#allocation27_spill] sm:$0xff] }
 0x648   : > { %v14825_v0 = vmax.f32 %v14761_v16, 0.0  ;;  %v14762_v4 = vadd.f32 %v14698_v40, %v14480_v10  ;;  %v14176_v62 = vpop.f32.mrf.mxu1  ;;  %v13990_v39 = vadd.f32 %v27104_v41, %v27103_v34  ;;  %v27106_v40 = vld [vmem:[#allocation94_spill] sm:$0xff] }
 0x649   : > { %v14763_v54 = vadd.f32 %v14699_v7, %v14481_v53  ;;  %v14700_v58 = vadd.f32 %v24552_v5, %v14623_v38  ;;  %v14624_v18 = vmul.f32 %v24533_v30, %v14355_v49  ;;  %v14356_v21 = vadd.f32 %v14173_v23, %v27098_v47  ;;  %v27107_v53 = vld [vmem:[#allocation167_spill] sm:$0xff]  ;;  %v27108_v38 = vld [vmem:[#allocation146_spill] sm:$0xff]  ;;  %v24781_v23 = vpop.f32.mrf.mxu0 }
 0x64a   : > { %14889 = vst [vmem:[%s24581_s29 + $0xb0] sm:$0xff] %v14825_v0  ;;  %v14826_v31 = vmax.f32 %v14762_v4, 0.0  ;;  %v14177_v28 = vadd.f32 %v14176_v62, %v13984_v14  ;;  %v14178_v33 = vpop.f32.mrf.mxu1  ;;  %v13994_v9 = vadd.f32 %v27107_v53, %v27106_v40  ;;  %v14485_v14 = vld [vmem:[%s18167_s30 + $0xe0] sm:$0xff]  ;;  %v27116_v53 = vld [vmem:[#allocation153_spill] sm:$0xff] }
 0x64b   : > { %v14827_v46 = vmax.f32 %v14763_v54, 0.0  ;;  %v14764_v57 = vadd.f32 %v14700_v58, %v14482_v12  ;;  %v14701_v35 = vadd.f32 %v24541_v61, %v14624_v18  ;;  %v14625_v44 = vmul.f32 %v24544_v24, %v14356_v21  ;;  %v27109_v0 = vld [vmem:[#allocation156_spill] sm:$0xff]  ;;  %v27111_v54 = vld [vmem:[#allocation70_spill] sm:$0xff] }
 0x64c   : > { %14890 = vst [vmem:[%s24581_s29 + $0xb8] sm:$0xff] %v14826_v31  ;;  %v14357_v15 = vadd.f32 %v14177_v28, %v27105_v48  ;;  %v14179_v10 = vadd.f32 %v14178_v33, %v13986_v32  ;;  %v14180_v50 = vpop.f32.mrf.mxu1  ;;  %v27110_v62 = vld [vmem:[#allocation136_spill] sm:$0xff]  ;;  %v14487_v28 = vld [vmem:[%s18167_s30 + $0xf0] sm:$0xff] }
 0x64d   : > { %14891 = vst [vmem:[%s24581_s29 + $0xc0] sm:$0xff] %v14827_v46  ;;  %v14828_v42 = vmax.f32 %v14764_v57, 0.0  ;;  %v14765_v6 = vadd.f32 %v14701_v35, %v14483_v43  ;;  %v14702_v59 = vadd.f32 %v24552_v5, %v14625_v44  ;;  %v14181_v16 = vadd.f32 %v14180_v50, %v13988_v22  ;;  %v24796_v46 = vpop.f32.mrf.mxu0  ;;  %v27113_v44 = vld [vmem:[#allocation23_spill] sm:$0xff] }
 0x64e   : > { %v14626_v7 = vmul.f32 %v24533_v30, %v14357_v15  ;;  %v14358_v19 = vadd.f32 %v14179_v10, %v27108_v38  ;;  %v14182_v49 = vpop.f32.mrf.mxu1  ;;  %v13996_v58 = vadd.f32 %v27111_v54, %v27110_v62  ;;  %v14488_v10 = vld [vmem:[%s18167_s30 + $0xf8] sm:$0xff]  ;;  %v27118_v62 = vld [vmem:[#allocation120_spill] sm:$0xff] }
 0x64f   : > { %14892 = vst [vmem:[%s24581_s29 + $0xc8] sm:$0xff] %v14828_v42  ;;  %v14829_v27 = vmax.f32 %v14765_v6, 0.0  ;;  %v14766_v13 = vadd.f32 %v14702_v59, %v14484_v37  ;;  %v14359_v4 = vadd.f32 %v14181_v16, %v27109_v0  ;;  %v14183_v12 = vadd.f32 %v14182_v49, %v13990_v39  ;;  %v27114_v39 = vld [vmem:[#allocation8_spill] sm:$0xff]  ;;  %v27115_v16 = vld [vmem:[#allocation15_spill] sm:$0xff] }
 0x650   : > { %v14703_v18 = vadd.f32 %v24541_v61, %v14626_v7  ;;  %v14627_v47 = vmul.f32 %v24544_v24, %v14358_v19  ;;  %v14186_v21 = vpop.f32.mrf.mxu1  ;;  %v13998_v37 = vadd.f32 %v24555_v2, %v27114_v39  ;;  %v27117_v7 = vld [vmem:[#allocation115_spill] sm:$0xff]  ;;  %v14489_v19 = vld [vmem:[%s18167_s30 + $0x100] sm:$0xff]  ;;  %v27123_v39 = vld [vmem:[#allocation126_spill] sm:$0xff] }
 0x651   : > { %14893 = vst [vmem:[%s24581_s29 + $0xd0] sm:$0xff] %v14829_v27  ;;  %v14830_v8 = vmax.f32 %v14766_v13, 0.0  ;;  %v14628_v32 = vmul.f32 %v24533_v30, %v14359_v4  ;;  %v14360_v51 = vadd.f32 %v14183_v12, %v27112_v3  ;;  %v14187_v22 = vadd.f32 %v14186_v21, %v13994_v9  ;;  %v24814_v13 = vpop.f32.mrf.mxu0  ;;  %v27119_v54 = vld [vmem:[#allocation108_spill] sm:$0xff]  ;;  %v27120_v3 = vld [vmem:[#allocation135_spill] sm:$0xff] }
 0x652   : > { %v14767_v31 = vadd.f32 %v14703_v18, %v14485_v14  ;;  %v14704_v43 = vadd.f32 %v24552_v5, %v14627_v47  ;;  %v14188_v33 = vpop.f32.mrf.mxu1  ;;  %v14000_v9 = vadd.f32 %v24573_v20, %v27116_v53  ;;  %v14004_v38 = vadd.f32 %v24589_v25, %v27117_v7  ;;  %v14490_v25 = vld [vmem:[%s18167_s30 + $0x108] sm:$0xff] }
 0x653   : > { %14894 = vst [vmem:[%s24581_s29 + $0xd8] sm:$0xff] %v14830_v8  ;;  %v14705_v57 = vadd.f32 %v24541_v61, %v14628_v32  ;;  %v14629_v35 = vmul.f32 %v24544_v24, %v14360_v51  ;;  %v14361_v34 = vadd.f32 %v14187_v22, %v27113_v44  ;;  %v14189_v41 = vadd.f32 %v14188_v33, %v13996_v58  ;;  %v27121_v22 = vld [vmem:[#allocation176_spill] sm:$0xff] }
 0x654   : > { %v14831_v48 = vmax.f32 %v14767_v31, 0.0  ;;  %v14768_v15 = vadd.f32 %v14704_v43, %v14486_v11  ;;  %v14190_v50 = vpop.f32.mrf.mxu1  ;;  %v14006_v20 = vadd.f32 %v24604_v36, %v27118_v62  ;;  %v14008_v51 = vadd.f32 %v24622_v29, %v27120_v3  ;;  %v27122_v44 = vld [vmem:[#allocation60_spill] sm:$0xff]  ;;  %v14494_v62 = vld [vmem:[%s18167_s30 + $0x128] sm:$0xff]  ;;  %v14495_v3 = vld [vmem:[%s18167_s30 + $0x130] sm:$0xff] }
 0x655   : > { %v14769_v42 = vadd.f32 %v14705_v57, %v14487_v28  ;;  %v14706_v6 = vadd.f32 %v24552_v5, %v14629_v35  ;;  %v14630_v59 = vmul.f32 %v24533_v30, %v14361_v34  ;;  %v14362_v40 = vadd.f32 %v14189_v41, %v27115_v16  ;;  %v24829_v28 = vpop.f32.mrf.mxu0  ;;  %v14491_v35 = vld [vmem:[%s18167_s30 + $0x110] sm:$0xff] }
 0x656   : > { %14895 = vst [vmem:[%s24581_s29 + $0xe0] sm:$0xff] %v14831_v48  ;;  %v14832_v2 = vmax.f32 %v14768_v15, 0.0  ;;  %v14191_v49 = vadd.f32 %v14190_v50, %v13998_v37  ;;  %v14192_v27 = vpop.f32.mrf.mxu1  ;;  %v14010_v29 = vadd.f32 %v24637_v52, %v27123_v39  ;;  %v14492_v50 = vld [vmem:[%s18167_s30 + $0x118] sm:$0xff] }
 0x657   : > { %v14833_v14 = vmax.f32 %v14769_v42, 0.0  ;;  %v14770_v0 = vadd.f32 %v14706_v6, %v14488_v10  ;;  %v14707_v4 = vadd.f32 %v24541_v61, %v14630_v59  ;;  %v14631_v12 = vmul.f32 %v24544_v24, %v14362_v40  ;;  %v27124_v6 = vld [vmem:[#allocation89_spill] sm:$0xff]  ;;  %v24844_v52 = vpop.f32.mrf.mxu0 }
 0x658   : > { %14896 = vst [vmem:[%s24581_s29 + $0xe8] sm:$0xff] %v14832_v2  ;;  %v14363_v58 = vadd.f32 %v14191_v49, %v27119_v54  ;;  %v14193_v18 = vadd.f32 %v14192_v27, %v14000_v9  ;;  %v14196_v47 = vpop.f32.mrf.mxu1  ;;  %v14493_v9 = vld [vmem:[%s18167_s30 + $0x120] sm:$0xff] }
 0x659   : > { %14897 = vst [vmem:[%s24581_s29 + $0xf0] sm:$0xff] %v14833_v14  ;;  %v14834_v21 = vmax.f32 %v14770_v0, 0.0  ;;  %v14771_v8 = vadd.f32 %v14707_v4, %v14489_v19  ;;  %v14708_v11 = vadd.f32 %v24552_v5, %v14631_v12  ;;  %v14197_v32 = vadd.f32 %v14196_v47, %v14004_v38  ;;  %v27125_v19 = vld [vmem:[#allocation175_spill] sm:$0xff] }
 0x65a   : > { %v14632_v36 = vmul.f32 %v24533_v30, %v14363_v58  ;;  %v14364_v31 = vadd.f32 %v14193_v18, %v27121_v22  ;;  %v14198_v43 = vpop.f32.mrf.mxu1  ;;  %v27126_v14 = vld [vmem:[#allocation131_spill] sm:$0xff]  ;;  %v27127_v18 = vld [vmem:[#allocation57_spill] sm:$0xff]  ;;  %v24862_v22 = vpop.f32.mrf.mxu0 }
 0x65b   : > { %14898 = vst [vmem:[%s24581_s29 + $0xf8] sm:$0xff] %v14834_v21  ;;  %v14835_v33 = vmax.f32 %v14771_v8, 0.0  ;;  %v14772_v57 = vadd.f32 %v14708_v11, %v14490_v25  ;;  %v14365_v34 = vadd.f32 %v14197_v32, %v27122_v44  ;;  %v14199_v41 = vadd.f32 %v14198_v43, %v14006_v20  ;;  %v27128_v21 = vld [vmem:[#allocation107_spill] sm:$0xff]  ;;  %v27131_v44 = vld [vmem:[#allocation182_spill] sm:$0xff] }
 0x65c   : > { %v14709_v37 = vadd.f32 %v24541_v61, %v14632_v36  ;;  %v14633_v48 = vmul.f32 %v24544_v24, %v14364_v31  ;;  %v14200_v15 = vpop.f32.mrf.mxu1  ;;  %v14014_v0 = vadd.f32 %v24652_v60, %v27126_v14  ;;  %v14016_v8 = vadd.f32 %v24670_v56, %v27128_v21  ;;  %v27129_v11 = vld [vmem:[#allocation35_spill] sm:$0xff] }
 0x65d   : > { %14899 = vst [vmem:[%s24581_s29 + $0x100] sm:$0xff] %v14835_v33  ;;  %v14836_v10 = vmax.f32 %v14772_v57, 0.0  ;;  %v14634_v42 = vmul.f32 %v24533_v30, %v14365_v34  ;;  %v14366_v59 = vadd.f32 %v14199_v41, %v27124_v6  ;;  %v14201_v16 = vadd.f32 %v14200_v15, %v14008_v51 }
 0x65e   : > { %v14773_v40 = vadd.f32 %v14709_v37, %v14491_v35  ;;  %v14710_v53 = vadd.f32 %v24552_v5, %v14633_v48  ;;  %v14202_v7 = vpop.f32.mrf.mxu1  ;;  %v14018_v32 = vadd.f32 %v24685_v55, %v27129_v11  ;;  %v27130_v35 = vld [vmem:[#allocation100_spill] sm:$0xff]  ;;  %v14496_v55 = vld [vmem:[%s18167_s30 + $0x138] sm:$0xff] }
 0x65f   : > { %14900 = vst [vmem:[%s24581_s29 + $0x108] sm:$0xff] %v14836_v10  ;;  %v14711_v38 = vadd.f32 %v24541_v61, %v14634_v42  ;;  %v14635_v2 = vmul.f32 %v24544_v24, %v14366_v59  ;;  %v14367_v49 = vadd.f32 %v14201_v16, %v27125_v19  ;;  %v14203_v27 = vadd.f32 %v14202_v7, %v14010_v29  ;;  %v27132_v10 = vld [vmem:[#allocation44_spill] sm:$0xff]  ;;  %v27133_v42 = vld [vmem:[#allocation49_spill] sm:$0xff]  ;;  %v24877_v16 = vpop.f32.mrf.mxu0  ;;  %v27134_v7 = vld [vmem:[#allocation90_spill] sm:$0xff] }
 0x660   : > { %v14837_v4 = vmax.f32 %v14773_v40, 0.0  ;;  %v14774_v12 = vadd.f32 %v14710_v53, %v14492_v50  ;;  %v14206_v20 = vpop.f32.mrf.mxu1  ;;  %v14020_v56 = vadd.f32 %v24700_v1, %v27130_v35  ;;  %v14024_v50 = vadd.f32 %v24718_v17, %v27132_v10  ;;  %v27135_v19 = vld [vmem:[#allocation97_spill] sm:$0xff]  ;;  %v27137_v11 = vld [vmem:[#allocation19_spill] sm:$0xff] }
 0x661   : > { %v14775_v25 = vadd.f32 %v14711_v38, %v14493_v9  ;;  %v14712_v54 = vadd.f32 %v24552_v5, %v14635_v2  ;;  %v14636_v58 = vmul.f32 %v24533_v30, %v14367_v49  ;;  %v14368_v47 = vadd.f32 %v14203_v27, %v27127_v18  ;;  %v14497_v9 = vld [vmem:[%s18167_s30 + $0x140] sm:$0xff]  ;;  %v14499_v18 = vld [vmem:[%s18167_s30 + $0x150] sm:$0xff] }
 0x662   : > { %14901 = vst [vmem:[%s24581_s29 + $0x110] sm:$0xff] %v14837_v4  ;;  %v14838_v60 = vmax.f32 %v14774_v12, 0.0  ;;  %v14207_v51 = vadd.f32 %v14206_v20, %v14014_v0  ;;  %v14208_v36 = vpop.f32.mrf.mxu1  ;;  %v14026_v17 = vadd.f32 %v24733_v45, %v27135_v19  ;;  %v14498_v4 = vld [vmem:[%s18167_s30 + $0x148] sm:$0xff]  ;;  %v24892_v45 = vpop.f32.mrf.mxu0 }
 0x663   : > { %v14839_v31 = vmax.f32 %v14775_v25, 0.0  ;;  %v14776_v43 = vadd.f32 %v14712_v54, %v14494_v62  ;;  %v14713_v33 = vadd.f32 %v24541_v61, %v14636_v58  ;;  %v14637_v57 = vmul.f32 %v24544_v24, %v14368_v47  ;;  %v27136_v62 = vld [vmem:[#allocation158_spill] sm:$0xff] }
 0x664   : > { %14902 = vst [vmem:[%s24581_s29 + $0x118] sm:$0xff] %v14838_v60  ;;  %v14369_v34 = vadd.f32 %v14207_v51, %v27131_v44  ;;  %v14209_v41 = vadd.f32 %v14208_v36, %v14016_v8  ;;  %v14210_v39 = vpop.f32.mrf.mxu1  ;;  %v24910_v10 = vpop.f32.mrf.mxu0 }
 0x665   : > { %14903 = vst [vmem:[%s24581_s29 + $0x120] sm:$0xff] %v14839_v31  ;;  %v14840_v29 = vmax.f32 %v14776_v43, 0.0  ;;  %v14777_v37 = vadd.f32 %v14713_v33, %v14495_v3  ;;  %v14714_v48 = vadd.f32 %v24552_v5, %v14637_v57  ;;  %v14211_v15 = vadd.f32 %v14210_v39, %v14018_v32  ;;  %v27138_v3 = vld [vmem:[#allocation159_spill] sm:$0xff]  ;;  %v27141_v39 = vld [vmem:[#allocation113_spill] sm:$0xff] }
 0x666   : > { %v14638_v1 = vmul.f32 %v24533_v30, %v14369_v34  ;;  %v14370_v6 = vadd.f32 %v14209_v41, %v27133_v42  ;;  %v14212_v59 = vpop.f32.mrf.mxu1  ;;  %v14028_v51 = vadd.f32 %v24748_v63, %v27138_v3  ;;  %v14500_v43 = vld [vmem:[%s18167_s30 + $0x158] sm:$0xff]  ;;  %v27140_v34 = vld [vmem:[#allocation106_spill] sm:$0xff] }
 0x667   : > { %14904 = vst [vmem:[%s24581_s29 + $0x128] sm:$0xff] %v14840_v29  ;;  %v14841_v40 = vmax.f32 %v14777_v37, 0.0  ;;  %v14778_v53 = vadd.f32 %v14714_v48, %v14496_v55  ;;  %v14371_v38 = vadd.f32 %v14211_v15, %v27134_v7  ;;  %v14213_v2 = vadd.f32 %v14212_v59, %v14020_v56  ;;  %v27139_v55 = vld [vmem:[#allocation55_spill] sm:$0xff]  ;;  %v14501_v37 = vld [vmem:[%s18167_s30 + $0x160] sm:$0xff]  ;;  %v27142_v59 = vld [vmem:[#allocation66_spill] sm:$0xff] }
 0x668   : > { %v14715_v49 = vadd.f32 %v24541_v61, %v14638_v1  ;;  %v14639_v27 = vmul.f32 %v24544_v24, %v14370_v6  ;;  %v14216_v14 = vpop.f32.mrf.mxu1  ;;  %v14030_v41 = vadd.f32 %v24766_v26, %v27140_v34  ;;  %v14034_v29 = vadd.f32 %v24781_v23, %v27141_v39  ;;  %v14502_v23 = vld [vmem:[%s18167_s30 + $0x168] sm:$0xff]  ;;  %v27150_v39 = vld [vmem:[#allocation99_spill] sm:$0xff] }
 0x669   : > { %14905 = vst [vmem:[%s24581_s29 + $0x130] sm:$0xff] %v14841_v40  ;;  %v14842_v0 = vmax.f32 %v14778_v53, 0.0  ;;  %v14640_v12 = vmul.f32 %v24533_v30, %v14371_v38  ;;  %v14372_v20 = vadd.f32 %v14213_v2, %v27136_v62  ;;  %v14217_v25 = vadd.f32 %v14216_v14, %v14024_v50  ;;  %v27143_v40 = vld [vmem:[#allocation20_spill] sm:$0xff]  ;;  %v27145_v14 = vld [vmem:[#allocation14_spill] sm:$0xff] }
 0x66a   : > { %v14779_v54 = vadd.f32 %v14715_v49, %v14497_v9  ;;  %v14716_v58 = vadd.f32 %v24552_v5, %v14639_v27  ;;  %v14218_v47 = vpop.f32.mrf.mxu1  ;;  %v14036_v26 = vadd.f32 %v24796_v46, %v27142_v59  ;;  %v27144_v49 = vld [vmem:[#allocation28_spill] sm:$0xff] }
 0x66b   : > { %14906 = vst [vmem:[%s24581_s29 + $0x138] sm:$0xff] %v14842_v0  ;;  %v14717_v21 = vadd.f32 %v24541_v61, %v14640_v12  ;;  %v14641_v8 = vmul.f32 %v24544_v24, %v14372_v20  ;;  %v14373_v32 = vadd.f32 %v14217_v25, %v27137_v11  ;;  %v14219_v60 = vadd.f32 %v14218_v47, %v14026_v17  ;;  %v24925_v12 = vpop.f32.mrf.mxu0  ;;  %v14503_v25 = vld [vmem:[%s18167_s30 + $0x170] sm:$0xff] }
 0x66c   : > { %v14843_v36 = vmax.f32 %v14779_v54, 0.0  ;;  %v14780_v31 = vadd.f32 %v14716_v58, %v14498_v4  ;;  %v14220_v33 = vpop.f32.mrf.mxu1  ;;  %v14038_v27 = vadd.f32 %v24814_v13, %v27144_v49  ;;  %v27146_v54 = vld [vmem:[#allocation184_spill] sm:$0xff]  ;;  %v27147_v47 = vld [vmem:[#allocation110_spill] sm:$0xff] }
 0x66d   : > { %v14781_v57 = vadd.f32 %v14717_v21, %v14499_v18  ;;  %v14718_v35 = vadd.f32 %v24552_v5, %v14641_v8  ;;  %v14642_v56 = vmul.f32 %v24533_v30, %v14373_v32  ;;  %v14374_v44 = vadd.f32 %v14219_v60, %v27139_v55  ;;  %v14504_v60 = vld [vmem:[%s18167_s30 + $0x178] sm:$0xff] }
 0x66e   : > { %14907 = vst [vmem:[%s24581_s29 + $0x140] sm:$0xff] %v14843_v36  ;;  %v14844_v63 = vmax.f32 %v14780_v31, 0.0  ;;  %v14221_v48 = vadd.f32 %v14220_v33, %v14028_v51  ;;  %v14222_v15 = vpop.f32.mrf.mxu1  ;;  %v14040_v13 = vadd.f32 %v24829_v28, %v27147_v47  ;;  %v27148_v51 = vld [vmem:[#allocation178_spill] sm:$0xff]  ;;  %v24940_v28 = vpop.f32.mrf.mxu0  ;;  %v27156_v47 = vld [vmem:[#allocation25_spill] sm:$0xff] }
 0x66f   : > { %v14845_v50 = vmax.f32 %v14781_v57, 0.0  ;;  %v14782_v1 = vadd.f32 %v14718_v35, %v14500_v43  ;;  %v14719_v42 = vadd.f32 %v24541_v61, %v14642_v56  ;;  %v14643_v6 = vmul.f32 %v24544_v24, %v14374_v44  ;;  %v14505_v57 = vld [vmem:[%s18167_s30 + $0x180] sm:$0xff]  ;;  %v27149_v44 = vld [vmem:[#allocation54_spill] sm:$0xff] }
 0x670   : > { %14908 = vst [vmem:[%s24581_s29 + $0x148] sm:$0xff] %v14844_v63  ;;  %v14375_v53 = vadd.f32 %v14221_v48, %v27143_v40  ;;  %v14223_v9 = vadd.f32 %v14222_v15, %v14030_v41  ;;  %v14226_v7 = vpop.f32.mrf.mxu1  ;;  %v14506_v48 = vld [vmem:[%s18167_s30 + $0x188] sm:$0xff]  ;;  %v27153_v40 = vld [vmem:[#allocation116_spill] sm:$0xff] }
 0x671   : > { %14909 = vst [vmem:[%s24581_s29 + $0x150] sm:$0xff] %v14845_v50  ;;  %v14846_v38 = vmax.f32 %v14782_v1, 0.0  ;;  %v14783_v2 = vadd.f32 %v14719_v42, %v14501_v37  ;;  %v14720_v19 = vadd.f32 %v24552_v5, %v14643_v6  ;;  %v14227_v17 = vadd.f32 %v14226_v7, %v14034_v29  ;;  %v27151_v6 = vld [vmem:[#allocation177_spill] sm:$0xff] }
 0x672   : > { %v14644_v46 = vmul.f32 %v24533_v30, %v14375_v53  ;;  %v14376_v0 = vadd.f32 %v14223_v9, %v27145_v14  ;;  %v14228_v4 = vpop.f32.mrf.mxu1  ;;  %v14044_v29 = vadd.f32 %v24844_v52, %v27150_v39  ;;  %v14048_v53 = vadd.f32 %v24877_v16, %v27153_v40  ;;  %v14507_v9 = vld [vmem:[%s18167_s30 + $0x190] sm:$0xff] }
 0x673   : > { %14910 = vst [vmem:[%s24581_s29 + $0x158] sm:$0xff] %v14846_v38  ;;  %v14847_v62 = vmax.f32 %v14783_v2, 0.0  ;;  %v14784_v20 = vadd.f32 %v14720_v19, %v14502_v23  ;;  %v14377_v58 = vadd.f32 %v14227_v17, %v27146_v54  ;;  %v14229_v18 = vadd.f32 %v14228_v4, %v14036_v26  ;;  %v27152_v26 = vld [vmem:[#allocation114_spill] sm:$0xff]  ;;  %v14059_v2 = vpop.f32.mrf.mxu0 }
 0x674   : > { %v14721_v21 = vadd.f32 %v24541_v61, %v14644_v46  ;;  %v14645_v8 = vmul.f32 %v24544_v24, %v14376_v0  ;;  %v14230_v11 = vpop.f32.mrf.mxu1  ;;  %v14046_v23 = vadd.f32 %v24862_v22, %v27152_v26  ;;  %v27154_v46 = vld [vmem:[#allocation149_spill] sm:$0xff]  ;;  %v14508_v22 = vld [vmem:[%s18167_s30 + $0x198] sm:$0xff]  ;;  %v27155_v16 = vld [vmem:[#allocation62_spill] sm:$0xff] }
 0x675   : > { %14911 = vst [vmem:[%s24581_s29 + $0x160] sm:$0xff] %v14847_v62  ;;  %v14848_v32 = vmax.f32 %v14784_v20, 0.0  ;;  %v14646_v3 = vmul.f32 %v24533_v30, %v14377_v58  ;;  %v14378_v36 = vadd.f32 %v14229_v18, %v27148_v51  ;;  %v14231_v31 = vadd.f32 %v14230_v11, %v14038_v27  ;;  %v14063_v20 = vpop.f32.mrf.mxu0  ;;  %v27158_v51 = vld [vmem:[#allocation171_spill] sm:$0xff] }
 0x676   : > { %v14785_v43 = vadd.f32 %v14721_v21, %v14503_v25  ;;  %v14722_v33 = vadd.f32 %v24552_v5, %v14645_v8  ;;  %v14232_v35 = vpop.f32.mrf.mxu1  ;;  %v14050_v14 = vadd.f32 %v24892_v45, %v27154_v46  ;;  %v27157_v21 = vld [vmem:[#allocation75_spill] sm:$0xff] }
 0x677   : > { %14912 = vst [vmem:[%s24581_s29 + $0x168] sm:$0xff] %v14848_v32  ;;  %v14723_v56 = vadd.f32 %v24541_v61, %v14646_v3  ;;  %v14647_v55 = vmul.f32 %v24544_v24, %v14378_v36  ;;  %v14379_v34 = vadd.f32 %v14231_v31, %v27149_v44  ;;  %v14233_v41 = vadd.f32 %v14232_v35, %v14040_v13  ;;  %v14509_v3 = vld [vmem:[%s18167_s30 + $0x1a0] sm:$0xff]  ;;  %v14510_v44 = vld [vmem:[%s18167_s30 + $0x1a8] sm:$0xff] }
 0x678   : > { %v14849_v63 = vmax.f32 %v14785_v43, 0.0  ;;  %v14786_v37 = vadd.f32 %v14722_v33, %v14504_v60  ;;  %v14236_v15 = vpop.f32.mrf.mxu1  ;;  %v14054_v13 = vadd.f32 %v24910_v10, %v27156_v47  ;;  %v27159_v43 = vld [vmem:[#allocation30_spill] sm:$0xff] }
 0x679   : > { %v14787_v50 = vadd.f32 %v14723_v56, %v14505_v57  ;;  %v14724_v1 = vadd.f32 %v24552_v5, %v14647_v55  ;;  %v14648_v42 = vmul.f32 %v24533_v30, %v14379_v34  ;;  %v14380_v59 = vadd.f32 %v14233_v41, %v27151_v6  ;;  %v14065_v56 = vpop.f32.mrf.mxu0  ;;  %v27160_v41 = vld [vmem:[#allocation17_spill] sm:$0xff] }
 0x67a   : > { %14913 = vst [vmem:[%s24581_s29 + $0x170] sm:$0xff] %v14849_v63  ;;  %v14850_v52 = vmax.f32 %v14786_v37, 0.0  ;;  %v14237_v7 = vadd.f32 %v14236_v15, %v14044_v29  ;;  %v14238_v38 = vpop.f32.mrf.mxu1  ;;  %v14056_v33 = vadd.f32 %v24925_v12, %v27159_v43  ;;  %v27169_v43 = vld [vmem:[#allocation67_spill] sm:$0xff] }
 0x67b   : > { %v14851_v19 = vmax.f32 %v14787_v50, 0.0  ;;  %v14788_v17 = vadd.f32 %v14724_v1, %v14506_v48  ;;  %v14725_v49 = vadd.f32 %v24541_v61, %v14648_v42  ;;  %v14649_v27 = vmul.f32 %v24544_v24, %v14380_v59  ;;  %v14511_v48 = vld [vmem:[%s18167_s30 + $0x1b0] sm:$0xff]  ;;  %v27161_v1 = vld [vmem:[#allocation124_spill] sm:$0xff]  ;;  %v27162_v59 = vld [vmem:[#allocation101_spill] sm:$0xff] }
 0x67c   : > { %14914 = vst [vmem:[%s24581_s29 + $0x178] sm:$0xff] %v14850_v52  ;;  %v14381_v0 = vadd.f32 %v14237_v7, %v27155_v16  ;;  %v14239_v4 = vadd.f32 %v14238_v38, %v14046_v23  ;;  %v14240_v62 = vpop.f32.mrf.mxu1  ;;  %v14058_v26 = vadd.f32 %v24940_v28, %v27162_v59  ;;  %v14513_v16 = vld [vmem:[%s18167_s30 + $0x1c0] sm:$0xff] }
 0x67d   : > { %14915 = vst [vmem:[%s24581_s29 + $0x180] sm:$0xff] %v14851_v19  ;;  %v14852_v25 = vmax.f32 %v14788_v17, 0.0  ;;  %v14789_v54 = vadd.f32 %v14725_v49, %v14507_v9  ;;  %v14726_v58 = vadd.f32 %v24552_v5, %v14649_v27  ;;  %v14241_v18 = vadd.f32 %v14240_v62, %v14048_v53  ;;  %v14512_v53 = vld [vmem:[%s18167_s30 + $0x1b8] sm:$0xff]  ;;  %v14067_v9 = vpop.f32.mrf.mxu0  ;;  %v27163_v17 = vld [vmem:[#allocation92_spill] sm:$0xff]  ;;  %v27164_v27 = vld [vmem:[#allocation13_spill] sm:$0xff] }
 0x67e   : > { %v14650_v45 = vmul.f32 %v24533_v30, %v14381_v0  ;;  %v14382_v8 = vadd.f32 %v14239_v4, %v27157_v21  ;;  %v14242_v11 = vpop.f32.mrf.mxu1  ;;  %v14060_v46 = vadd.f32 %v14059_v2, %v27164_v27  ;;  %v27167_v2 = vld [vmem:[#allocation161_spill] sm:$0xff] }
 0x67f   : > { %14916 = vst [vmem:[%s24581_s29 + $0x188] sm:$0xff] %v14852_v25  ;;  %v14853_v32 = vmax.f32 %v14789_v54, 0.0  ;;  %v14790_v60 = vadd.f32 %v14726_v58, %v14508_v22  ;;  %v14383_v36 = vadd.f32 %v14241_v18, %v27158_v51  ;;  %v14243_v31 = vadd.f32 %v14242_v11, %v14050_v14  ;;  %v27165_v14 = vld [vmem:[#allocation34_spill] sm:$0xff]  ;;  %v27166_v18 = vld [vmem:[#allocation151_spill] sm:$0xff]  ;;  %v27168_v51 = vld [vmem:[#allocation61_spill] sm:$0xff] }
 0x680   : > { %v14727_v10 = vadd.f32 %v24541_v61, %v14650_v45  ;;  %v14651_v57 = vmul.f32 %v24544_v24, %v14382_v8  ;;  %v14246_v35 = vpop.f32.mrf.mxu1  ;;  %v14064_v22 = vadd.f32 %v14063_v20, %v27165_v14  ;;  %v14066_v47 = vadd.f32 %v14065_v56, %v27166_v18  ;;  %v14069_v8 = vpop.f32.mrf.mxu0  ;;  %v14515_v56 = vld [vmem:[%s18167_s30 + $0x1d0] sm:$0xff]  ;;  %v27174_v14 = vld [vmem:[#allocation77_spill] sm:$0xff] }
 0x681   : > { %14917 = vst [vmem:[%s24581_s29 + $0x190] sm:$0xff] %v14853_v32  ;;  %v14854_v55 = vmax.f32 %v14790_v60, 0.0  ;;  %v14652_v34 = vmul.f32 %v24533_v30, %v14383_v36  ;;  %v14384_v39 = vadd.f32 %v14243_v31, %v27160_v41  ;;  %v14247_v29 = vadd.f32 %v14246_v35, %v14054_v13  ;;  %v14514_v13 = vld [vmem:[%s18167_s30 + $0x1c8] sm:$0xff]  ;;  %v27171_v41 = vld [vmem:[#allocation43_spill] sm:$0xff] }
 0x682   : > { %v14791_v63 = vadd.f32 %v14727_v10, %v14509_v3  ;;  %v14728_v37 = vadd.f32 %v24552_v5, %v14651_v57  ;;  %v14248_v12 = vpop.f32.mrf.mxu1  ;;  %v14068_v36 = vadd.f32 %v14067_v9, %v27168_v51 }
 0x683   : > { %14918 = vst [vmem:[%s24581_s29 + $0x198] sm:$0xff] %v14854_v55  ;;  %v14729_v15 = vadd.f32 %v24541_v61, %v14652_v34  ;;  %v14653_v50 = vmul.f32 %v24544_v24, %v14384_v39  ;;  %v14385_v42 = vadd.f32 %v14247_v29, %v27161_v1  ;;  %v14249_v6 = vadd.f32 %v14248_v12, %v14056_v33  ;;  %v27170_v55 = vld [vmem:[#allocation143_spill] sm:$0xff] }
 0x684   : > { %v14855_v23 = vmax.f32 %v14791_v63, 0.0  ;;  %v14792_v40 = vadd.f32 %v14728_v37, %v14510_v44  ;;  %v14250_v52 = vpop.f32.mrf.mxu1  ;;  %v14070_v39 = vadd.f32 %v14069_v8, %v27171_v41  ;;  %v14516_v12 = vld [vmem:[%s18167_s30 + $0x1d8] sm:$0xff] }
 0x685   : > { %v14793_v7 = vadd.f32 %v14729_v15, %v14511_v48  ;;  %v14730_v38 = vadd.f32 %v24552_v5, %v14653_v50  ;;  %v14654_v19 = vmul.f32 %v24533_v30, %v14385_v42  ;;  %v14386_v49 = vadd.f32 %v14249_v6, %v27163_v17  ;;  %v27172_v50 = vld [vmem:[#allocation72_spill] sm:$0xff]  ;;  %v14518_v17 = vld [vmem:[%s18167_s30 + $0x1e8] sm:$0xff] }
 0x686   : > { %14919 = vst [vmem:[%s24581_s29 + $0x1a0] sm:$0xff] %v14855_v23  ;;  %v14856_v28 = vmax.f32 %v14792_v40, 0.0  ;;  %v14251_v0 = vadd.f32 %v14250_v52, %v14058_v26  ;;  %v14252_v4 = vpop.f32.mrf.mxu1  ;;  %v14517_v26 = vld [vmem:[%s18167_s30 + $0x1e0] sm:$0xff]  ;;  %v27173_v52 = vld [vmem:[#allocation50_spill] sm:$0xff] }
 0x687   : > { %v14857_v62 = vmax.f32 %v14793_v7, 0.0  ;;  %v14794_v25 = vadd.f32 %v14730_v38, %v14512_v53  ;;  %v14731_v54 = vadd.f32 %v24541_v61, %v14654_v19  ;;  %v14655_v58 = vmul.f32 %v24544_v24, %v14386_v49 }
 0x688   : > { %14920 = vst [vmem:[%s24581_s29 + $0x1a8] sm:$0xff] %v14856_v28  ;;  %v14387_v45 = vadd.f32 %v14251_v0, %v27167_v2  ;;  %v14253_v20 = vadd.f32 %v14252_v4, %v14060_v46  ;;  %v14256_v21 = vpop.f32.mrf.mxu1 }
 0x689   : > { %14921 = vst [vmem:[%s24581_s29 + $0x1b0] sm:$0xff] %v14857_v62  ;;  %v14858_v11 = vmax.f32 %v14794_v25, 0.0  ;;  %v14795_v32 = vadd.f32 %v14731_v54, %v14513_v16  ;;  %v14732_v60 = vadd.f32 %v24552_v5, %v14655_v58  ;;  %v14257_v3 = vadd.f32 %v14256_v21, %v14064_v22  ;;  %v14519_v16 = vld [vmem:[%s18167_s30 + $0x1f0] sm:$0xff]  ;;  %v14520_v54 = vld [vmem:[%s18167_s30 + $0x1f8] sm:$0xff]  ;;  %s25051_s30 = scalar_lea.sflag [#allocation6], %s161_s27 }
 0x68a   : > { %v14656_v31 = vmul.f32 %v24533_v30, %v14387_v45  ;;  %v14388_v33 = vadd.f32 %v14253_v20, %v27169_v43  ;;  %v14258_v10 = vpop.f32.mrf.mxu1 }
 0x68b   : > { %14922 = vst [vmem:[%s24581_s29 + $0x1b8] sm:$0xff] %v14858_v11  ;;  %v14859_v57 = vmax.f32 %v14795_v32, 0.0  ;;  %v14796_v35 = vadd.f32 %v14732_v60, %v14514_v13  ;;  %v14389_v44 = vadd.f32 %v14257_v3, %v27170_v55  ;;  %v14259_v34 = vadd.f32 %v14258_v10, %v14066_v47 }
 0x68c   : > { %v14733_v29 = vadd.f32 %v24541_v61, %v14656_v31  ;;  %v14657_v63 = vmul.f32 %v24544_v24, %v14388_v33  ;;  %v14260_v37 = vpop.f32.mrf.mxu1 }
 0x68d   : > { %14923 = vst [vmem:[%s24581_s29 + $0x1c0] sm:$0xff] %v14859_v57  ;;  %v14860_v48 = vmax.f32 %v14796_v35, 0.0  ;;  %v14658_v15 = vmul.f32 %v24533_v30, %v14389_v44  ;;  %v14390_v1 = vadd.f32 %v14259_v34, %v27172_v50  ;;  %v14261_v42 = vadd.f32 %v14260_v37, %v14068_v36 }
 0x68e   : > { %v14797_v6 = vadd.f32 %v14733_v29, %v14515_v56  ;;  %v14734_v59 = vadd.f32 %v24552_v5, %v14657_v63  ;;  %v14262_v23 = vpop.f32.mrf.mxu1 }
 0x68f   : > { %14924 = vst [vmem:[%s24581_s29 + $0x1c8] sm:$0xff] %v14860_v48  ;;  %v14735_v40 = vadd.f32 %v24541_v61, %v14658_v15  ;;  %v14659_v53 = vmul.f32 %v24544_v24, %v14390_v1  ;;  %v14391_v9 = vadd.f32 %v14261_v42, %v27173_v52  ;;  %v14263_v7 = vadd.f32 %v14262_v23, %v14070_v39 }
 0x690   : > { %v14861_v38 = vmax.f32 %v14797_v6, 0.0  ;;  %v14798_v19 = vadd.f32 %v14734_v59, %v14516_v12 }
 0x691   : > { %v14799_v49 = vadd.f32 %v14735_v40, %v14517_v26  ;;  %v14736_v27 = vadd.f32 %v24552_v5, %v14659_v53  ;;  %v14660_v46 = vmul.f32 %v24533_v30, %v14391_v9  ;;  %v14392_v22 = vadd.f32 %v14263_v7, %v27174_v14 }
 0x692   : > { %14925 = vst [vmem:[%s24581_s29 + $0x1d0] sm:$0xff] %v14861_v38  ;;  %v14862_v28 = vmax.f32 %v14798_v19, 0.0 }
 0x693   : > { %v14863_v0 = vmax.f32 %v14799_v49, 0.0  ;;  %v14800_v4 = vadd.f32 %v14736_v27, %v14518_v17  ;;  %v14737_v62 = vadd.f32 %v24541_v61, %v14660_v46  ;;  %v14661_v25 = vmul.f32 %v24544_v24, %v14392_v22 }
 0x694   : > { %14926 = vst [vmem:[%s24581_s29 + $0x1d8] sm:$0xff] %v14862_v28 }
 0x695   : > { %14927 = vst [vmem:[%s24581_s29 + $0x1e0] sm:$0xff] %v14863_v0  ;;  %v14864_v30 = vmax.f32 %v14800_v4, 0.0  ;;  %v14801_v58 = vadd.f32 %v14737_v62, %v14519_v16  ;;  %v14738_v18 = vadd.f32 %v24552_v5, %v14661_v25 }
 0x697   : > { %14928 = vst [vmem:[%s24581_s29 + $0x1e8] sm:$0xff] %v14864_v30  ;;  %v14865_v47 = vmax.f32 %v14801_v58, 0.0  ;;  %v14802_v13 = vadd.f32 %v14738_v18, %v14520_v54 }
 0x699   : > { %14929 = vst [vmem:[%s24581_s29 + $0x1f0] sm:$0xff] %v14865_v47  ;;  %v14866_v61 = vmax.f32 %v14802_v13, 0.0 }
 0x69b   : > { %14930 = vst [vmem:[%s24581_s29 + $0x1f8] sm:$0xff] %v14866_v61 }
 0x69c   : > { %17897 = shalt.err (!%p17894_p3)
}
 0x69d   : > { %s17898_s17 = scalar_lea.hbm %s25043_s8, 8192  ;;  %s17902_s24 = scalar_lea.hbm %s25094_s3, 16384 }
 0x69e   : > { %p17899_p4 = scmp.ne.s32.totalorder %s25043_s8, %s17898_s17  ;;  %p17903_p9 = scmp.lt.s32.totalorder %s25043_s8, %s25094_s3 }
 0x69f   : > { %p17904_p10 = scmp.lt.s32.totalorder %s17902_s24, %s17898_s17 }
 0x6a0   : > { %p17900_p7 = pnand %p17899_p4, %p18008_p5 }
 0x6a1   : > { %p17905_p11 = por %p17904_p10, %p17903_p9 }
 0x6a2   : > { %p17901_p8 = pneg %p17900_p7 }
 0x6a4   : > { %p17906_p12 = pnand %p17905_p11, %p17901_p8 }
 0x6a6   : > { %17909 = shalt.err (!%p17906_p12)
}
 0x6a7   : > { %s17948_s27 = smov 256   ;;  %s17949_s28 = smov 16  }
 0x6a8   : > { %16976 = dma.vmem_to_hbm [thread:$0]  (%p18008_p5), %s25045_s5, 8192, %s25043_s8, %s25051_s30, %s17948_s27, %s17948_s27, %s17949_s28  }
 0x6a9 PF: > { %p16982_p13 = scmp.ge.s32.totalorder %s17944_s15, 2  ;;  %s14960_s29 = sand.u32 1, %s17932_s12  }
 0x6aa   : > { %s14961_s4 = scalar_lea.sflag [#allocation6], %s14960_s29 }
 0x6ab   : > { %p16979_p0 = pnand %p16982_p13, %p18012_p6 }
 0x6ad   : > { %p16980_p1 = pneg %p16979_p0 }
 0x6af   : > { %17927 = dma.done.wait (%p16980_p1), %s14961_s4, 8192  }
 0x6b0   : > { %17929 = vsyncadd (%p16980_p1), %s14961_s4, 4294959104  ;;  %p13_p2 = scmp.ge.s32.totalorder %s17995_s18, 4   ;;  %s27175_s12 = smov %s17936_s13 }
 0x6b1   : > { %s27176_s13 = smov %s17940_s14  ;;  %s27177_s14 = smov %s18006_s21 }
 0x6b2   : > { %s27178_s15 = smov %s17995_s18  ;;  %15 = sbr.rel (!%p13_p2) target bundleno = 3 (0x3), region = 77 }
 0x6b7   :  { %14966 = vsyncpa [#allocation6], 1 }
 0x6b8   :  { %14968 = vsyncpa [#allocation6 + $0x1], 1 }

</bundles_post_ra>
